<compile_context>
chip_gen: v5e
topology: v5e:2x2
jax: 0.10.0
libtpu: 0.0.40
codegen_flags: <defaults>
</compile_context>

<pallas_src>
import functools

import jax
import jax.numpy as jnp
from jax.experimental import pallas as pl
from jax.experimental.pallas import tpu as pltpu


# ---------------------------------------------------------------------------
# Fused Pallas kernel: conv3x3(+bn1 scale folded)+bias+relu ->
#                      conv3x3(+bn2 scale folded)+bias+residual+relu
# ---------------------------------------------------------------------------
def _basic_block_kernel(x_ref, w1_ref, b1_ref, w2_ref, b2_ref,
                        o_ref, xpad_ref, midpad_ref, patch_ref, *, H, W):
    """One batch element; intermediate activation stays in VMEM."""
    C = o_ref.shape[-1]
    x = x_ref[0]                                     # (H, W, C) f32 (also residual)

    # ---------------- conv1 (+bn1 scale) + bias + relu ----------------
    # Zero halo + copy interior into the padded VMEM scratch (no HBM pad
    # pass).  Re-zeroed every grid step: safe under megacore grid splitting.
    xpad_ref[...] = jnp.zeros_like(xpad_ref)
    xpad_ref[1:H + 1, 1:W + 1, :] = x.astype(jnp.bfloat16)
    xpad = xpad_ref[...]                             # (H+2, W+2, C) bf16

    # Build the im2col patch matrix once: columns ordered (kh, kw, c) to match
    # the host-side weight reshape (3, 3, Cin, Cout) -> (9*Cin, Cout).
    for kh in range(3):
        for kw in range(3):
            t = kh * 3 + kw
            patch_ref[:, t * C:(t + 1) * C] = (
                xpad[kh:kh + H, kw:kw + W, :].reshape(H * W, C))

    mid = jnp.dot(patch_ref[...], w1_ref[...],       # (H*W, 9C) @ (9C, C)
                  preferred_element_type=jnp.float32)
    mid = jnp.maximum(mid + b1_ref[...], 0.0)        # (H*W, C) f32

    # ---------------- conv2 (+bn2 scale) + bias + residual + relu ----------
    midpad_ref[...] = jnp.zeros_like(midpad_ref)
    midpad_ref[1:H + 1, 1:W + 1, :] = mid.reshape(H, W, C).astype(jnp.bfloat16)
    mpad = midpad_ref[...]                           # (H+2, W+2, C) bf16

    for kh in range(3):
        for kw in range(3):
            t = kh * 3 + kw
            patch_ref[:, t * C:(t + 1) * C] = (
                mpad[kh:kh + H, kw:kw + W, :].reshape(H * W, C))

    out = jnp.dot(patch_ref[...], w2_ref[...],
                  preferred_element_type=jnp.float32)
    out = out + b2_ref[...]
    out = out + x.reshape(H * W, C).astype(jnp.float32)       # residual (f32)
    out = jnp.maximum(out, 0.0)
    o_ref[0] = out.reshape(H, W, C).astype(o_ref.dtype)


# ---------------------------------------------------------------------------
# Wrapper: layout glue (incl. BN-scale folding into weights) + pallas_call
# ---------------------------------------------------------------------------
def basic_block_forward(x_nchw, params):
    """BasicBlock forward, stride=1, downsample=None. Input/output are NCHW."""
    N, Cin, H, W = x_nchw.shape
    C = params["bn1_scale"].shape[0]
    assert Cin == C, "stride=1 / downsample=None requires inplanes == planes"

    x_nhwc = jnp.transpose(x_nchw, (0, 2, 3, 1))     # NCHW -> NHWC

    # Fold the BN per-output-channel scale into the conv weights (exact), then
    # HWIO (3,3,Cin,Cout) -> (9*Cin, Cout) in bf16 for the MXU.  Biases f32.
    s1 = params["bn1_scale"].astype(jnp.float32)
    s2 = params["bn2_scale"].astype(jnp.float32)
    w1 = (params["w1_hwio"].astype(jnp.float32) * s1[None, None, None, :]
          ).reshape(9 * C, C).astype(jnp.bfloat16)
    w2 = (params["w2_hwio"].astype(jnp.float32) * s2[None, None, None, :]
          ).reshape(9 * C, C).astype(jnp.bfloat16)
    b1 = params["bn1_bias"].reshape(1, C).astype(jnp.float32)
    b2 = params["bn2_bias"].reshape(1, C).astype(jnp.float32)

    kernel = functools.partial(_basic_block_kernel, H=H, W=W)
    out = pl.pallas_call(
        kernel,
        out_shape=jax.ShapeDtypeStruct((N, H, W, C), x_nhwc.dtype),
        grid_spec=pltpu.PrefetchScalarGridSpec(
            num_scalar_prefetch=0,
            grid=(N,),
            in_specs=[
                pl.BlockSpec((1, H, W, C), lambda n: (n, 0, 0, 0)),   # x / residual
                pl.BlockSpec((9 * C, C), lambda n: (0, 0)),           # w1 (scale-folded)
                pl.BlockSpec((1, C), lambda n: (0, 0)),               # bn1 bias
                pl.BlockSpec((9 * C, C), lambda n: (0, 0)),           # w2 (scale-folded)
                pl.BlockSpec((1, C), lambda n: (0, 0)),               # bn2 bias
            ],
            out_specs=pl.BlockSpec((1, H, W, C), lambda n: (n, 0, 0, 0)),
            scratch_shapes=[
                pltpu.VMEM((H + 2, W + 2, C), jnp.bfloat16),   # padded input
                pltpu.VMEM((H + 2, W + 2, C), jnp.bfloat16),   # padded intermediate
                pltpu.VMEM((H * W, 9 * C), jnp.bfloat16),      # im2col patches (reused)
            ],
        ),
        compiler_params=pltpu.CompilerParams(
            dimension_semantics=("parallel",),
            vmem_limit_bytes=48 * 1024 * 1024,
        ),
    )(x_nhwc, w1, b1, w2, b2)

    return jnp.transpose(out, (0, 3, 1, 2))          # NHWC -> NCHW


# ---------------------------------------------------------------------------
# Parameter construction (deterministic, synthetic)
# ---------------------------------------------------------------------------
def make_params(key, inplanes, planes, eps=1e-5):
    ks = jax.random.split(key, 10)
    w1 = jax.random.normal(ks[0], (planes, inplanes, 3, 3), jnp.float32) * 0.1
    w2 = jax.random.normal(ks[1], (planes, planes, 3, 3), jnp.float32) * 0.1
    g1 = jax.random.normal(ks[2], (planes,), jnp.float32) * 0.1 + 1.0
    b1 = jax.random.normal(ks[3], (planes,), jnp.float32) * 0.1
    m1 = jax.random.normal(ks[4], (planes,), jnp.float32) * 0.1
    v1 = jax.random.uniform(ks[5], (planes,), jnp.float32, 0.5, 1.5)
    g2 = jax.random.normal(ks[6], (planes,), jnp.float32) * 0.1 + 1.0
    b2 = jax.random.normal(ks[7], (planes,), jnp.float32) * 0.1
    m2 = jax.random.normal(ks[8], (planes,), jnp.float32) * 0.1
    v2 = jax.random.uniform(ks[9], (planes,), jnp.float32, 0.5, 1.5)

    s1 = g1 / jnp.sqrt(v1 + eps)
    s2 = g2 / jnp.sqrt(v2 + eps)
    return {
        "w1_oihw": w1, "w2_oihw": w2,
        "w1_hwio": jnp.transpose(w1, (2, 3, 1, 0)),   # OIHW -> HWIO
        "w2_hwio": jnp.transpose(w2, (2, 3, 1, 0)),
        "bn1_scale": s1, "bn1_bias": b1 - m1 * s1,
        "bn2_scale": s2, "bn2_bias": b2 - m2 * s2,
    }


def reference_forward(x, p):
    """Pure-JAX NCHW reference (lax conv, f32) for correctness check."""
    def conv(v, w):
        return jax.lax.conv_general_dilated(
            v, w, window_strides=(1, 1), padding=((1, 1), (1, 1)),
            dimension_numbers=("NCHW", "OIHW", "NCHW"))
    out = conv(x, p["w1_oihw"])
    out = out * p["bn1_scale"][None, :, None, None] + p["bn1_bias"][None, :, None, None]
    out = jnp.maximum(out, 0.0)
    out = conv(out, p["w2_oihw"])
    out = out * p["bn2_scale"][None, :, None, None] + p["bn2_bias"][None, :, None, None]
    out = out + x
    return jnp.maximum(out, 0.0)


if __name__ == "__main__":
    key = jax.random.PRNGKey(0)
    kx, kp = jax.random.split(key)

    N, C, H, W = 2, 4, 16, 16          # inplanes = planes = 4, stride = 1
    x = jax.random.normal(kx, (N, C, H, W), jnp.float32)
    params = make_params(kp, inplanes=C, planes=C)

    out = jax.block_until_ready(basic_block_forward(x, params))
    ref = jax.block_until_ready(reference_forward(x, params))

    assert out.shape == ref.shape == (N, C, H, W)
    # bf16 matmul inputs (f32 accumulation) -> looser tolerance than pure f32.
    assert jnp.allclose(out, ref, rtol=5e-2, atol=5e-2), "mismatch vs reference"

    print("KERNEL_OK")
</pallas_src>

<mosaic_0001>
module attributes {stable_mosaic.version = 11 : i64} {
  func.func @_basic_block_kernel(%arg0: i32, %arg1: memref<1x16x16x4xf32, #tpu.memory_space<vmem>>, %arg2: memref<36x4xbf16, #tpu.memory_space<vmem>>, %arg3: memref<1x4xf32, #tpu.memory_space<vmem>>, %arg4: memref<36x4xbf16, #tpu.memory_space<vmem>>, %arg5: memref<1x4xf32, #tpu.memory_space<vmem>>, %arg6: memref<1x16x16x4xf32, #tpu.memory_space<vmem>>, %arg7: memref<18x18x4xbf16, #tpu.memory_space<vmem>>, %arg8: memref<18x18x4xbf16, #tpu.memory_space<vmem>>, %arg9: memref<256x36xbf16, #tpu.memory_space<vmem>>) attributes {dimension_semantics = [#tpu.dimension_semantics<parallel>], iteration_bounds = array<i64: 2>, scalar_prefetch = 0 : i64, scratch_operands = 3 : i64, tpu.core_type = #tpu.core_type<tc>, window_params = [{transform_indices = @transform_0, window_bounds = array<i64: 1, 16, 16, 4>}, {pipeline_mode = #tpu.pipeline_mode<synchronous>, transform_indices = @transform_1, window_bounds = array<i64: 36, 4>}, {pipeline_mode = #tpu.pipeline_mode<synchronous>, transform_indices = @transform_2, window_bounds = array<i64: 1, 4>}, {pipeline_mode = #tpu.pipeline_mode<synchronous>, transform_indices = @transform_3, window_bounds = array<i64: 36, 4>}, {pipeline_mode = #tpu.pipeline_mode<synchronous>, transform_indices = @transform_4, window_bounds = array<i64: 1, 4>}, {transform_indices = @transform_5, window_bounds = array<i64: 1, 16, 16, 4>}]} {
    %c0 = arith.constant 0 : index
    %c0_0 = arith.constant 0 : index
    %c0_1 = arith.constant 0 : index
    %c0_2 = arith.constant 0 : index
    %0 = vector.load %arg1[%c0, %c0_0, %c0_1, %c0_2] : memref<1x16x16x4xf32, #tpu.memory_space<vmem>>, vector<1x16x16x4xf32>
    %1 = vector.shape_cast %0 : vector<1x16x16x4xf32> to vector<16x16x4xf32>
    %cst = arith.constant 0.000000e+00 : bf16
    %2 = vector.broadcast %cst : bf16 to vector<18x18x4xbf16>
    %c0_3 = arith.constant 0 : index
    %c0_4 = arith.constant 0 : index
    %c0_5 = arith.constant 0 : index
    %3 = vector.load %arg7[%c0_3, %c0_4, %c0_5] : memref<18x18x4xbf16, #tpu.memory_space<vmem>>, vector<18x18x4xbf16>
    tpu.vector_store %arg7[%c0_3, %c0_4, %c0_5], %2 {strides = array<i32>} : memref<18x18x4xbf16, #tpu.memory_space<vmem>>, vector<18x18x4xbf16>,
    %4 = arith.truncf %1 : vector<16x16x4xf32> to vector<16x16x4xbf16>
    %c1 = arith.constant 1 : index
    %c1_6 = arith.constant 1 : index
    %c0_7 = arith.constant 0 : index
    %5 = vector.load %arg7[%c1, %c1_6, %c0_7] : memref<18x18x4xbf16, #tpu.memory_space<vmem>>, vector<16x16x4xbf16>
    tpu.vector_store %arg7[%c1, %c1_6, %c0_7], %4 {strides = array<i32>} : memref<18x18x4xbf16, #tpu.memory_space<vmem>>, vector<16x16x4xbf16>,
    %c0_8 = arith.constant 0 : index
    %c0_9 = arith.constant 0 : index
    %c0_10 = arith.constant 0 : index
    %6 = vector.load %arg7[%c0_8, %c0_9, %c0_10] : memref<18x18x4xbf16, #tpu.memory_space<vmem>>, vector<18x18x4xbf16>
    %7 = vector.extract_strided_slice %6 {offsets = [0, 0, 0], sizes = [16, 16, 4], strides = [1, 1, 1]} : vector<18x18x4xbf16> to vector<16x16x4xbf16>
    %8 = vector.shape_cast %7 : vector<16x16x4xbf16> to vector<256x4xbf16>
    %c0_11 = arith.constant 0 : index
    %c0_12 = arith.constant 0 : index
    %9 = vector.load %arg9[%c0_11, %c0_12] : memref<256x36xbf16, #tpu.memory_space<vmem>>, vector<256x4xbf16>
    tpu.vector_store %arg9[%c0_11, %c0_12], %8 {strides = array<i32>} : memref<256x36xbf16, #tpu.memory_space<vmem>>, vector<256x4xbf16>,
    %10 = vector.extract_strided_slice %6 {offsets = [0, 1, 0], sizes = [16, 16, 4], strides = [1, 1, 1]} : vector<18x18x4xbf16> to vector<16x16x4xbf16>
    %11 = vector.shape_cast %10 : vector<16x16x4xbf16> to vector<256x4xbf16>
    %c0_13 = arith.constant 0 : index
    %c4 = arith.constant 4 : index
    %12 = vector.load %arg9[%c0_13, %c4] : memref<256x36xbf16, #tpu.memory_space<vmem>>, vector<256x4xbf16>
    tpu.vector_store %arg9[%c0_13, %c4], %11 {strides = array<i32>} : memref<256x36xbf16, #tpu.memory_space<vmem>>, vector<256x4xbf16>,
    %13 = vector.extract_strided_slice %6 {offsets = [0, 2, 0], sizes = [16, 16, 4], strides = [1, 1, 1]} : vector<18x18x4xbf16> to vector<16x16x4xbf16>
    %14 = vector.shape_cast %13 : vector<16x16x4xbf16> to vector<256x4xbf16>
    %c0_14 = arith.constant 0 : index
    %c8 = arith.constant 8 : index
    %15 = vector.load %arg9[%c0_14, %c8] : memref<256x36xbf16, #tpu.memory_space<vmem>>, vector<256x4xbf16>
    tpu.vector_store %arg9[%c0_14, %c8], %14 {strides = array<i32>} : memref<256x36xbf16, #tpu.memory_space<vmem>>, vector<256x4xbf16>,
    %16 = vector.extract_strided_slice %6 {offsets = [1, 0, 0], sizes = [16, 16, 4], strides = [1, 1, 1]} : vector<18x18x4xbf16> to vector<16x16x4xbf16>
    %17 = vector.shape_cast %16 : vector<16x16x4xbf16> to vector<256x4xbf16>
    %c0_15 = arith.constant 0 : index
    %c12 = arith.constant 12 : index
    %18 = vector.load %arg9[%c0_15, %c12] : memref<256x36xbf16, #tpu.memory_space<vmem>>, vector<256x4xbf16>
    tpu.vector_store %arg9[%c0_15, %c12], %17 {strides = array<i32>} : memref<256x36xbf16, #tpu.memory_space<vmem>>, vector<256x4xbf16>,
    %19 = vector.extract_strided_slice %6 {offsets = [1, 1, 0], sizes = [16, 16, 4], strides = [1, 1, 1]} : vector<18x18x4xbf16> to vector<16x16x4xbf16>
    %20 = vector.shape_cast %19 : vector<16x16x4xbf16> to vector<256x4xbf16>
    %c0_16 = arith.constant 0 : index
    %c16 = arith.constant 16 : index
    %21 = vector.load %arg9[%c0_16, %c16] : memref<256x36xbf16, #tpu.memory_space<vmem>>, vector<256x4xbf16>
    tpu.vector_store %arg9[%c0_16, %c16], %20 {strides = array<i32>} : memref<256x36xbf16, #tpu.memory_space<vmem>>, vector<256x4xbf16>,
    %22 = vector.extract_strided_slice %6 {offsets = [1, 2, 0], sizes = [16, 16, 4], strides = [1, 1, 1]} : vector<18x18x4xbf16> to vector<16x16x4xbf16>
    %23 = vector.shape_cast %22 : vector<16x16x4xbf16> to vector<256x4xbf16>
    %c0_17 = arith.constant 0 : index
    %c20 = arith.constant 20 : index
    %24 = vector.load %arg9[%c0_17, %c20] : memref<256x36xbf16, #tpu.memory_space<vmem>>, vector<256x4xbf16>
    tpu.vector_store %arg9[%c0_17, %c20], %23 {strides = array<i32>} : memref<256x36xbf16, #tpu.memory_space<vmem>>, vector<256x4xbf16>,
    %25 = vector.extract_strided_slice %6 {offsets = [2, 0, 0], sizes = [16, 16, 4], strides = [1, 1, 1]} : vector<18x18x4xbf16> to vector<16x16x4xbf16>
    %26 = vector.shape_cast %25 : vector<16x16x4xbf16> to vector<256x4xbf16>
    %c0_18 = arith.constant 0 : index
    %c24 = arith.constant 24 : index
    %27 = vector.load %arg9[%c0_18, %c24] : memref<256x36xbf16, #tpu.memory_space<vmem>>, vector<256x4xbf16>
    tpu.vector_store %arg9[%c0_18, %c24], %26 {strides = array<i32>} : memref<256x36xbf16, #tpu.memory_space<vmem>>, vector<256x4xbf16>,
    %28 = vector.extract_strided_slice %6 {offsets = [2, 1, 0], sizes = [16, 16, 4], strides = [1, 1, 1]} : vector<18x18x4xbf16> to vector<16x16x4xbf16>
    %29 = vector.shape_cast %28 : vector<16x16x4xbf16> to vector<256x4xbf16>
    %c0_19 = arith.constant 0 : index
    %c28 = arith.constant 28 : index
    %30 = vector.load %arg9[%c0_19, %c28] : memref<256x36xbf16, #tpu.memory_space<vmem>>, vector<256x4xbf16>
    tpu.vector_store %arg9[%c0_19, %c28], %29 {strides = array<i32>} : memref<256x36xbf16, #tpu.memory_space<vmem>>, vector<256x4xbf16>,
    %31 = vector.extract_strided_slice %6 {offsets = [2, 2, 0], sizes = [16, 16, 4], strides = [1, 1, 1]} : vector<18x18x4xbf16> to vector<16x16x4xbf16>
    %32 = vector.shape_cast %31 : vector<16x16x4xbf16> to vector<256x4xbf16>
    %c0_20 = arith.constant 0 : index
    %c32 = arith.constant 32 : index
    %33 = vector.load %arg9[%c0_20, %c32] : memref<256x36xbf16, #tpu.memory_space<vmem>>, vector<256x4xbf16>
    tpu.vector_store %arg9[%c0_20, %c32], %32 {strides = array<i32>} : memref<256x36xbf16, #tpu.memory_space<vmem>>, vector<256x4xbf16>,
    %c0_21 = arith.constant 0 : index
    %c0_22 = arith.constant 0 : index
    %34 = vector.load %arg9[%c0_21, %c0_22] : memref<256x36xbf16, #tpu.memory_space<vmem>>, vector<256x36xbf16>
    %c0_23 = arith.constant 0 : index
    %c0_24 = arith.constant 0 : index
    %35 = vector.load %arg2[%c0_23, %c0_24] : memref<36x4xbf16, #tpu.memory_space<vmem>>, vector<36x4xbf16>
    %cst_25 = arith.constant dense<0.000000e+00> : vector<256x4xf32>
    %36 = tpu.matmul %34, %35, %cst_25 {dimension_numbers = #tpu.dot_dimension_numbers<[1], [0], [0], [1], [0, 0, 1, 1], [], []>} : vector<256x36xbf16>, vector<36x4xbf16>, vector<256x4xf32> -> vector<256x4xf32>
    %c0_26 = arith.constant 0 : index
    %c0_27 = arith.constant 0 : index
    %37 = vector.load %arg3[%c0_26, %c0_27] : memref<1x4xf32, #tpu.memory_space<vmem>>, vector<1x4xf32>
    %38 = vector.broadcast %37 : vector<1x4xf32> to vector<256x4xf32>
    %39 = arith.addf %36, %38 : vector<256x4xf32>
    %cst_28 = arith.constant 0.000000e+00 : f32
    %40 = vector.broadcast %cst_28 : f32 to vector<256x4xf32>
    %41 = arith.maximumf %39, %40 : vector<256x4xf32>
    %cst_29 = arith.constant 0.000000e+00 : bf16
    %42 = vector.broadcast %cst_29 : bf16 to vector<18x18x4xbf16>
    %c0_30 = arith.constant 0 : index
    %c0_31 = arith.constant 0 : index
    %c0_32 = arith.constant 0 : index
    %43 = vector.load %arg8[%c0_30, %c0_31, %c0_32] : memref<18x18x4xbf16, #tpu.memory_space<vmem>>, vector<18x18x4xbf16>
    tpu.vector_store %arg8[%c0_30, %c0_31, %c0_32], %42 {strides = array<i32>} : memref<18x18x4xbf16, #tpu.memory_space<vmem>>, vector<18x18x4xbf16>,
    %44 = vector.shape_cast %41 : vector<256x4xf32> to vector<16x16x4xf32>
    %45 = arith.truncf %44 : vector<16x16x4xf32> to vector<16x16x4xbf16>
    %c1_33 = arith.constant 1 : index
    %c1_34 = arith.constant 1 : index
    %c0_35 = arith.constant 0 : index
    %46 = vector.load %arg8[%c1_33, %c1_34, %c0_35] : memref<18x18x4xbf16, #tpu.memory_space<vmem>>, vector<16x16x4xbf16>
    tpu.vector_store %arg8[%c1_33, %c1_34, %c0_35], %45 {strides = array<i32>} : memref<18x18x4xbf16, #tpu.memory_space<vmem>>, vector<16x16x4xbf16>,
    %c0_36 = arith.constant 0 : index
    %c0_37 = arith.constant 0 : index
    %c0_38 = arith.constant 0 : index
    %47 = vector.load %arg8[%c0_36, %c0_37, %c0_38] : memref<18x18x4xbf16, #tpu.memory_space<vmem>>, vector<18x18x4xbf16>
    %48 = vector.extract_strided_slice %47 {offsets = [0, 0, 0], sizes = [16, 16, 4], strides = [1, 1, 1]} : vector<18x18x4xbf16> to vector<16x16x4xbf16>
    %49 = vector.shape_cast %48 : vector<16x16x4xbf16> to vector<256x4xbf16>
    %c0_39 = arith.constant 0 : index
    %c0_40 = arith.constant 0 : index
    %50 = vector.load %arg9[%c0_39, %c0_40] : memref<256x36xbf16, #tpu.memory_space<vmem>>, vector<256x4xbf16>
    tpu.vector_store %arg9[%c0_39, %c0_40], %49 {strides = array<i32>} : memref<256x36xbf16, #tpu.memory_space<vmem>>, vector<256x4xbf16>,
    %51 = vector.extract_strided_slice %47 {offsets = [0, 1, 0], sizes = [16, 16, 4], strides = [1, 1, 1]} : vector<18x18x4xbf16> to vector<16x16x4xbf16>
    %52 = vector.shape_cast %51 : vector<16x16x4xbf16> to vector<256x4xbf16>
    %c0_41 = arith.constant 0 : index
    %c4_42 = arith.constant 4 : index
    %53 = vector.load %arg9[%c0_41, %c4_42] : memref<256x36xbf16, #tpu.memory_space<vmem>>, vector<256x4xbf16>
    tpu.vector_store %arg9[%c0_41, %c4_42], %52 {strides = array<i32>} : memref<256x36xbf16, #tpu.memory_space<vmem>>, vector<256x4xbf16>,
    %54 = vector.extract_strided_slice %47 {offsets = [0, 2, 0], sizes = [16, 16, 4], strides = [1, 1, 1]} : vector<18x18x4xbf16> to vector<16x16x4xbf16>
    %55 = vector.shape_cast %54 : vector<16x16x4xbf16> to vector<256x4xbf16>
    %c0_43 = arith.constant 0 : index
    %c8_44 = arith.constant 8 : index
    %56 = vector.load %arg9[%c0_43, %c8_44] : memref<256x36xbf16, #tpu.memory_space<vmem>>, vector<256x4xbf16>
    tpu.vector_store %arg9[%c0_43, %c8_44], %55 {strides = array<i32>} : memref<256x36xbf16, #tpu.memory_space<vmem>>, vector<256x4xbf16>,
    %57 = vector.extract_strided_slice %47 {offsets = [1, 0, 0], sizes = [16, 16, 4], strides = [1, 1, 1]} : vector<18x18x4xbf16> to vector<16x16x4xbf16>
    %58 = vector.shape_cast %57 : vector<16x16x4xbf16> to vector<256x4xbf16>
    %c0_45 = arith.constant 0 : index
    %c12_46 = arith.constant 12 : index
    %59 = vector.load %arg9[%c0_45, %c12_46] : memref<256x36xbf16, #tpu.memory_space<vmem>>, vector<256x4xbf16>
    tpu.vector_store %arg9[%c0_45, %c12_46], %58 {strides = array<i32>} : memref<256x36xbf16, #tpu.memory_space<vmem>>, vector<256x4xbf16>,
    %60 = vector.extract_strided_slice %47 {offsets = [1, 1, 0], sizes = [16, 16, 4], strides = [1, 1, 1]} : vector<18x18x4xbf16> to vector<16x16x4xbf16>
    %61 = vector.shape_cast %60 : vector<16x16x4xbf16> to vector<256x4xbf16>
    %c0_47 = arith.constant 0 : index
    %c16_48 = arith.constant 16 : index
    %62 = vector.load %arg9[%c0_47, %c16_48] : memref<256x36xbf16, #tpu.memory_space<vmem>>, vector<256x4xbf16>
    tpu.vector_store %arg9[%c0_47, %c16_48], %61 {strides = array<i32>} : memref<256x36xbf16, #tpu.memory_space<vmem>>, vector<256x4xbf16>,
    %63 = vector.extract_strided_slice %47 {offsets = [1, 2, 0], sizes = [16, 16, 4], strides = [1, 1, 1]} : vector<18x18x4xbf16> to vector<16x16x4xbf16>
    %64 = vector.shape_cast %63 : vector<16x16x4xbf16> to vector<256x4xbf16>
    %c0_49 = arith.constant 0 : index
    %c20_50 = arith.constant 20 : index
    %65 = vector.load %arg9[%c0_49, %c20_50] : memref<256x36xbf16, #tpu.memory_space<vmem>>, vector<256x4xbf16>
    tpu.vector_store %arg9[%c0_49, %c20_50], %64 {strides = array<i32>} : memref<256x36xbf16, #tpu.memory_space<vmem>>, vector<256x4xbf16>,
    %66 = vector.extract_strided_slice %47 {offsets = [2, 0, 0], sizes = [16, 16, 4], strides = [1, 1, 1]} : vector<18x18x4xbf16> to vector<16x16x4xbf16>
    %67 = vector.shape_cast %66 : vector<16x16x4xbf16> to vector<256x4xbf16>
    %c0_51 = arith.constant 0 : index
    %c24_52 = arith.constant 24 : index
    %68 = vector.load %arg9[%c0_51, %c24_52] : memref<256x36xbf16, #tpu.memory_space<vmem>>, vector<256x4xbf16>
    tpu.vector_store %arg9[%c0_51, %c24_52], %67 {strides = array<i32>} : memref<256x36xbf16, #tpu.memory_space<vmem>>, vector<256x4xbf16>,
    %69 = vector.extract_strided_slice %47 {offsets = [2, 1, 0], sizes = [16, 16, 4], strides = [1, 1, 1]} : vector<18x18x4xbf16> to vector<16x16x4xbf16>
    %70 = vector.shape_cast %69 : vector<16x16x4xbf16> to vector<256x4xbf16>
    %c0_53 = arith.constant 0 : index
    %c28_54 = arith.constant 28 : index
    %71 = vector.load %arg9[%c0_53, %c28_54] : memref<256x36xbf16, #tpu.memory_space<vmem>>, vector<256x4xbf16>
    tpu.vector_store %arg9[%c0_53, %c28_54], %70 {strides = array<i32>} : memref<256x36xbf16, #tpu.memory_space<vmem>>, vector<256x4xbf16>,
    %72 = vector.extract_strided_slice %47 {offsets = [2, 2, 0], sizes = [16, 16, 4], strides = [1, 1, 1]} : vector<18x18x4xbf16> to vector<16x16x4xbf16>
    %73 = vector.shape_cast %72 : vector<16x16x4xbf16> to vector<256x4xbf16>
    %c0_55 = arith.constant 0 : index
    %c32_56 = arith.constant 32 : index
    %74 = vector.load %arg9[%c0_55, %c32_56] : memref<256x36xbf16, #tpu.memory_space<vmem>>, vector<256x4xbf16>
    tpu.vector_store %arg9[%c0_55, %c32_56], %73 {strides = array<i32>} : memref<256x36xbf16, #tpu.memory_space<vmem>>, vector<256x4xbf16>,
    %c0_57 = arith.constant 0 : index
    %c0_58 = arith.constant 0 : index
    %75 = vector.load %arg9[%c0_57, %c0_58] : memref<256x36xbf16, #tpu.memory_space<vmem>>, vector<256x36xbf16>
    %c0_59 = arith.constant 0 : index
    %c0_60 = arith.constant 0 : index
    %76 = vector.load %arg4[%c0_59, %c0_60] : memref<36x4xbf16, #tpu.memory_space<vmem>>, vector<36x4xbf16>
    %cst_61 = arith.constant dense<0.000000e+00> : vector<256x4xf32>
    %77 = tpu.matmul %75, %76, %cst_61 {dimension_numbers = #tpu.dot_dimension_numbers<[1], [0], [0], [1], [0, 0, 1, 1], [], []>} : vector<256x36xbf16>, vector<36x4xbf16>, vector<256x4xf32> -> vector<256x4xf32>
    %c0_62 = arith.constant 0 : index
    %c0_63 = arith.constant 0 : index
    %78 = vector.load %arg5[%c0_62, %c0_63] : memref<1x4xf32, #tpu.memory_space<vmem>>, vector<1x4xf32>
    %79 = vector.broadcast %78 : vector<1x4xf32> to vector<256x4xf32>
    %80 = arith.addf %77, %79 : vector<256x4xf32>
    %81 = vector.shape_cast %1 : vector<16x16x4xf32> to vector<256x4xf32>
    %82 = arith.addf %80, %81 : vector<256x4xf32>
    %cst_64 = arith.constant 0.000000e+00 : f32
    %83 = vector.broadcast %cst_64 : f32 to vector<256x4xf32>
    %84 = arith.maximumf %82, %83 : vector<256x4xf32>
    %85 = vector.shape_cast %84 : vector<256x4xf32> to vector<16x16x4xf32>
    %c0_65 = arith.constant 0 : index
    %c0_66 = arith.constant 0 : index
    %c0_67 = arith.constant 0 : index
    %c0_68 = arith.constant 0 : index
    %86 = vector.load %arg6[%c0_65, %c0_66, %c0_67, %c0_68] : memref<1x16x16x4xf32, #tpu.memory_space<vmem>>, vector<1x16x16x4xf32>
    %87 = vector.shape_cast %86 : vector<1x16x16x4xf32> to vector<16x16x4xf32>
    %88 = vector.shape_cast %85 : vector<16x16x4xf32> to vector<1x16x16x4xf32>
    tpu.vector_store %arg6[%c0_65, %c0_66, %c0_67, %c0_68], %88 {strides = array<i32>} : memref<1x16x16x4xf32, #tpu.memory_space<vmem>>, vector<1x16x16x4xf32>,
    return
  }
  func.func @transform_0(%arg0: i32) -> (i32, i32, i32, i32) {
    %c0_i32 = arith.constant 0 : i32
    %c0_i32_0 = arith.constant 0 : i32
    %c0_i32_1 = arith.constant 0 : i32
    %c0_i32_2 = arith.constant 0 : i32
    return %arg0, %c0_i32, %c0_i32_0, %c0_i32_1 : i32, i32, i32, i32
  }
  func.func @transform_1(%arg0: i32) -> (i32, i32) {
    %c0_i32 = arith.constant 0 : i32
    %c0_i32_0 = arith.constant 0 : i32
    %c0_i32_1 = arith.constant 0 : i32
    return %c0_i32, %c0_i32_0 : i32, i32
  }
  func.func @transform_2(%arg0: i32) -> (i32, i32) {
    %c0_i32 = arith.constant 0 : i32
    %c0_i32_0 = arith.constant 0 : i32
    %c0_i32_1 = arith.constant 0 : i32
    return %c0_i32, %c0_i32_0 : i32, i32
  }
  func.func @transform_3(%arg0: i32) -> (i32, i32) {
    %c0_i32 = arith.constant 0 : i32
    %c0_i32_0 = arith.constant 0 : i32
    %c0_i32_1 = arith.constant 0 : i32
    return %c0_i32, %c0_i32_0 : i32, i32
  }
  func.func @transform_4(%arg0: i32) -> (i32, i32) {
    %c0_i32 = arith.constant 0 : i32
    %c0_i32_0 = arith.constant 0 : i32
    %c0_i32_1 = arith.constant 0 : i32
    return %c0_i32, %c0_i32_0 : i32, i32
  }
  func.func @transform_5(%arg0: i32) -> (i32, i32, i32, i32) {
    %c0_i32 = arith.constant 0 : i32
    %c0_i32_0 = arith.constant 0 : i32
    %c0_i32_1 = arith.constant 0 : i32
    %c0_i32_2 = arith.constant 0 : i32
    return %arg0, %c0_i32, %c0_i32_0, %c0_i32_1 : i32, i32, i32, i32
  }
}

</mosaic_0001>

<bundles_post_ra>
// kernel: tpu_custom_call.1
= control target key start
LH: loop header
LB: loop body
LE: loop exit
PB: predicated region body
PF: predicated region fallthrough
CT: control target
= control target key end

     0   :  { %s5877_s18 = smov 0   ;;  %s9685_s0 = inlined_call_operand.vmem [shape: f32[2,16,16,4], index: 0, kind: input, shape index: {}]   ;;  %s9686_s1 = inlined_call_operand.vmem [shape: bf16[36,4], index: 1, kind: input, shape index: {}]   ;;  %s9687_s2 = inlined_call_operand.vmem [shape: f32[1,4], index: 2, kind: input, shape index: {}]   ;;  %s9688_s3 = inlined_call_operand.vmem [shape: bf16[36,4], index: 3, kind: input, shape index: {}]   ;;  %s9689_s4 = inlined_call_operand.vmem [shape: f32[1,4], index: 4, kind: input, shape index: {}]   ;;  %s9690_s5 = inlined_call_operand.vmem [shape: f32[2,16,16,4], index: 5, kind: output, shape index: {}]  }
   0x1 LB: > { %s5502_s19 = sadd.s32 4294967295, %s5836_s18   ;;  %p5506_p0 = scmp.ge.s32.totalorder %s5836_s18, 1  ;;  %s5836_s18 = sphi %s5877_s18, %s15_s18  }
   0x2   : > { %p187_p1 = scmp.lt.s32.totalorder %s5836_s18, 3 }
   0x4   : > { %p188_p2 = pnand %p5506_p0, %p187_p1 }
   0x6   : > { %191 = sbr.rel (%p188_p2) target bundleno = 2060 (0x80c), region = 40 }
   0xb   : > { %vm258_vm0 = vcmask 27648   ;;  %v5838_v0 = vmov 0   ;;  %vm873_vm1 = vsmask.f32 3328  ;;  %vm874_vm2 = vsmask.f32 7440 }
   0xc   : > { %259 = vst.msk [vmem:[#allocation2] sm:$0xf] %vm258_vm0, %v5838_v0  ;;  %vm5920_vm3 = vmor %vm873_vm1, %vm874_vm2  ;;  %v9906_v10 = vmov 0  ;;  %s5839_s20 = smov 4   ;;  %p215_p3 = scmp.lt.s32.totalorder %s5502_s19, 1  ;;  %vm261_vm4 = vcmask 24576  }
   0xd   : > { %260 = vst.msk [vmem:[#allocation2 + $0x4] sm:$0xf] %vm258_vm0, %v5838_v0  ;;  %v9907_v10 = vsel %vm5920_vm3, 4294967295, %v9906_v10  ;;  %vm671_vm5 = vsmask.f32 7938  ;;  %vm1437_vm11 = vcmask 1042432  }
   0xe   : > { %263 = vst.msk [vmem:[#allocation2 + $0xc] sm:$0xf] %vm258_vm0, %v5838_v0  ;;  %s10208_s19 = smov (!%p215_p3, %s5502_s19), 1  ;;  %vm346_vm6 = vsmask.f32 256  ;;  %vm6160_vm8 = vmand %vm258_vm0, %vm671_vm5  ;;  %vm1438_vm12 = vcmask 1046532  }
   0xf   : > { %264 = vst.msk [vmem:[#allocation2 + $0x10] sm:$0xf] %vm258_vm0, %v5838_v0  ;;  %s5725_s21 = sshll.u32 %s10208_s19, 8  ;;  %vm347_vm7 = vsmask.f32 4368  ;;  %vm6213_vm10 = vmand %vm261_vm4, %vm346_vm6  ;;  %vm1356_vm14 = vcmask 60448  }
  0x10   : > { %266 = vst.msk [vmem:[#allocation2 + $0x18] sm:$0xf] %vm258_vm0, %v5838_v0  ;;  %s6071_s24 = scalar_lea.vmem %s9685_s0, %s5725_s21  ;;  %vm6174_vm9 = vmor %vm346_vm6, %vm347_vm7  ;;  %s5840_s25 = smov 8   ;;  %vm1648_vm15 = vcmask 93248   ;;  %vm1779_vm1 = vcmask 126048   ;;  %vm1932_vm2 = vcmask 158848  }
  0x11   : > { %267 = vst.msk [vmem:[#allocation2 + $0x1c] sm:$0xf] %vm258_vm0, %v5838_v0  ;;  %v226_v16 = vld [vmem:[%s6071_s24] sm:$0xff]  ;;  %v227_v18 = vld [vmem:[%s6071_s24 + $0x8] sm:$0xff]  ;;  %v232_v26 = vld [vmem:[%s6071_s24 + $0x30] sm:$0xff]  ;;  %s5841_s26 = smov 12   ;;  %s9499_s8 = scalar_lea.vmem %s9690_s5, %s5725_s21 }
  0x12   : > { %269 = vst.msk [vmem:[#allocation2 + $0x24] sm:$0xf] %vm258_vm0, %v5838_v0  ;;  %v230_v21 = vld [vmem:[%s6071_s24 + $0x20] sm:$0xff]  ;;  %v314_v22 = vpack.c.bf16 %v226_v16, %v226_v16  ;;  %v231_v23 = vld [vmem:[%s6071_s24 + $0x28] sm:$0xff]  ;;  %v315_v25 = vpack.c.bf16 %v227_v18, %v227_v18  ;;  %v233_v28 = vld [vmem:[%s6071_s24 + $0x38] sm:$0xff]  ;;  %v6103_v32 = vpack.c.bf16 %v232_v26, %v232_v26  ;;  %s5842_s27 = smov 16  }
  0x13   : > { %v5899_v1 = vld [vmem:[#allocation2] sm:$0xf]  ;;  %270 = vst.msk [vmem:[#allocation2 + $0x28] sm:$0xf] %vm258_vm0, %v5838_v0  ;;  %v318_v27 = vpack.c.bf16 %v230_v21, %v230_v21  ;;  %v319_v30 = vpack.c.bf16 %v231_v23, %v231_v23  ;;  %v321_v34 = vpack.c.bf16 %v233_v28, %v233_v28  ;;  %v236_v35 = vld [vmem:[%s6071_s24 + $0x50] sm:$0xff]  ;;  %v237_v50 = vld [vmem:[%s6071_s24 + $0x58] sm:$0xff] }
  0x14   : > { %v5903_v2 = vld [vmem:[#allocation2 + $0x4] sm:$0xf]  ;;  %v877_v3 = vshrl.u32 %v5899_v1, 16  ;;  %v880_v4 = vshll.u32 %v5899_v1, 16  ;;  %272 = vst.msk [vmem:[#allocation2 + $0x30] sm:$0xf] %vm258_vm0, %v5838_v0  ;;  %v6117_v40 = vpack.c.bf16 %v236_v35, %v236_v35  ;;  %v6151_v60 = vpack.c.bf16 %v237_v50, %v237_v50  ;;  %vm6995_vm13 = vmor %vm1437_vm11, %vm1438_vm12 }
  0x15   : > { %v886_v5 = vshll.u32 %v5903_v2, 16  ;;  %273 = vst.msk [vmem:[#allocation2 + $0x34] sm:$0xf] %vm258_vm0, %v5838_v0  ;;  %v890_v13 = vshrl.u32 %v5903_v2, 16  ;;  %v350_v31 = vshrl.u32 %v314_v22, 16  ;;  %v358_v33 = vshrl.u32 %v315_v25, 16 }
  0x16   : > { %v879_v6 = vrot.slane %v877_v3, 4  ;;  %v882_v7 = vrot.slane %v880_v4, 5  ;;  %275 = vst.msk [vmem:[#allocation2 + $0x3c] sm:$0xf] %vm258_vm0, %v5838_v0  ;;  %v384_v36 = vshrl.u32 %v318_v27, 16  ;;  %v392_v37 = vshrl.u32 %v319_v30, 16 }
  0x17   : > { %276 = vst.msk [vmem:[#allocation2 + $0x40] sm:$0xf] %vm258_vm0, %v5838_v0  ;;  %v5916_v9 = vrot.slane %v886_v5, 5  ;;  %v892_v14 = vrot.slane %v890_v13, 4  ;;  %v6114_v38 = vrot.slane %v350_v31, 7  ;;  %v401_v39 = vshrl.u32 %v6103_v32, 16 }
  0x18   : > { %v883_v8 = vor.u32 %v882_v7, %v879_v6  ;;  %278 = vst.msk [vmem:[#allocation2 + $0x48] sm:$0xf] %vm258_vm0, %v5838_v0  ;;  %v353_v41 = vshll.u32 %v314_v22, 16  ;;  %v6121_v42 = vrot.slane %v358_v33, 7  ;;  %v361_v43 = vshll.u32 %v315_v25, 16  ;;  %v228_v46 = vld [vmem:[%s6071_s24 + $0x10] sm:$0xff] }
  0x19   : > { %9908 = vst [vmem:[#allocation5_spill] sm:$0xff] %v9907_v10  ;;  %v893_v15 = vor.u32 %v892_v14, %v5916_v9  ;;  %v409_v44 = vshrl.u32 %v321_v34, 16  ;;  %v386_v45 = vrot.slane %v384_v36, 7  ;;  %v387_v47 = vshll.u32 %v318_v27, 16  ;;  %v6138_v53 = vld [vmem:[#allocation2 + $0xc] sm:$0xf] }
  0x1a   : > { %279 = vst.msk [vmem:[#allocation2 + $0x4c] sm:$0xf] %vm258_vm0, %v5838_v0  ;;  %v884_v11 = vrot.slane %v883_v8, 4  ;;  %v6128_v48 = vrot.slane %v392_v37, 7  ;;  %v395_v49 = vshll.u32 %v319_v30, 16  ;;  %v6133_v51 = vrot.slane %v401_v39, 7 }
  0x1b   : > { %281 = vst.msk [vmem:[#allocation2 + $0x54] sm:$0xf] %vm258_vm0, %v5838_v0  ;;  %v894_v19 = vrot.slane %v893_v15, 4  ;;  %v435_v52 = vshrl.u32 %v6117_v40, 16  ;;  %v6140_v54 = vrot.slane %v409_v44, 7  ;;  %v412_v55 = vshll.u32 %v321_v34, 16 }
  0x1c   : > { %282 = vst.msk [vmem:[#allocation2 + $0x58] sm:$0xf] %vm258_vm0, %v5838_v0  ;;  %v889_v12 = vsel %vm5920_vm3, %v884_v11, %v5916_v9  ;;  %v229_v56 = vld [vmem:[%s6071_s24 + $0x18] sm:$0xff]  ;;  %v6143_v57 = vpack.c.bf16 %v228_v46, %v228_v46  ;;  %v6148_v58 = vor.u32 %v353_v41, %v6114_v38  ;;  %v356_v59 = vrot.slane %v6114_v38, 4  ;;  %v234_v61 = vld [vmem:[%s6071_s24 + $0x40] sm:$0xff]  ;;  %v235_v8 = vld [vmem:[%s6071_s24 + $0x48] sm:$0xff] }
  0x1d   : > { %284 = vst.msk [vmem:[#allocation2 + $0x60] sm:$0xf] %vm258_vm0, %v5838_v0  ;;  %1260 = vrot.lane.b32.xlu0 %v889_v12, %s5839_s20  ;;  %v238_v62 = vld [vmem:[%s6071_s24 + $0x60] sm:$0xff]  ;;  %v363_v63 = vor.u32 %v361_v43, %v6121_v42  ;;  %v9909_v3 = vmov 0  ;;  %v6164_v4 = vor.u32 %v387_v47, %v386_v45  ;;  %v390_v5 = vrot.slane %v386_v45, 4  ;;  %v239_v15 = vld [vmem:[%s6071_s24 + $0x68] sm:$0xff] }
  0x1e   : > { %285 = vst.msk [vmem:[#allocation2 + $0x64] sm:$0xf] %vm258_vm0, %v5838_v0  ;;  %v9910_v3 = vsel %vm6160_vm8, 4294967295, %v9909_v3  ;;  %v397_v6 = vor.u32 %v395_v49, %v6128_v48  ;;  %v6167_v7 = vld [vmem:[#allocation2 + $0x24] sm:$0xf]  ;;  %v9912_v9 = vmov 0  ;;  %v6182_v14 = vpack.c.bf16 %v229_v56, %v229_v56 }
  0x1f   : > { %287 = vst.msk [vmem:[#allocation2 + $0x6c] sm:$0xf] %vm258_vm0, %v5838_v0  ;;  %v9913_v9 = vsel %vm6174_vm9, 4294967295, %v9912_v9  ;;  %v407_v11 = vrot.slane %v6133_v51, 4  ;;  %v6179_v12 = vrot.slane %v435_v52, 7  ;;  %v438_v13 = vshll.u32 %v6117_v40, 16 }
  0x20   : > { %288 = vst.msk [vmem:[#allocation2 + $0x70] sm:$0xf] %vm258_vm0, %v5838_v0  ;;  %v414_v16 = vor.u32 %v412_v55, %v6140_v54  ;;  %v6189_v18 = vpack.c.bf16 %v234_v61, %v234_v61  ;;  %v365_v21 = vrot.slane %v6121_v42, 4  ;;  %v443_v23 = vshrl.u32 %v6151_v60, 16  ;;  %v6227_v34 = vld [vmem:[#allocation2 + $0x48] sm:$0xf] }
  0x21   : > { %290 = vst.msk [vmem:[#allocation2 + $0x78] sm:$0xf] %vm258_vm0, %v5838_v0  ;;  %v364_v25 = vsel %vm6174_vm9, %v356_v59, %v363_v63  ;;  %v690_v26 = vsel %vm6160_vm8, %v6164_v4, %v6167_v7  ;;  %v9915_v27 = vmov 0  ;;  %v416_v28 = vrot.slane %v6140_v54, 4  ;;  %v242_v41 = vld [vmem:[%s6071_s24 + $0x80] sm:$0xff]  ;;  %v243_v61 = vld [vmem:[%s6071_s24 + $0x88] sm:$0xff] }
  0x22   : > { %291 = vst.msk [vmem:[#allocation2 + $0x7c] sm:$0xf] %vm258_vm0, %v5838_v0  ;;  %v9916_v27 = vsel %vm6213_vm10, 4294967295, %v9915_v27  ;;  %v6218_v30 = vpack.c.bf16 %v239_v15, %v239_v15  ;;  %v398_v31 = vsel %vm6174_vm9, %v390_v5, %v397_v6  ;;  %v6225_v33 = vor.u32 %v438_v13, %v6179_v12  ;;  %v6294_v13 = vld [vmem:[#allocation2 + $0x3c] sm:$0xf]  ;;  %s5843_s28 = smov 20  }
  0x23   : > { %293 = vst.msk [vmem:[#allocation2 + $0x84] sm:$0xf] %vm258_vm0, %v5838_v0  ;;  %v370_v35 = vshll.u32 %v6143_v57, 16  ;;  %v375_v36 = vshrl.u32 %v6182_v14, 16  ;;  %v6235_v37 = vsel %vm6174_vm9, %v407_v11, %v414_v16  ;;  %v418_v39 = vshrl.u32 %v6189_v18, 16  ;;  %s5844_s29 = smov 24  }
  0x24   : > { %294 = vst.msk [vmem:[#allocation2 + $0x88] sm:$0xf] %vm258_vm0, %v5838_v0  ;;  %v6246_v43 = vrot.slane %v443_v23, 7  ;;  %v446_v44 = vshll.u32 %v6151_v60, 16  ;;  %v399_v46 = vrot.slane %v6128_v48, 4  ;;  %v378_v47 = vshll.u32 %v6182_v14, 16 }
  0x25   : > { %296 = vst.msk [vmem:[#allocation2 + $0x90] sm:$0xf] %vm258_vm0, %v5838_v0  ;;  %v460_v49 = vshrl.u32 %v6218_v30, 16  ;;  %v6255_v50 = vpack.c.bf16 %v242_v41, %v242_v41  ;;  %v441_v54 = vrot.slane %v6179_v12, 4  ;;  %v711_v48 = vsel %vm6160_vm8, %v6225_v33, %v6227_v34  ;;  %v6332_v41 = vld [vmem:[#allocation2 + $0x30] sm:$0xf] }
  0x26   : > { %297 = vst.msk [vmem:[#allocation2 + $0x94] sm:$0xf] %vm258_vm0, %v5838_v0  ;;  %v6266_v55 = vrot.slane %v375_v36, 7  ;;  %v421_v59 = vshll.u32 %v6189_v18, 16  ;;  %v6284_v4 = vpack.c.bf16 %v243_v61, %v243_v61  ;;  %v448_v6 = vor.u32 %v446_v44, %v6246_v43  ;;  %s5845_s30 = smov 28   ;;  %s5846_s6 = smov 32  }
  0x27   : > { %299 = vst.msk [vmem:[#allocation2 + $0x9c] sm:$0xf] %vm258_vm0, %v5838_v0  ;;  %v486_v5 = vshrl.u32 %v6255_v50, 16  ;;  %v463_v11 = vshll.u32 %v6218_v30, 16  ;;  %v404_v15 = vshll.u32 %v6103_v32, 16  ;;  %v489_v32 = vshll.u32 %v6255_v50, 16 }
  0x28   : > { %300 = vst.msk [vmem:[#allocation2 + $0xa0] sm:$0xf] %vm258_vm0, %v5838_v0  ;;  %v380_v12 = vor.u32 %v378_v47, %v6266_v55  ;;  %v494_v14 = vshrl.u32 %v6284_v4, 16  ;;  %v245_v47 = vld [vmem:[%s6071_s24 + $0x98] sm:$0xff]  ;;  %vm2200_vm5 = vcmask 224448   ;;  %vm2353_vm6 = vcmask 257248  }
  0x29   : > { %302 = vst.msk [vmem:[#allocation2 + $0xa8] sm:$0xf] %vm258_vm0, %v5838_v0  ;;  %v6307_v23 = vrot.slane %v486_v5, 7  ;;  %vm2708_vm7 = vcmask 1041408   ;;  %vm2490_vm11 = vcmask 290048   ;;  %vm2659_vm12 = vcmask 293888  }
  0x2a   : > { %303 = vst.msk [vmem:[#allocation2 + $0xac] sm:$0xf] %vm258_vm0, %v5838_v0 }
  0x2b   : > { %305 = vst.msk [vmem:[#allocation2 + $0xb4] sm:$0xf] %vm258_vm0, %v5838_v0  ;;  %v6351_v50 = vor.u32 %v489_v32, %v6307_v23  ;;  %v6395_v32 = vpack.c.bf16 %v245_v47, %v245_v47 }
  0x2c   : > { %306 = vst.msk [vmem:[#allocation2 + $0xb8] sm:$0xf] %vm258_vm0, %v5838_v0 }
  0x2d   : > { %308 = vst.msk [vmem:[#allocation2 + $0xc0] sm:$0xf] %vm258_vm0, %v5838_v0 }
  0x2e   : > { %309 = vst.msk [vmem:[#allocation2 + $0xc4] sm:$0xf] %vm258_vm0, %v5838_v0 }
  0x2f   : > { %311 = vst.msk [vmem:[#allocation2 + $0xcc] sm:$0xf] %vm258_vm0, %v5838_v0 }
  0x30   : > { %312 = vst.msk [vmem:[#allocation2 + $0xd0] sm:$0xf] %vm258_vm0, %v5838_v0 }
  0x31   : > { %841 = vst.msk [vmem:[#allocation4] sm:$0xf] %vm258_vm0, %v5899_v1 }
  0x32   : > { %842 = vst.msk [vmem:[#allocation4 + $0x4] sm:$0xf] %vm258_vm0, %v5903_v2 }
  0x33   : > { %2833 = vst.msk [vmem:[#allocation3] sm:$0xf] %vm258_vm0, %v5838_v0 }
  0x34   : > { %2834 = vst.msk [vmem:[#allocation3 + $0x4] sm:$0xf] %vm258_vm0, %v5838_v0 }
  0x35   : > { %2836 = vst.msk [vmem:[#allocation3 + $0xc] sm:$0xf] %vm258_vm0, %v5838_v0 }
  0x36   : > { %2837 = vst.msk [vmem:[#allocation3 + $0x10] sm:$0xf] %vm258_vm0, %v5838_v0 }
  0x37   : > { %2839 = vst.msk [vmem:[#allocation3 + $0x18] sm:$0xf] %vm258_vm0, %v5838_v0 }
  0x38   : > { %2840 = vst.msk [vmem:[#allocation3 + $0x1c] sm:$0xf] %vm258_vm0, %v5838_v0 }
  0x39   : > { %2842 = vst.msk [vmem:[#allocation3 + $0x24] sm:$0xf] %vm258_vm0, %v5838_v0 }
  0x3a   : > { %2843 = vst.msk [vmem:[#allocation3 + $0x28] sm:$0xf] %vm258_vm0, %v5838_v0 }
  0x3b   : > { %2845 = vst.msk [vmem:[#allocation3 + $0x30] sm:$0xf] %vm258_vm0, %v5838_v0 }
  0x3c   : > { %2846 = vst.msk [vmem:[#allocation3 + $0x34] sm:$0xf] %vm258_vm0, %v5838_v0 }
  0x3d   : > { %2848 = vst.msk [vmem:[#allocation3 + $0x3c] sm:$0xf] %vm258_vm0, %v5838_v0 }
  0x3e   : > { %2849 = vst.msk [vmem:[#allocation3 + $0x40] sm:$0xf] %vm258_vm0, %v5838_v0 }
  0x3f   : > { %2851 = vst.msk [vmem:[#allocation3 + $0x48] sm:$0xf] %vm258_vm0, %v5838_v0 }
  0x40   : > { %2852 = vst.msk [vmem:[#allocation3 + $0x4c] sm:$0xf] %vm258_vm0, %v5838_v0 }
  0x41   : > { %2854 = vst.msk [vmem:[#allocation3 + $0x54] sm:$0xf] %vm258_vm0, %v5838_v0 }
  0x42   : > { %2855 = vst.msk [vmem:[#allocation3 + $0x58] sm:$0xf] %vm258_vm0, %v5838_v0 }
  0x43   : > { %2857 = vst.msk [vmem:[#allocation3 + $0x60] sm:$0xf] %vm258_vm0, %v5838_v0 }
  0x44   : > { %2858 = vst.msk [vmem:[#allocation3 + $0x64] sm:$0xf] %vm258_vm0, %v5838_v0 }
  0x45   : > { %2860 = vst.msk [vmem:[#allocation3 + $0x6c] sm:$0xf] %vm258_vm0, %v5838_v0 }
  0x46   : > { %2861 = vst.msk [vmem:[#allocation3 + $0x70] sm:$0xf] %vm258_vm0, %v5838_v0 }
  0x47   : > { %2863 = vst.msk [vmem:[#allocation3 + $0x78] sm:$0xf] %vm258_vm0, %v5838_v0 }
  0x48   : > { %2864 = vst.msk [vmem:[#allocation3 + $0x7c] sm:$0xf] %vm258_vm0, %v5838_v0 }
  0x49   : > { %2866 = vst.msk [vmem:[#allocation3 + $0x84] sm:$0xf] %vm258_vm0, %v5838_v0 }
  0x4a   : > { %2867 = vst.msk [vmem:[#allocation3 + $0x88] sm:$0xf] %vm258_vm0, %v5838_v0 }
  0x4b   : > { %2869 = vst.msk [vmem:[#allocation3 + $0x90] sm:$0xf] %vm258_vm0, %v5838_v0 }
  0x4c   : > { %2870 = vst.msk [vmem:[#allocation3 + $0x94] sm:$0xf] %vm258_vm0, %v5838_v0 }
  0x4d   : > { %2872 = vst.msk [vmem:[#allocation3 + $0x9c] sm:$0xf] %vm258_vm0, %v5838_v0 }
  0x4e   : > { %2873 = vst.msk [vmem:[#allocation3 + $0xa0] sm:$0xf] %vm258_vm0, %v5838_v0 }
  0x4f   : > { %2875 = vst.msk [vmem:[#allocation3 + $0xa8] sm:$0xf] %vm258_vm0, %v5838_v0 }
  0x50   : > { %2876 = vst.msk [vmem:[#allocation3 + $0xac] sm:$0xf] %vm258_vm0, %v5838_v0 }
  0x51   : > { %2878 = vst.msk [vmem:[#allocation3 + $0xb4] sm:$0xf] %vm258_vm0, %v5838_v0 }
  0x52   : > { %2879 = vst.msk [vmem:[#allocation3 + $0xb8] sm:$0xf] %vm258_vm0, %v5838_v0 }
  0x53   : > { %2881 = vst.msk [vmem:[#allocation3 + $0xc0] sm:$0xf] %vm258_vm0, %v5838_v0 }
  0x54   : > { %2882 = vst.msk [vmem:[#allocation3 + $0xc4] sm:$0xf] %vm258_vm0, %v5838_v0 }
  0x55   : > { %2884 = vst.msk [vmem:[#allocation3 + $0xcc] sm:$0xf] %vm258_vm0, %v5838_v0 }
  0x56   : > { %2885 = vst.msk [vmem:[#allocation3 + $0xd0] sm:$0xf] %vm258_vm0, %v5838_v0 }
  0x57   : > { %262 = vst.msk [vmem:[#allocation2 + $0x8] sm:$0x1] %vm261_vm4, %v5838_v0 }
  0x58   : > { %265 = vst.msk [vmem:[#allocation2 + $0x14] sm:$0x1] %vm261_vm4, %v5838_v0 }
  0x59   : > { %268 = vst.msk [vmem:[#allocation2 + $0x20] sm:$0x1] %vm261_vm4, %v5838_v0 }
  0x5a   : > { %271 = vst.msk [vmem:[#allocation2 + $0x2c] sm:$0x1] %vm261_vm4, %v5838_v0 }
  0x5b   : > { %274 = vst.msk [vmem:[#allocation2 + $0x38] sm:$0x1] %vm261_vm4, %v5838_v0 }
  0x5c   : > { %277 = vst.msk [vmem:[#allocation2 + $0x44] sm:$0x1] %vm261_vm4, %v5838_v0 }
  0x5d   : > { %280 = vst.msk [vmem:[#allocation2 + $0x50] sm:$0x1] %vm261_vm4, %v5838_v0 }
  0x5e   : > { %v789_v17 = vld [vmem:[#allocation2 + $0x8] sm:$0x1]  ;;  %283 = vst.msk [vmem:[#allocation2 + $0x5c] sm:$0x1] %vm261_vm4, %v5838_v0 }
  0x5f   : > { %v896_v20 = vshll.u32 %v789_v17, 16  ;;  %286 = vst.msk [vmem:[#allocation2 + $0x68] sm:$0x1] %vm261_vm4, %v5838_v0  ;;  %v367_v17 = vshrl.u32 %v6143_v57, 16  ;;  %v679_v22 = vld [vmem:[#allocation2 + $0x14] sm:$0x1] }
  0x60   : > { %289 = vst.msk [vmem:[#allocation2 + $0x74] sm:$0x1] %vm261_vm4, %v5838_v0  ;;  %v680_v42 = vsel %vm6213_vm10, %v365_v21, %v679_v22  ;;  %v6273_v57 = vld [vmem:[#allocation2 + $0x18] sm:$0xf]  ;;  %v686_v30 = vld [vmem:[#allocation2 + $0x20] sm:$0x1] }
  0x61   : > { %v898_v24 = vrot.slane %v896_v20, 5  ;;  %292 = vst.msk [vmem:[#allocation2 + $0x80] sm:$0x1] %vm261_vm4, %v5838_v0  ;;  %v674_v20 = vsel %vm6160_vm8, %v6148_v58, %v6138_v53  ;;  %v6237_v38 = vrot.slane %v367_v17, 7  ;;  %v693_v53 = vld [vmem:[#allocation2 + $0x2c] sm:$0x1] }
  0x62   : > { %295 = vst.msk [vmem:[#allocation2 + $0x8c] sm:$0x1] %vm261_vm4, %v5838_v0  ;;  %v420_v58 = vrot.slane %v418_v39, 7  ;;  %v6327_v39 = vrot.slane %v494_v14, 7 }
  0x63   : > { %v899_v29 = vsel %vm5920_vm3, %v894_v19, %v898_v24  ;;  %298 = vst.msk [vmem:[#allocation2 + $0x98] sm:$0x1] %vm261_vm4, %v5838_v0  ;;  %v6191_v19 = vpack.c.bf16 %v238_v62, %v238_v62  ;;  %v6201_v24 = vpack.c.bf16 %v235_v8, %v235_v8  ;;  %v6271_v56 = vor.u32 %v370_v35, %v6237_v38 }
  0x64   : > { %1262 = vrot.lane.b32.xlu0 %v899_v29, %s5839_s20  ;;  %301 = vst.msk [vmem:[#allocation2 + $0xa4] sm:$0x1] %vm261_vm4, %v5838_v0  ;;  %v700_v29 = vld [vmem:[#allocation2 + $0x38] sm:$0x1]  ;;  %v373_v7 = vrot.slane %v6237_v38, 4  ;;  %v462_v8 = vrot.slane %v460_v49, 7  ;;  %v6298_v16 = vor.u32 %v421_v59, %v420_v58 }
  0x65   : > { %304 = vst.msk [vmem:[#allocation2 + $0xb0] sm:$0x1] %vm261_vm4, %v5838_v0  ;;  %v452_v40 = vshrl.u32 %v6191_v19, 16  ;;  %v426_v45 = vshrl.u32 %v6201_v24, 16  ;;  %v701_v52 = vsel %vm6213_vm10, %v416_v28, %v700_v29  ;;  %v429_v63 = vshll.u32 %v6201_v24, 16  ;;  %v240_v24 = vld [vmem:[%s6071_s24 + $0x70] sm:$0xff] }
  0x66   : > { %307 = vst.msk [vmem:[#allocation2 + $0xbc] sm:$0x1] %vm261_vm4, %v5838_v0  ;;  %v424_v17 = vrot.slane %v420_v58, 4  ;;  %v683_v21 = vsel %vm6160_vm8, %v6271_v56, %v6273_v57  ;;  %v465_v28 = vor.u32 %v463_v11, %v462_v8  ;;  %v721_v29 = vld [vmem:[#allocation2 + $0x5c] sm:$0x1]  ;;  %v6324_v36 = vsel %vm6174_vm9, %v373_v7, %v380_v12 }
  0x67   : > { %310 = vst.msk [vmem:[#allocation2 + $0xc8] sm:$0x1] %vm261_vm4, %v5838_v0  ;;  %v6276_v60 = vrot.slane %v452_v40, 7  ;;  %v6281_v62 = vrot.slane %v426_v45, 7  ;;  %v382_v38 = vrot.slane %v6266_v55, 4  ;;  %v6330_v40 = vor.u32 %v404_v15, %v6133_v51 }
  0x68   : > { %313 = vst.msk [vmem:[#allocation2 + $0xd4] sm:$0x1] %vm261_vm4, %v5838_v0  ;;  %v497_v45 = vshll.u32 %v6284_v4, 16 }
  0x69   : > { %2835 = vst.msk [vmem:[#allocation3 + $0x8] sm:$0x1] %vm261_vm4, %v5838_v0  ;;  %v458_v18 = vrot.slane %v6276_v60, 4  ;;  %v431_v22 = vor.u32 %v429_v63, %v6281_v62  ;;  %v241_v63 = vld [vmem:[%s6071_s24 + $0x78] sm:$0xff]  ;;  %v6378_v7 = vsel %vm6213_vm10, %v382_v38, %v686_v30 }
  0x6a   : > { %2838 = vst.msk [vmem:[#allocation3 + $0x14] sm:$0x1] %vm261_vm4, %v5838_v0 }
  0x6b   : > { %2841 = vst.msk [vmem:[#allocation3 + $0x20] sm:$0x1] %vm261_vm4, %v5838_v0  ;;  %v6348_v49 = vsel %vm6174_vm9, %v424_v17, %v431_v22  ;;  %v6363_v59 = vsel %vm6174_vm9, %v458_v18, %v465_v28 }
  0x6c   : > { %2844 = vst.msk [vmem:[#allocation3 + $0x2c] sm:$0x1] %vm261_vm4, %v5838_v0 }
  0x6d   : > { %2847 = vst.msk [vmem:[#allocation3 + $0x38] sm:$0x1] %vm261_vm4, %v5838_v0 }
  0x6e   : > { %2850 = vst.msk [vmem:[#allocation3 + $0x44] sm:$0x1] %vm261_vm4, %v5838_v0 }
  0x6f   : > { %2853 = vst.msk [vmem:[#allocation3 + $0x50] sm:$0x1] %vm261_vm4, %v5838_v0 }
  0x70   : > { %9911 = vst [vmem:[#allocation6_spill] sm:$0xff] %v9910_v3 }
  0x71   : > { %2856 = vst.msk [vmem:[#allocation3 + $0x5c] sm:$0x1] %vm261_vm4, %v5838_v0 }
  0x72   : > { %9914 = vst [vmem:[#allocation7_spill] sm:$0xff] %v9913_v9 }
  0x73   : > { %2859 = vst.msk [vmem:[#allocation3 + $0x68] sm:$0x1] %vm261_vm4, %v5838_v0 }
  0x74   : > { %2862 = vst.msk [vmem:[#allocation3 + $0x74] sm:$0x1] %vm261_vm4, %v5838_v0 }
  0x75   : > { %2865 = vst.msk [vmem:[#allocation3 + $0x80] sm:$0x1] %vm261_vm4, %v5838_v0 }
  0x76   : > { %9917 = vst [vmem:[#allocation8_spill] sm:$0xff] %v9916_v27 }
  0x77   : > { %2868 = vst.msk [vmem:[#allocation3 + $0x8c] sm:$0x1] %vm261_vm4, %v5838_v0 }
  0x78   : > { %2871 = vst.msk [vmem:[#allocation3 + $0x98] sm:$0x1] %vm261_vm4, %v5838_v0 }
  0x79   : > { %2874 = vst.msk [vmem:[#allocation3 + $0xa4] sm:$0x1] %vm261_vm4, %v5838_v0 }
  0x7a   : > { %2877 = vst.msk [vmem:[#allocation3 + $0xb0] sm:$0x1] %vm261_vm4, %v5838_v0 }
  0x7b   : > { %2880 = vst.msk [vmem:[#allocation3 + $0xbc] sm:$0x1] %vm261_vm4, %v5838_v0 }
  0x7c   : > { %2883 = vst.msk [vmem:[#allocation3 + $0xc8] sm:$0x1] %vm261_vm4, %v5838_v0 }
  0x7d   : > { %2886 = vst.msk [vmem:[#allocation3 + $0xd4] sm:$0x1] %vm261_vm4, %v5838_v0  ;;  %v694_v0 = vsel %vm6213_vm10, %v399_v46, %v693_v53  ;;  %v6341_v46 = vld [vmem:[#allocation2 + $0x6c] sm:$0xf]  ;;  %vm2069_vm4 = vcmask 191648  }
  0x7e   : > { %675 = vst [vmem:[#allocation2 + $0xc] sm:$0xf] %v674_v20  ;;  %v467_v20 = vrot.slane %v462_v8, 4  ;;  %v6402_v8 = vpack.c.bf16 %v241_v63, %v241_v63 }
  0x7f   : > { %676 = vst.msk [vmem:[#allocation2 + $0x10] sm:$0xf] %vm258_vm0, %v364_v25  ;;  %v244_v25 = vld [vmem:[%s6071_s24 + $0x90] sm:$0xff] }
  0x80   : > { %691 = vst [vmem:[#allocation2 + $0x24] sm:$0xf] %v690_v26  ;;  %v6314_v26 = vsel %vm6174_vm9, %v441_v54, %v448_v6  ;;  %v6318_v35 = vpack.c.bf16 %v244_v25, %v244_v25  ;;  %v6367_v61 = vsel %vm6213_vm10, %v467_v20, %v721_v29 }
  0x81   : > { %692 = vst.msk [vmem:[#allocation2 + $0x28] sm:$0xf] %vm258_vm0, %v398_v31  ;;  %v6316_v31 = vpack.c.bf16 %v240_v24, %v240_v24 }
  0x82   : > { %681 = vst [vmem:[#allocation2 + $0x14] sm:$0x1] %v680_v42  ;;  %v704_v42 = vsel %vm6160_vm8, %v6298_v16, %v6294_v13  ;;  %v503_v53 = vshrl.u32 %v6318_v35, 16  ;;  %v6464_v13 = vld [vmem:[#allocation2 + $0x60] sm:$0xf] }
  0x83   : > { %699 = vst.msk [vmem:[#allocation2 + $0x34] sm:$0xf] %vm258_vm0, %v6235_v37  ;;  %v450_v37 = vrot.slane %v6246_v43, 4 }
  0x84   : > { %702 = vst [vmem:[#allocation2 + $0x38] sm:$0x1] %v701_v52  ;;  %v469_v52 = vshrl.u32 %v6316_v31, 16 }
  0x85   : > { %v6344_v51 = vld [vmem:[#allocation2 + $0xc] sm:$0xf]  ;;  %695 = vst [vmem:[#allocation2 + $0x2c] sm:$0x1] %v694_v0 }
  0x86   : > { %v6355_v54 = vld [vmem:[#allocation2 + $0x10] sm:$0xf]  ;;  %v901_v55 = vshrl.u32 %v6344_v51, 16  ;;  %v904_v58 = vshll.u32 %v6344_v51, 16  ;;  %843 = vst.msk [vmem:[#allocation4 + $0x8] sm:$0xf] %vm258_vm0, %v6344_v51 }
  0x87   : > { %v910_v4 = vshll.u32 %v6355_v54, 16  ;;  %844 = vst.msk [vmem:[#allocation4 + $0xc] sm:$0xf] %vm258_vm0, %v6355_v54  ;;  %v6373_v5 = vld [vmem:[#allocation2 + $0x24] sm:$0xf]  ;;  %v914_v6 = vshrl.u32 %v6355_v54, 16 }
  0x88   : > { %v903_v11 = vrot.slane %v901_v55, 4  ;;  %v906_v0 = vrot.slane %v904_v58, 5  ;;  %v6384_v12 = vld [vmem:[#allocation2 + $0x28] sm:$0xf]  ;;  %v949_v14 = vshrl.u32 %v6373_v5, 16  ;;  %v952_v15 = vshll.u32 %v6373_v5, 16 }
  0x89   : > { %v912_v17 = vrot.slane %v910_v4, 5  ;;  %v958_v18 = vshll.u32 %v6384_v12, 16  ;;  %847 = vst.msk [vmem:[#allocation4 + $0x18] sm:$0xf] %vm258_vm0, %v6373_v5  ;;  %v792_v20 = vld [vmem:[#allocation2 + $0x14] sm:$0x1]  ;;  %v499_v4 = vor.u32 %v497_v45, %v6327_v39 }
  0x8a   : > { %v907_v24 = vor.u32 %v906_v0, %v903_v11  ;;  %v951_v25 = vrot.slane %v949_v14, 4  ;;  %v954_v28 = vrot.slane %v952_v15, 5  ;;  %848 = vst.msk [vmem:[#allocation4 + $0x1c] sm:$0xf] %vm258_vm0, %v6384_v12  ;;  %v916_v29 = vrot.slane %v914_v6, 4 }
  0x8b   : > { %v960_v30 = vrot.slane %v958_v18, 5  ;;  %v920_v38 = vshll.u32 %v792_v20, 16  ;;  %v6399_v55 = vld [vmem:[#allocation2 + $0x34] sm:$0xf]  ;;  %v801_v58 = vld [vmem:[#allocation2 + $0x38] sm:$0x1] }
  0x8c   : > { %v908_v44 = vrot.slane %v907_v24, 4  ;;  %v955_v22 = vor.u32 %v954_v28, %v951_v25  ;;  %v917_v47 = vor.u32 %v916_v29, %v912_v17  ;;  %v982_v11 = vshll.u32 %v6399_v55, 16  ;;  %850 = vst.msk [vmem:[#allocation4 + $0x24] sm:$0xf] %vm258_vm0, %v6399_v55  ;;  %v6407_v0 = vld [vmem:[#allocation2 + $0x2c] sm:$0x1] }
  0x8d   : > { %v986_v6 = vshrl.u32 %v6399_v55, 16  ;;  %v992_v14 = vshll.u32 %v801_v58, 16  ;;  %v962_v15 = vshrl.u32 %v6384_v12, 16  ;;  %712 = vst [vmem:[#allocation2 + $0x48] sm:$0xf] %v711_v48  ;;  %v472_v45 = vshll.u32 %v6316_v31, 16 }
  0x8e   : > { %v6419_v63 = vsel %vm5920_vm3, %v908_v44, %v912_v17  ;;  %v956_v18 = vrot.slane %v955_v22, 4  ;;  %v6421_v20 = vrot.slane %v982_v11, 5  ;;  %713 = vst.msk [vmem:[#allocation2 + $0x4c] sm:$0xf] %vm258_vm0, %v6314_v26  ;;  %v511_v24 = vshrl.u32 %v6395_v32, 16 }
  0x8f   : > { %9918 = vst [vmem:[#allocation9_spill] sm:$0xff] %v6419_v63  ;;  %1264 = vrot.lane.b32.xlu1 %v6419_v63, %s5839_s20  ;;  %v922_v25 = vrot.slane %v920_v38, 5  ;;  %v988_v33 = vrot.slane %v986_v6, 4  ;;  %v964_v34 = vrot.slane %v962_v15, 4  ;;  %v968_v48 = vshll.u32 %v6407_v0, 16 }
  0x90   : > { %684 = vst [vmem:[#allocation2 + $0x18] sm:$0xf] %v683_v21  ;;  %v6436_v26 = vsel %vm5920_vm3, %v956_v18, %v960_v30  ;;  %v918_v31 = vrot.slane %v917_v47, 4  ;;  %v714_v44 = vld [vmem:[#allocation2 + $0x50] sm:$0x1]  ;;  %v6440_v17 = vrot.slane %v469_v52, 7 }
  0x91   : > { %9919 = vst [vmem:[#allocation10_spill] sm:$0xff] %v6436_v26  ;;  %v477_v22 = vshrl.u32 %v6402_v8, 16  ;;  %1272 = vrot.lane.b32.xlu0 %v6436_v26, %s5839_s20  ;;  %v989_v28 = vor.u32 %v988_v33, %v6421_v20  ;;  %v994_v56 = vrot.slane %v992_v14, 5  ;;  %v965_v57 = vor.u32 %v964_v34, %v960_v30 }
  0x92   : > { %685 = vst.msk [vmem:[#allocation2 + $0x1c] sm:$0xf] %vm258_vm0, %v6324_v36  ;;  %v970_v21 = vrot.slane %v968_v48, 5  ;;  %v248_v36 = vld [vmem:[%s6071_s24 + $0xb0] sm:$0xff]  ;;  %v480_v38 = vshll.u32 %v6402_v8, 16  ;;  %v6460_v30 = vrot.slane %v503_v53, 7  ;;  %v6477_v53 = vor.u32 %v472_v45, %v6440_v17 }
  0x93   : > { %705 = vst [vmem:[#allocation2 + $0x3c] sm:$0xf] %v704_v42  ;;  %v6455_v29 = vrot.slane %v477_v22, 7  ;;  %v990_v58 = vrot.slane %v989_v28, 4  ;;  %v966_v47 = vrot.slane %v965_v57, 4  ;;  %v6466_v16 = vrot.slane %v511_v24, 7 }
  0x94   : > { %706 = vst.msk [vmem:[#allocation2 + $0x40] sm:$0xf] %vm258_vm0, %v6348_v49  ;;  %v514_v42 = vshll.u32 %v6395_v32, 16  ;;  %v6471_v49 = vsel %vm5920_vm3, %v918_v31, %v922_v25  ;;  %v6473_v8 = vld [vmem:[#allocation2 + $0x48] sm:$0xf]  ;;  %v9921_v15 = vrot.slane %v6307_v23, 4  ;;  %v725_v57 = vsel %vm6160_vm8, %v6477_v53, %v6464_v13 }
  0x95   : > { %720 = vst.msk [vmem:[#allocation2 + $0x58] sm:$0xf] %vm258_vm0, %v6363_v59  ;;  %v6481_v6 = vld [vmem:[#allocation2 + $0x4c] sm:$0xf]  ;;  %v1021_v14 = vshrl.u32 %v6473_v8, 16  ;;  %v1024_v32 = vshll.u32 %v6473_v8, 16  ;;  %v6499_v18 = vsel %vm5920_vm3, %v990_v58, %v994_v56  ;;  %v482_v56 = vor.u32 %v480_v38, %v6455_v29 }
  0x96   : > { %9920 = vst [vmem:[#allocation11_spill] sm:$0xff] %v6471_v49  ;;  %v6495_v45 = vsel %vm6174_vm9, %v9921_v15, %v499_v4  ;;  %v1030_v24 = vshll.u32 %v6481_v6, 16  ;;  %v1034_v43 = vshrl.u32 %v6481_v6, 16  ;;  %v249_v31 = vld [vmem:[%s6071_s24 + $0xb8] sm:$0xff] }
  0x97   : > { %723 = vst [vmem:[#allocation2 + $0x5c] sm:$0x1] %v6367_v61  ;;  %v715_v61 = vsel %vm6213_vm10, %v450_v37, %v714_v44  ;;  %v6504_v25 = vld [vmem:[#allocation2 + $0x18] sm:$0xf]  ;;  %v6507_v37 = vpack.c.bf16 %v248_v36, %v248_v36  ;;  %1266 = vrot.lane.b32.xlu1 %v6471_v49, %s5839_s20  ;;  %v1023_v23 = vrot.slane %v1021_v14, 4  ;;  %v1026_v4 = vrot.slane %v1024_v32, 5 }
  0x98   : > { %853 = vst.msk [vmem:[#allocation4 + $0x30] sm:$0xf] %vm258_vm0, %v6473_v8  ;;  %v925_v34 = vshrl.u32 %v6504_v25, 16  ;;  %v928_v48 = vshll.u32 %v6504_v25, 16  ;;  %v6516_v44 = vrot.slane %v1030_v24, 5  ;;  %v6532_v36 = vsel %vm5920_vm3, %v966_v47, %v970_v21  ;;  %v9998_v9 = vld [vmem:[#allocation10_spill] sm:$0xff] }
  0x99   : > { %9922 = vst [vmem:[#allocation12_spill] sm:$0xff] %v6499_v18  ;;  %v6511_v33 = vld [vmem:[#allocation2 + $0x1c] sm:$0xf]  ;;  %1278 = vrot.lane.b32.xlu0 %v6499_v18, %s5839_s20  ;;  %v1027_v58 = vor.u32 %v1026_v4, %v1023_v23  ;;  %v6552_v52 = vpack.c.bf16 %v249_v31, %v249_v31  ;;  %v1036_v26 = vrot.slane %v1034_v43, 4 }
  0x9a   : > { %854 = vst.msk [vmem:[#allocation4 + $0x34] sm:$0xf] %vm258_vm0, %v6481_v6  ;;  %v934_v22 = vshll.u32 %v6511_v33, 16  ;;  %v6521_v28 = vld [vmem:[#allocation2 + $0x3c] sm:$0xf]  ;;  %v927_v14 = vrot.slane %v925_v34, 4  ;;  %v516_v34 = vor.u32 %v514_v42, %v6466_v16 }
  0x9b   : > { %845 = vst.msk [vmem:[#allocation4 + $0x10] sm:$0xf] %vm258_vm0, %v6504_v25  ;;  %v930_v32 = vrot.slane %v928_v48, 5  ;;  %v6536_v15 = vld [vmem:[#allocation2 + $0x40] sm:$0xf]  ;;  %v997_v24 = vshrl.u32 %v6521_v28, 16  ;;  %v1037_v43 = vor.u32 %v1036_v26, %v6516_v44 }
  0x9c   : > { %9923 = vst [vmem:[#allocation13_spill] sm:$0xff] %v6532_v36  ;;  %v936_v38 = vrot.slane %v934_v22, 5  ;;  %v1000_v13 = vshll.u32 %v6521_v28, 16  ;;  %v1006_v53 = vshll.u32 %v6536_v15, 16  ;;  %v1028_v21 = vrot.slane %v1027_v58, 4 }
  0x9d   : > { %846 = vst.msk [vmem:[#allocation4 + $0x14] sm:$0xf] %vm258_vm0, %v6511_v33  ;;  %v931_v47 = vor.u32 %v930_v32, %v927_v14  ;;  %v6545_v23 = vld [vmem:[#allocation2 + $0x58] sm:$0xf]  ;;  %v938_v4 = vshrl.u32 %v6511_v33, 16  ;;  %v999_v48 = vrot.slane %v997_v24, 4 }
  0x9e   : > { %851 = vst.msk [vmem:[#allocation4 + $0x28] sm:$0xf] %vm258_vm0, %v6521_v28  ;;  %v1002_v22 = vrot.slane %v1000_v13, 5  ;;  %v6549_v59 = vld [vmem:[#allocation2 + $0x5c] sm:$0x1]  ;;  %v1054_v11 = vshll.u32 %v6545_v23, 16  ;;  %v6557_v58 = vsel %vm5920_vm3, %v1028_v21, %v6516_v44 }
  0x9f   : > { %852 = vst.msk [vmem:[#allocation4 + $0x2c] sm:$0xf] %vm258_vm0, %v6536_v15  ;;  %v932_v14 = vrot.slane %v931_v47, 4  ;;  %v1058_v32 = vshrl.u32 %v6545_v23, 16  ;;  %v1064_v18 = vshll.u32 %v6549_v59, 16  ;;  %v940_v31 = vrot.slane %v938_v4, 4  ;;  %1274 = vrot.lane.b32.xlu1 %v6532_v36, %s5839_s20 }
  0xa0   : > { %9924 = vst [vmem:[#allocation14_spill] sm:$0xff] %v6549_v59  ;;  %v742_v42 = vld [vmem:[#allocation2 + $0x80] sm:$0x1]  ;;  %v1003_v24 = vor.u32 %v1002_v22, %v999_v48  ;;  %v6563_v13 = vrot.slane %v1054_v11, 5  ;;  %v6572_v47 = vrot.slane %v1006_v53, 5  ;;  %v518_v48 = vrot.slane %v6466_v16, 4 }
  0xa1   : > { %9925 = vst [vmem:[#allocation15_spill] sm:$0xff] %v6557_v58  ;;  %v6570_v21 = vsel %vm5920_vm3, %v932_v14, %v936_v38  ;;  %v1060_v49 = vrot.slane %v1058_v32, 4  ;;  %v941_v11 = vor.u32 %v940_v31, %v936_v38  ;;  %v9927_v4 = vsel %vm6160_vm8, %v6351_v50, %v6341_v46  ;;  %v707_v53 = vld [vmem:[#allocation2 + $0x44] sm:$0x1]  ;;  %1284 = vrot.lane.b32.xlu0 %v6557_v58, %s5839_s20 }
  0xa2   : > { %856 = vst.msk [vmem:[#allocation4 + $0x3c] sm:$0xf] %vm258_vm0, %v6545_v23  ;;  %1268 = vrot.lane.b32.xlu2 %v6570_v21, %s5839_s20  ;;  %v1010_v22 = vshrl.u32 %v6536_v15, 16  ;;  %v9928_v26 = vrot.slane %v6440_v17, 4  ;;  %v9929_v46 = vrot.slane %v6460_v30, 4  ;;  %v246_v44 = vld [vmem:[%s6071_s24 + $0xa0] sm:$0xff]  ;;  %v743_v17 = vsel %vm6213_vm10, %v518_v48, %v742_v42 }
  0xa3   : > { %688 = vst [vmem:[#allocation2 + $0x20] sm:$0x1] %v6378_v7  ;;  %v1004_v7 = vrot.slane %v1003_v24, 4  ;;  %v1061_v16 = vor.u32 %v1060_v49, %v6563_v13  ;;  %v1066_v38 = vrot.slane %v1064_v18, 5  ;;  %v9930_v49 = vsel %vm6160_vm8, %v6330_v40, %v6332_v41  ;;  %v247_v42 = vld [vmem:[%s6071_s24 + $0xa8] sm:$0xff]  ;;  %v250_v48 = vld [vmem:[%s6071_s24 + $0xc0] sm:$0xff] }
  0xa4   : > { %9926 = vst [vmem:[#allocation16_spill] sm:$0xff] %v6570_v21  ;;  %v517_v50 = vsel %vm6174_vm9, %v9929_v46, %v516_v34  ;;  %v501_v14 = vrot.slane %v6327_v39, 4  ;;  %v735_v34 = vld [vmem:[#allocation2 + $0x74] sm:$0x1]  ;;  %v6615_v40 = vrot.slane %v1010_v22, 4  ;;  %v537_v41 = vshrl.u32 %v6507_v37, 16 }
  0xa5   : > { %716 = vst [vmem:[#allocation2 + $0x50] sm:$0x1] %v715_v61  ;;  %v483_v61 = vsel %vm6174_vm9, %v9928_v26, %v482_v56  ;;  %v6613_v18 = vsel %vm5920_vm3, %v1004_v7, %v6572_v47  ;;  %v1062_v32 = vrot.slane %v1061_v16, 4  ;;  %v942_v24 = vrot.slane %v941_v11, 4 }
  0xa6   : > { %733 = vst [vmem:[#allocation2 + $0x6c] sm:$0xf] %v9927_v4  ;;  %v540_v31 = vshll.u32 %v6507_v37, 16  ;;  %v545_v39 = vshrl.u32 %v6552_v52, 16  ;;  %v6626_v7 = vrot.slane %v537_v41, 7  ;;  %v6640_v22 = vsel %vm6213_vm10, %v501_v14, %v735_v34 }
  0xa7   : > { %734 = vst.msk [vmem:[#allocation2 + $0x70] sm:$0xf] %vm258_vm0, %v6495_v45  ;;  %v9931_v45 = vrot.slane %v6281_v62, 4  ;;  %v1038_v62 = vrot.slane %v1037_v43, 4  ;;  %v6633_v11 = vsel %vm5920_vm3, %v1062_v32, %v1066_v38  ;;  %v455_v16 = vshll.u32 %v6191_v19, 16  ;;  %1280 = vrot.lane.b32.xlu1 %v6613_v18, %s5839_s20 }
  0xa8   : > { %698 = vst [vmem:[#allocation2 + $0x30] sm:$0xf] %v9930_v49  ;;  %v543_v46 = vrot.slane %v6626_v7, 4  ;;  %v542_v32 = vor.u32 %v540_v31, %v6626_v7  ;;  %v6667_v41 = vpack.c.bf16 %v250_v48, %v250_v48 }
  0xa9   : > { %v708_v56 = vsel %vm6213_vm10, %v9931_v45, %v707_v53  ;;  %9932 = vst [vmem:[#allocation17_spill] sm:$0xff] %v6613_v18  ;;  %v6629_v53 = vpack.c.bf16 %v246_v44, %v246_v44  ;;  %v752_v45 = vld [vmem:[#allocation2 + $0x90] sm:$0xf]  ;;  %1290 = vrot.lane.b32.xlu0 %v6633_v11, %s5839_s20 }
  0xaa   : > { %726 = vst [vmem:[#allocation2 + $0x60] sm:$0xf] %v725_v57  ;;  %v6623_v4 = vld [vmem:[#allocation2 + $0x20] sm:$0x1]  ;;  %v548_v57 = vshll.u32 %v6552_v52, 16  ;;  %v753_v58 = vsel %vm6160_vm8, %v542_v32, %v752_v45 }
  0xab   : > { %727 = vst.msk [vmem:[#allocation2 + $0x64] sm:$0xf] %vm258_vm0, %v483_v61  ;;  %v944_v43 = vshll.u32 %v6623_v4, 16 }
  0xac   : > { %741 = vst.msk [vmem:[#allocation2 + $0x7c] sm:$0xf] %vm258_vm0, %v517_v50  ;;  %v6636_v37 = vld [vmem:[#allocation2 + $0x50] sm:$0x1]  ;;  %v6651_v50 = vpack.c.bf16 %v247_v42, %v247_v42 }
  0xad   : > { %9933 = vst [vmem:[#allocation18_spill] sm:$0xff] %v6633_v11  ;;  %v1040_v52 = vshll.u32 %v6636_v37, 16  ;;  %v6646_v26 = vld [vmem:[#allocation2 + $0x6c] sm:$0xf]  ;;  %v946_v44 = vrot.slane %v944_v43, 5 }
  0xae   : > { %744 = vst [vmem:[#allocation2 + $0x80] sm:$0x1] %v743_v17  ;;  %v6653_v38 = vld [vmem:[#allocation2 + $0x70] sm:$0xf]  ;;  %v1093_v19 = vshrl.u32 %v6646_v26, 16  ;;  %v1096_v49 = vshll.u32 %v6646_v26, 16 }
  0xaf   : > { %9934 = vst [vmem:[#allocation19_spill] sm:$0xff] %v6646_v26  ;;  %v6657_v17 = vrot.slane %v545_v39, 7  ;;  %v1102_v14 = vshll.u32 %v6653_v38, 16  ;;  %v6664_v34 = vld [vmem:[#allocation2 + $0x30] sm:$0xf]  ;;  %v6671_v42 = vsel %vm5920_vm3, %v942_v24, %v946_v44 }
  0xb0   : > { %709 = vst [vmem:[#allocation2 + $0x44] sm:$0x1] %v708_v56  ;;  %v1042_v56 = vrot.slane %v1040_v52, 5  ;;  %v1095_v39 = vrot.slane %v1093_v19, 4  ;;  %v1098_v43 = vrot.slane %v1096_v49, 5  ;;  %v973_v52 = vshrl.u32 %v6664_v34, 16  ;;  %1270 = vrot.lane.b32.xlu2 %v6671_v42, %s5839_s20 }
  0xb1   : > { %859 = vst.msk [vmem:[#allocation4 + $0x48] sm:$0xf] %vm258_vm0, %v6646_v26  ;;  %v6682_v31 = vrot.slane %v1102_v14, 5  ;;  %v976_v24 = vshll.u32 %v6664_v34, 16  ;;  %v6687_v48 = vld [vmem:[#allocation2 + $0x60] sm:$0xf]  ;;  %v550_v7 = vor.u32 %v548_v57, %v6657_v17  ;;  %v457_v57 = vor.u32 %v455_v16, %v6276_v60 }
  0xb2   : > { %9935 = vst [vmem:[#allocation20_spill] sm:$0xff] %v6671_v42  ;;  %v6680_v61 = vsel %vm5920_vm3, %v1038_v62, %v1042_v56  ;;  %v1099_v44 = vor.u32 %v1098_v43, %v1095_v39  ;;  %v975_v19 = vrot.slane %v973_v52, 4  ;;  %v6690_v49 = vld [vmem:[#allocation2 + $0x64] sm:$0xf]  ;;  %v1069_v62 = vshrl.u32 %v6687_v48, 16  ;;  %v251_v39 = vld [vmem:[%s6071_s24 + $0xc8] sm:$0xff] }
  0xb3   : > { %860 = vst.msk [vmem:[#allocation4 + $0x4c] sm:$0xf] %vm258_vm0, %v6653_v38  ;;  %v1072_v56 = vshll.u32 %v6687_v48, 16  ;;  %v978_v14 = vrot.slane %v976_v24, 5  ;;  %v1078_v11 = vshll.u32 %v6690_v49, 16  ;;  %v254_v43 = vld [vmem:[%s6071_s24 + $0xe0] sm:$0xff]  ;;  %1286 = vrot.lane.b32.xlu1 %v6680_v61, %s5839_s20  ;;  %v551_v16 = vsel %vm6174_vm9, %v543_v46, %v550_v7 }
  0xb4   : > { %9936 = vst [vmem:[#allocation21_spill] sm:$0xff] %v6680_v61  ;;  %v6697_v18 = vld [vmem:[#allocation2 + $0x7c] sm:$0xf]  ;;  %v1100_v52 = vrot.slane %v1099_v44, 4  ;;  %v1071_v36 = vrot.slane %v1069_v62, 4  ;;  %v1106_v7 = vshrl.u32 %v6653_v38, 16 }
  0xb5   : > { %849 = vst.msk [vmem:[#allocation4 + $0x20] sm:$0xf] %vm258_vm0, %v6664_v34  ;;  %v1074_v21 = vrot.slane %v1072_v56, 5  ;;  %v1126_v24 = vshll.u32 %v6697_v18, 16  ;;  %v979_v42 = vor.u32 %v978_v14, %v975_v19  ;;  %v6709_v63 = vrot.slane %v1078_v11, 5 }
  0xb6   : > { %857 = vst.msk [vmem:[#allocation4 + $0x40] sm:$0xf] %vm258_vm0, %v6687_v48  ;;  %v6711_v26 = vld [vmem:[#allocation2 + $0x80] sm:$0x1]  ;;  %v1130_v60 = vshrl.u32 %v6697_v18, 16  ;;  %v6721_v45 = vsel %vm5920_vm3, %v1100_v52, %v6682_v31 }
  0xb7   : > { %9937 = vst [vmem:[#allocation22_spill] sm:$0xff] %v6697_v18  ;;  %v1075_v32 = vor.u32 %v1074_v21, %v1071_v36  ;;  %v6723_v44 = vrot.slane %v1126_v24, 5  ;;  %v1136_v11 = vshll.u32 %v6711_v26, 16  ;;  %v6726_v19 = vld [vmem:[#allocation2 + $0x44] sm:$0x1]  ;;  %1296 = vrot.lane.b32.xlu0 %v6721_v45, %s5839_s20  ;;  %v980_v62 = vrot.slane %v979_v42, 4 }
  0xb8   : > { %858 = vst.msk [vmem:[#allocation4 + $0x44] sm:$0xf] %vm258_vm0, %v6690_v49  ;;  %v1132_v56 = vrot.slane %v1130_v60, 4  ;;  %v1016_v46 = vshll.u32 %v6726_v19, 16  ;;  %v9940_v36 = vor.u32 %v6615_v40, %v6572_v47  ;;  %v717_v52 = vld [vmem:[#allocation2 + $0x54] sm:$0xf]  ;;  %v6737_v24 = vpack.c.bf16 %v251_v39, %v251_v39 }
  0xb9   : > { %9938 = vst [vmem:[#allocation23_spill] sm:$0xff] %v6711_v26  ;;  %v1076_v14 = vrot.slane %v1075_v32, 4  ;;  %v6744_v42 = vsel %vm5920_vm3, %v980_v62, %v6421_v20  ;;  %v1108_v32 = vrot.slane %v1106_v7, 4  ;;  %v718_v40 = vsel %vm6160_vm8, %v457_v57, %v717_v52 }
  0xba   : > { %862 = vst.msk [vmem:[#allocation4 + $0x54] sm:$0xf] %vm258_vm0, %v6697_v18  ;;  %v1014_v21 = vrot.slane %v9940_v36, 4  ;;  %v1133_v60 = vor.u32 %v1132_v56, %v6723_v44  ;;  %1276 = vrot.lane.b32.xlu2 %v6744_v42, %s5839_s20  ;;  %v520_v39 = vshrl.u32 %v6629_v53, 16  ;;  %v523_v20 = vshll.u32 %v6629_v53, 16 }
  0xbb   : > { %9939 = vst [vmem:[#allocation24_spill] sm:$0xff] %v6721_v45  ;;  %v6752_v47 = vsel %vm5920_vm3, %v1076_v14, %v6709_v63  ;;  %v528_v62 = vshrl.u32 %v6651_v50, 16  ;;  %v531_v7 = vshll.u32 %v6651_v50, 16  ;;  %v745_v14 = vld [vmem:[#allocation2 + $0x84] sm:$0xf]  ;;  %v554_v36 = vshrl.u32 %v6667_v41, 16 }
  0xbc   : > { %737 = vst [vmem:[#allocation2 + $0x74] sm:$0x1] %v6640_v22  ;;  %v6739_v22 = vpack.c.bf16 %v254_v43, %v254_v43  ;;  %v1134_v43 = vrot.slane %v1133_v60, 4  ;;  %v522_v56 = vrot.slane %v520_v39, 7  ;;  %v562_v57 = vshrl.u32 %v6737_v24, 16  ;;  %1292 = vrot.lane.b32.xlu1 %v6752_v47, %s5839_s20 }
  0xbd   : > { %754 = vst [vmem:[#allocation2 + $0x90] sm:$0xf] %v753_v58  ;;  %v1138_v58 = vrot.slane %v1136_v11, 5  ;;  %v1109_v11 = vor.u32 %v1108_v32, %v6682_v31  ;;  %v6771_v52 = vrot.slane %v528_v62, 7  ;;  %v565_v60 = vshll.u32 %v6737_v24, 16 }
  0xbe   : > { %755 = vst.msk [vmem:[#allocation2 + $0x94] sm:$0xf] %vm258_vm0, %v551_v16  ;;  %v1018_v16 = vrot.slane %v1016_v46, 5  ;;  %v526_v39 = vrot.slane %v522_v56, 4  ;;  %v6777_v45 = vrot.slane %v554_v36, 7 }
  0xbf   : > { %9941 = vst [vmem:[#allocation25_spill] sm:$0xff] %v6744_v42  ;;  %v6767_v53 = vsel %vm5920_vm3, %v1134_v43, %v1138_v58  ;;  %v1110_v46 = vrot.slane %v1109_v11, 4  ;;  %v728_v62 = vld [vmem:[#allocation2 + $0x68] sm:$0x1] }
  0xc0   : > { %9942 = vst [vmem:[#allocation26_spill] sm:$0xff] %v6752_v47  ;;  %v255_v47 = vld [vmem:[%s6071_s24 + $0xe8] sm:$0xff]  ;;  %1302 = vrot.lane.b32.xlu0 %v6767_v53, %s5839_s20  ;;  %v6784_v58 = vsel %vm5920_vm3, %v1014_v21, %v1018_v16  ;;  %v560_v16 = vrot.slane %v6777_v45, 4 }
  0xc1   : > { %719 = vst [vmem:[#allocation2 + $0x54] sm:$0xf] %v718_v40  ;;  %v525_v40 = vor.u32 %v523_v20, %v522_v56  ;;  %v533_v20 = vor.u32 %v531_v7, %v6771_v52  ;;  %v763_v7 = vld [vmem:[#allocation2 + $0xa4] sm:$0x1] }
  0xc2   : > { %9943 = vst [vmem:[#allocation27_spill] sm:$0xff] %v6767_v53  ;;  %1282 = vrot.lane.b32.xlu2 %v6784_v58, %s5839_s20 }
  0xc3   : > { %v6769_v31 = vld [vmem:[#allocation2 + $0x74] sm:$0x1]  ;;  %9945 = vst [vmem:[#allocation29_spill] sm:$0xff] %v6784_v58  ;;  %v746_v21 = vsel %vm6160_vm8, %v525_v40, %v745_v14  ;;  %v534_v42 = vsel %vm6174_vm9, %v526_v39, %v533_v20  ;;  %v484_v40 = vrot.slane %v6455_v29, 4  ;;  %v756_v20 = vld [vmem:[#allocation2 + $0x98] sm:$0x1] }
  0xc4   : > { %v1112_v50 = vshll.u32 %v6769_v31, 16  ;;  %v6775_v32 = vld [vmem:[#allocation2 + $0x90] sm:$0xf]  ;;  %747 = vst [vmem:[#allocation2 + $0x84] sm:$0xf] %v746_v21  ;;  %v552_v29 = vrot.slane %v6657_v17, 4 }
  0xc5   : > { %9944 = vst [vmem:[#allocation28_spill] sm:$0xff] %v6775_v32  ;;  %v6786_v43 = vld [vmem:[#allocation2 + $0x94] sm:$0xf]  ;;  %v1165_v24 = vshrl.u32 %v6775_v32, 16  ;;  %v1168_v11 = vshll.u32 %v6775_v32, 16 }
  0xc6   : > { %9946 = vst [vmem:[#allocation30_spill] sm:$0xff] %v6786_v43  ;;  %v1114_v56 = vrot.slane %v1112_v50, 5  ;;  %v1174_v36 = vshll.u32 %v6786_v43, 16  ;;  %v757_v17 = vsel %vm6213_vm10, %v552_v29, %v756_v20 }
  0xc7   : > { %865 = vst.msk [vmem:[#allocation4 + $0x60] sm:$0xf] %vm258_vm0, %v6775_v32  ;;  %v1167_v53 = vrot.slane %v1165_v24, 4  ;;  %v1170_v61 = vrot.slane %v1168_v11, 5  ;;  %v564_v32 = vrot.slane %v562_v57, 7  ;;  %v6813_v24 = vpack.c.bf16 %v255_v47, %v255_v47 }
  0xc8   : > { %866 = vst.msk [vmem:[#allocation4 + $0x64] sm:$0xf] %vm258_vm0, %v6786_v43  ;;  %v6805_v50 = vsel %vm5920_vm3, %v1110_v46, %v1114_v56  ;;  %v6807_v26 = vrot.slane %v1174_v36, 5  ;;  %v6809_v14 = vld [vmem:[#allocation2 + $0x54] sm:$0xf]  ;;  %v729_v36 = vsel %vm6213_vm10, %v484_v40, %v728_v62  ;;  %v1178_v40 = vshrl.u32 %v6786_v43, 16 }
  0xc9   : > { %9947 = vst [vmem:[#allocation31_spill] sm:$0xff] %v6805_v50  ;;  %v1171_v39 = vor.u32 %v1170_v61, %v1167_v53  ;;  %v1045_v57 = vshrl.u32 %v6809_v14, 16  ;;  %v1048_v11 = vshll.u32 %v6809_v14, 16  ;;  %v567_v46 = vor.u32 %v565_v60, %v564_v32  ;;  %1298 = vrot.lane.b32.xlu1 %v6805_v50, %s5839_s20  ;;  %v252_v60 = vld [vmem:[%s6071_s24 + $0xd0] sm:$0xff] }
  0xca   : > { %748 = vst.msk [vmem:[#allocation2 + $0x88] sm:$0xf] %vm258_vm0, %v534_v42  ;;  %v569_v56 = vrot.slane %v564_v32, 4  ;;  %v1082_v42 = vshrl.u32 %v6690_v49, 16  ;;  %v599_v50 = vshll.u32 %v6813_v24, 16 }
  0xcb   : > { %855 = vst.msk [vmem:[#allocation4 + $0x38] sm:$0xf] %vm258_vm0, %v6809_v14  ;;  %v1172_v61 = vrot.slane %v1171_v39, 4  ;;  %v1047_v47 = vrot.slane %v1045_v57, 4  ;;  %v1050_v53 = vrot.slane %v1048_v11, 5  ;;  %v568_v21 = vsel %vm6174_vm9, %v560_v16, %v567_v46  ;;  %v253_v46 = vld [vmem:[%s6071_s24 + $0xd8] sm:$0xff] }
  0xcc   : > { %730 = vst [vmem:[#allocation2 + $0x68] sm:$0x1] %v729_v36  ;;  %v764_v32 = vsel %vm6213_vm10, %v569_v56, %v763_v7  ;;  %v1084_v62 = vrot.slane %v1082_v42, 4  ;;  %v588_v16 = vshrl.u32 %v6739_v22, 16  ;;  %v591_v11 = vshll.u32 %v6739_v22, 16 }
  0xcd   : > { %762 = vst.msk [vmem:[#allocation2 + $0xa0] sm:$0xf] %vm258_vm0, %v568_v21  ;;  %v6837_v39 = vsel %vm5920_vm3, %v1172_v61, %v6807_v26  ;;  %v1051_v57 = vor.u32 %v1050_v53, %v1047_v47  ;;  %v6844_v7 = vld [vmem:[#allocation2 + $0x84] sm:$0xf]  ;;  %v596_v56 = vshrl.u32 %v6813_v24, 16  ;;  %v6848_v42 = vpack.c.bf16 %v252_v60, %v252_v60 }
  0xce   : > { %9948 = vst [vmem:[#allocation32_spill] sm:$0xff] %v6837_v39  ;;  %1308 = vrot.lane.b32.xlu0 %v6837_v39, %s5839_s20  ;;  %v1085_v20 = vor.u32 %v1084_v62, %v6709_v63  ;;  %v773_v36 = vld [vmem:[#allocation2 + $0xb4] sm:$0xf]  ;;  %v1141_v47 = vshrl.u32 %v6844_v7, 16  ;;  %v1144_v22 = vshll.u32 %v6844_v7, 16  ;;  %v590_v53 = vrot.slane %v588_v16, 7 }
  0xcf   : > { %765 = vst [vmem:[#allocation2 + $0xa4] sm:$0x1] %v764_v32  ;;  %v1052_v29 = vrot.slane %v1051_v57, 4  ;;  %v1180_v63 = vrot.slane %v1178_v40, 4  ;;  %v6857_v32 = vrot.slane %v596_v56, 7  ;;  %v341_v62 = vpack.c.bf16 %v253_v46, %v253_v46 }
  0xd0   : > { %758 = vst [vmem:[#allocation2 + $0x98] sm:$0x1] %v757_v17  ;;  %v1143_v17 = vrot.slane %v1141_v47, 4  ;;  %v1146_v57 = vrot.slane %v1144_v22, 5  ;;  %v593_v16 = vor.u32 %v591_v11, %v590_v53  ;;  %v1086_v56 = vrot.slane %v1085_v20, 4 }
  0xd1   : > { %v6850_v61 = vld [vmem:[#allocation2 + $0x88] sm:$0xf]  ;;  %863 = vst.msk [vmem:[#allocation4 + $0x58] sm:$0xf] %vm258_vm0, %v6844_v7  ;;  %v6862_v60 = vsel %vm5920_vm3, %v1052_v29, %v6563_v13  ;;  %v594_v46 = vrot.slane %v590_v53, 4  ;;  %v506_v11 = vshll.u32 %v6318_v35, 16  ;;  %v1181_v24 = vor.u32 %v1180_v63, %v6807_v26 }
  0xd2   : > { %v1150_v21 = vshll.u32 %v6850_v61, 16  ;;  %9949 = vst [vmem:[#allocation33_spill] sm:$0xff] %v6862_v60  ;;  %1288 = vrot.lane.b32.xlu2 %v6862_v60, %s5839_s20  ;;  %v1147_v58 = vor.u32 %v1146_v57, %v1143_v17  ;;  %v774_v47 = vsel %vm6160_vm8, %v593_v16, %v773_v36  ;;  %v738_v22 = vld [vmem:[#allocation2 + $0x78] sm:$0xf]  ;;  %v601_v53 = vor.u32 %v599_v50, %v6857_v32 }
  0xd3   : > { %864 = vst.msk [vmem:[#allocation4 + $0x5c] sm:$0xf] %vm258_vm0, %v6850_v61  ;;  %v6870_v40 = vld [vmem:[#allocation2 + $0x68] sm:$0x1]  ;;  %v508_v35 = vor.u32 %v506_v11, %v6460_v30 }
  0xd4   : > { %v6868_v39 = vrot.slane %v1150_v21, 5  ;;  %v6873_v13 = vld [vmem:[#allocation2 + $0xa0] sm:$0xf]  ;;  %v1088_v29 = vshll.u32 %v6870_v40, 16  ;;  %v1148_v17 = vrot.slane %v1147_v58, 4 }
  0xd5   : > { %9950 = vst [vmem:[#allocation34_spill] sm:$0xff] %v6873_v13  ;;  %v1198_v21 = vshll.u32 %v6873_v13, 16  ;;  %v1202_v20 = vshrl.u32 %v6873_v13, 16  ;;  %v739_v30 = vsel %vm6160_vm8, %v508_v35, %v738_v22  ;;  %v603_v35 = vrot.slane %v6857_v32, 4 }
  0xd6   : > { %v6879_v60 = vld [vmem:[#allocation2 + $0xa4] sm:$0x1]  ;;  %868 = vst.msk [vmem:[#allocation4 + $0x6c] sm:$0xf] %vm258_vm0, %v6873_v13  ;;  %v1090_v36 = vrot.slane %v1088_v29, 5  ;;  %v602_v13 = vsel %vm6174_vm9, %v594_v46, %v601_v53  ;;  %v6899_v26 = vsel %vm5920_vm3, %v1148_v17, %v6868_v39  ;;  %v571_v46 = vshrl.u32 %v6848_v42, 16 }
  0xd7   : > { %v1208_v57 = vshll.u32 %v6879_v60, 16  ;;  %v6888_v16 = vld [vmem:[#allocation2 + $0x98] sm:$0x1]  ;;  %v6891_v18 = vrot.slane %v1198_v21, 5  ;;  %v1204_v59 = vrot.slane %v1202_v20, 4  ;;  %9951 = vst [vmem:[#allocation35_spill] sm:$0xff] %v6899_v26  ;;  %1304 = vrot.lane.b32.xlu1 %v6899_v26, %s5839_s20 }
  0xd8   : > { %v1184_v43 = vshll.u32 %v6888_v16, 16  ;;  %775 = vst [vmem:[#allocation2 + $0xb4] sm:$0xf] %v774_v47  ;;  %v6903_v58 = vsel %vm5920_vm3, %v1086_v56, %v1090_v36  ;;  %v574_v29 = vshll.u32 %v6848_v42, 16  ;;  %v1182_v47 = vrot.slane %v1181_v24, 4 }
  0xd9   : > { %9952 = vst [vmem:[#allocation36_spill] sm:$0xff] %v6903_v58  ;;  %v1205_v50 = vor.u32 %v1204_v59, %v6891_v18  ;;  %v1210_v63 = vrot.slane %v1208_v57, 5  ;;  %v579_v56 = vshrl.u32 %v341_v62, 16  ;;  %v582_v21 = vshll.u32 %v341_v62, 16  ;;  %v766_v53 = vld [vmem:[#allocation2 + $0xa8] sm:$0xf] }
  0xda   : > { %776 = vst.msk [vmem:[#allocation2 + $0xb8] sm:$0xf] %vm258_vm0, %v602_v13  ;;  %v1186_v11 = vrot.slane %v1184_v43, 5  ;;  %1294 = vrot.lane.b32.xlu2 %v6903_v58, %s5839_s20  ;;  %v573_v13 = vrot.slane %v571_v46, 7  ;;  %v535_v59 = vrot.slane %v6771_v52, 4  ;;  %v1154_v52 = vshrl.u32 %v6850_v61, 16 }
  0xdb   : > { %740 = vst [vmem:[#allocation2 + $0x78] sm:$0xf] %v739_v30  ;;  %v1206_v20 = vrot.slane %v1205_v50, 4  ;;  %v6915_v22 = vrot.slane %v579_v56, 7  ;;  %v749_v24 = vld [vmem:[#allocation2 + $0x8c] sm:$0x1] }
  0xdc   : > { %v576_v57 = vor.u32 %v574_v29, %v573_v13  ;;  %v577_v42 = vrot.slane %v573_v13, 4  ;;  %v6926_v43 = vsel %vm5920_vm3, %v1182_v47, %v1186_v11  ;;  %v777_v30 = vld [vmem:[#allocation2 + $0xbc] sm:$0x1]  ;;  %v750_v56 = vsel %vm6213_vm10, %v535_v59, %v749_v24 }
  0xdd   : > { %v6920_v17 = vsel %vm5920_vm3, %v1206_v20, %v1210_v63  ;;  %9954 = vst [vmem:[#allocation38_spill] sm:$0xff] %v6926_v43  ;;  %v584_v36 = vor.u32 %v582_v21, %v6915_v22  ;;  %v9745_v26 = vrot.slane %v5903_v2, 5 }
  0xde   : > { %9953 = vst [vmem:[#allocation37_spill] sm:$0xff] %v6920_v17  ;;  %1314 = vrot.lane.b32.xlu0 %v6920_v17, %s5839_s20  ;;  %v767_v29 = vsel %vm6160_vm8, %v576_v57, %v766_v53  ;;  %v1156_v57 = vrot.slane %v1154_v52, 4 }
  0xdf   : > { %v6928_v62 = vld [vmem:[#allocation2 + $0xb4] sm:$0xf]  ;;  %v585_v32 = vsel %vm6174_vm9, %v577_v42, %v584_v36  ;;  %1310 = vrot.lane.b32.xlu1 %v6926_v43, %s5839_s20  ;;  %768 = vst [vmem:[#allocation2 + $0xa8] sm:$0xf] %v767_v29  ;;  %v778_v42 = vsel %vm6213_vm10, %v603_v35, %v777_v30  ;;  %v759_v29 = vld [vmem:[#allocation2 + $0x9c] sm:$0xf] }
  0xe0   : > { %v1237_v63 = vshrl.u32 %v6928_v62, 16  ;;  %v1240_v46 = vshll.u32 %v6928_v62, 16  ;;  %871 = vst.msk [vmem:[#allocation4 + $0x78] sm:$0xf] %vm258_vm0, %v6928_v62 }
  0xe1   : > { %v6933_v50 = vld [vmem:[#allocation2 + $0xb8] sm:$0xf]  ;;  %769 = vst.msk [vmem:[#allocation2 + $0xac] sm:$0xf] %vm258_vm0, %v585_v32  ;;  %v770_v32 = vld [vmem:[#allocation2 + $0xb0] sm:$0x1] }
  0xe2   : > { %v1246_v47 = vshll.u32 %v6933_v50, 16  ;;  %872 = vst.msk [vmem:[#allocation4 + $0x7c] sm:$0xf] %vm258_vm0, %v6933_v50  ;;  %v6944_v11 = vld [vmem:[#allocation2 + $0x78] sm:$0xf]  ;;  %v1239_v21 = vrot.slane %v1237_v63, 4 }
  0xe3   : > { %v1242_v20 = vrot.slane %v1240_v46, 5  ;;  %v1117_v13 = vshrl.u32 %v6944_v11, 16  ;;  %v1120_v53 = vshll.u32 %v6944_v11, 16  ;;  %861 = vst.msk [vmem:[#allocation4 + $0x50] sm:$0xf] %vm258_vm0, %v6944_v11  ;;  %v557_v63 = vshll.u32 %v6667_v41, 16 }
  0xe4   : > { %v6958_v17 = vrot.slane %v1246_v47, 5  ;;  %751 = vst [vmem:[#allocation2 + $0x8c] sm:$0x1] %v750_v56  ;;  %v1157_v47 = vor.u32 %v1156_v57, %v6868_v39  ;;  %v586_v41 = vrot.slane %v6915_v22, 4  ;;  %v1250_v56 = vshrl.u32 %v6933_v50, 16 }
  0xe5   : > { %v1243_v36 = vor.u32 %v1242_v20, %v1239_v21  ;;  %v1119_v59 = vrot.slane %v1117_v13, 4  ;;  %v1122_v24 = vrot.slane %v1120_v53, 5  ;;  %779 = vst [vmem:[#allocation2 + $0xbc] sm:$0x1] %v778_v42  ;;  %v559_v52 = vor.u32 %v557_v63, %v6777_v45  ;;  %v5788_v22 = vld [vmem:[#allocation2 + $0x8] sm:$0x1]  ;;  %v1261_v63 = vpop.permute.xlu0 %1260 }
  0xe6   : > { %v6981_v20 = vld [vmem:[#allocation2 + $0xa8] sm:$0xf]  ;;  %v1444_v39 = vrot.slane %v9745_v26, 4  ;;  %v771_v42 = vsel %vm6213_vm10, %v586_v41, %v770_v32  ;;  %1357 = vst.msk [vmem:[#allocation4] sm:$0xf] %vm1356_vm14, %v1261_v63 }
  0xe7   : > { %v1244_v46 = vrot.slane %v1243_v36, 4  ;;  %v1123_v43 = vor.u32 %v1122_v24, %v1119_v59  ;;  %v760_v21 = vsel %vm6160_vm8, %v559_v52, %v759_v29  ;;  %v1213_v53 = vshrl.u32 %v6981_v20, 16  ;;  %869 = vst.msk [vmem:[#allocation4 + $0x70] sm:$0xf] %vm258_vm0, %v6981_v20 }
  0xe8   : > { %761 = vst [vmem:[#allocation2 + $0x9c] sm:$0xf] %v760_v21  ;;  %v6987_v13 = vld [vmem:[#allocation2 + $0xac] sm:$0xf]  ;;  %v1216_v57 = vshll.u32 %v6981_v20, 16  ;;  %v1158_v24 = vrot.slane %v1157_v47, 4 }
  0xe9   : > { %v6967_v35 = vsel %vm5920_vm3, %v1244_v46, %v6958_v17  ;;  %v1124_v30 = vrot.slane %v1123_v43, 4  ;;  %v1445_v43 = vrot.slane %v5788_v22, 5  ;;  %9957 = vst [vmem:[#allocation41_spill] sm:$0xff] %v6987_v13  ;;  %v1222_v36 = vshll.u32 %v6987_v13, 16 }
  0xea   : > { %9955 = vst [vmem:[#allocation39_spill] sm:$0xff] %v6967_v35  ;;  %1320 = vrot.lane.b32.xlu0 %v6967_v35, %s5839_s20  ;;  %v1215_v46 = vrot.slane %v1213_v53, 4  ;;  %v1218_v29 = vrot.slane %v1216_v57, 5  ;;  %v1226_v35 = vshrl.u32 %v6987_v13, 16  ;;  %v5513_v57 = vrot.slane %v6504_v25, 9 }
  0xeb   : > { %v6979_v45 = vsel %vm5920_vm3, %v1124_v30, %v6723_v44  ;;  %v9958_v44 = vmov 0  ;;  %870 = vst.msk [vmem:[#allocation4 + $0x74] sm:$0xf] %vm258_vm0, %v6987_v13  ;;  %v7004_v59 = vld [vmem:[#allocation2 + $0x8c] sm:$0x1]  ;;  %v1252_v30 = vrot.slane %v1250_v56, 4  ;;  %v1446_v21 = vsel %vm6995_vm13, %v1444_v39, %v1445_v43 }
  0xec   : > { %9956 = vst [vmem:[#allocation40_spill] sm:$0xff] %v6979_v45  ;;  %1300 = vrot.lane.b32.xlu2 %v6979_v45, %s5839_s20  ;;  %v9959_v44 = vsel %vm6995_vm13, 4294967295, %v9958_v44  ;;  %v1160_v52 = vshll.u32 %v7004_v59, 16  ;;  %v7009_v22 = vld [vmem:[#allocation2 + $0xbc] sm:$0x1]  ;;  %v1219_v41 = vor.u32 %v1218_v29, %v1215_v46  ;;  %v1224_v32 = vrot.slane %v1222_v36, 5 }
  0xed   : > { %9960 = vst [vmem:[#allocation42_spill] sm:$0xff] %v9959_v44  ;;  %v1253_v39 = vor.u32 %v1252_v30, %v6958_v17  ;;  %v1256_v43 = vshll.u32 %v7009_v22, 16  ;;  %v1228_v46 = vrot.slane %v1226_v35, 4  ;;  %v1263_v29 = vpop.permute.xlu0 %1262 }
  0xee   : > { %772 = vst [vmem:[#allocation2 + $0xb0] sm:$0x1] %v771_v42  ;;  %v1162_v26 = vrot.slane %v1160_v52, 5  ;;  %v1220_v47 = vrot.slane %v1219_v41, 4  ;;  %v1456_v42 = vrot.slane %v6511_v33, 5 }
  0xef   : > { %v7020_v53 = vld [vmem:[#allocation2 + $0x9c] sm:$0xf]  ;;  %v1254_v52 = vrot.slane %v1253_v39, 4  ;;  %v1258_v30 = vrot.slane %v1256_v43, 5  ;;  %1358 = vst.msk [vmem:[#allocation4 + $0x4] sm:$0xf] %vm1356_vm14, %v1263_v29  ;;  %v1229_v45 = vor.u32 %v1228_v46, %v1224_v32 }
  0xf0   : > { %v7016_v56 = vsel %vm5920_vm3, %v1158_v24, %v1162_v26  ;;  %v1189_v36 = vshrl.u32 %v7020_v53, 16  ;;  %v1192_v63 = vshll.u32 %v7020_v53, 16  ;;  %867 = vst.msk [vmem:[#allocation4 + $0x68] sm:$0xf] %vm258_vm0, %v7020_v53  ;;  %v7030_v26 = vsel %vm5920_vm3, %v1220_v47, %v1224_v32 }
  0xf1   : > { %9961 = vst [vmem:[#allocation43_spill] sm:$0xff] %v7016_v56  ;;  %1316 = vrot.lane.b32.xlu1 %v7030_v26, %s5839_s20  ;;  %v7041_v41 = vsel %vm6995_vm13, %v5513_v57, %v1456_v42  ;;  %v7047_v35 = vsel %vm5920_vm3, %v1254_v52, %v1258_v30  ;;  %v1466_v57 = vrot.slane %v6407_v0, 5  ;;  %v1230_v32 = vrot.slane %v1229_v45, 4 }
  0xf2   : > { %1554 = vrot.lane.b32.xlu0 %v1446_v21, %s5840_s25  ;;  %v1191_v17 = vrot.slane %v1189_v36, 4  ;;  %v1194_v24 = vrot.slane %v1192_v63, 5  ;;  %v5516_v45 = vrot.slane %v6521_v28, 9  ;;  %v1477_v46 = vrot.slane %v6536_v15, 5 }
  0xf3   : > { %v5511_v29 = vrot.slane %v5899_v1, 9  ;;  %v1458_v52 = vrot.slane %v1456_v42, 4  ;;  %v1459_v30 = vrot.slane %v6623_v4, 5  ;;  %v1487_v4 = vrot.slane %v6636_v37, 5  ;;  %v5789_v42 = vld [vmem:[#allocation2 + $0x14] sm:$0x1] }
  0xf4   : > { %1306 = vrot.lane.b32.xlu2 %v7016_v56, %s5839_s20  ;;  %v1195_v47 = vor.u32 %v1194_v24, %v1191_v17  ;;  %v1463_v56 = vrot.slane %v6384_v12, 5  ;;  %v5512_v17 = vrot.slane %v6344_v51, 9  ;;  %v1449_v24 = vrot.slane %v6355_v54, 5 }
  0xf5   : > { %v7036_v21 = vld [vmem:[#allocation2 + $0xb0] sm:$0x1] }
  0xf6   : > { %v1196_v27 = vrot.slane %v1195_v47, 4  ;;  %v1232_v36 = vshll.u32 %v7036_v21, 16  ;;  %v1465_v43 = vrot.slane %v1463_v56, 4  ;;  %v7075_v0 = vsel %vm6995_vm13, %v5512_v17, %v1449_v24 }
  0xf7   : > { %v7089_v47 = vsel %vm6995_vm13, %v5516_v45, %v1477_v46  ;;  %v1452_v17 = vrot.slane %v5789_v42, 5  ;;  %v5515_v45 = vrot.slane %v6664_v34, 9  ;;  %v1480_v42 = vrot.slane %v6726_v19, 5 }
  0xf8   : > { %v7054_v39 = vsel %vm5920_vm3, %v1196_v27, %v6891_v18  ;;  %v1234_v63 = vrot.slane %v1232_v36, 5  ;;  %v7067_v27 = vsel %vm6995_vm13, %v1465_v43, %v1466_v57  ;;  %9964 = vst [vmem:[#allocation46_spill] sm:$0xff] %v7089_v47  ;;  %v9754_v36 = vrot.slane %v6481_v6, 5 }
  0xf9   : > { %9962 = vst [vmem:[#allocation44_spill] sm:$0xff] %v7054_v39  ;;  %1322 = vrot.lane.b32.xlu1 %v7047_v35, %s5839_s20  ;;  %v9965_v43 = vrot.slane %v5903_v2, 5  ;;  %v1451_v2 = vrot.slane %v1449_v24, 4 }
  0xfa   : > { %1560 = vrot.lane.b32.xlu0 %v7041_v41, %s5840_s25  ;;  %v7071_v18 = vsel %vm5920_vm3, %v1230_v32, %v1234_v63  ;;  %v7098_v63 = vsel %vm6995_vm13, %v1458_v52, %v1459_v30  ;;  %v1486_v1 = vrot.slane %v9754_v36, 4  ;;  %v1491_v36 = vrot.slane %v6545_v23, 5 }
  0xfb   : > { %9963 = vst [vmem:[#allocation45_spill] sm:$0xff] %v7071_v18  ;;  %v1443_v57 = vsel %vm6995_vm13, %v5511_v29, %v9965_v43  ;;  %v1470_v29 = vrot.slane %v6399_v55, 5  ;;  %v7117_v37 = vsel %vm6995_vm13, %v1451_v2, %v1452_v17  ;;  %v1479_v2 = vrot.slane %v1477_v46, 4 }
  0xfc   : > { %1312 = vrot.lane.b32.xlu2 %v7054_v39, %s5839_s20  ;;  %v1269_v32 = vpop.permute.xlu2 %1268  ;;  %v7113_v52 = vsel %vm6995_vm13, %v1486_v1, %v1487_v4  ;;  %v5514_v4 = vrot.slane %v6373_v5, 9 }
  0xfd   : > { %1361 = vst.msk [vmem:[#allocation4 + $0x10] sm:$0xf] %vm1356_vm14, %v1269_v32  ;;  %v7122_v24 = vsel %vm6995_vm13, %v5515_v45, %v1470_v29  ;;  %v1498_v32 = vrot.slane %v6690_v49, 5  ;;  %v9755_v45 = vrot.slane %v6653_v38, 5  ;;  %v7150_v46 = vsel %vm6995_vm13, %v1479_v2, %v1480_v42 }
  0xfe   : > { %9966 = vst [vmem:[#allocation47_spill] sm:$0xff] %v7113_v52 }
  0xff   : > { %9967 = vst [vmem:[#allocation48_spill] sm:$0xff] %v7122_v24 }
 0x100   : > { %9969 = vst [vmem:[#allocation50_spill] sm:$0xff] %v7150_v46 }
 0x101   : > { %1556 = vrot.lane.b32.xlu1 %v7075_v0, %s5840_s25  ;;  %v1265_v30 = vpop.permute.xlu1 %1264 }
 0x102   : > { %1566 = vrot.lane.b32.xlu0 %v7067_v27, %s5840_s25  ;;  %1359 = vst.msk [vmem:[#allocation4 + $0x8] sm:$0xf] %vm1356_vm14, %v1265_v30 }
 0x103   : > { %v1273_v43 = vpop.permute.xlu0 %1272 }
 0x104   : > { %1318 = vrot.lane.b32.xlu2 %v7071_v18, %s5839_s20  ;;  %1363 = vst.msk [vmem:[#allocation4 + $0x18] sm:$0xf] %vm1356_vm14, %v1273_v43  ;;  %v7145_v43 = vsel %vm6995_vm13, %v5514_v4, %v1463_v56  ;;  %v1472_v56 = vrot.slane %v1470_v29, 4  ;;  %v5790_v4 = vld [vmem:[#allocation2 + $0x38] sm:$0x1] }
 0x105   : > { %v1473_v2 = vrot.slane %v5790_v4, 5 }
 0x109   : > { %1562 = vrot.lane.b32.xlu1 %v7098_v63, %s5840_s25  ;;  %v1267_v30 = vpop.permute.xlu1 %1266 }
 0x10a   : > { %1572 = vrot.lane.b32.xlu0 %v7089_v47, %s5840_s25  ;;  %v1271_v1 = vpop.permute.xlu2 %1270  ;;  %1360 = vst.msk [vmem:[#allocation4 + $0xc] sm:$0xf] %vm1356_vm14, %v1267_v30  ;;  %v5518_v30 = vrot.slane %v6809_v14, 9 }
 0x10b   : > { %1362 = vst.msk [vmem:[#allocation4 + $0x14] sm:$0xf] %vm1356_vm14, %v1271_v1  ;;  %v1279_v19 = vpop.permute.xlu0 %1278  ;;  %v1508_v1 = vrot.slane %v6769_v31, 5 }
 0x10c   : > { %1552 = vrot.lane.b32.xlu2 %v1443_v57, %s5840_s25  ;;  %v5519_v57 = vrot.slane %v6687_v48, 9  ;;  %1366 = vst.msk [vmem:[#allocation4 + $0x24] sm:$0xf] %vm1356_vm14, %v1279_v19  ;;  %v7176_v29 = vsel %vm6995_vm13, %v5518_v30, %v1491_v36  ;;  %v1501_v30 = vrot.slane %v6870_v40, 5 }
 0x10d   : > { %9971 = vst [vmem:[#allocation52_spill] sm:$0xff] %v7176_v29 }
 0x10e   : > { %v7138_v17 = vsel %vm6995_vm13, %v5519_v57, %v1498_v32  ;;  %v1507_v57 = vrot.slane %v9755_v45, 4  ;;  %v7171_v45 = vsel %vm6995_vm13, %v1472_v56, %v1473_v2  ;;  %v1500_v2 = vrot.slane %v1498_v32, 4 }
 0x10f   : > { %9968 = vst [vmem:[#allocation49_spill] sm:$0xff] %v7138_v17 }
 0x110   : > { %v7167_v31 = vsel %vm6995_vm13, %v1507_v57, %v1508_v1  ;;  %v1519_v57 = vrot.slane %v6850_v61, 5  ;;  %v5517_v1 = vrot.slane %v6473_v8, 9  ;;  %v7204_v40 = vsel %vm6995_vm13, %v1500_v2, %v1501_v30  ;;  %v9977_v30 = vld [vmem:[#allocation22_spill] sm:$0xff] }
 0x111   : > { %1568 = vrot.lane.b32.xlu1 %v7122_v24, %s5840_s25  ;;  %9970 = vst [vmem:[#allocation51_spill] sm:$0xff] %v7167_v31  ;;  %v1275_v19 = vpop.permute.xlu1 %1274  ;;  %v5521_v2 = vrot.slane %v6944_v11, 9  ;;  %v9982_v24 = vrot.slane %v6653_v38, 5 }
 0x112   : > { %1578 = vrot.lane.b32.xlu0 %v7113_v52, %s5840_s25  ;;  %1364 = vst.msk [vmem:[#allocation4 + $0x1c] sm:$0xf] %vm1356_vm14, %v1275_v19 }
 0x113   : > { %v1285_v4 = vpop.permute.xlu0 %1284 }
 0x114   : > { %1558 = vrot.lane.b32.xlu2 %v7117_v37, %s5840_s25  ;;  %v1277_v42 = vpop.permute.xlu2 %1276  ;;  %1369 = vst.msk [vmem:[#allocation4 + $0x30] sm:$0xf] %vm1356_vm14, %v1285_v4 }
 0x115   : > { %1365 = vst.msk [vmem:[#allocation4 + $0x20] sm:$0xf] %vm1356_vm14, %v1277_v42  ;;  %v5522_v42 = vrot.slane %v6844_v7, 9 }
 0x117   : > { %v7192_v19 = vsel %vm6995_vm13, %v5522_v42, %v1519_v57 }
 0x118   : > { %9972 = vst [vmem:[#allocation53_spill] sm:$0xff] %v7192_v19 }
 0x119   : > { %1574 = vrot.lane.b32.xlu1 %v7150_v46, %s5840_s25  ;;  %v9974_v46 = vrot.slane %v6481_v6, 5 }
 0x11a   : > { %1584 = vrot.lane.b32.xlu0 %v7138_v17, %s5840_s25  ;;  %v1281_v17 = vpop.permute.xlu1 %1280 }
 0x11b   : > { %1367 = vst.msk [vmem:[#allocation4 + $0x28] sm:$0xf] %vm1356_vm14, %v1281_v17  ;;  %v1291_v32 = vpop.permute.xlu0 %1290  ;;  %v1493_v17 = vrot.slane %v1491_v36, 4 }
 0x11c   : > { %1564 = vrot.lane.b32.xlu2 %v7145_v43, %s5840_s25  ;;  %v1283_v56 = vpop.permute.xlu2 %1282  ;;  %1372 = vst.msk [vmem:[#allocation4 + $0x3c] sm:$0xf] %vm1356_vm14, %v1291_v32 }
 0x11d   : > { %1368 = vst.msk [vmem:[#allocation4 + $0x2c] sm:$0xf] %vm1356_vm14, %v1283_v56  ;;  %v1529_v56 = vrot.slane %v6888_v16, 5 }
 0x121   : > { %1580 = vrot.lane.b32.xlu1 %v7176_v29, %s5840_s25  ;;  %v7199_v29 = vsel %vm6995_vm13, %v5517_v1, %v9974_v46  ;;  %v9976_v46 = vld [vmem:[#allocation14_spill] sm:$0xff] }
 0x122   : > { %1590 = vrot.lane.b32.xlu0 %v7167_v31, %s5840_s25  ;;  %v9973_v31 = vld [vmem:[#allocation30_spill] sm:$0xff]  ;;  %v1494_v1 = vrot.slane %v9976_v46, 5 }
 0x123   : > { %v9766_v4 = vrot.slane %v9973_v31, 5  ;;  %9975 = vst [vmem:[#allocation30_spill] sm:$0xff] %v7204_v40 }
 0x124   : > { %1570 = vrot.lane.b32.xlu2 %v7171_v45, %s5840_s25  ;;  %v7226_v52 = vsel %vm6995_vm13, %v1493_v17, %v1494_v1  ;;  %v9980_v17 = vld [vmem:[#allocation19_spill] sm:$0xff] }
 0x125   : > { %v1528_v42 = vrot.slane %v9766_v4, 4  ;;  %v1287_v32 = vpop.permute.xlu1 %1286  ;;  %v5520_v1 = vrot.slane %v9980_v17, 9 }
 0x126   : > { %1370 = vst.msk [vmem:[#allocation4 + $0x34] sm:$0xf] %vm1356_vm14, %v1287_v32 }
 0x127   : > { %v7221_v4 = vsel %vm6995_vm13, %v1528_v42, %v1529_v56  ;;  %v5525_v42 = vrot.slane %v6981_v20, 9  ;;  %v1540_v56 = vrot.slane %v6987_v13, 5 }
 0x128   : > { %9978 = vst [vmem:[#allocation14_spill] sm:$0xff] %v7221_v4 }
 0x129   : > { %1586 = vrot.lane.b32.xlu1 %v7204_v40, %s5840_s25  ;;  %v1297_v46 = vpop.permute.xlu0 %1296  ;;  %v7246_v32 = vsel %vm6995_vm13, %v5525_v42, %v1540_v56  ;;  %v1547_v40 = vrot.slane %v6933_v50, 5 }
 0x12a   : > { %1596 = vrot.lane.b32.xlu0 %v7192_v19, %s5840_s25  ;;  %v1512_v19 = vrot.slane %v9977_v30, 5  ;;  %1375 = vst.msk [vmem:[#allocation4 + $0x48] sm:$0xf] %vm1356_vm14, %v1297_v46 }
 0x12b   : > { %9981 = vst [vmem:[#allocation19_spill] sm:$0xff] %v7246_v32  ;;  %v1549_v42 = vrot.slane %v1547_v40, 4 }
 0x12c   : > { %1576 = vrot.lane.b32.xlu2 %v7199_v29, %s5840_s25  ;;  %v1289_v16 = vpop.permute.xlu2 %1288  ;;  %v7231_v36 = vsel %vm6995_vm13, %v5521_v2, %v1512_v19  ;;  %v1521_v2 = vrot.slane %v1519_v57, 4 }
 0x12d   : > { %1371 = vst.msk [vmem:[#allocation4 + $0x38] sm:$0xf] %vm1356_vm14, %v1289_v16  ;;  %v1522_v16 = vrot.slane %v7004_v59, 5 }
 0x12e   : > { %9979 = vst [vmem:[#allocation22_spill] sm:$0xff] %v7231_v36  ;;  %v1293_v46 = vpop.permute.xlu1 %1292 }
 0x12f   : > { %1373 = vst.msk [vmem:[#allocation4 + $0x40] sm:$0xf] %vm1356_vm14, %v1293_v46  ;;  %v7259_v59 = vsel %vm6995_vm13, %v1521_v2, %v1522_v16  ;;  %v5524_v2 = vrot.slane %v7020_v53, 9  ;;  %v9985_v16 = vld [vmem:[#allocation34_spill] sm:$0xff] }
 0x130   : > { %v1533_v47 = vrot.slane %v9985_v16, 5 }
 0x131   : > { %1592 = vrot.lane.b32.xlu1 %v7231_v36, %s5840_s25  ;;  %v7254_v36 = vsel %vm6995_vm13, %v5520_v1, %v9982_v24  ;;  %v1514_v24 = vrot.slane %v1512_v19, 4  ;;  %v9984_v1 = vld [vmem:[#allocation23_spill] sm:$0xff] }
 0x132   : > { %1602 = vrot.lane.b32.xlu0 %v7221_v4, %s5840_s25  ;;  %9983 = vst [vmem:[#allocation54_spill] sm:$0xff] %v7254_v36  ;;  %v1303_v57 = vpop.permute.xlu0 %1302  ;;  %v1515_v46 = vrot.slane %v9984_v1, 5  ;;  %v7283_v19 = vsel %vm6995_vm13, %v5524_v2, %v1533_v47  ;;  %v9989_v2 = vrot.slane %v9973_v31, 5 }
 0x133   : > { %1378 = vst.msk [vmem:[#allocation4 + $0x54] sm:$0xf] %vm1356_vm14, %v1303_v57 }
 0x134   : > { %1582 = vrot.lane.b32.xlu2 %v7226_v52, %s5840_s25  ;;  %v1295_v4 = vpop.permute.xlu2 %1294  ;;  %v7278_v57 = vsel %vm6995_vm13, %v1514_v24, %v1515_v46  ;;  %v1542_v46 = vrot.slane %v1540_v56, 4  ;;  %v1536_v56 = vrot.slane %v6879_v60, 5  ;;  %v5526_v60 = vrot.slane %v6928_v62, 9 }
 0x135   : > { %1374 = vst.msk [vmem:[#allocation4 + $0x44] sm:$0xf] %vm1356_vm14, %v1295_v4  ;;  %v1550_v4 = vrot.slane %v7009_v22, 5 }
 0x136   : > { %9987 = vst [vmem:[#allocation34_spill] sm:$0xff] %v7278_v57 }
 0x139   : > { %1598 = vrot.lane.b32.xlu1 %v7259_v59, %s5840_s25 }
 0x13a   : > { %1608 = vrot.lane.b32.xlu0 %v7246_v32, %s5840_s25  ;;  %v7274_v32 = vsel %vm6995_vm13, %v1549_v42, %v1550_v4  ;;  %v9988_v42 = vld [vmem:[#allocation28_spill] sm:$0xff] }
 0x13b   : > { %9986 = vst [vmem:[#allocation23_spill] sm:$0xff] %v7274_v32  ;;  %v1299_v22 = vpop.permute.xlu1 %1298  ;;  %v5523_v4 = vrot.slane %v9988_v42, 9 }
 0x13c   : > { %1588 = vrot.lane.b32.xlu2 %v7254_v36, %s5840_s25  ;;  %1376 = vst.msk [vmem:[#allocation4 + $0x4c] sm:$0xf] %vm1356_vm14, %v1299_v22  ;;  %v1543_v22 = vrot.slane %v7036_v21, 5  ;;  %v1535_v21 = vrot.slane %v1533_v47, 4 }
 0x140   : > { %v1309_v1 = vpop.permute.xlu0 %1308 }
 0x141   : > { %1381 = vst.msk [vmem:[#allocation4 + $0x60] sm:$0xf] %vm1356_vm14, %v1309_v1  ;;  %1604 = vrot.lane.b32.xlu1 %v7283_v19, %s5840_s25  ;;  %v7303_v1 = vsel %vm6995_vm13, %v1542_v46, %v1543_v22  ;;  %v7316_v46 = vsel %vm6995_vm13, %v1535_v21, %v1536_v56  ;;  %v7330_v21 = vsel %vm6995_vm13, %v5526_v60, %v1547_v40 }
 0x142   : > { %1614 = vrot.lane.b32.xlu0 %v7274_v32, %s5840_s25  ;;  %v7299_v32 = vsel %vm6995_vm13, %v5523_v4, %v9989_v2  ;;  %9991 = vst [vmem:[#allocation55_spill] sm:$0xff] %v7316_v46 }
 0x143   : > { %9990 = vst [vmem:[#allocation28_spill] sm:$0xff] %v7299_v32 }
 0x144   : > { %1594 = vrot.lane.b32.xlu2 %v7278_v57, %s5840_s25  ;;  %9992 = vst [vmem:[#allocation56_spill] sm:$0xff] %v7330_v21 }
 0x146   : > { %v1301_v24 = vpop.permute.xlu2 %1300 }
 0x147   : > { %1377 = vst.msk [vmem:[#allocation4 + $0x50] sm:$0xf] %vm1356_vm14, %v1301_v24 }
 0x149   : > { %1610 = vrot.lane.b32.xlu1 %v7303_v1, %s5840_s25  ;;  %v1305_v24 = vpop.permute.xlu1 %1304 }
 0x14a   : > { %1687 = vrot.lane.b32.xlu0 %v6504_v25, %s5841_s26  ;;  %1379 = vst.msk [vmem:[#allocation4 + $0x58] sm:$0xf] %vm1356_vm14, %v1305_v24 }
 0x14c   : > { %1600 = vrot.lane.b32.xlu2 %v7299_v32, %s5840_s25 }
 0x14e   : > { %v1307_v4 = vpop.permute.xlu2 %1306 }
 0x14f   : > { %1380 = vst.msk [vmem:[#allocation4 + $0x5c] sm:$0xf] %vm1356_vm14, %v1307_v4 }
 0x150   : > { %v1315_v22 = vpop.permute.xlu0 %1314 }
 0x151   : > { %1384 = vst.msk [vmem:[#allocation4 + $0x6c] sm:$0xf] %vm1356_vm14, %v1315_v22  ;;  %1683 = vrot.lane.b32.xlu1 %v6344_v51, %s5841_s26  ;;  %v1311_v47 = vpop.permute.xlu1 %1310 }
 0x152   : > { %1693 = vrot.lane.b32.xlu0 %v6384_v12, %s5841_s26  ;;  %1382 = vst.msk [vmem:[#allocation4 + $0x64] sm:$0xf] %vm1356_vm14, %v1311_v47  ;;  %v256_v47 = vld [vmem:[%s6071_s24 + $0xf0] sm:$0xff] }
 0x154   : > { %1606 = vrot.lane.b32.xlu2 %v7316_v46, %s5840_s25 }
 0x156   : > { %v1313_v2 = vpop.permute.xlu2 %1312 }
 0x157   : > { %1383 = vst.msk [vmem:[#allocation4 + $0x68] sm:$0xf] %vm1356_vm14, %v1313_v2 }
 0x159   : > { %1689 = vrot.lane.b32.xlu1 %v6511_v33, %s5841_s26 }
 0x15a   : > { %1699 = vrot.lane.b32.xlu0 %v6521_v28, %s5841_s26 }
 0x15c   : > { %1612 = vrot.lane.b32.xlu2 %v7330_v21, %s5840_s25  ;;  %v1321_v56 = vpop.permute.xlu0 %1320 }
 0x15d   : > { %1387 = vst.msk [vmem:[#allocation4 + $0x78] sm:$0xf] %vm1356_vm14, %v1321_v56  ;;  %v344_v56 = vpack.c.bf16 %v256_v47, %v256_v47 }
 0x15e   : > { %v1319_v51 = vpop.permute.xlu2 %1318 }
 0x15f   : > { %1386 = vst.msk [vmem:[#allocation4 + $0x74] sm:$0xf] %vm1356_vm14, %v1319_v51 }
 0x161   : > { %1695 = vrot.lane.b32.xlu1 %v6664_v34, %s5841_s26 }
 0x162   : > { %1705 = vrot.lane.b32.xlu0 %v6481_v6, %s5841_s26 }
 0x163   : > { %v1317_v4 = vpop.permute.xlu1 %1316 }
 0x164   : > { %1685 = vrot.lane.b32.xlu2 %v6355_v54, %s5841_s26  ;;  %v1555_v40 = vpop.permute.xlu0 %1554  ;;  %1385 = vst.msk [vmem:[#allocation4 + $0x70] sm:$0xf] %vm1356_vm14, %v1317_v4 }
 0x165   : > { %1650 = vst.msk [vmem:[#allocation4 + $0x4] sm:$0xf] %vm1648_vm15, %v1555_v40  ;;  %v605_v40 = vshrl.u32 %v344_v56, 16 }
 0x166   : > { %v1553_v24 = vpop.permute.xlu2 %1552 }
 0x167   : > { %1649 = vst.msk [vmem:[#allocation4] sm:$0xf] %vm1648_vm15, %v1553_v24  ;;  %v607_v4 = vrot.slane %v605_v40, 7 }
 0x169   : > { %1701 = vrot.lane.b32.xlu1 %v6536_v15, %s5841_s26 }
 0x16a   : > { %1711 = vrot.lane.b32.xlu0 %v6687_v48, %s5841_s26 }
 0x16b   : > { %v1323_v60 = vpop.permute.xlu1 %1322 }
 0x16c   : > { %1691 = vrot.lane.b32.xlu2 %v6373_v5, %s5841_s26  ;;  %v1561_v54 = vpop.permute.xlu0 %1560  ;;  %1388 = vst.msk [vmem:[#allocation4 + $0x7c] sm:$0xf] %vm1356_vm14, %v1323_v60  ;;  %v780_v60 = vld [vmem:[#allocation2 + $0xc0] sm:$0xf] }
 0x16d   : > { %1653 = vst.msk [vmem:[#allocation4 + $0x10] sm:$0xf] %vm1648_vm15, %v1561_v54  ;;  %v608_v54 = vshll.u32 %v344_v56, 16 }
 0x16e   : > { %v1559_v22 = vpop.permute.xlu2 %1558 }
 0x16f   : > { %1652 = vst.msk [vmem:[#allocation4 + $0xc] sm:$0xf] %vm1648_vm15, %v1559_v22  ;;  %v610_v22 = vor.u32 %v608_v54, %v607_v4 }
 0x171   : > { %1707 = vrot.lane.b32.xlu1 %v6809_v14, %s5841_s26 }
 0x172   : > { %1717 = vrot.lane.b32.xlu0 %v6653_v38, %s5841_s26 }
 0x173   : > { %v1557_v24 = vpop.permute.xlu1 %1556 }
 0x174   : > { %1697 = vrot.lane.b32.xlu2 %v6399_v55, %s5841_s26  ;;  %v1567_v2 = vpop.permute.xlu0 %1566  ;;  %1651 = vst.msk [vmem:[#allocation4 + $0x8] sm:$0xf] %vm1648_vm15, %v1557_v24  ;;  %v257_v24 = vld [vmem:[%s6071_s24 + $0xf8] sm:$0xff] }
 0x175   : > { %1656 = vst.msk [vmem:[#allocation4 + $0x1c] sm:$0xf] %vm1648_vm15, %v1567_v2  ;;  %v781_v2 = vsel %vm6160_vm8, %v610_v22, %v780_v60  ;;  %v345_v54 = vpack.c.bf16 %v257_v24, %v257_v24 }
 0x176   : > { %v1565_v51 = vpop.permute.xlu2 %1564  ;;  %782 = vst [vmem:[#allocation2 + $0xc0] sm:$0xf] %v781_v2 }
 0x177   : > { %1655 = vst.msk [vmem:[#allocation4 + $0x18] sm:$0xf] %vm1648_vm15, %v1565_v51 }
 0x179   : > { %1713 = vrot.lane.b32.xlu1 %v6690_v49, %s5841_s26 }
 0x17a   : > { %1723 = vrot.lane.b32.xlu0 %v6844_v7, %s5841_s26 }
 0x17b   : > { %v1563_v56 = vpop.permute.xlu1 %1562 }
 0x17c   : > { %1703 = vrot.lane.b32.xlu2 %v6473_v8, %s5841_s26  ;;  %v1573_v47 = vpop.permute.xlu0 %1572  ;;  %1654 = vst.msk [vmem:[#allocation4 + $0x14] sm:$0xf] %vm1648_vm15, %v1563_v56  ;;  %v611_v56 = vrot.slane %v607_v4, 4 }
 0x17d   : > { %1659 = vst.msk [vmem:[#allocation4 + $0x28] sm:$0xf] %vm1648_vm15, %v1573_v47  ;;  %v613_v47 = vshrl.u32 %v345_v54, 16 }
 0x17e   : > { %v1571_v51 = vpop.permute.xlu2 %1570 }
 0x17f   : > { %1658 = vst.msk [vmem:[#allocation4 + $0x24] sm:$0xf] %vm1648_vm15, %v1571_v51  ;;  %v7389_v2 = vrot.slane %v613_v47, 7  ;;  %v616_v51 = vshll.u32 %v345_v54, 16  ;;  %v9993_v47 = vld [vmem:[#allocation9_spill] sm:$0xff] }
 0x181   : > { %1719 = vrot.lane.b32.xlu1 %v6944_v11, %s5841_s26  ;;  %v618_v3 = vor.u32 %v616_v51, %v7389_v2 }
 0x182   : > { %1729 = vrot.lane.b32.xlu0 %v9973_v31, %s5841_s26 }
 0x183   : > { %v1569_v60 = vpop.permute.xlu1 %1568  ;;  %v619_v24 = vsel %vm6174_vm9, %v611_v56, %v618_v3 }
 0x184   : > { %1709 = vrot.lane.b32.xlu2 %v6545_v23, %s5841_s26  ;;  %v1579_v40 = vpop.permute.xlu0 %1578  ;;  %1657 = vst.msk [vmem:[#allocation4 + $0x20] sm:$0xf] %vm1648_vm15, %v1569_v60 }
 0x185   : > { %1662 = vst.msk [vmem:[#allocation4 + $0x34] sm:$0xf] %vm1648_vm15, %v1579_v40 }
 0x186   : > { %v1577_v22 = vpop.permute.xlu2 %1576  ;;  %783 = vst.msk [vmem:[#allocation2 + $0xc4] sm:$0xf] %vm258_vm0, %v619_v24  ;;  %v7422_v24 = vld [vmem:[#allocation2 + $0xc0] sm:$0xf] }
 0x187   : > { %1661 = vst.msk [vmem:[#allocation4 + $0x30] sm:$0xf] %vm1648_vm15, %v1577_v22 }
 0x189   : > { %1725 = vrot.lane.b32.xlu1 %v6850_v61, %s5841_s26 }
 0x18a   : > { %1735 = vrot.lane.b32.xlu0 %v6981_v20, %s5841_s26 }
 0x18b   : > { %v1575_v54 = vpop.permute.xlu1 %1574 }
 0x18c   : > { %1715 = vrot.lane.b32.xlu2 %v9980_v17, %s5841_s26  ;;  %v1585_v40 = vpop.permute.xlu0 %1584  ;;  %1660 = vst.msk [vmem:[#allocation4 + $0x2c] sm:$0xf] %vm1648_vm15, %v1575_v54 }
 0x18d   : > { %1665 = vst.msk [vmem:[#allocation4 + $0x40] sm:$0xf] %vm1648_vm15, %v1585_v40 }
 0x18e   : > { %v1583_v22 = vpop.permute.xlu2 %1582 }
 0x18f   : > { %1664 = vst.msk [vmem:[#allocation4 + $0x3c] sm:$0xf] %vm1648_vm15, %v1583_v22  ;;  %v9994_v22 = vld [vmem:[#allocation20_spill] sm:$0xff] }
 0x191   : > { %1731 = vrot.lane.b32.xlu1 %v7020_v53, %s5841_s26 }
 0x192   : > { %1741 = vrot.lane.b32.xlu0 %v6933_v50, %s5841_s26 }
 0x193   : > { %v1581_v60 = vpop.permute.xlu1 %1580 }
 0x194   : > { %1721 = vrot.lane.b32.xlu2 %v9977_v30, %s5841_s26  ;;  %v1591_v4 = vpop.permute.xlu0 %1590  ;;  %1663 = vst.msk [vmem:[#allocation4 + $0x38] sm:$0xf] %vm1648_vm15, %v1581_v60  ;;  %v9995_v60 = vld [vmem:[#allocation25_spill] sm:$0xff] }
 0x195   : > { %1668 = vst.msk [vmem:[#allocation4 + $0x4c] sm:$0xf] %vm1648_vm15, %v1591_v4 }
 0x196   : > { %v1589_v3 = vpop.permute.xlu2 %1588 }
 0x197   : > { %1667 = vst.msk [vmem:[#allocation4 + $0x48] sm:$0xf] %vm1648_vm15, %v1589_v3 }
 0x199   : > { %1737 = vrot.lane.b32.xlu1 %v6987_v13, %s5841_s26  ;;  %v784_v13 = vld [vmem:[#allocation2 + $0xc8] sm:$0x1] }
 0x19a   : > { %1836 = vrot.lane.b32.xlu0 %v9993_v47, %s5842_s27 }
 0x19b   : > { %v1587_v40 = vpop.permute.xlu1 %1586 }
 0x19c   : > { %1727 = vrot.lane.b32.xlu2 %v9988_v42, %s5841_s26  ;;  %v1597_v51 = vpop.permute.xlu0 %1596  ;;  %1666 = vst.msk [vmem:[#allocation4 + $0x44] sm:$0xf] %vm1648_vm15, %v1587_v40 }
 0x19d   : > { %1671 = vst.msk [vmem:[#allocation4 + $0x58] sm:$0xf] %vm1648_vm15, %v1597_v51  ;;  %v9996_v51 = vld [vmem:[#allocation11_spill] sm:$0xff] }
 0x19e   : > { %v1595_v56 = vpop.permute.xlu2 %1594 }
 0x19f   : > { %1670 = vst.msk [vmem:[#allocation4 + $0x54] sm:$0xf] %vm1648_vm15, %v1595_v56 }
 0x1a1   : > { %1743 = vrot.lane.b32.xlu1 %v7422_v24, %s5841_s26 }
 0x1a2   : > { %1842 = vrot.lane.b32.xlu0 %v9994_v22, %s5842_s27  ;;  %v10006_v22 = vld [vmem:[#allocation18_spill] sm:$0xff] }
 0x1a3   : > { %v1593_v3 = vpop.permute.xlu1 %1592 }
 0x1a4   : > { %1733 = vrot.lane.b32.xlu2 %v9985_v16, %s5841_s26  ;;  %v1603_v54 = vpop.permute.xlu0 %1602  ;;  %1669 = vst.msk [vmem:[#allocation4 + $0x50] sm:$0xf] %vm1648_vm15, %v1593_v3 }
 0x1a5   : > { %1674 = vst.msk [vmem:[#allocation4 + $0x64] sm:$0xf] %vm1648_vm15, %v1603_v54  ;;  %v7442_v54 = vld [vmem:[#allocation2 + $0xc4] sm:$0xf] }
 0x1a6   : > { %v1601_v4 = vpop.permute.xlu2 %1600 }
 0x1a7   : > { %1673 = vst.msk [vmem:[#allocation4 + $0x60] sm:$0xf] %vm1648_vm15, %v1601_v4  ;;  %v9997_v4 = vld [vmem:[#allocation29_spill] sm:$0xff] }
 0x1a9   : > { %1838 = vrot.lane.b32.xlu1 %v9996_v51, %s5842_s27 }
 0x1aa   : > { %1848 = vrot.lane.b32.xlu0 %v9995_v60, %s5842_s27  ;;  %v10001_v60 = vld [vmem:[#allocation12_spill] sm:$0xff] }
 0x1ab   : > { %v1599_v40 = vpop.permute.xlu1 %1598 }
 0x1ac   : > { %1739 = vrot.lane.b32.xlu2 %v6928_v62, %s5841_s26  ;;  %v1609_v47 = vpop.permute.xlu0 %1608  ;;  %1672 = vst.msk [vmem:[#allocation4 + $0x5c] sm:$0xf] %vm1648_vm15, %v1599_v40  ;;  %v10000_v40 = vld [vmem:[#allocation16_spill] sm:$0xff] }
 0x1ad   : > { %1677 = vst.msk [vmem:[#allocation4 + $0x70] sm:$0xf] %vm1648_vm15, %v1609_v47 }
 0x1ae   : > { %v1607_v56 = vpop.permute.xlu2 %1606 }
 0x1af   : > { %1676 = vst.msk [vmem:[#allocation4 + $0x6c] sm:$0xf] %vm1648_vm15, %v1607_v56  ;;  %v9999_v56 = vld [vmem:[#allocation33_spill] sm:$0xff] }
 0x1b1   : > { %1844 = vrot.lane.b32.xlu1 %v9998_v9, %s5842_s27 }
 0x1b2   : > { %1854 = vrot.lane.b32.xlu0 %v9997_v4, %s5842_s27 }
 0x1b3   : > { %v1605_v51 = vpop.permute.xlu1 %1604 }
 0x1b4   : > { %1745 = vrot.lane.b32.xlu2 %v7442_v54, %s5841_s26  ;;  %v1615_v3 = vpop.permute.xlu0 %1614  ;;  %1675 = vst.msk [vmem:[#allocation4 + $0x68] sm:$0xf] %vm1648_vm15, %v1605_v51 }
 0x1b5   : > { %1680 = vst.msk [vmem:[#allocation4 + $0x7c] sm:$0xf] %vm1648_vm15, %v1615_v3 }
 0x1b6   : > { %v1613_v47 = vpop.permute.xlu2 %1612 }
 0x1b7   : > { %1679 = vst.msk [vmem:[#allocation4 + $0x78] sm:$0xf] %vm1648_vm15, %v1613_v47  ;;  %v10002_v47 = vld [vmem:[#allocation13_spill] sm:$0xff] }
 0x1b9   : > { %1850 = vrot.lane.b32.xlu1 %v10001_v60, %s5842_s27 }
 0x1ba   : > { %1860 = vrot.lane.b32.xlu0 %v9999_v56, %s5842_s27  ;;  %v10003_v56 = vld [vmem:[#allocation15_spill] sm:$0xff] }
 0x1bb   : > { %v1611_v9 = vpop.permute.xlu1 %1610 }
 0x1bc   : > { %1840 = vrot.lane.b32.xlu2 %v10000_v40, %s5842_s27  ;;  %v1688_v4 = vpop.permute.xlu0 %1687  ;;  %1678 = vst.msk [vmem:[#allocation4 + $0x74] sm:$0xf] %vm1648_vm15, %v1611_v9  ;;  %v10004_v9 = vld [vmem:[#allocation40_spill] sm:$0xff] }
 0x1bd   : > { %1782 = vst.msk [vmem:[#allocation4 + $0x8] sm:$0xf] %vm1779_vm1, %v1688_v4 }
 0x1be   : > { %v1686_v3 = vpop.permute.xlu2 %1685 }
 0x1bf   : > { %1781 = vst.msk [vmem:[#allocation4 + $0x4] sm:$0xf] %vm1779_vm1, %v1686_v3  ;;  %v10005_v3 = vld [vmem:[#allocation17_spill] sm:$0xff] }
 0x1c1   : > { %1856 = vrot.lane.b32.xlu1 %v10003_v56, %s5842_s27 }
 0x1c2   : > { %1866 = vrot.lane.b32.xlu0 %v6903_v58, %s5842_s27 }
 0x1c3   : > { %v1684_v4 = vpop.permute.xlu1 %1683 }
 0x1c4   : > { %1846 = vrot.lane.b32.xlu2 %v10002_v47, %s5842_s27  ;;  %v1694_v51 = vpop.permute.xlu0 %1693  ;;  %1780 = vst.msk [vmem:[#allocation4] sm:$0xf] %vm1779_vm1, %v1684_v4 }
 0x1c5   : > { %1785 = vst.msk [vmem:[#allocation4 + $0x14] sm:$0xf] %vm1779_vm1, %v1694_v51  ;;  %v620_v51 = vrot.slane %v7389_v2, 4  ;;  %v10010_v2 = vld [vmem:[#allocation24_spill] sm:$0xff] }
 0x1c6   : > { %v1692_v60 = vpop.permute.xlu2 %1691 }
 0x1c7   : > { %1784 = vst.msk [vmem:[#allocation4 + $0x10] sm:$0xf] %vm1779_vm1, %v1692_v60  ;;  %v785_v4 = vsel %vm6213_vm10, %v620_v51, %v784_v13  ;;  %v1813_v13 = vshrl.u32 %v7422_v24, 16  ;;  %v10011_v60 = vld [vmem:[#allocation26_spill] sm:$0xff] }
 0x1c8   : > { %786 = vst [vmem:[#allocation2 + $0xc8] sm:$0x1] %v785_v4 }
 0x1c9   : > { %1862 = vrot.lane.b32.xlu1 %v10006_v22, %s5842_s27  ;;  %v10009_v22 = vld [vmem:[#allocation21_spill] sm:$0xff]  ;;  %v1815_v51 = vrot.slane %v1813_v13, 4 }
 0x1ca   : > { %1872 = vrot.lane.b32.xlu0 %v10004_v9, %s5842_s27  ;;  %v10008_v9 = vld [vmem:[#allocation43_spill] sm:$0xff] }
 0x1cb   : > { %v1690_v47 = vpop.permute.xlu1 %1689 }
 0x1cc   : > { %1852 = vrot.lane.b32.xlu2 %v10005_v3, %s5842_s27  ;;  %v1700_v58 = vpop.permute.xlu0 %1699  ;;  %1783 = vst.msk [vmem:[#allocation4 + $0xc] sm:$0xf] %vm1779_vm1, %v1690_v47  ;;  %v1816_v47 = vshll.u32 %v7422_v24, 16 }
 0x1cd   : > { %1788 = vst.msk [vmem:[#allocation4 + $0x20] sm:$0xf] %vm1779_vm1, %v1700_v58 }
 0x1ce   : > { %v1698_v56 = vpop.permute.xlu2 %1697  ;;  %v1818_v4 = vrot.slane %v1816_v47, 5 }
 0x1cf   : > { %1787 = vst.msk [vmem:[#allocation4 + $0x1c] sm:$0xf] %vm1779_vm1, %v1698_v56 }
 0x1d1   : > { %1868 = vrot.lane.b32.xlu1 %v10010_v2, %s5842_s27 }
 0x1d2   : > { %1878 = vrot.lane.b32.xlu0 %v10008_v9, %s5842_s27 }
 0x1d3   : > { %v1696_v56 = vpop.permute.xlu1 %1695 }
 0x1d4   : > { %1858 = vrot.lane.b32.xlu2 %v10009_v22, %s5842_s27  ;;  %v1706_v58 = vpop.permute.xlu0 %1705  ;;  %1786 = vst.msk [vmem:[#allocation4 + $0x18] sm:$0xf] %vm1779_vm1, %v1696_v56  ;;  %v1819_v22 = vor.u32 %v1818_v4, %v1815_v51  ;;  %v1822_v56 = vshll.u32 %v7442_v54, 16  ;;  %v10016_v4 = vld [vmem:[#allocation35_spill] sm:$0xff] }
 0x1d5   : > { %1791 = vst.msk [vmem:[#allocation4 + $0x2c] sm:$0xf] %vm1779_vm1, %v1706_v58  ;;  %v10012_v58 = vld [vmem:[#allocation27_spill] sm:$0xff] }
 0x1d6   : > { %v1704_v3 = vpop.permute.xlu2 %1703  ;;  %v1820_v13 = vrot.slane %v1819_v22, 4  ;;  %v1824_v47 = vrot.slane %v1822_v56, 5  ;;  %v1826_v22 = vshrl.u32 %v7442_v54, 16 }
 0x1d7   : > { %1790 = vst.msk [vmem:[#allocation4 + $0x28] sm:$0xf] %vm1779_vm1, %v1704_v3 }
 0x1d9   : > { %1874 = vrot.lane.b32.xlu1 %v10012_v58, %s5842_s27 }
 0x1da   : > { %1884 = vrot.lane.b32.xlu0 %v7054_v39, %s5842_s27  ;;  %v10013_v39 = vld [vmem:[#allocation31_spill] sm:$0xff] }
 0x1db   : > { %v1702_v2 = vpop.permute.xlu1 %1701 }
 0x1dc   : > { %1864 = vrot.lane.b32.xlu2 %v10011_v60, %s5842_s27  ;;  %v1712_v9 = vpop.permute.xlu0 %1711  ;;  %1789 = vst.msk [vmem:[#allocation4 + $0x24] sm:$0xf] %vm1779_vm1, %v1702_v2  ;;  %v7514_v2 = vsel %vm5920_vm3, %v1820_v13, %v1824_v47 }
 0x1dd   : > { %1794 = vst.msk [vmem:[#allocation4 + $0x38] sm:$0xf] %vm1779_vm1, %v1712_v9  ;;  %v10014_v9 = vld [vmem:[#allocation32_spill] sm:$0xff] }
 0x1de   : > { %v1710_v3 = vpop.permute.xlu2 %1709  ;;  %10015 = vst [vmem:[#allocation9_spill] sm:$0xff] %v7514_v2 }
 0x1df   : > { %1793 = vst.msk [vmem:[#allocation4 + $0x34] sm:$0xf] %vm1779_vm1, %v1710_v3 }
 0x1e1   : > { %1880 = vrot.lane.b32.xlu1 %v10014_v9, %s5842_s27 }
 0x1e2   : > { %1890 = vrot.lane.b32.xlu0 %v7071_v18, %s5842_s27  ;;  %v1828_v18 = vrot.slane %v1826_v22, 4  ;;  %v10019_v22 = vld [vmem:[#allocation39_spill] sm:$0xff] }
 0x1e3   : > { %v1708_v51 = vpop.permute.xlu1 %1707 }
 0x1e4   : > { %1870 = vrot.lane.b32.xlu2 %v10013_v39, %s5842_s27  ;;  %v1718_v58 = vpop.permute.xlu0 %1717  ;;  %1792 = vst.msk [vmem:[#allocation4 + $0x30] sm:$0xf] %vm1779_vm1, %v1708_v51  ;;  %v7526_v51 = vld [vmem:[#allocation2 + $0xc8] sm:$0x1] }
 0x1e5   : > { %1797 = vst.msk [vmem:[#allocation4 + $0x44] sm:$0xf] %vm1779_vm1, %v1718_v58  ;;  %v10017_v58 = vld [vmem:[#allocation37_spill] sm:$0xff]  ;;  %v1832_v9 = vshll.u32 %v7526_v51, 16 }
 0x1e6   : > { %v1716_v3 = vpop.permute.xlu2 %1715 }
 0x1e7   : > { %1796 = vst.msk [vmem:[#allocation4 + $0x40] sm:$0xf] %vm1779_vm1, %v1716_v3  ;;  %v1834_v39 = vrot.slane %v1832_v9, 5 }
 0x1e9   : > { %1886 = vrot.lane.b32.xlu1 %v10017_v58, %s5842_s27  ;;  %v10018_v58 = vld [vmem:[#allocation38_spill] sm:$0xff] }
 0x1ea   : > { %1896 = vrot.lane.b32.xlu0 %v7514_v2, %s5842_s27  ;;  %v1829_v2 = vor.u32 %v1828_v18, %v1824_v47 }
 0x1eb   : > { %v1714_v13 = vpop.permute.xlu1 %1713 }
 0x1ec   : > { %1876 = vrot.lane.b32.xlu2 %v10016_v4, %s5842_s27  ;;  %v1724_v56 = vpop.permute.xlu0 %1723  ;;  %1795 = vst.msk [vmem:[#allocation4 + $0x3c] sm:$0xf] %vm1779_vm1, %v1714_v13  ;;  %v1830_v4 = vrot.slane %v1829_v2, 4 }
 0x1ed   : > { %1800 = vst.msk [vmem:[#allocation4 + $0x50] sm:$0xf] %vm1779_vm1, %v1724_v56 }
 0x1ee   : > { %v1722_v3 = vpop.permute.xlu2 %1721  ;;  %v7541_v18 = vsel %vm5920_vm3, %v1830_v4, %v1834_v39 }
 0x1ef   : > { %1799 = vst.msk [vmem:[#allocation4 + $0x4c] sm:$0xf] %vm1779_vm1, %v1722_v3 }
 0x1f1   : > { %1892 = vrot.lane.b32.xlu1 %v10019_v22, %s5842_s27 }
 0x1f2   : > { %1975 = vrot.lane.b32.xlu0 %v7117_v37, %s5843_s28 }
 0x1f3   : > { %v1720_v13 = vpop.permute.xlu1 %1719 }
 0x1f4   : > { %1882 = vrot.lane.b32.xlu2 %v10018_v58, %s5842_s27  ;;  %v1730_v56 = vpop.permute.xlu0 %1729  ;;  %1798 = vst.msk [vmem:[#allocation4 + $0x48] sm:$0xf] %vm1779_vm1, %v1720_v13 }
 0x1f5   : > { %1803 = vst.msk [vmem:[#allocation4 + $0x5c] sm:$0xf] %vm1779_vm1, %v1730_v56 }
 0x1f6   : > { %v1728_v3 = vpop.permute.xlu2 %1727 }
 0x1f7   : > { %1802 = vst.msk [vmem:[#allocation4 + $0x58] sm:$0xf] %vm1779_vm1, %v1728_v3 }
 0x1f9   : > { %1898 = vrot.lane.b32.xlu1 %v7541_v18, %s5842_s27 }
 0x1fa   : > { %1981 = vrot.lane.b32.xlu0 %v7145_v43, %s5843_s28 }
 0x1fb   : > { %v1726_v9 = vpop.permute.xlu1 %1725 }
 0x1fc   : > { %1888 = vrot.lane.b32.xlu2 %v7030_v26, %s5842_s27  ;;  %v1736_v37 = vpop.permute.xlu0 %1735  ;;  %1801 = vst.msk [vmem:[#allocation4 + $0x54] sm:$0xf] %vm1779_vm1, %v1726_v9 }
 0x1fd   : > { %1806 = vst.msk [vmem:[#allocation4 + $0x68] sm:$0xf] %vm1779_vm1, %v1736_v37 }
 0x1fe   : > { %v1734_v47 = vpop.permute.xlu2 %1733 }
 0x1ff   : > { %1805 = vst.msk [vmem:[#allocation4 + $0x64] sm:$0xf] %vm1779_vm1, %v1734_v47 }
 0x201   : > { %1977 = vrot.lane.b32.xlu1 %v7041_v41, %s5843_s28 }
 0x202   : > { %1987 = vrot.lane.b32.xlu0 %v7171_v45, %s5843_s28 }
 0x203   : > { %v1732_v4 = vpop.permute.xlu1 %1731 }
 0x204   : > { %1894 = vrot.lane.b32.xlu2 %v7047_v35, %s5842_s27  ;;  %v1742_v39 = vpop.permute.xlu0 %1741  ;;  %1804 = vst.msk [vmem:[#allocation4 + $0x60] sm:$0xf] %vm1779_vm1, %v1732_v4  ;;  %v10022_v4 = vld [vmem:[#allocation47_spill] sm:$0xff] }
 0x205   : > { %1809 = vst.msk [vmem:[#allocation4 + $0x74] sm:$0xf] %vm1779_vm1, %v1742_v39  ;;  %v10021_v39 = vld [vmem:[#allocation48_spill] sm:$0xff] }
 0x206   : > { %v1740_v2 = vpop.permute.xlu2 %1739 }
 0x207   : > { %1808 = vst.msk [vmem:[#allocation4 + $0x70] sm:$0xf] %vm1779_vm1, %v1740_v2 }
 0x209   : > { %1983 = vrot.lane.b32.xlu1 %v7067_v27, %s5843_s28 }
 0x20a   : > { %1993 = vrot.lane.b32.xlu0 %v7199_v29, %s5843_s28 }
 0x20b   : > { %v1738_v13 = vpop.permute.xlu1 %1737 }
 0x20c   : > { %1973 = vrot.lane.b32.xlu2 %v7075_v0, %s5843_s28  ;;  %v1837_v56 = vpop.permute.xlu0 %1836  ;;  %1807 = vst.msk [vmem:[#allocation4 + $0x6c] sm:$0xf] %vm1779_vm1, %v1738_v13  ;;  %v10020_v0 = vld [vmem:[#allocation46_spill] sm:$0xff] }
 0x20d   : > { %1933 = vst.msk [vmem:[#allocation4] sm:$0xf] %vm1932_vm2, %v1837_v56  ;;  %v10023_v13 = vld [vmem:[#allocation50_spill] sm:$0xff] }
 0x20e   : > { %v1746_v3 = vpop.permute.xlu2 %1745 }
 0x20f   : > { %1811 = vst.msk [vmem:[#allocation4 + $0x7c] sm:$0xf] %vm1779_vm1, %v1746_v3 }
 0x211   : > { %1989 = vrot.lane.b32.xlu1 %v10020_v0, %s5843_s28 }
 0x212   : > { %1999 = vrot.lane.b32.xlu0 %v7226_v52, %s5843_s28 }
 0x213   : > { %v1744_v9 = vpop.permute.xlu1 %1743 }
 0x214   : > { %1979 = vrot.lane.b32.xlu2 %v7098_v63, %s5843_s28  ;;  %v1843_v37 = vpop.permute.xlu0 %1842  ;;  %1810 = vst.msk [vmem:[#allocation4 + $0x78] sm:$0xf] %vm1779_vm1, %v1744_v9 }
 0x215   : > { %1936 = vst.msk [vmem:[#allocation4 + $0xc] sm:$0xf] %vm1932_vm2, %v1843_v37 }
 0x216   : > { %v1841_v47 = vpop.permute.xlu2 %1840 }
 0x217   : > { %1935 = vst.msk [vmem:[#allocation4 + $0x8] sm:$0xf] %vm1932_vm2, %v1841_v47  ;;  %v10024_v47 = vld [vmem:[#allocation49_spill] sm:$0xff] }
 0x219   : > { %1995 = vrot.lane.b32.xlu1 %v10022_v4, %s5843_s28 }
 0x21a   : > { %2005 = vrot.lane.b32.xlu0 %v7254_v36, %s5843_s28  ;;  %v10029_v36 = vld [vmem:[#allocation22_spill] sm:$0xff] }
 0x21b   : > { %v1839_v3 = vpop.permute.xlu1 %1838 }
 0x21c   : > { %1985 = vrot.lane.b32.xlu2 %v10021_v39, %s5843_s28  ;;  %v1849_v2 = vpop.permute.xlu0 %1848  ;;  %1934 = vst.msk [vmem:[#allocation4 + $0x4] sm:$0xf] %vm1932_vm2, %v1839_v3 }
 0x21d   : > { %1939 = vst.msk [vmem:[#allocation4 + $0x18] sm:$0xf] %vm1932_vm2, %v1849_v2 }
 0x21e   : > { %v1847_v56 = vpop.permute.xlu2 %1846 }
 0x21f   : > { %1938 = vst.msk [vmem:[#allocation4 + $0x14] sm:$0xf] %vm1932_vm2, %v1847_v56  ;;  %v10025_v56 = vld [vmem:[#allocation52_spill] sm:$0xff] }
 0x221   : > { %2001 = vrot.lane.b32.xlu1 %v10024_v47, %s5843_s28 }
 0x222   : > { %2011 = vrot.lane.b32.xlu0 %v7278_v57, %s5843_s28  ;;  %v10026_v57 = vld [vmem:[#allocation51_spill] sm:$0xff] }
 0x223   : > { %v1845_v2 = vpop.permute.xlu1 %1844 }
 0x224   : > { %1991 = vrot.lane.b32.xlu2 %v10023_v13, %s5843_s28  ;;  %v1855_v37 = vpop.permute.xlu0 %1854  ;;  %1937 = vst.msk [vmem:[#allocation4 + $0x10] sm:$0xf] %vm1932_vm2, %v1845_v2 }
 0x225   : > { %1942 = vst.msk [vmem:[#allocation4 + $0x24] sm:$0xf] %vm1932_vm2, %v1855_v37 }
 0x226   : > { %v1853_v9 = vpop.permute.xlu2 %1852 }
 0x227   : > { %1941 = vst.msk [vmem:[#allocation4 + $0x20] sm:$0xf] %vm1932_vm2, %v1853_v9  ;;  %v10027_v9 = vld [vmem:[#allocation30_spill] sm:$0xff] }
 0x229   : > { %2007 = vrot.lane.b32.xlu1 %v10026_v57, %s5843_s28 }
 0x22a   : > { %2017 = vrot.lane.b32.xlu0 %v7299_v32, %s5843_s28  ;;  %v10028_v32 = vld [vmem:[#allocation53_spill] sm:$0xff] }
 0x22b   : > { %v1851_v37 = vpop.permute.xlu1 %1850 }
 0x22c   : > { %1997 = vrot.lane.b32.xlu2 %v10025_v56, %s5843_s28  ;;  %v1861_v3 = vpop.permute.xlu0 %1860  ;;  %1940 = vst.msk [vmem:[#allocation4 + $0x1c] sm:$0xf] %vm1932_vm2, %v1851_v37 }
 0x22d   : > { %1945 = vst.msk [vmem:[#allocation4 + $0x30] sm:$0xf] %vm1932_vm2, %v1861_v3 }
 0x22e   : > { %v1859_v47 = vpop.permute.xlu2 %1858 }
 0x22f   : > { %1944 = vst.msk [vmem:[#allocation4 + $0x2c] sm:$0xf] %vm1932_vm2, %v1859_v47  ;;  %v1968_v47 = vrot.slane %v7442_v54, 5 }
 0x231   : > { %2013 = vrot.lane.b32.xlu1 %v10028_v32, %s5843_s28  ;;  %v1970_v37 = vrot.slane %v1968_v47, 4 }
 0x232   : > { %2023 = vrot.lane.b32.xlu0 %v7316_v46, %s5843_s28  ;;  %v1971_v46 = vrot.slane %v7526_v51, 5 }
 0x233   : > { %v1857_v3 = vpop.permute.xlu1 %1856 }
 0x234   : > { %2003 = vrot.lane.b32.xlu2 %v10027_v9, %s5843_s28  ;;  %v1867_v2 = vpop.permute.xlu0 %1866  ;;  %1943 = vst.msk [vmem:[#allocation4 + $0x28] sm:$0xf] %vm1932_vm2, %v1857_v3  ;;  %v7627_v3 = vsel %vm6995_vm13, %v1970_v37, %v1971_v46 }
 0x235   : > { %1948 = vst.msk [vmem:[#allocation4 + $0x3c] sm:$0xf] %vm1932_vm2, %v1867_v2  ;;  %v10030_v2 = vld [vmem:[#allocation14_spill] sm:$0xff] }
 0x236   : > { %v1865_v57 = vpop.permute.xlu2 %1864 }
 0x237   : > { %1947 = vst.msk [vmem:[#allocation4 + $0x38] sm:$0xf] %vm1932_vm2, %v1865_v57 }
 0x239   : > { %2019 = vrot.lane.b32.xlu1 %v10030_v2, %s5843_s28 }
 0x23a   : > { %2029 = vrot.lane.b32.xlu0 %v7330_v21, %s5843_s28  ;;  %v10031_v21 = vld [vmem:[#allocation19_spill] sm:$0xff] }
 0x23b   : > { %v1863_v4 = vpop.permute.xlu1 %1862 }
 0x23c   : > { %2009 = vrot.lane.b32.xlu2 %v10029_v36, %s5843_s28  ;;  %v1873_v32 = vpop.permute.xlu0 %1872  ;;  %1946 = vst.msk [vmem:[#allocation4 + $0x34] sm:$0xf] %vm1932_vm2, %v1863_v4  ;;  %v10032_v4 = vld [vmem:[#allocation23_spill] sm:$0xff] }
 0x23d   : > { %1951 = vst.msk [vmem:[#allocation4 + $0x48] sm:$0xf] %vm1932_vm2, %v1873_v32 }
 0x23e   : > { %v1871_v57 = vpop.permute.xlu2 %1870 }
 0x23f   : > { %1950 = vst.msk [vmem:[#allocation4 + $0x44] sm:$0xf] %vm1932_vm2, %v1871_v57 }
 0x241   : > { %2025 = vrot.lane.b32.xlu1 %v10031_v21, %s5843_s28 }
 0x242   : > { %2035 = vrot.lane.b32.xlu0 %v7627_v3, %s5843_s28 }
 0x243   : > { %v1869_v57 = vpop.permute.xlu1 %1868 }
 0x244   : > { %2015 = vrot.lane.b32.xlu2 %v7259_v59, %s5843_s28  ;;  %v1879_v51 = vpop.permute.xlu0 %1878  ;;  %1949 = vst.msk [vmem:[#allocation4 + $0x40] sm:$0xf] %vm1932_vm2, %v1869_v57 }
 0x245   : > { %1954 = vst.msk [vmem:[#allocation4 + $0x54] sm:$0xf] %vm1932_vm2, %v1879_v51 }
 0x246   : > { %v1877_v32 = vpop.permute.xlu2 %1876 }
 0x247   : > { %1953 = vst.msk [vmem:[#allocation4 + $0x50] sm:$0xf] %vm1932_vm2, %v1877_v32  ;;  %v5527_v32 = vrot.slane %v7422_v24, 9 }
 0x249   : > { %2031 = vrot.lane.b32.xlu1 %v10032_v4, %s5843_s28 }
 0x24a   : > { %2108 = vrot.lane.b32.xlu0 %v6373_v5, %s5844_s29 }
 0x24b   : > { %v1875_v51 = vpop.permute.xlu1 %1874 }
 0x24c   : > { %2021 = vrot.lane.b32.xlu2 %v7283_v19, %s5843_s28  ;;  %v1885_v46 = vpop.permute.xlu0 %1884  ;;  %1952 = vst.msk [vmem:[#allocation4 + $0x4c] sm:$0xf] %vm1932_vm2, %v1875_v51 }
 0x24d   : > { %1957 = vst.msk [vmem:[#allocation4 + $0x60] sm:$0xf] %vm1932_vm2, %v1885_v46 }
 0x24e   : > { %v1883_v37 = vpop.permute.xlu2 %1882 }
 0x24f   : > { %1956 = vst.msk [vmem:[#allocation4 + $0x5c] sm:$0xf] %vm1932_vm2, %v1883_v37 }
 0x251   : > { %2104 = vrot.lane.b32.xlu1 %v6504_v25, %s5844_s29 }
 0x252   : > { %2114 = vrot.lane.b32.xlu0 %v6399_v55, %s5844_s29  ;;  %v7660_v55 = vsel %vm6995_vm13, %v5527_v32, %v1968_v47  ;;  %v10033_v32 = vld [vmem:[#allocation13_spill] sm:$0xff] }
 0x253   : > { %v1881_v46 = vpop.permute.xlu1 %1880 }
 0x254   : > { %2027 = vrot.lane.b32.xlu2 %v7303_v1, %s5843_s28  ;;  %v1891_v5 = vpop.permute.xlu0 %1890  ;;  %1955 = vst.msk [vmem:[#allocation4 + $0x58] sm:$0xf] %vm1932_vm2, %v1881_v46  ;;  %v10035_v46 = vld [vmem:[#allocation17_spill] sm:$0xff] }
 0x255   : > { %1960 = vst.msk [vmem:[#allocation4 + $0x6c] sm:$0xf] %vm1932_vm2, %v1891_v5  ;;  %v7743_v5 = vld [vmem:[#allocation2 + $0xcc] sm:$0xf] }
 0x256   : > { %v1889_v57 = vpop.permute.xlu2 %1888 }
 0x257   : > { %1959 = vst.msk [vmem:[#allocation4 + $0x68] sm:$0xf] %vm1932_vm2, %v1889_v57 }
 0x259   : > { %2110 = vrot.lane.b32.xlu1 %v6384_v12, %s5844_s29 }
 0x25a   : > { %2120 = vrot.lane.b32.xlu0 %v6473_v8, %s5844_s29 }
 0x25b   : > { %v1887_v51 = vpop.permute.xlu1 %1886 }
 0x25c   : > { %2033 = vrot.lane.b32.xlu2 %v7660_v55, %s5843_s28  ;;  %v1897_v25 = vpop.permute.xlu0 %1896  ;;  %1958 = vst.msk [vmem:[#allocation4 + $0x64] sm:$0xf] %vm1932_vm2, %v1887_v51 }
 0x25d   : > { %1963 = vst.msk [vmem:[#allocation4 + $0x78] sm:$0xf] %vm1932_vm2, %v1897_v25 }
 0x25e   : > { %v1895_v37 = vpop.permute.xlu2 %1894 }
 0x25f   : > { %1962 = vst.msk [vmem:[#allocation4 + $0x74] sm:$0xf] %vm1932_vm2, %v1895_v37  ;;  %v10036_v37 = vld [vmem:[#allocation20_spill] sm:$0xff] }
 0x261   : > { %2116 = vrot.lane.b32.xlu1 %v6521_v28, %s5844_s29 }
 0x262   : > { %2126 = vrot.lane.b32.xlu0 %v6545_v23, %s5844_s29 }
 0x263   : > { %v1893_v47 = vpop.permute.xlu1 %1892 }
 0x264   : > { %2106 = vrot.lane.b32.xlu2 %v6511_v33, %s5844_s29  ;;  %v1976_v8 = vpop.permute.xlu0 %1975  ;;  %1961 = vst.msk [vmem:[#allocation4 + $0x70] sm:$0xf] %vm1932_vm2, %v1893_v47  ;;  %v10037_v47 = vld [vmem:[#allocation21_spill] sm:$0xff] }
 0x265   : > { %2071 = vst.msk [vmem:[#allocation4 + $0x4] sm:$0xf] %vm2069_vm4, %v1976_v8 }
 0x266   : > { %v1974_v12 = vpop.permute.xlu2 %1973 }
 0x267   : > { %2070 = vst.msk [vmem:[#allocation4] sm:$0xf] %vm2069_vm4, %v1974_v12  ;;  %v7763_v12 = vld [vmem:[#allocation2 + $0xd0] sm:$0xf] }
 0x269   : > { %2122 = vrot.lane.b32.xlu1 %v6481_v6, %s5844_s29 }
 0x26a   : > { %2132 = vrot.lane.b32.xlu0 %v9980_v17, %s5844_s29 }
 0x26b   : > { %v1899_v28 = vpop.permute.xlu1 %1898 }
 0x26c   : > { %2112 = vrot.lane.b32.xlu2 %v6664_v34, %s5844_s29  ;;  %v1982_v23 = vpop.permute.xlu0 %1981  ;;  %1964 = vst.msk [vmem:[#allocation4 + $0x7c] sm:$0xf] %vm1932_vm2, %v1899_v28 }
 0x26d   : > { %2074 = vst.msk [vmem:[#allocation4 + $0x10] sm:$0xf] %vm2069_vm4, %v1982_v23  ;;  %v10038_v23 = vld [vmem:[#allocation25_spill] sm:$0xff] }
 0x26e   : > { %v1980_v33 = vpop.permute.xlu2 %1979 }
 0x26f   : > { %2073 = vst.msk [vmem:[#allocation4 + $0xc] sm:$0xf] %vm2069_vm4, %v1980_v33 }
 0x271   : > { %2128 = vrot.lane.b32.xlu1 %v6687_v48, %s5844_s29 }
 0x272   : > { %2138 = vrot.lane.b32.xlu0 %v9977_v30, %s5844_s29 }
 0x273   : > { %v1978_v34 = vpop.permute.xlu1 %1977 }
 0x274   : > { %2118 = vrot.lane.b32.xlu2 %v6536_v15, %s5844_s29  ;;  %v1988_v17 = vpop.permute.xlu0 %1987  ;;  %2072 = vst.msk [vmem:[#allocation4 + $0x8] sm:$0xf] %vm2069_vm4, %v1978_v34  ;;  %v10040_v34 = vld [vmem:[#allocation29_spill] sm:$0xff] }
 0x275   : > { %2077 = vst.msk [vmem:[#allocation4 + $0x1c] sm:$0xf] %vm2069_vm4, %v1988_v17  ;;  %v10039_v17 = vld [vmem:[#allocation10_spill] sm:$0xff] }
 0x276   : > { %v1986_v6 = vpop.permute.xlu2 %1985 }
 0x277   : > { %2076 = vst.msk [vmem:[#allocation4 + $0x18] sm:$0xf] %vm2069_vm4, %v1986_v6 }
 0x279   : > { %2134 = vrot.lane.b32.xlu1 %v6653_v38, %s5844_s29 }
 0x27a   : > { %2144 = vrot.lane.b32.xlu0 %v9988_v42, %s5844_s29 }
 0x27b   : > { %v1984_v48 = vpop.permute.xlu1 %1983 }
 0x27c   : > { %2124 = vrot.lane.b32.xlu2 %v6809_v14, %s5844_s29  ;;  %v1994_v30 = vpop.permute.xlu0 %1993  ;;  %2075 = vst.msk [vmem:[#allocation4 + $0x14] sm:$0xf] %vm2069_vm4, %v1984_v48  ;;  %v10041_v48 = vld [vmem:[#allocation31_spill] sm:$0xff] }
 0x27d   : > { %2080 = vst.msk [vmem:[#allocation4 + $0x28] sm:$0xf] %vm2069_vm4, %v1994_v30 }
 0x27e   : > { %v1992_v15 = vpop.permute.xlu2 %1991 }
 0x27f   : > { %2079 = vst.msk [vmem:[#allocation4 + $0x24] sm:$0xf] %vm2069_vm4, %v1992_v15 }
 0x281   : > { %2140 = vrot.lane.b32.xlu1 %v6844_v7, %s5844_s29 }
 0x282   : > { %2150 = vrot.lane.b32.xlu0 %v9985_v16, %s5844_s29 }
 0x283   : > { %v1990_v14 = vpop.permute.xlu1 %1989 }
 0x284   : > { %2130 = vrot.lane.b32.xlu2 %v6690_v49, %s5844_s29  ;;  %v2000_v42 = vpop.permute.xlu0 %1999  ;;  %2078 = vst.msk [vmem:[#allocation4 + $0x20] sm:$0xf] %vm2069_vm4, %v1990_v14 }
 0x285   : > { %2083 = vst.msk [vmem:[#allocation4 + $0x34] sm:$0xf] %vm2069_vm4, %v2000_v42 }
 0x286   : > { %v1998_v38 = vpop.permute.xlu2 %1997 }
 0x287   : > { %2082 = vst.msk [vmem:[#allocation4 + $0x30] sm:$0xf] %vm2069_vm4, %v1998_v38  ;;  %v10043_v38 = vld [vmem:[#allocation33_spill] sm:$0xff] }
 0x289   : > { %2146 = vrot.lane.b32.xlu1 %v9973_v31, %s5844_s29 }
 0x28a   : > { %2156 = vrot.lane.b32.xlu0 %v6928_v62, %s5844_s29 }
 0x28b   : > { %v1996_v7 = vpop.permute.xlu1 %1995 }
 0x28c   : > { %2136 = vrot.lane.b32.xlu2 %v6944_v11, %s5844_s29  ;;  %v2006_v16 = vpop.permute.xlu0 %2005  ;;  %2081 = vst.msk [vmem:[#allocation4 + $0x2c] sm:$0xf] %vm2069_vm4, %v1996_v7  ;;  %v10045_v7 = vld [vmem:[#allocation15_spill] sm:$0xff] }
 0x28d   : > { %2086 = vst.msk [vmem:[#allocation4 + $0x40] sm:$0xf] %vm2069_vm4, %v2006_v16 }
 0x28e   : > { %v2004_v49 = vpop.permute.xlu2 %2003 }
 0x28f   : > { %2085 = vst.msk [vmem:[#allocation4 + $0x3c] sm:$0xf] %vm2069_vm4, %v2004_v49  ;;  %v10044_v49 = vld [vmem:[#allocation35_spill] sm:$0xff] }
 0x291   : > { %2152 = vrot.lane.b32.xlu1 %v6981_v20, %s5844_s29 }
 0x292   : > { %2162 = vrot.lane.b32.xlu0 %v7442_v54, %s5844_s29 }
 0x293   : > { %v2002_v31 = vpop.permute.xlu1 %2001 }
 0x294   : > { %2142 = vrot.lane.b32.xlu2 %v6850_v61, %s5844_s29  ;;  %v2012_v62 = vpop.permute.xlu0 %2011  ;;  %2084 = vst.msk [vmem:[#allocation4 + $0x38] sm:$0xf] %vm2069_vm4, %v2002_v31 }
 0x295   : > { %2089 = vst.msk [vmem:[#allocation4 + $0x4c] sm:$0xf] %vm2069_vm4, %v2012_v62 }
 0x296   : > { %v2010_v11 = vpop.permute.xlu2 %2009 }
 0x297   : > { %2088 = vst.msk [vmem:[#allocation4 + $0x48] sm:$0xf] %vm2069_vm4, %v2010_v11  ;;  %v10046_v11 = vld [vmem:[#allocation36_spill] sm:$0xff] }
 0x299   : > { %2158 = vrot.lane.b32.xlu1 %v6933_v50, %s5844_s29 }
 0x29a   : > { %2257 = vrot.lane.b32.xlu0 %v10000_v40, %s5845_s30  ;;  %v10034_v40 = vld [vmem:[#allocation41_spill] sm:$0xff] }
 0x29b   : > { %v2008_v54 = vpop.permute.xlu1 %2007 }
 0x29c   : > { %2148 = vrot.lane.b32.xlu2 %v7020_v53, %s5844_s29  ;;  %v2018_v61 = vpop.permute.xlu0 %2017  ;;  %2087 = vst.msk [vmem:[#allocation4 + $0x44] sm:$0xf] %vm2069_vm4, %v2008_v54 }
 0x29d   : > { %2092 = vst.msk [vmem:[#allocation4 + $0x58] sm:$0xf] %vm2069_vm4, %v2018_v61 }
 0x29e   : > { %v2016_v20 = vpop.permute.xlu2 %2015 }
 0x29f   : > { %2091 = vst.msk [vmem:[#allocation4 + $0x54] sm:$0xf] %vm2069_vm4, %v2016_v20  ;;  %v10047_v20 = vld [vmem:[#allocation18_spill] sm:$0xff] }
 0x2a1   : > { %2164 = vrot.lane.b32.xlu1 %v7743_v5, %s5844_s29 }
 0x2a2   : > { %2263 = vrot.lane.b32.xlu0 %v10033_v32, %s5845_s30  ;;  %v10048_v32 = vld [vmem:[#allocation40_spill] sm:$0xff] }
 0x2a3   : > { %v2014_v57 = vpop.permute.xlu1 %2013 }
 0x2a4   : > { %2154 = vrot.lane.b32.xlu2 %v10034_v40, %s5844_s29  ;;  %v2024_v53 = vpop.permute.xlu0 %2023  ;;  %2090 = vst.msk [vmem:[#allocation4 + $0x50] sm:$0xf] %vm2069_vm4, %v2014_v57 }
 0x2a5   : > { %2095 = vst.msk [vmem:[#allocation4 + $0x64] sm:$0xf] %vm2069_vm4, %v2024_v53  ;;  %v2234_v53 = vshrl.u32 %v7743_v5, 16 }
 0x2a6   : > { %v2022_v50 = vpop.permute.xlu2 %2021 }
 0x2a7   : > { %2094 = vst.msk [vmem:[#allocation4 + $0x60] sm:$0xf] %vm2069_vm4, %v2022_v50  ;;  %v2237_v50 = vshll.u32 %v7743_v5, 16 }
 0x2a9   : > { %2259 = vrot.lane.b32.xlu1 %v10036_v37, %s5845_s30 }
 0x2aa   : > { %2269 = vrot.lane.b32.xlu0 %v10035_v46, %s5845_s30  ;;  %v2239_v46 = vrot.slane %v2237_v50, 5 }
 0x2ab   : > { %v2020_v8 = vpop.permute.xlu1 %2019 }
 0x2ac   : > { %2160 = vrot.lane.b32.xlu2 %v7422_v24, %s5844_s29  ;;  %v2030_v25 = vpop.permute.xlu0 %2029  ;;  %2093 = vst.msk [vmem:[#allocation4 + $0x5c] sm:$0xf] %vm2069_vm4, %v2020_v8 }
 0x2ad   : > { %2098 = vst.msk [vmem:[#allocation4 + $0x70] sm:$0xf] %vm2069_vm4, %v2030_v25  ;;  %v10049_v25 = vld [vmem:[#allocation24_spill] sm:$0xff] }
 0x2ae   : > { %v2028_v51 = vpop.permute.xlu2 %2027 }
 0x2af   : > { %2097 = vst.msk [vmem:[#allocation4 + $0x6c] sm:$0xf] %vm2069_vm4, %v2028_v51  ;;  %v10050_v51 = vld [vmem:[#allocation43_spill] sm:$0xff] }
 0x2b1   : > { %2265 = vrot.lane.b32.xlu1 %v10038_v23, %s5845_s30 }
 0x2b2   : > { %2275 = vrot.lane.b32.xlu0 %v10037_v47, %s5845_s30  ;;  %v2243_v47 = vshll.u32 %v7763_v12, 16 }
 0x2b3   : > { %v2026_v28 = vpop.permute.xlu1 %2025 }
 0x2b4   : > { %2166 = vrot.lane.b32.xlu2 %v7763_v12, %s5844_s29  ;;  %v2036_v24 = vpop.permute.xlu0 %2035  ;;  %2096 = vst.msk [vmem:[#allocation4 + $0x68] sm:$0xf] %vm2069_vm4, %v2026_v28  ;;  %v10051_v28 = vld [vmem:[#allocation27_spill] sm:$0xff] }
 0x2b5   : > { %2101 = vst.msk [vmem:[#allocation4 + $0x7c] sm:$0xf] %vm2069_vm4, %v2036_v24 }
 0x2b6   : > { %v2034_v33 = vpop.permute.xlu2 %2033 }
 0x2b7   : > { %2100 = vst.msk [vmem:[#allocation4 + $0x78] sm:$0xf] %vm2069_vm4, %v2034_v33  ;;  %v2245_v33 = vrot.slane %v2243_v47, 5 }
 0x2b9   : > { %2271 = vrot.lane.b32.xlu1 %v10040_v34, %s5845_s30 }
 0x2ba   : > { %2281 = vrot.lane.b32.xlu0 %v10011_v60, %s5845_s30  ;;  %v10042_v60 = vld [vmem:[#allocation12_spill] sm:$0xff] }
 0x2bb   : > { %v2032_v15 = vpop.permute.xlu1 %2031 }
 0x2bc   : > { %2261 = vrot.lane.b32.xlu2 %v10039_v17, %s5845_s30  ;;  %v2109_v6 = vpop.permute.xlu0 %2108  ;;  %2099 = vst.msk [vmem:[#allocation4 + $0x74] sm:$0xf] %vm2069_vm4, %v2032_v15 }
 0x2bd   : > { %2203 = vst.msk [vmem:[#allocation4 + $0x8] sm:$0xf] %vm2200_vm5, %v2109_v6  ;;  %v10052_v6 = vld [vmem:[#allocation44_spill] sm:$0xff] }
 0x2be   : > { %v2107_v30 = vpop.permute.xlu2 %2106 }
 0x2bf   : > { %2202 = vst.msk [vmem:[#allocation4 + $0x4] sm:$0xf] %vm2200_vm5, %v2107_v30 }
 0x2c1   : > { %2277 = vrot.lane.b32.xlu1 %v10043_v38, %s5845_s30 }
 0x2c2   : > { %2287 = vrot.lane.b32.xlu0 %v10041_v48, %s5845_s30  ;;  %v10053_v48 = vld [vmem:[#allocation32_spill] sm:$0xff] }
 0x2c3   : > { %v2105_v16 = vpop.permute.xlu1 %2104 }
 0x2c4   : > { %2267 = vrot.lane.b32.xlu2 %v10042_v60, %s5845_s30  ;;  %v2115_v42 = vpop.permute.xlu0 %2114  ;;  %2201 = vst.msk [vmem:[#allocation4] sm:$0xf] %vm2200_vm5, %v2105_v16 }
 0x2c5   : > { %2206 = vst.msk [vmem:[#allocation4 + $0x14] sm:$0xf] %vm2200_vm5, %v2115_v42  ;;  %v10054_v42 = vld [vmem:[#allocation45_spill] sm:$0xff] }
 0x2c6   : > { %v2113_v14 = vpop.permute.xlu2 %2112 }
 0x2c7   : > { %2205 = vst.msk [vmem:[#allocation4 + $0x10] sm:$0xf] %vm2200_vm5, %v2113_v14 }
 0x2c9   : > { %2283 = vrot.lane.b32.xlu1 %v10046_v11, %s5845_s30  ;;  %v10055_v11 = vld [vmem:[#allocation37_spill] sm:$0xff] }
 0x2ca   : > { %2293 = vrot.lane.b32.xlu0 %v10044_v49, %s5845_s30  ;;  %v7841_v49 = vld [vmem:[#allocation2 + $0xd4] sm:$0x1] }
 0x2cb   : > { %v2111_v61 = vpop.permute.xlu1 %2110 }
 0x2cc   : > { %2273 = vrot.lane.b32.xlu2 %v10045_v7, %s5845_s30  ;;  %v2121_v62 = vpop.permute.xlu0 %2120  ;;  %2204 = vst.msk [vmem:[#allocation4 + $0xc] sm:$0xf] %vm2200_vm5, %v2111_v61  ;;  %v10056_v61 = vld [vmem:[#allocation9_spill] sm:$0xff] }
 0x2cd   : > { %2209 = vst.msk [vmem:[#allocation4 + $0x20] sm:$0xf] %vm2200_vm5, %v2121_v62  ;;  %v2253_v62 = vshll.u32 %v7841_v49, 16 }
 0x2ce   : > { %v2119_v31 = vpop.permute.xlu2 %2118 }
 0x2cf   : > { %2208 = vst.msk [vmem:[#allocation4 + $0x1c] sm:$0xf] %vm2200_vm5, %v2119_v31 }
 0x2d1   : > { %2289 = vrot.lane.b32.xlu1 %v10048_v32, %s5845_s30  ;;  %v2255_v32 = vrot.slane %v2253_v62, 5 }
 0x2d2   : > { %2299 = vrot.lane.b32.xlu0 %v10018_v58, %s5845_s30  ;;  %v2236_v58 = vrot.slane %v2234_v53, 4 }
 0x2d3   : > { %v2117_v57 = vpop.permute.xlu1 %2116 }
 0x2d4   : > { %2279 = vrot.lane.b32.xlu2 %v10047_v20, %s5845_s30  ;;  %v2127_v54 = vpop.permute.xlu0 %2126  ;;  %2207 = vst.msk [vmem:[#allocation4 + $0x18] sm:$0xf] %vm2200_vm5, %v2117_v57  ;;  %v2240_v23 = vor.u32 %v2239_v46, %v2236_v58 }
 0x2d5   : > { %2212 = vst.msk [vmem:[#allocation4 + $0x2c] sm:$0xf] %vm2200_vm5, %v2127_v54 }
 0x2d6   : > { %v2125_v40 = vpop.permute.xlu2 %2124 }
 0x2d7   : > { %2211 = vst.msk [vmem:[#allocation4 + $0x28] sm:$0xf] %vm2200_vm5, %v2125_v40 }
 0x2d9   : > { %2295 = vrot.lane.b32.xlu1 %v10050_v51, %s5845_s30  ;;  %v10060_v51 = vld [vmem:[#allocation34_spill] sm:$0xff] }
 0x2da   : > { %2305 = vrot.lane.b32.xlu0 %v7030_v26, %s5845_s30  ;;  %v2241_v26 = vrot.slane %v2240_v23, 4  ;;  %v10062_v23 = vld [vmem:[#allocation28_spill] sm:$0xff] }
 0x2db   : > { %v2123_v24 = vpop.permute.xlu1 %2122 }
 0x2dc   : > { %2285 = vrot.lane.b32.xlu2 %v10049_v25, %s5845_s30  ;;  %v2133_v37 = vpop.permute.xlu0 %2132  ;;  %2210 = vst.msk [vmem:[#allocation4 + $0x24] sm:$0xf] %vm2200_vm5, %v2123_v24  ;;  %v2246_v15 = vsel %vm5920_vm3, %v2241_v26, %v2245_v33 }
 0x2dd   : > { %2215 = vst.msk [vmem:[#allocation4 + $0x38] sm:$0xf] %vm2200_vm5, %v2133_v37 }
 0x2de   : > { %v2131_v8 = vpop.permute.xlu2 %2130 }
 0x2df   : > { %2214 = vst.msk [vmem:[#allocation4 + $0x34] sm:$0xf] %vm2200_vm5, %v2131_v8 }
 0x2e1   : > { %2301 = vrot.lane.b32.xlu1 %v10052_v6, %s5845_s30 }
 0x2e2   : > { %2311 = vrot.lane.b32.xlu0 %v7047_v35, %s5845_s30  ;;  %v2247_v35 = vshrl.u32 %v7763_v12, 16 }
 0x2e3   : > { %v2129_v30 = vpop.permute.xlu1 %2128 }
 0x2e4   : > { %2291 = vrot.lane.b32.xlu2 %v10051_v28, %s5845_s30  ;;  %v2139_v17 = vpop.permute.xlu0 %2138  ;;  %2213 = vst.msk [vmem:[#allocation4 + $0x30] sm:$0xf] %vm2200_vm5, %v2129_v30  ;;  %v2249_v38 = vrot.slane %v2247_v35, 4  ;;  %v2559_v30 = vld [vmem:[%s9686_s1 + $0x10] sm:$0x3] }
 0x2e5   : > { %2218 = vst.msk [vmem:[#allocation4 + $0x44] sm:$0xf] %vm2200_vm5, %v2139_v17  ;;  %v10064_v17 = vld [vmem:[#allocation55_spill] sm:$0xff] }
 0x2e6   : > { %v2137_v34 = vpop.permute.xlu2 %2136  ;;  %v2250_v7 = vor.u32 %v2249_v38, %v2245_v33 }
 0x2e7   : > { %2217 = vst.msk [vmem:[#allocation4 + $0x40] sm:$0xf] %vm2200_vm5, %v2137_v34 }
 0x2e8   : > { %v2251_v54 = vrot.slane %v2250_v7, 4  ;;  %v5743_v7 = vld [vmem:[%s9686_s1] sm:$0xff] }
 0x2e9   : > { %2307 = vrot.lane.b32.xlu1 %v10054_v42, %s5845_s30 }
 0x2ea   : > { %2317 = vrot.lane.b32.xlu0 %v2246_v15, %s5845_s30 }
 0x2eb   : > { %v2135_v16 = vpop.permute.xlu1 %2134 }
 0x2ec   : > { %2297 = vrot.lane.b32.xlu2 %v10053_v48, %s5845_s30  ;;  %v2145_v60 = vpop.permute.xlu0 %2144  ;;  %2216 = vst.msk [vmem:[#allocation4 + $0x3c] sm:$0xf] %vm2200_vm5, %v2135_v16  ;;  %v10065_v48 = vld [vmem:[#allocation56_spill] sm:$0xff] }
 0x2ed   : > { %2221 = vst.msk [vmem:[#allocation4 + $0x50] sm:$0xf] %vm2200_vm5, %v2145_v60 }
 0x2ee   : > { %v2143_v14 = vpop.permute.xlu2 %2142 }
 0x2ef   : > { %2220 = vst.msk [vmem:[#allocation4 + $0x4c] sm:$0xf] %vm2200_vm5, %v2143_v14 }
 0x2f1   : > { %2313 = vrot.lane.b32.xlu1 %v10056_v61, %s5845_s30 }
 0x2f2   : > { %2396 = vrot.lane.b32.xlu0 %v7098_v63, %s5846_s6  ;;  %v2256_v63 = vsel %vm5920_vm3, %v2251_v54, %v2255_v32 }
 0x2f3   : > { %v2141_v40 = vpop.permute.xlu1 %2140 }
 0x2f4   : > { %2303 = vrot.lane.b32.xlu2 %v10055_v11, %s5845_s30  ;;  %v2151_v31 = vpop.permute.xlu0 %2150  ;;  %2219 = vst.msk [vmem:[#allocation4 + $0x48] sm:$0xf] %vm2200_vm5, %v2141_v40  ;;  %v7971_v40 = vld [vmem:[#allocation3 + $0x4] sm:$0xf] }
 0x2f5   : > { %2224 = vst.msk [vmem:[#allocation4 + $0x5c] sm:$0xf] %vm2200_vm5, %v2151_v31 }
 0x2f6   : > { %v2149_v20 = vpop.permute.xlu2 %2148 }
 0x2f7   : > { %2223 = vst.msk [vmem:[#allocation4 + $0x58] sm:$0xf] %vm2200_vm5, %v2149_v20 }
 0x2f9   : > { %2319 = vrot.lane.b32.xlu1 %v2256_v63, %s5845_s30 }
 0x2fa   : > { %2402 = vrot.lane.b32.xlu0 %v10021_v39, %s5846_s6 }
 0x2fb   : > { %v2147_v57 = vpop.permute.xlu1 %2146 }
 0x2fc   : > { %2309 = vrot.lane.b32.xlu2 %v10019_v22, %s5845_s30  ;;  %v2157_v53 = vpop.permute.xlu0 %2156  ;;  %2222 = vst.msk [vmem:[#allocation4 + $0x54] sm:$0xf] %vm2200_vm5, %v2147_v57 }
 0x2fd   : > { %2227 = vst.msk [vmem:[#allocation4 + $0x68] sm:$0xf] %vm2200_vm5, %v2157_v53 }
 0x2fe   : > { %v2155_v50 = vpop.permute.xlu2 %2154 }
 0x2ff   : > { %2226 = vst.msk [vmem:[#allocation4 + $0x64] sm:$0xf] %vm2200_vm5, %v2155_v50  ;;  %v7973_v50 = vld [vmem:[#allocation3] sm:$0xf] }
 0x301   : > { %2398 = vrot.lane.b32.xlu1 %v7145_v43, %s5846_s6 }
 0x302   : > { %2408 = vrot.lane.b32.xlu0 %v10023_v13, %s5846_s6 }
 0x303   : > { %v2153_v58 = vpop.permute.xlu1 %2152 }
 0x304   : > { %2315 = vrot.lane.b32.xlu2 %v7541_v18, %s5845_s30  ;;  %v2163_v39 = vpop.permute.xlu0 %2162  ;;  %2225 = vst.msk [vmem:[#allocation4 + $0x60] sm:$0xf] %vm2200_vm5, %v2153_v58 }
 0x305   : > { %2230 = vst.msk [vmem:[#allocation4 + $0x74] sm:$0xf] %vm2200_vm5, %v2163_v39 }
 0x306   : > { %v2161_v22 = vpop.permute.xlu2 %2160 }
 0x307   : > { %2229 = vst.msk [vmem:[#allocation4 + $0x70] sm:$0xf] %vm2200_vm5, %v2161_v22 }
 0x309   : > { %2404 = vrot.lane.b32.xlu1 %v7171_v45, %s5846_s6 }
 0x30a   : > { %2414 = vrot.lane.b32.xlu0 %v10025_v56, %s5846_s6 }
 0x30b   : > { %v2159_v13 = vpop.permute.xlu1 %2158 }
 0x30c   : > { %2394 = vrot.lane.b32.xlu2 %v7041_v41, %s5846_s6  ;;  %v2258_v18 = vpop.permute.xlu0 %2257  ;;  %2228 = vst.msk [vmem:[#allocation4 + $0x6c] sm:$0xf] %vm2200_vm5, %v2159_v13 }
 0x30d   : > { %2354 = vst.msk [vmem:[#allocation4] sm:$0xf] %vm2353_vm6, %v2258_v18 }
 0x30e   : > { %v2167_v43 = vpop.permute.xlu2 %2166 }
 0x30f   : > { %2232 = vst.msk [vmem:[#allocation4 + $0x7c] sm:$0xf] %vm2200_vm5, %v2167_v43 }
 0x311   : > { %2410 = vrot.lane.b32.xlu1 %v7199_v29, %s5846_s6 }
 0x312   : > { %2420 = vrot.lane.b32.xlu0 %v10027_v9, %s5846_s6 }
 0x313   : > { %v2165_v45 = vpop.permute.xlu1 %2164 }
 0x314   : > { %v2264_v46 = vpop.permute.xlu0 %2263  ;;  %2400 = vrot.lane.b32.xlu2 %v7067_v27, %s5846_s6  ;;  %2231 = vst.msk [vmem:[#allocation4 + $0x78] sm:$0xf] %vm2200_vm5, %v2165_v45 }
 0x315   : > { %2357 = vst.msk [vmem:[#allocation4 + $0xc] sm:$0xf] %vm2353_vm6, %v2264_v46 }
 0x316   : > { %v2262_v41 = vpop.permute.xlu2 %2261 }
 0x317   : > { %2356 = vst.msk [vmem:[#allocation4 + $0x8] sm:$0xf] %vm2353_vm6, %v2262_v41 }
 0x319   : > { %2416 = vrot.lane.b32.xlu1 %v7226_v52, %s5846_s6 }
 0x31a   : > { %2426 = vrot.lane.b32.xlu0 %v10029_v36, %s5846_s6  ;;  %v10057_v36 = vld [vmem:[#allocation47_spill] sm:$0xff] }
 0x31b   : > { %v2260_v29 = vpop.permute.xlu1 %2259 }
 0x31c   : > { %v2270_v56 = vpop.permute.xlu0 %2269  ;;  %2406 = vrot.lane.b32.xlu2 %v10020_v0, %s5846_s6  ;;  %2355 = vst.msk [vmem:[#allocation4 + $0x4] sm:$0xf] %vm2353_vm6, %v2260_v29  ;;  %v10058_v0 = vld [vmem:[#allocation54_spill] sm:$0xff] }
 0x31d   : > { %2360 = vst.msk [vmem:[#allocation4 + $0x18] sm:$0xf] %vm2353_vm6, %v2270_v56 }
 0x31e   : > { %v2268_v27 = vpop.permute.xlu2 %2267 }
 0x31f   : > { %2359 = vst.msk [vmem:[#allocation4 + $0x14] sm:$0xf] %vm2353_vm6, %v2268_v27 }
 0x321   : > { %2422 = vrot.lane.b32.xlu1 %v10058_v0, %s5846_s6 }
 0x322   : > { %2432 = vrot.lane.b32.xlu0 %v7259_v59, %s5846_s6  ;;  %v10059_v59 = vld [vmem:[#allocation49_spill] sm:$0xff] }
 0x323   : > { %v2266_v25 = vpop.permute.xlu1 %2265 }
 0x324   : > { %v2276_v9 = vpop.permute.xlu0 %2275  ;;  %2412 = vrot.lane.b32.xlu2 %v10057_v36, %s5846_s6  ;;  %2358 = vst.msk [vmem:[#allocation4 + $0x10] sm:$0xf] %vm2353_vm6, %v2266_v25 }
 0x325   : > { %2363 = vst.msk [vmem:[#allocation4 + $0x24] sm:$0xf] %vm2353_vm6, %v2276_v9 }
 0x326   : > { %v2274_v52 = vpop.permute.xlu2 %2273 }
 0x327   : > { %2362 = vst.msk [vmem:[#allocation4 + $0x20] sm:$0xf] %vm2353_vm6, %v2274_v52 }
 0x329   : > { %2428 = vrot.lane.b32.xlu1 %v10060_v51, %s5846_s6 }
 0x32a   : > { %2438 = vrot.lane.b32.xlu0 %v7283_v19, %s5846_s6  ;;  %v10061_v19 = vld [vmem:[#allocation51_spill] sm:$0xff] }
 0x32b   : > { %v2272_v47 = vpop.permute.xlu1 %2271 }
 0x32c   : > { %v2282_v37 = vpop.permute.xlu0 %2281  ;;  %2418 = vrot.lane.b32.xlu2 %v10059_v59, %s5846_s6  ;;  %2361 = vst.msk [vmem:[#allocation4 + $0x1c] sm:$0xf] %vm2353_vm6, %v2272_v47 }
 0x32d   : > { %2366 = vst.msk [vmem:[#allocation4 + $0x30] sm:$0xf] %vm2353_vm6, %v2282_v37 }
 0x32e   : > { %v2280_v8 = vpop.permute.xlu2 %2279 }
 0x32f   : > { %2365 = vst.msk [vmem:[#allocation4 + $0x2c] sm:$0xf] %vm2353_vm6, %v2280_v8 }
 0x331   : > { %2434 = vrot.lane.b32.xlu1 %v10062_v23, %s5846_s6 }
 0x332   : > { %2444 = vrot.lane.b32.xlu0 %v7303_v1, %s5846_s6  ;;  %v10063_v1 = vld [vmem:[#allocation53_spill] sm:$0xff] }
 0x333   : > { %v2278_v33 = vpop.permute.xlu1 %2277 }
 0x334   : > { %v2288_v24 = vpop.permute.xlu0 %2287  ;;  %2424 = vrot.lane.b32.xlu2 %v10061_v19, %s5846_s6  ;;  %2364 = vst.msk [vmem:[#allocation4 + $0x28] sm:$0xf] %vm2353_vm6, %v2278_v33 }
 0x335   : > { %2369 = vst.msk [vmem:[#allocation4 + $0x3c] sm:$0xf] %vm2353_vm6, %v2288_v24 }
 0x336   : > { %v2286_v26 = vpop.permute.xlu2 %2285 }
 0x337   : > { %2368 = vst.msk [vmem:[#allocation4 + $0x38] sm:$0xf] %vm2353_vm6, %v2286_v26 }
 0x339   : > { %2440 = vrot.lane.b32.xlu1 %v10064_v17, %s5846_s6 }
 0x33a   : > { %2450 = vrot.lane.b32.xlu0 %v7660_v55, %s5846_s6  ;;  %v2653_v55 = vunpack.c.l.b16 %v2559_v30 }
 0x33b   : > { %v2284_v34 = vpop.permute.xlu1 %2283 }
 0x33c   : > { %v2294_v28 = vpop.permute.xlu0 %2293  ;;  %2430 = vrot.lane.b32.xlu2 %v10063_v1, %s5846_s6  ;;  %2367 = vst.msk [vmem:[#allocation4 + $0x34] sm:$0xf] %vm2353_vm6, %v2284_v34  ;;  %v2656_v35 = vpack.c.b16 %v2653_v55, %v2653_v55 }
 0x33d   : > { %2372 = vst.msk [vmem:[#allocation4 + $0x48] sm:$0xf] %vm2353_vm6, %v2294_v28 }
 0x33e   : > { %v2292_v6 = vpop.permute.xlu2 %2291  ;;  %v2710_v38 = vsel %vm2708_vm7, %v2656_v35, 0 }
 0x33f   : > { %2371 = vst.msk [vmem:[#allocation4 + $0x44] sm:$0xf] %vm2353_vm6, %v2292_v6  ;;  %2717 = vmatpush.bf16.msra.mxu0 %v2710_v38  ;;  %5763 = vmatpush.bf16.msra.mxu2 %v2710_v38 }
 0x341   : > { %2446 = vrot.lane.b32.xlu1 %v10065_v48, %s5846_s6 }
 0x343   : > { %v2290_v42 = vpop.permute.xlu1 %2289 }
 0x344   : > { %v2300_v15 = vpop.permute.xlu0 %2299  ;;  %2436 = vrot.lane.b32.xlu2 %v10030_v2, %s5846_s6  ;;  %2370 = vst.msk [vmem:[#allocation4 + $0x40] sm:$0xf] %vm2353_vm6, %v2290_v42  ;;  %v5744_v2 = vld [vmem:[%s9686_s1 + $0x8] sm:$0xff] }
 0x345   : > { %2375 = vst.msk [vmem:[#allocation4 + $0x54] sm:$0xf] %vm2353_vm6, %v2300_v15  ;;  %2718 = vmatpush.bf16.msra.mxu0 %v5744_v2  ;;  %5764 = vmatpush.bf16.msra.mxu2 %v5744_v2  ;;  %v2389_v2 = vrot.slane %v7763_v12, 5  ;;  %v8031_v12 = vld [vmem:[%s9687_s2] ss:$0 sm:$0xff] }
 0x346   : > { %v2298_v60 = vpop.permute.xlu2 %2297 }
 0x347   : > { %2374 = vst.msk [vmem:[#allocation4 + $0x50] sm:$0xf] %vm2353_vm6, %v2298_v60 }
 0x349   : > { %2452 = vrot.lane.b32.xlu1 %v7627_v3, %s5846_s6  ;;  %2719 = vmatpush.bf16.msra.mxu0 %v5743_v7 }
 0x34a   : > { %5765 = vmatpush.bf16.msra.mxu2 %v5743_v7  ;;  %v3442_v7 = vshll.u32 %v7973_v50, 16 }
 0x34b   : > { %v2296_v62 = vpop.permute.xlu1 %2295 }
 0x34c   : > { %v2306_v14 = vpop.permute.xlu0 %2305  ;;  %2442 = vrot.lane.b32.xlu2 %v10031_v21, %s5846_s6  ;;  %2373 = vst.msk [vmem:[#allocation4 + $0x4c] sm:$0xf] %vm2353_vm6, %v2296_v62  ;;  %v2391_v62 = vrot.slane %v2389_v2, 4 }
 0x34d   : > { %2378 = vst.msk [vmem:[#allocation4 + $0x60] sm:$0xf] %vm2353_vm6, %v2306_v14 }
 0x34e   : > { %v2304_v16 = vpop.permute.xlu2 %2303 }
 0x34f   : > { %2377 = vst.msk [vmem:[#allocation4 + $0x5c] sm:$0xf] %vm2353_vm6, %v2304_v16  ;;  %v3439_v16 = vshrl.u32 %v7973_v50, 16 }
 0x353   : > { %v2302_v3 = vpop.permute.xlu1 %2301 }
 0x354   : > { %v2312_v11 = vpop.permute.xlu0 %2311  ;;  %2448 = vrot.lane.b32.xlu2 %v10032_v4, %s5846_s6  ;;  %2376 = vst.msk [vmem:[#allocation4 + $0x58] sm:$0xf] %vm2353_vm6, %v2302_v3  ;;  %v3444_v3 = vrot.slane %v3442_v7, 5 }
 0x355   : > { %2381 = vst.msk [vmem:[#allocation4 + $0x6c] sm:$0xf] %vm2353_vm6, %v2312_v11  ;;  %v2392_v11 = vrot.slane %v7841_v49, 5  ;;  %v5528_v49 = vrot.slane %v7743_v5, 9 }
 0x356   : > { %v2310_v21 = vpop.permute.xlu2 %2309 }
 0x357   : > { %2380 = vst.msk [vmem:[#allocation4 + $0x68] sm:$0xf] %vm2353_vm6, %v2310_v21  ;;  %v3441_v21 = vrot.slane %v3439_v16, 4 }
 0x35b   : > { %v2308_v20 = vpop.permute.xlu1 %2307 }
 0x35c   : > { %v2318_v31 = vpop.permute.xlu0 %2317  ;;  %2379 = vst.msk [vmem:[#allocation4 + $0x64] sm:$0xf] %vm2353_vm6, %v2308_v20  ;;  %v3448_v20 = vshll.u32 %v7971_v40, 16 }
 0x35d   : > { %2384 = vst.msk [vmem:[#allocation4 + $0x78] sm:$0xf] %vm2353_vm6, %v2318_v31  ;;  %v2393_v31 = vsel %vm6995_vm13, %v2391_v62, %v2392_v11 }
 0x35e   : > { %v2316_v61 = vpop.permute.xlu2 %2315  ;;  %2456 = vrot.lane.b32.xlu0 %v2393_v31, %s5846_s6 }
 0x35f   : > { %2383 = vst.msk [vmem:[#allocation4 + $0x74] sm:$0xf] %vm2353_vm6, %v2316_v61  ;;  %v3445_v61 = vor.u32 %v3444_v3, %v3441_v21  ;;  %v3247_v3 = vld [vmem:[#allocation3 + $0x18] sm:$0xf] }
 0x363   : > { %v2314_v32 = vpop.permute.xlu1 %2313 }
 0x364   : > { %v2397_v54 = vpop.permute.xlu0 %2396  ;;  %2382 = vst.msk [vmem:[#allocation4 + $0x70] sm:$0xf] %vm2353_vm6, %v2314_v32 }
 0x365   : > { %2492 = vst.msk [vmem:[#allocation4 + $0x4] sm:$0xf] %vm2490_vm11, %v2397_v54  ;;  %v3446_v54 = vrot.slane %v3445_v61, 4 }
 0x366   : > { %v2395_v4 = vpop.permute.xlu2 %2394 }
 0x367   : > { %2491 = vst.msk [vmem:[#allocation4] sm:$0xf] %vm2490_vm11, %v2395_v4  ;;  %v3450_v4 = vrot.slane %v3448_v20, 5 }
 0x36b   : > { %v2320_v22 = vpop.permute.xlu1 %2319 }
 0x36c   : > { %v5727_v63 = vld [vmem:[#allocation4] sm:$0xf0]  ;;  %v2403_v53 = vpop.permute.xlu0 %2402  ;;  %2385 = vst.msk [vmem:[#allocation4 + $0x7c] sm:$0xf] %vm2353_vm6, %v2320_v22  ;;  %v3452_v22 = vshrl.u32 %v7971_v40, 16 }
 0x36d   : > { %3407 = vst.msk [vmem:[#allocation4 + $0x4] sm:$0xf] %vm258_vm0, %v7971_v40 }
 0x36e   : > { %v5531_v57 = vld [vmem:[#allocation4] sm:$0xf]  ;;  %v2401_v39 = vpop.permute.xlu2 %2400  ;;  %2495 = vst.msk [vmem:[#allocation4 + $0x10] sm:$0xf] %vm2490_vm11, %v2403_v53 }
 0x36f   : > { %3406 = vst.msk [vmem:[#allocation4] sm:$0xf] %vm258_vm0, %v7973_v50  ;;  %v5532_v58 = vor.u32 %v5727_v63, %v5531_v57  ;;  %v3451_v63 = vsel %vm5920_vm3, %v3446_v54, %v3450_v4 }
 0x370   : > { %2494 = vst.msk [vmem:[#allocation4 + $0xc] sm:$0xf] %vm2490_vm11, %v2401_v39  ;;  %3822 = vrot.lane.b32.xlu1 %v3451_v63, %s5839_s20  ;;  %v2390_v39 = vsel %vm6995_vm13, %v5528_v49, %v2389_v2 }
 0x371   : > { %5601 = vmatmul.msk.bf16.vlgmr.msra.gmra.mxu0 %vm2659_vm12, %v5532_v58  ;;  %2454 = vrot.lane.b32.xlu2 %v2390_v39, %s5846_s6 }
 0x373   : > { %v2399_v13 = vpop.permute.xlu1 %2398 }
 0x374   : > { %v2409_v18 = vpop.permute.xlu0 %2408  ;;  %2493 = vst.msk [vmem:[#allocation4 + $0x8] sm:$0xf] %vm2490_vm11, %v2399_v13 }
 0x375   : > { %2498 = vst.msk [vmem:[#allocation4 + $0x1c] sm:$0xf] %vm2490_vm11, %v2409_v18  ;;  %v3454_v18 = vrot.slane %v3452_v22, 4 }
 0x376   : > { %v2407_v43 = vpop.permute.xlu2 %2406 }
 0x377   : > { %2497 = vst.msk [vmem:[#allocation4 + $0x18] sm:$0xf] %vm2490_vm11, %v2407_v43 }
 0x37b   : > { %v2405_v45 = vpop.permute.xlu1 %2404  ;;  %v5728_v56 = vld [vmem:[#allocation4 + $0x8] sm:$0xff] }
 0x37c   : > { %v2415_v46 = vpop.permute.xlu0 %2414  ;;  %2496 = vst.msk [vmem:[#allocation4 + $0x14] sm:$0xf] %vm2490_vm11, %v2405_v45  ;;  %v3455_v45 = vor.u32 %v3454_v18, %v3450_v4 }
 0x37d   : > { %2501 = vst.msk [vmem:[#allocation4 + $0x28] sm:$0xf] %vm2490_vm11, %v2415_v46  ;;  %v3354_v46 = vld [vmem:[#allocation3 + $0x8] sm:$0x1] }
 0x37e   : > { %v2413_v41 = vpop.permute.xlu2 %2412  ;;  %v5730_v24 = vld [vmem:[#allocation4 + $0x18] sm:$0xff] }
 0x37f   : > { %2500 = vst.msk [vmem:[#allocation4 + $0x24] sm:$0xf] %vm2490_vm11, %v2413_v41 }
 0x381   : > { %5602 = vmatmul.msk.bf16.gmra.mxu0 %vm2659_vm12, %v5728_v56  ;;  %v3458_v56 = vshll.u32 %v3354_v46, 16 }
 0x383   : > { %v2411_v9 = vpop.permute.xlu1 %2410  ;;  %v5729_v25 = vld [vmem:[#allocation4 + $0x10] sm:$0xff] }
 0x384   : > { %v2421_v27 = vpop.permute.xlu0 %2420  ;;  %2499 = vst.msk [vmem:[#allocation4 + $0x20] sm:$0xf] %vm2490_vm11, %v2411_v9  ;;  %v3240_v9 = vld [vmem:[#allocation3 + $0xc] sm:$0xf] }
 0x385   : > { %2504 = vst.msk [vmem:[#allocation4 + $0x34] sm:$0xf] %vm2490_vm11, %v2421_v27 }
 0x386   : > { %v2419_v29 = vpop.permute.xlu2 %2418 }
 0x387   : > { %2503 = vst.msk [vmem:[#allocation4 + $0x30] sm:$0xf] %vm2490_vm11, %v2419_v29 }
 0x38b   : > { %v2417_v52 = vpop.permute.xlu1 %2416  ;;  %v5731_v33 = vld [vmem:[#allocation4 + $0x20] sm:$0xff] }
 0x38c   : > { %v2427_v36 = vpop.permute.xlu0 %2426  ;;  %2502 = vst.msk [vmem:[#allocation4 + $0x2c] sm:$0xf] %vm2490_vm11, %v2417_v52 }
 0x38d   : > { %2507 = vst.msk [vmem:[#allocation4 + $0x40] sm:$0xf] %vm2490_vm11, %v2427_v36  ;;  %v3456_v36 = vrot.slane %v3455_v45, 4 }
 0x38e   : > { %v2425_v0 = vpop.permute.xlu2 %2424  ;;  %v5733_v35 = vld [vmem:[#allocation4 + $0x30] sm:$0xff] }
 0x38f   : > { %2506 = vst.msk [vmem:[#allocation4 + $0x3c] sm:$0xf] %vm2490_vm11, %v2425_v0  ;;  %v3460_v0 = vrot.slane %v3458_v56, 5 }
 0x391   : > { %5603 = vmatmul.msk.bf16.gmra.mxu0 %vm2659_vm12, %v5729_v25 }
 0x393   : > { %v2423_v51 = vpop.permute.xlu1 %2422  ;;  %v5732_v34 = vld [vmem:[#allocation4 + $0x28] sm:$0xff] }
 0x394   : > { %v2433_v37 = vpop.permute.xlu0 %2432  ;;  %2505 = vst.msk [vmem:[#allocation4 + $0x38] sm:$0xf] %vm2490_vm11, %v2423_v51 }
 0x395   : > { %2510 = vst.msk [vmem:[#allocation4 + $0x4c] sm:$0xf] %vm2490_vm11, %v2433_v37  ;;  %v3461_v37 = vsel %vm5920_vm3, %v3456_v36, %v3460_v0 }
 0x396   : > { %v2431_v59 = vpop.permute.xlu2 %2430  ;;  %3824 = vrot.lane.b32.xlu2 %v3461_v37, %s5839_s20 }
 0x397   : > { %2509 = vst.msk [vmem:[#allocation4 + $0x48] sm:$0xf] %vm2490_vm11, %v2431_v59 }
 0x39b   : > { %v2429_v47 = vpop.permute.xlu1 %2428  ;;  %v5734_v60 = vld [vmem:[#allocation4 + $0x38] sm:$0xff] }
 0x39c   : > { %2508 = vst.msk [vmem:[#allocation4 + $0x44] sm:$0xf] %vm2490_vm11, %v2429_v47  ;;  %v2439_v26 = vpop.permute.xlu0 %2438 }
 0x39d   : > { %2513 = vst.msk [vmem:[#allocation4 + $0x58] sm:$0xf] %vm2490_vm11, %v2439_v26 }
 0x39e   : > { %v2437_v8 = vpop.permute.xlu2 %2436  ;;  %v5736_v1 = vld [vmem:[#allocation4 + $0x48] sm:$0xff] }
 0x39f   : > { %2512 = vst.msk [vmem:[#allocation4 + $0x54] sm:$0xf] %vm2490_vm11, %v2437_v8 }
 0x3a1   : > { %5604 = vmatmul.msk.bf16.gmra.mxu0 %vm2659_vm12, %v5730_v24 }
 0x3a3   : > { %v5735_v19 = vld [vmem:[#allocation4 + $0x40] sm:$0xff]  ;;  %v2435_v23 = vpop.permute.xlu1 %2434 }
 0x3a4   : > { %2511 = vst.msk [vmem:[#allocation4 + $0x50] sm:$0xf] %vm2490_vm11, %v2435_v23  ;;  %5609 = vmatmul.msk.bf16.vlgmr.msra.gmra.mxu2 %vm2659_vm12, %v5735_v19  ;;  %v2445_v6 = vpop.permute.xlu0 %2444 }
 0x3a5   : > { %2516 = vst.msk [vmem:[#allocation4 + $0x64] sm:$0xf] %vm2490_vm11, %v2445_v6 }
 0x3a6   : > { %v2443_v17 = vpop.permute.xlu2 %2442 }
 0x3a7   : > { %2515 = vst.msk [vmem:[#allocation4 + $0x60] sm:$0xf] %vm2490_vm11, %v2443_v17 }
 0x3ab   : > { %v2441_v28 = vpop.permute.xlu1 %2440  ;;  %v5737_v30 = vld [vmem:[#allocation4 + $0x50] sm:$0xff] }
 0x3ac   : > { %2514 = vst.msk [vmem:[#allocation4 + $0x5c] sm:$0xf] %vm2490_vm11, %v2441_v28  ;;  %v2451_v42 = vpop.permute.xlu0 %2450  ;;  %v3244_v28 = vld [vmem:[#allocation3 + $0x14] sm:$0x1] }
 0x3ad   : > { %2519 = vst.msk [vmem:[#allocation4 + $0x70] sm:$0xf] %vm2490_vm11, %v2451_v42 }
 0x3ae   : > { %v2449_v55 = vpop.permute.xlu2 %2448  ;;  %v5739_v14 = vld [vmem:[#allocation4 + $0x60] sm:$0xff] }
 0x3af   : > { %2518 = vst.msk [vmem:[#allocation4 + $0x6c] sm:$0xf] %vm2490_vm11, %v2449_v55 }
 0x3b1   : > { %5605 = vmatmul.msk.bf16.gmra.mxu0 %vm2659_vm12, %v5731_v33 }
 0x3b3   : > { %v2447_v15 = vpop.permute.xlu1 %2446  ;;  %v5738_v48 = vld [vmem:[#allocation4 + $0x58] sm:$0xff] }
 0x3b4   : > { %5610 = vmatmul.msk.bf16.gmra.mxu2 %vm2659_vm12, %v5736_v1  ;;  %2517 = vst.msk [vmem:[#allocation4 + $0x68] sm:$0xf] %vm2490_vm11, %v2447_v15 }
 0x3bb   : > { %v2453_v38 = vpop.permute.xlu1 %2452  ;;  %v5740_v13 = vld [vmem:[#allocation4 + $0x68] sm:$0xff] }
 0x3bc   : > { %2520 = vst.msk [vmem:[#allocation4 + $0x74] sm:$0xf] %vm2490_vm11, %v2453_v38 }
 0x3c1   : > { %5606 = vmatmul.msk.bf16.gmra.mxu0 %vm2659_vm12, %v5732_v34 }
 0x3c3   : > { %v5741_v2 = vld [vmem:[#allocation4 + $0x70] sm:$0xff] }
 0x3c4   : > { %5611 = vmatmul.msk.bf16.gmra.mxu2 %vm2659_vm12, %v5737_v30 }
 0x3d1   : > { %5607 = vmatmul.msk.bf16.gmra.mxu0 %vm2659_vm12, %v5733_v35 }
 0x3d4   : > { %5612 = vmatmul.msk.bf16.gmra.mxu2 %vm2659_vm12, %v5738_v48 }
 0x3e1   : > { %5608 = vmatmul.msk.bf16.gmra.mxu0 %vm2659_vm12, %v5734_v60 }
 0x3e4   : > { %5613 = vmatmul.msk.bf16.gmra.mxu2 %vm2659_vm12, %v5739_v14 }
 0x3ee   : > { %v2721_v32 = vpop.f32.mrf.mxu0 }
 0x3ef   : > { %v2722_v53 = vadd.f32 %v8031_v12, %v2721_v32 }
 0x3f1   : > { %v2801_v57 = vmax.f32 %v2722_v53, 0.0 }
 0x3f3   : > { %v2887_v58 = vpack.c.bf16 %v2801_v57, %v2801_v57 }
 0x3f4   : > { %5614 = vmatmul.msk.bf16.gmra.mxu2 %vm2659_vm12, %v5740_v13 }
 0x3f5   : > { %v2920_v43 = vshrl.u32 %v2887_v58, 16  ;;  %v2923_v5 = vshll.u32 %v2887_v58, 16 }
 0x3f6   : > { %v2723_v41 = vpop.f32.mrf.mxu0 }
 0x3f7   : > { %v2922_v27 = vrot.slane %v2920_v43, 7  ;;  %v2724_v29 = vadd.f32 %v8031_v12, %v2723_v41  ;;  %v3251_v41 = vld [vmem:[#allocation3 + $0x20] sm:$0x1] }
 0x3f9   : > { %v2925_v52 = vor.u32 %v2923_v5, %v2922_v27  ;;  %v2802_v25 = vmax.f32 %v2724_v29, 0.0  ;;  %v2926_v19 = vrot.slane %v2922_v27, 4 }
 0x3fb   : > { %v3241_v51 = vsel %vm6160_vm8, %v2925_v52, %v3240_v9  ;;  %v2888_v8 = vpack.c.bf16 %v2802_v25, %v2802_v25 }
 0x3fc   : > { %3242 = vst [vmem:[#allocation3 + $0xc] sm:$0xf] %v3241_v51 }
 0x3fd   : > { %v2928_v47 = vshrl.u32 %v2888_v8, 16  ;;  %v2931_v26 = vshll.u32 %v2888_v8, 16 }
 0x3fe   : > { %v2726_v24 = vpop.f32.mrf.mxu0 }
 0x3ff   : > { %v2930_v23 = vrot.slane %v2928_v47, 7  ;;  %v2727_v33 = vadd.f32 %v8031_v12, %v2726_v24 }
 0x401   : > { %v2933_v1 = vor.u32 %v2931_v26, %v2930_v23  ;;  %v2935_v17 = vrot.slane %v2930_v23, 4  ;;  %v2803_v6 = vmax.f32 %v2727_v33, 0.0 }
 0x403   : > { %v2934_v30 = vsel %vm6174_vm9, %v2926_v19, %v2933_v1  ;;  %v3245_v15 = vsel %vm6213_vm10, %v2935_v17, %v3244_v28  ;;  %v2889_v35 = vpack.c.bf16 %v2803_v6, %v2803_v6  ;;  %v8055_v48 = vld [vmem:[#allocation3 + $0xc] sm:$0xf] }
 0x404   : > { %3243 = vst.msk [vmem:[#allocation3 + $0x10] sm:$0xf] %vm258_vm0, %v2934_v30  ;;  %v3463_v60 = vshrl.u32 %v8055_v48, 16  ;;  %v3466_v42 = vshll.u32 %v8055_v48, 16  ;;  %5615 = vmatmul.msk.bf16.gmra.mxu2 %vm2659_vm12, %v5741_v2  ;;  %v3254_v30 = vld [vmem:[#allocation3 + $0x24] sm:$0xf] }
 0x405   : > { %3246 = vst [vmem:[#allocation3 + $0x14] sm:$0x1] %v3245_v15  ;;  %v2937_v38 = vshrl.u32 %v2889_v35, 16  ;;  %v2940_v11 = vshll.u32 %v2889_v35, 16 }
 0x406   : > { %v2728_v14 = vpop.f32.mrf.mxu0  ;;  %v3465_v16 = vrot.slane %v3463_v60, 4  ;;  %v3468_v7 = vrot.slane %v3466_v42, 5  ;;  %3408 = vst.msk [vmem:[#allocation4 + $0x8] sm:$0xf] %vm258_vm0, %v8055_v48 }
 0x407   : > { %v2939_v62 = vrot.slane %v2937_v38, 7  ;;  %v2729_v21 = vadd.f32 %v8031_v12, %v2728_v14 }
 0x408   : > { %v3469_v31 = vor.u32 %v3468_v7, %v3465_v16 }
 0x409   : > { %v2942_v61 = vor.u32 %v2940_v11, %v2939_v62  ;;  %v2804_v20 = vmax.f32 %v2729_v21, 0.0  ;;  %v2943_v27 = vrot.slane %v2939_v62, 4 }
 0x40a   : > { %v3470_v32 = vrot.slane %v3469_v31, 4 }
 0x40b   : > { %v3248_v54 = vsel %vm6160_vm8, %v2942_v61, %v3247_v3  ;;  %v2890_v4 = vpack.c.bf16 %v2804_v20, %v2804_v20  ;;  %v8066_v49 = vld [vmem:[#allocation3 + $0x10] sm:$0xf] }
 0x40c   : > { %3249 = vst [vmem:[#allocation3 + $0x18] sm:$0xf] %v3248_v54  ;;  %v3472_v63 = vshll.u32 %v8066_v49, 16  ;;  %v3357_v53 = vld [vmem:[#allocation3 + $0x14] sm:$0x1]  ;;  %v3476_v57 = vshrl.u32 %v8066_v49, 16 }
 0x40d   : > { %v2945_v39 = vshrl.u32 %v2890_v4, 16  ;;  %3409 = vst.msk [vmem:[#allocation4 + $0xc] sm:$0xf] %vm258_vm0, %v8066_v49  ;;  %v3482_v43 = vshll.u32 %v3357_v53, 16  ;;  %v2948_v13 = vshll.u32 %v2890_v4, 16 }
 0x40e   : > { %v2731_v22 = vpop.f32.mrf.mxu0  ;;  %v3474_v58 = vrot.slane %v3472_v63, 5  ;;  %v3478_v18 = vrot.slane %v3476_v57, 4 }
 0x40f   : > { %v2947_v5 = vrot.slane %v2945_v39, 7  ;;  %v2732_v46 = vadd.f32 %v8031_v12, %v2731_v22  ;;  %v3484_v52 = vrot.slane %v3482_v43, 5 }
 0x410   : > { %v8075_v45 = vsel %vm5920_vm3, %v3470_v32, %v3474_v58  ;;  %v3479_v56 = vor.u32 %v3478_v18, %v3474_v58  ;;  %v3258_v32 = vld [vmem:[#allocation3 + $0x2c] sm:$0x1] }
 0x411   : > { %10069 = vst [vmem:[#allocation11_spill] sm:$0xff] %v8075_v45  ;;  %v2950_v29 = vor.u32 %v2948_v13, %v2947_v5  ;;  %v2952_v9 = vrot.slane %v2947_v5, 4  ;;  %v2805_v36 = vmax.f32 %v2732_v46, 0.0  ;;  %3826 = vrot.lane.b32.xlu0 %v8075_v45, %s5839_s20 }
 0x412   : > { %v3480_v0 = vrot.slane %v3479_v56, 4 }
 0x413   : > { %v2951_v25 = vsel %vm6174_vm9, %v2943_v27, %v2950_v29  ;;  %v3252_v37 = vsel %vm6213_vm10, %v2952_v9, %v3251_v41  ;;  %v2891_v51 = vpack.c.bf16 %v2805_v36, %v2805_v36  ;;  %v8083_v8 = vld [vmem:[#allocation3 + $0x18] sm:$0xf] }
 0x414   : > { %3250 = vst.msk [vmem:[#allocation3 + $0x1c] sm:$0xf] %vm258_vm0, %v2951_v25  ;;  %v8088_v47 = vsel %vm5920_vm3, %v3480_v0, %v3484_v52  ;;  %v3487_v24 = vshrl.u32 %v8083_v8, 16  ;;  %v3490_v19 = vshll.u32 %v8083_v8, 16 }
 0x415   : > { %10070 = vst [vmem:[#allocation16_spill] sm:$0xff] %v8088_v47  ;;  %v2954_v23 = vshrl.u32 %v2891_v51, 16  ;;  %3828 = vrot.lane.b32.xlu1 %v8088_v47, %s5839_s20  ;;  %v2957_v17 = vshll.u32 %v2891_v51, 16 }
 0x416   : > { %3253 = vst [vmem:[#allocation3 + $0x20] sm:$0x1] %v3252_v37  ;;  %v2733_v26 = vpop.f32.mrf.mxu0  ;;  %v3489_v33 = vrot.slane %v3487_v24, 4  ;;  %v3492_v28 = vrot.slane %v3490_v19, 5  ;;  %v3261_v24 = vld [vmem:[#allocation3 + $0x30] sm:$0xf] }
 0x417   : > { %3410 = vst.msk [vmem:[#allocation4 + $0x10] sm:$0xf] %vm258_vm0, %v8083_v8  ;;  %v2956_v1 = vrot.slane %v2954_v23, 7  ;;  %v2734_v6 = vadd.f32 %v8031_v12, %v2733_v26 }
 0x418   : > { %v3493_v60 = vor.u32 %v3492_v28, %v3489_v33 }
 0x419   : > { %v2959_v15 = vor.u32 %v2957_v17, %v2956_v1  ;;  %v2806_v35 = vmax.f32 %v2734_v6, 0.0  ;;  %v2960_v57 = vrot.slane %v2956_v1, 4 }
 0x41a   : > { %v3494_v21 = vrot.slane %v3493_v60, 4 }
 0x41b   : > { %v3255_v42 = vsel %vm6160_vm8, %v2959_v15, %v3254_v30  ;;  %v2892_v38 = vpack.c.bf16 %v2806_v35, %v2806_v35  ;;  %v8099_v2 = vld [vmem:[#allocation3 + $0x1c] sm:$0xf] }
 0x41c   : > { %3256 = vst [vmem:[#allocation3 + $0x24] sm:$0xf] %v3255_v42  ;;  %v3496_v14 = vshll.u32 %v8099_v2, 16  ;;  %v3500_v7 = vshrl.u32 %v8099_v2, 16 }
 0x41d   : > { %v3360_v16 = vld [vmem:[#allocation3 + $0x20] sm:$0x1]  ;;  %v2962_v62 = vshrl.u32 %v2892_v38, 16  ;;  %3411 = vst.msk [vmem:[#allocation4 + $0x14] sm:$0xf] %vm258_vm0, %v8099_v2  ;;  %v2965_v54 = vshll.u32 %v2892_v38, 16 }
 0x41e   : > { %v2736_v11 = vpop.f32.mrf.mxu0  ;;  %v3498_v3 = vrot.slane %v3496_v14, 5  ;;  %v3502_v31 = vrot.slane %v3500_v7, 4  ;;  %v3506_v61 = vshll.u32 %v3360_v16, 16 }
 0x41f   : > { %v2964_v20 = vrot.slane %v2962_v62, 7  ;;  %v2737_v4 = vadd.f32 %v8031_v12, %v2736_v11 }
 0x420   : > { %v8108_v63 = vsel %vm5920_vm3, %v3494_v21, %v3498_v3  ;;  %v3503_v53 = vor.u32 %v3502_v31, %v3498_v3  ;;  %v3508_v43 = vrot.slane %v3506_v61, 5  ;;  %v3265_v61 = vld [vmem:[#allocation3 + $0x38] sm:$0x1] }
 0x421   : > { %10071 = vst [vmem:[#allocation26_spill] sm:$0xff] %v8108_v63  ;;  %v2967_v39 = vor.u32 %v2965_v54, %v2964_v20  ;;  %v2969_v22 = vrot.slane %v2964_v20, 4  ;;  %v2807_v58 = vmax.f32 %v2737_v4, 0.0  ;;  %3830 = vrot.lane.b32.xlu2 %v8108_v63, %s5839_s20 }
 0x422   : > { %v3504_v18 = vrot.slane %v3503_v53, 4 }
 0x423   : > { %v2968_v5 = vsel %vm6174_vm9, %v2960_v57, %v2967_v39  ;;  %v3259_v13 = vsel %vm6213_vm10, %v2969_v22, %v3258_v32  ;;  %v2893_v46 = vpack.c.bf16 %v2807_v58, %v2807_v58  ;;  %v8116_v41 = vld [vmem:[#allocation3 + $0x24] sm:$0xf] }
 0x424   : > { %3257 = vst.msk [vmem:[#allocation3 + $0x28] sm:$0xf] %vm258_vm0, %v2968_v5  ;;  %v8121_v56 = vsel %vm5920_vm3, %v3504_v18, %v3508_v43  ;;  %v3511_v27 = vshrl.u32 %v8116_v41, 16  ;;  %v3514_v29 = vshll.u32 %v8116_v41, 16 }
 0x425   : > { %10072 = vst [vmem:[#allocation38_spill] sm:$0xff] %v8121_v56  ;;  %v2971_v9 = vshrl.u32 %v2893_v46, 16  ;;  %3832 = vrot.lane.b32.xlu0 %v8121_v56, %s5839_s20  ;;  %v2974_v37 = vshll.u32 %v2893_v46, 16 }
 0x426   : > { %3260 = vst [vmem:[#allocation3 + $0x2c] sm:$0x1] %v3259_v13  ;;  %v2738_v36 = vpop.f32.mrf.mxu0  ;;  %v3513_v0 = vrot.slane %v3511_v27, 4  ;;  %v3516_v52 = vrot.slane %v3514_v29, 5 }
 0x427   : > { %3412 = vst.msk [vmem:[#allocation4 + $0x18] sm:$0xf] %vm258_vm0, %v8116_v41  ;;  %v2973_v25 = vrot.slane %v2971_v9, 7  ;;  %v2739_v51 = vadd.f32 %v8031_v12, %v2738_v36  ;;  %v2761_v17 = vpop.f32.mrf.mxu2 }
 0x428   : > { %v3517_v26 = vor.u32 %v3516_v52, %v3513_v0  ;;  %v2762_v60 = vadd.f32 %v8031_v12, %v2761_v17  ;;  %v3296_v52 = vld [vmem:[#allocation3 + $0x6c] sm:$0xf] }
 0x429   : > { %v2976_v19 = vor.u32 %v2974_v37, %v2973_v25  ;;  %v2808_v23 = vmax.f32 %v2739_v51, 0.0  ;;  %v2977_v31 = vrot.slane %v2973_v25, 4 }
 0x42a   : > { %v3518_v38 = vrot.slane %v3517_v26, 4  ;;  %v2817_v21 = vmax.f32 %v2762_v60, 0.0 }
 0x42b   : > { %v3262_v33 = vsel %vm6160_vm8, %v2976_v19, %v3261_v24  ;;  %v2894_v28 = vpack.c.bf16 %v2808_v23, %v2808_v23  ;;  %v8132_v1 = vld [vmem:[#allocation3 + $0x28] sm:$0xf] }
 0x42c   : > { %3263 = vst [vmem:[#allocation3 + $0x30] sm:$0xf] %v3262_v33  ;;  %v3520_v6 = vshll.u32 %v8132_v1, 16  ;;  %v3524_v15 = vshrl.u32 %v8132_v1, 16  ;;  %v2903_v53 = vpack.c.bf16 %v2817_v21, %v2817_v21 }
 0x42d   : > { %v3363_v30 = vld [vmem:[#allocation3 + $0x2c] sm:$0x1]  ;;  %v2979_v35 = vshrl.u32 %v2894_v28, 16  ;;  %3413 = vst.msk [vmem:[#allocation4 + $0x1c] sm:$0xf] %vm258_vm0, %v8132_v1  ;;  %v2982_v11 = vshll.u32 %v2894_v28, 16 }
 0x42e   : > { %v2741_v42 = vpop.f32.mrf.mxu0  ;;  %v3522_v14 = vrot.slane %v3520_v6, 5  ;;  %v3526_v16 = vrot.slane %v3524_v15, 4  ;;  %v3530_v7 = vshll.u32 %v3363_v30, 16  ;;  %v3056_v43 = vshrl.u32 %v2903_v53, 16  ;;  %v3268_v15 = vld [vmem:[#allocation3 + $0x3c] sm:$0xf] }
 0x42f   : > { %v2981_v62 = vrot.slane %v2979_v35, 7  ;;  %v2742_v3 = vadd.f32 %v8031_v12, %v2741_v42  ;;  %v2763_v46 = vpop.f32.mrf.mxu2  ;;  %v3059_v0 = vshll.u32 %v2903_v53, 16 }
 0x430   : > { %v8142_v20 = vsel %vm5920_vm3, %v3518_v38, %v3522_v14  ;;  %v3527_v54 = vor.u32 %v3526_v16, %v3522_v14  ;;  %v3532_v22 = vrot.slane %v3530_v7, 5  ;;  %v3058_v36 = vrot.slane %v3056_v43, 7 }
 0x431   : > { %10073 = vst [vmem:[#allocation39_spill] sm:$0xff] %v8142_v20  ;;  %v2984_v4 = vor.u32 %v2982_v11, %v2981_v62  ;;  %v2986_v32 = vrot.slane %v2981_v62, 4  ;;  %v2809_v57 = vmax.f32 %v2742_v3, 0.0  ;;  %3834 = vrot.lane.b32.xlu1 %v8142_v20, %s5839_s20  ;;  %v2764_v25 = vadd.f32 %v8031_v12, %v2763_v46 }
 0x432   : > { %v3528_v39 = vrot.slane %v3527_v54, 4  ;;  %v3061_v23 = vor.u32 %v3059_v0, %v3058_v36  ;;  %v3062_v38 = vrot.slane %v3058_v36, 4  ;;  %v3272_v0 = vld [vmem:[#allocation3 + $0x44] sm:$0x1] }
 0x433   : > { %v2985_v58 = vsel %vm6174_vm9, %v2977_v31, %v2984_v4  ;;  %v3266_v18 = vsel %vm6213_vm10, %v2986_v32, %v3265_v61  ;;  %v8150_v5 = vld [vmem:[#allocation3 + $0x30] sm:$0xf]  ;;  %v2895_v13 = vpack.c.bf16 %v2809_v57, %v2809_v57  ;;  %v2818_v26 = vmax.f32 %v2764_v25, 0.0  ;;  %v3300_v57 = vld [vmem:[#allocation3 + $0x74] sm:$0x1] }
 0x434   : > { %3264 = vst.msk [vmem:[#allocation3 + $0x34] sm:$0xf] %vm258_vm0, %v2985_v58  ;;  %v8155_v27 = vsel %vm5920_vm3, %v3528_v39, %v3532_v22  ;;  %v3535_v29 = vshrl.u32 %v8150_v5, 16  ;;  %v3538_v9 = vshll.u32 %v8150_v5, 16  ;;  %v3297_v30 = vsel %vm6160_vm8, %v3061_v23, %v3296_v52 }
 0x435   : > { %10074 = vst [vmem:[#allocation46_spill] sm:$0xff] %v8155_v27  ;;  %3836 = vrot.lane.b32.xlu2 %v8155_v27, %s5839_s20  ;;  %v2988_v37 = vshrl.u32 %v2895_v13, 16  ;;  %v2991_v17 = vshll.u32 %v2895_v13, 16  ;;  %v2904_v35 = vpack.c.bf16 %v2818_v26, %v2818_v26 }
 0x436   : > { %3267 = vst [vmem:[#allocation3 + $0x38] sm:$0x1] %v3266_v18  ;;  %v2743_v51 = vpop.f32.mrf.mxu0  ;;  %v3537_v24 = vrot.slane %v3535_v29, 4  ;;  %v3540_v19 = vrot.slane %v3538_v9, 5 }
 0x437   : > { %3414 = vst.msk [vmem:[#allocation4 + $0x20] sm:$0xf] %vm258_vm0, %v8150_v5  ;;  %v2744_v33 = vadd.f32 %v8031_v12, %v2743_v51  ;;  %v2990_v28 = vrot.slane %v2988_v37, 7  ;;  %v3064_v14 = vshrl.u32 %v2904_v35, 16  ;;  %v2766_v21 = vpop.f32.mrf.mxu2  ;;  %v3067_v4 = vshll.u32 %v2904_v35, 16 }
 0x438   : > { %v3541_v6 = vor.u32 %v3540_v19, %v3537_v24  ;;  %3298 = vst [vmem:[#allocation3 + $0x6c] sm:$0xf] %v3297_v30  ;;  %v2767_v53 = vadd.f32 %v8031_v12, %v2766_v21 }
 0x439   : > { %v2810_v60 = vmax.f32 %v2744_v33, 0.0  ;;  %v2993_v42 = vor.u32 %v2991_v17, %v2990_v28  ;;  %v3066_v54 = vrot.slane %v3064_v14, 7  ;;  %v2994_v36 = vrot.slane %v2990_v28, 4 }
 0x43a   : > { %v3542_v62 = vrot.slane %v3541_v6, 4  ;;  %v2819_v9 = vmax.f32 %v2767_v53, 0.0 }
 0x43b   : > { %v2896_v16 = vpack.c.bf16 %v2810_v60, %v2810_v60  ;;  %v8167_v7 = vld [vmem:[#allocation3 + $0x34] sm:$0xf]  ;;  %v3269_v11 = vsel %vm6160_vm8, %v2993_v42, %v3268_v15  ;;  %v3069_v13 = vor.u32 %v3067_v4, %v3066_v54  ;;  %v3071_v46 = vrot.slane %v3066_v54, 4 }
 0x43c   : > { %v3544_v3 = vshll.u32 %v8167_v7, 16  ;;  %3415 = vst.msk [vmem:[#allocation4 + $0x24] sm:$0xf] %vm258_vm0, %v8167_v7  ;;  %v3548_v61 = vshrl.u32 %v8167_v7, 16  ;;  %v2905_v26 = vpack.c.bf16 %v2819_v9, %v2819_v9 }
 0x43d   : > { %v3366_v31 = vld [vmem:[#allocation3 + $0x38] sm:$0x1]  ;;  %3270 = vst [vmem:[#allocation3 + $0x3c] sm:$0xf] %v3269_v11  ;;  %v2996_v32 = vshrl.u32 %v2896_v16, 16  ;;  %v2999_v39 = vshll.u32 %v2896_v16, 16  ;;  %v3070_v51 = vsel %vm6174_vm9, %v3062_v38, %v3069_v13  ;;  %v3301_v24 = vsel %vm6213_vm10, %v3071_v46, %v3300_v57 }
 0x43e   : > { %v2746_v22 = vpop.f32.mrf.mxu0  ;;  %v3546_v58 = vrot.slane %v3544_v3, 5  ;;  %v3550_v18 = vrot.slane %v3548_v61, 4  ;;  %v3554_v43 = vshll.u32 %v3366_v31, 16  ;;  %3299 = vst.msk [vmem:[#allocation3 + $0x70] sm:$0xf] %vm258_vm0, %v3070_v51  ;;  %v3073_v35 = vshrl.u32 %v2905_v26, 16 }
 0x43f   : > { %v2998_v29 = vrot.slane %v2996_v32, 7  ;;  %v2747_v52 = vadd.f32 %v8031_v12, %v2746_v22  ;;  %3302 = vst [vmem:[#allocation3 + $0x74] sm:$0x1] %v3301_v24  ;;  %v8192_v15 = vld [vmem:[#allocation3 + $0x6c] sm:$0xf]  ;;  %v2768_v42 = vpop.f32.mrf.mxu2  ;;  %v3076_v31 = vshll.u32 %v2905_v26, 16 }
 0x440   : > { %v8179_v25 = vsel %vm5920_vm3, %v3542_v62, %v3546_v58  ;;  %v3551_v37 = vor.u32 %v3550_v18, %v3546_v58  ;;  %v3556_v17 = vrot.slane %v3554_v43, 5  ;;  %10076 = vst [vmem:[#allocation50_spill] sm:$0xff] %v8192_v15  ;;  %v3303_v16 = vld [vmem:[#allocation3 + $0x78] sm:$0xf]  ;;  %v2769_v62 = vadd.f32 %v8031_v12, %v2768_v42  ;;  %v3275_v18 = vld [vmem:[#allocation3 + $0x48] sm:$0xf] }
 0x441   : > { %10075 = vst [vmem:[#allocation48_spill] sm:$0xff] %v8179_v25  ;;  %v3001_v19 = vor.u32 %v2999_v39, %v2998_v29  ;;  %v3003_v23 = vrot.slane %v2998_v29, 4  ;;  %3838 = vrot.lane.b32.xlu0 %v8179_v25, %s5839_s20  ;;  %v2811_v33 = vmax.f32 %v2747_v52, 0.0  ;;  %v3075_v3 = vrot.slane %v3073_v35, 7  ;;  %v3307_v35 = vld [vmem:[#allocation3 + $0x80] sm:$0x1] }
 0x442   : > { %v3552_v28 = vrot.slane %v3551_v37, 4  ;;  %v2820_v4 = vmax.f32 %v2769_v62, 0.0  ;;  %3424 = vst.msk [vmem:[#allocation4 + $0x48] sm:$0xf] %vm258_vm0, %v8192_v15 }
 0x443   : > { %v3002_v6 = vsel %vm6174_vm9, %v2994_v36, %v3001_v19  ;;  %v3273_v30 = vsel %vm6213_vm10, %v3003_v23, %v3272_v0  ;;  %v2897_v60 = vpack.c.bf16 %v2811_v33, %v2811_v33  ;;  %v3078_v39 = vor.u32 %v3076_v31, %v3075_v3 }
 0x444   : > { %3271 = vst.msk [vmem:[#allocation3 + $0x40] sm:$0xf] %vm258_vm0, %v3002_v6  ;;  %v8197_v38 = vsel %vm5920_vm3, %v3552_v28, %v3556_v17  ;;  %v8199_v14 = vld [vmem:[#allocation3 + $0x3c] sm:$0xf]  ;;  %v2906_v43 = vpack.c.bf16 %v2820_v4, %v2820_v4  ;;  %v3079_v0 = vrot.slane %v3075_v3, 4 }
 0x445   : > { %10077 = vst [vmem:[#allocation52_spill] sm:$0xff] %v8197_v38  ;;  %3840 = vrot.lane.b32.xlu1 %v8197_v38, %s5839_s20  ;;  %v3559_v11 = vshrl.u32 %v8199_v14, 16  ;;  %v3562_v21 = vshll.u32 %v8199_v14, 16  ;;  %v3005_v61 = vshrl.u32 %v2897_v60, 16  ;;  %v3008_v58 = vshll.u32 %v2897_v60, 16 }
 0x446   : > { %3274 = vst [vmem:[#allocation3 + $0x44] sm:$0x1] %v3273_v30  ;;  %v2748_v54 = vpop.f32.mrf.mxu0  ;;  %v8211_v46 = vld [vmem:[#allocation3 + $0x70] sm:$0xf]  ;;  %v3304_v29 = vsel %vm6160_vm8, %v3078_v39, %v3303_v16  ;;  %v3081_v52 = vshrl.u32 %v2906_v43, 16  ;;  %v3084_v23 = vshll.u32 %v2906_v43, 16 }
 0x447   : > { %3416 = vst.msk [vmem:[#allocation4 + $0x28] sm:$0xf] %vm258_vm0, %v8199_v14  ;;  %v2749_v32 = vadd.f32 %v8031_v12, %v2748_v54  ;;  %v3561_v53 = vrot.slane %v3559_v11, 4  ;;  %v3564_v57 = vrot.slane %v3562_v21, 5  ;;  %v3007_v22 = vrot.slane %v3005_v61, 7  ;;  %v2771_v26 = vpop.f32.mrf.mxu2  ;;  %v2455_v54 = vpop.permute.xlu2 %2454 }
 0x448   : > { %10078 = vst [vmem:[#allocation30_spill] sm:$0xff] %v8211_v46  ;;  %v3083_v28 = vrot.slane %v3081_v52, 7  ;;  %v2772_v6 = vadd.f32 %v8031_v12, %v2771_v26  ;;  %v3279_v4 = vld [vmem:[#allocation3 + $0x50] sm:$0x1] }
 0x449   : > { %v2812_v13 = vmax.f32 %v2749_v32, 0.0  ;;  %v3010_v9 = vor.u32 %v3008_v58, %v3007_v22  ;;  %v3565_v36 = vor.u32 %v3564_v57, %v3561_v53  ;;  %3425 = vst.msk [vmem:[#allocation4 + $0x4c] sm:$0xf] %vm258_vm0, %v8211_v46  ;;  %v3011_v24 = vrot.slane %v3007_v22, 4 }
 0x44a   : > { %3305 = vst [vmem:[#allocation3 + $0x78] sm:$0xf] %v3304_v29  ;;  %v3086_v21 = vor.u32 %v3084_v23, %v3083_v28  ;;  %v3088_v3 = vrot.slane %v3083_v28, 4  ;;  %v2821_v61 = vmax.f32 %v2772_v6, 0.0 }
 0x44b   : > { %v2898_v37 = vpack.c.bf16 %v2812_v13, %v2812_v13  ;;  %v8217_v51 = vld [vmem:[#allocation3 + $0x40] sm:$0xf]  ;;  %v3276_v19 = vsel %vm6160_vm8, %v3010_v9, %v3275_v18  ;;  %v3566_v16 = vrot.slane %v3565_v36, 4  ;;  %2521 = vst.msk [vmem:[#allocation4 + $0x78] sm:$0xf] %vm2490_vm11, %v2455_v54 }
 0x44c   : > { %v3568_v33 = vshll.u32 %v8217_v51, 16  ;;  %3417 = vst.msk [vmem:[#allocation4 + $0x2c] sm:$0xf] %vm258_vm0, %v8217_v51  ;;  %v3572_v11 = vshrl.u32 %v8217_v51, 16  ;;  %v3087_v22 = vsel %vm6174_vm9, %v3079_v0, %v3086_v21  ;;  %v3308_v58 = vsel %vm6213_vm10, %v3088_v3, %v3307_v35  ;;  %v3282_v54 = vld [vmem:[#allocation3 + $0x54] sm:$0xf] }
 0x44d   : > { %3277 = vst [vmem:[#allocation3 + $0x48] sm:$0xf] %v3276_v19  ;;  %v3013_v17 = vshrl.u32 %v2898_v37, 16  ;;  %v3369_v30 = vld [vmem:[#allocation3 + $0x44] sm:$0x1]  ;;  %v3016_v60 = vshll.u32 %v2898_v37, 16  ;;  %v2907_v13 = vpack.c.bf16 %v2821_v61, %v2821_v61 }
 0x44e   : > { %v2751_v42 = vpop.f32.mrf.mxu0  ;;  %v3570_v62 = vrot.slane %v3568_v33, 5  ;;  %v3574_v57 = vrot.slane %v3572_v11, 4  ;;  %v3578_v39 = vshll.u32 %v3369_v30, 16  ;;  %3306 = vst.msk [vmem:[#allocation3 + $0x7c] sm:$0xf] %vm258_vm0, %v3087_v22 }
 0x44f   : > { %v3015_v31 = vrot.slane %v3013_v17, 7  ;;  %v2752_v32 = vadd.f32 %v8031_v12, %v2751_v42  ;;  %3309 = vst [vmem:[#allocation3 + $0x80] sm:$0x1] %v3308_v58  ;;  %v3090_v52 = vshrl.u32 %v2907_v13, 16  ;;  %v2773_v19 = vpop.f32.mrf.mxu2  ;;  %v3093_v6 = vshll.u32 %v2907_v13, 16  ;;  %v3825_v21 = vpop.permute.xlu2 %3824 }
 0x450   : > { %v8229_v53 = vsel %vm5920_vm3, %v3566_v16, %v3570_v62  ;;  %v3575_v9 = vor.u32 %v3574_v57, %v3570_v62  ;;  %v3580_v26 = vrot.slane %v3578_v39, 5  ;;  %v2774_v33 = vadd.f32 %v8031_v12, %v2773_v19  ;;  %3919 = vst.msk [vmem:[#allocation4 + $0x4] sm:$0xf] %vm1356_vm14, %v3825_v21 }
 0x451   : > { %10079 = vst [vmem:[#allocation22_spill] sm:$0xff] %v8229_v53  ;;  %v3018_v18 = vor.u32 %v3016_v60, %v3015_v31  ;;  %v3020_v43 = vrot.slane %v3015_v31, 4  ;;  %3842 = vrot.lane.b32.xlu2 %v8229_v53, %s5839_s20  ;;  %v2813_v29 = vmax.f32 %v2752_v32, 0.0  ;;  %v8247_v17 = vrot.slane %v3090_v52, 7  ;;  %v3310_v60 = vld [vmem:[#allocation3 + $0x84] sm:$0xf] }
 0x452   : > { %v3576_v23 = vrot.slane %v3575_v9, 4  ;;  %v2822_v42 = vmax.f32 %v2774_v33, 0.0  ;;  %v8281_v21 = vld [vmem:[#allocation3 + $0x78] sm:$0xf] }
 0x453   : > { %v3019_v36 = vsel %vm6174_vm9, %v3011_v24, %v3018_v18  ;;  %v3280_v0 = vsel %vm6213_vm10, %v3020_v43, %v3279_v4  ;;  %v2899_v37 = vpack.c.bf16 %v2813_v29, %v2813_v29  ;;  %v3095_v3 = vor.u32 %v3093_v6, %v8247_v17  ;;  %3426 = vst.msk [vmem:[#allocation4 + $0x50] sm:$0xf] %vm258_vm0, %v8281_v21 }
 0x454   : > { %3278 = vst.msk [vmem:[#allocation3 + $0x4c] sm:$0xf] %vm258_vm0, %v3019_v36  ;;  %v8245_v28 = vld [vmem:[#allocation3 + $0x48] sm:$0xf]  ;;  %v8251_v24 = vsel %vm5920_vm3, %v3576_v23, %v3580_v26  ;;  %v2908_v4 = vpack.c.bf16 %v2822_v42, %v2822_v42  ;;  %v3096_v58 = vrot.slane %v8247_v17, 4 }
 0x455   : > { %3281 = vst [vmem:[#allocation3 + $0x50] sm:$0x1] %v3280_v0  ;;  %v3022_v30 = vshrl.u32 %v2899_v37, 16  ;;  %3844 = vrot.lane.b32.xlu0 %v8251_v24, %s5839_s20  ;;  %v3583_v62 = vshrl.u32 %v8245_v28, 16  ;;  %v3586_v11 = vshll.u32 %v8245_v28, 16  ;;  %v3025_v61 = vshll.u32 %v2899_v37, 16 }
 0x456   : > { %10080 = vst [vmem:[#allocation14_spill] sm:$0xff] %v8245_v28  ;;  %v2753_v35 = vpop.f32.mrf.mxu0  ;;  %v8262_v22 = vld [vmem:[#allocation3 + $0x7c] sm:$0xf]  ;;  %v3311_v18 = vsel %vm6160_vm8, %v3095_v3, %v3310_v60  ;;  %v3098_v13 = vshrl.u32 %v2908_v4, 16  ;;  %v3101_v29 = vshll.u32 %v2908_v4, 16 }
 0x457   : > { %10081 = vst [vmem:[#allocation19_spill] sm:$0xff] %v8251_v24  ;;  %v2754_v16 = vadd.f32 %v8031_v12, %v2753_v35  ;;  %v3024_v31 = vrot.slane %v3022_v30, 7  ;;  %v3585_v57 = vrot.slane %v3583_v62, 4  ;;  %v3588_v39 = vrot.slane %v3586_v11, 5  ;;  %v3314_v37 = vld [vmem:[#allocation3 + $0x8c] sm:$0x1]  ;;  %v2776_v19 = vpop.f32.mrf.mxu2 }
 0x458   : > { %3418 = vst.msk [vmem:[#allocation4 + $0x30] sm:$0xf] %vm258_vm0, %v8245_v28  ;;  %v3100_v17 = vrot.slane %v3098_v13, 7  ;;  %v2777_v35 = vadd.f32 %v8031_v12, %v2776_v19 }
 0x459   : > { %v2814_v32 = vmax.f32 %v2754_v16, 0.0  ;;  %v3027_v43 = vor.u32 %v3025_v61, %v3024_v31  ;;  %3427 = vst.msk [vmem:[#allocation4 + $0x54] sm:$0xf] %vm258_vm0, %v8262_v22  ;;  %v3589_v0 = vor.u32 %v3588_v39, %v3585_v57  ;;  %v3028_v57 = vrot.slane %v3024_v31, 4  ;;  %v3286_v39 = vld [vmem:[#allocation3 + $0x5c] sm:$0x1] }
 0x45a   : > { %3312 = vst [vmem:[#allocation3 + $0x84] sm:$0xf] %v3311_v18  ;;  %v3103_v3 = vor.u32 %v3101_v29, %v3100_v17  ;;  %v3105_v61 = vrot.slane %v3100_v17, 4  ;;  %v2823_v4 = vmax.f32 %v2777_v35, 0.0 }
 0x45b   : > { %v2900_v9 = vpack.c.bf16 %v2814_v32, %v2814_v32  ;;  %v8269_v36 = vld [vmem:[#allocation3 + $0x4c] sm:$0xf]  ;;  %v3283_v52 = vsel %vm6160_vm8, %v3027_v43, %v3282_v54  ;;  %v3590_v42 = vrot.slane %v3589_v0, 4  ;;  %v2457_v32 = vpop.permute.xlu0 %2456 }
 0x45c   : > { %v3592_v23 = vshll.u32 %v8269_v36, 16  ;;  %3419 = vst.msk [vmem:[#allocation4 + $0x34] sm:$0xf] %vm258_vm0, %v8269_v36  ;;  %v8276_v26 = vld [vmem:[#allocation3 + $0x50] sm:$0x1]  ;;  %v3596_v33 = vshrl.u32 %v8269_v36, 16  ;;  %v3104_v29 = vsel %vm6174_vm9, %v3096_v58, %v3103_v3  ;;  %v2909_v31 = vpack.c.bf16 %v2823_v4, %v2823_v4 }
 0x45d   : > { %3284 = vst [vmem:[#allocation3 + $0x54] sm:$0xf] %v3283_v52  ;;  %v3030_v6 = vshrl.u32 %v2900_v9, 16  ;;  %v3033_v30 = vshll.u32 %v2900_v9, 16  ;;  %v3602_v11 = vshll.u32 %v8276_v26, 16  ;;  %v3315_v9 = vsel %vm6213_vm10, %v3105_v61, %v3314_v37 }
 0x45e   : > { %v2756_v60 = vpop.f32.mrf.mxu0  ;;  %v3594_v16 = vrot.slane %v3592_v23, 5  ;;  %v3598_v62 = vrot.slane %v3596_v33, 4  ;;  %2522 = vst.msk [vmem:[#allocation4 + $0x7c] sm:$0xf] %vm2490_vm11, %v2457_v32  ;;  %v3655_v37 = vshrl.u32 %v8192_v15, 16  ;;  %v3688_v61 = vshll.u32 %v8262_v22, 16 }
 0x45f   : > { %v3032_v54 = vrot.slane %v3030_v6, 7  ;;  %v2757_v18 = vadd.f32 %v8031_v12, %v2756_v60  ;;  %3313 = vst.msk [vmem:[#allocation3 + $0x88] sm:$0xf] %vm258_vm0, %v3104_v29  ;;  %v3604_v33 = vrot.slane %v3602_v11, 5  ;;  %v3107_v6 = vshrl.u32 %v2909_v31, 16  ;;  %v2778_v35 = vpop.f32.mrf.mxu2 }
 0x460   : > { %v8288_v43 = vsel %vm5920_vm3, %v3590_v42, %v3594_v16  ;;  %v3599_v13 = vor.u32 %v3598_v62, %v3594_v16  ;;  %3316 = vst [vmem:[#allocation3 + $0x8c] sm:$0x1] %v3315_v9  ;;  %v3658_v16 = vshll.u32 %v8192_v15, 16  ;;  %v2779_v62 = vadd.f32 %v8031_v12, %v2778_v35 }
 0x461   : > { %10082 = vst [vmem:[#allocation23_spill] sm:$0xff] %v8288_v43  ;;  %v3035_v0 = vor.u32 %v3033_v30, %v3032_v54  ;;  %v3037_v52 = vrot.slane %v3032_v54, 4  ;;  %3846 = vrot.lane.b32.xlu1 %v8288_v43, %s5839_s20  ;;  %v2815_v19 = vmax.f32 %v2757_v18, 0.0  ;;  %v3109_v54 = vrot.slane %v3107_v6, 7  ;;  %v3317_v18 = vld [vmem:[#allocation3 + $0x90] sm:$0xf] }
 0x462   : > { %v3600_v23 = vrot.slane %v3599_v13, 4  ;;  %v3110_v4 = vshll.u32 %v2909_v31, 16  ;;  %v2824_v13 = vmax.f32 %v2779_v62, 0.0  ;;  %v3289_v31 = vld [vmem:[#allocation3 + $0x60] sm:$0xf]  ;;  %v8325_v35 = vrot.slane %v3658_v16, 5 }
 0x463   : > { %v3036_v17 = vsel %vm6174_vm9, %v3028_v57, %v3035_v0  ;;  %v3287_v58 = vsel %vm6213_vm10, %v3037_v52, %v3286_v39  ;;  %v2901_v30 = vpack.c.bf16 %v2815_v19, %v2815_v19  ;;  %v3692_v39 = vshrl.u32 %v8262_v22, 16  ;;  %v3321_v43 = vld [vmem:[#allocation3 + $0x98] sm:$0x1] }
 0x464   : > { %3285 = vst.msk [vmem:[#allocation3 + $0x58] sm:$0xf] %vm258_vm0, %v3036_v17  ;;  %v8306_v60 = vsel %vm5920_vm3, %v3600_v23, %v3604_v33  ;;  %v8308_v42 = vld [vmem:[#allocation3 + $0x54] sm:$0xf]  ;;  %v3112_v52 = vor.u32 %v3110_v4, %v3109_v54  ;;  %v8321_v33 = vrot.slane %v3655_v37, 4  ;;  %v8331_v4 = vrot.slane %v3688_v61, 5 }
 0x465   : > { %10083 = vst [vmem:[#allocation13_spill] sm:$0xff] %v8306_v60  ;;  %3848 = vrot.lane.b32.xlu2 %v8306_v60, %s5839_s20  ;;  %v3607_v11 = vshrl.u32 %v8308_v42, 16  ;;  %v3610_v3 = vshll.u32 %v8308_v42, 16  ;;  %v3039_v32 = vshrl.u32 %v2901_v30, 16  ;;  %v3042_v23 = vshll.u32 %v2901_v30, 16 }
 0x466   : > { %10084 = vst [vmem:[#allocation41_spill] sm:$0xff] %v8308_v42  ;;  %v2758_v57 = vpop.f32.mrf.mxu0  ;;  %v8323_v17 = vld [vmem:[#allocation3 + $0x84] sm:$0xf]  ;;  %v3318_v62 = vsel %vm6160_vm8, %v3112_v52, %v3317_v18  ;;  %v3293_v60 = vld [vmem:[#allocation3 + $0x68] sm:$0x1] }
 0x467   : > { %3288 = vst [vmem:[#allocation3 + $0x5c] sm:$0x1] %v3287_v58  ;;  %v2759_v29 = vadd.f32 %v8031_v12, %v2758_v57  ;;  %v3609_v9 = vrot.slane %v3607_v11, 4  ;;  %v3612_v0 = vrot.slane %v3610_v3, 5  ;;  %v3041_v19 = vrot.slane %v3039_v32, 7  ;;  %v2781_v24 = vpop.f32.mrf.mxu2 }
 0x468   : > { %3420 = vst.msk [vmem:[#allocation4 + $0x38] sm:$0xf] %vm258_vm0, %v8308_v42  ;;  %v2910_v58 = vpack.c.bf16 %v2824_v13, %v2824_v13  ;;  %v8335_v57 = vrot.slane %v3692_v39, 4  ;;  %v3113_v13 = vrot.slane %v3109_v54, 4  ;;  %v3823_v39 = vpop.permute.xlu1 %3822 }
 0x469   : > { %v2816_v6 = vmax.f32 %v2759_v29, 0.0  ;;  %3428 = vst.msk [vmem:[#allocation4 + $0x58] sm:$0xf] %vm258_vm0, %v8323_v17  ;;  %v3044_v11 = vor.u32 %v3042_v23, %v3041_v19  ;;  %v3613_v3 = vor.u32 %v3612_v0, %v3609_v9  ;;  %v2782_v0 = vadd.f32 %v8031_v12, %v2781_v24 }
 0x46a   : > { %3319 = vst [vmem:[#allocation3 + $0x90] sm:$0xf] %v3318_v62  ;;  %v3115_v37 = vshrl.u32 %v2910_v58, 16  ;;  %v3118_v29 = vshll.u32 %v2910_v58, 16 }
 0x46b   : > { %v2902_v30 = vpack.c.bf16 %v2816_v6, %v2816_v6  ;;  %v8333_v32 = vld [vmem:[#allocation3 + $0x58] sm:$0xf]  ;;  %v3290_v16 = vsel %vm6160_vm8, %v3044_v11, %v3289_v31  ;;  %v3614_v23 = vrot.slane %v3613_v3, 4  ;;  %3918 = vst.msk [vmem:[#allocation4] sm:$0xf] %vm1356_vm14, %v3823_v39  ;;  %v2825_v38 = vmax.f32 %v2782_v0, 0.0 }
 0x46c   : > { %10085 = vst [vmem:[#allocation17_spill] sm:$0xff] %v8333_v32  ;;  %v3616_v18 = vshll.u32 %v8333_v32, 16  ;;  %v3117_v61 = vrot.slane %v3115_v37, 7  ;;  %v3620_v31 = vshrl.u32 %v8333_v32, 16  ;;  %v8363_v0 = vld [vmem:[#allocation3 + $0x80] sm:$0x1]  ;;  %v3661_v39 = vor.u32 %v8325_v35, %v8321_v33 }
 0x46d   : > { %3421 = vst.msk [vmem:[#allocation4 + $0x3c] sm:$0xf] %vm258_vm0, %v8333_v32  ;;  %v3047_v9 = vshrl.u32 %v2902_v30, 16  ;;  %v3050_v54 = vshll.u32 %v2902_v30, 16  ;;  %v8352_v30 = vld [vmem:[#allocation3 + $0x88] sm:$0xf] }
 0x46e   : > { %3291 = vst [vmem:[#allocation3 + $0x60] sm:$0xf] %v3290_v16  ;;  %v8343_v52 = vld [vmem:[#allocation3 + $0x5c] sm:$0x1]  ;;  %v3618_v6 = vrot.slane %v3616_v18, 5  ;;  %v3120_v58 = vor.u32 %v3118_v29, %v3117_v61  ;;  %v3122_v62 = vrot.slane %v3117_v61, 4 }
 0x46f   : > { %v3049_v11 = vrot.slane %v3047_v9, 7  ;;  %v3045_v16 = vrot.slane %v3041_v19, 4  ;;  %v3622_v12 = vrot.slane %v3620_v31, 4  ;;  %v3626_v24 = vshll.u32 %v8343_v52, 16  ;;  %3429 = vst.msk [vmem:[#allocation4 + $0x5c] sm:$0xf] %vm258_vm0, %v8352_v30  ;;  %v2783_v31 = vpop.f32.mrf.mxu2 }
 0x470   : > { %v8349_v37 = vsel %vm5920_vm3, %v3614_v23, %v3618_v6  ;;  %v3121_v3 = vsel %vm6174_vm9, %v3113_v13, %v3120_v58  ;;  %v3322_v29 = vsel %vm6213_vm10, %v3122_v62, %v3321_v43  ;;  %v2911_v19 = vpack.c.bf16 %v2825_v38, %v2825_v38  ;;  %v8373_v58 = vld [vmem:[#allocation3 + $0x74] sm:$0x1] }
 0x471   : > { %10086 = vst [vmem:[#allocation20_spill] sm:$0xff] %v8349_v37  ;;  %v3052_v18 = vor.u32 %v3050_v54, %v3049_v11  ;;  %v3054_v61 = vrot.slane %v3049_v11, 4  ;;  %3850 = vrot.lane.b32.xlu0 %v8349_v37, %s5839_s20  ;;  %v3623_v9 = vor.u32 %v3622_v12, %v3618_v6  ;;  %v3664_v54 = vshll.u32 %v8211_v46, 16 }
 0x472   : > { %3320 = vst.msk [vmem:[#allocation3 + $0x94] sm:$0xf] %vm258_vm0, %v3121_v3  ;;  %v3124_v23 = vshrl.u32 %v2911_v19, 16  ;;  %v3628_v6 = vrot.slane %v3626_v24, 5  ;;  %v3668_v62 = vshrl.u32 %v8211_v46, 16  ;;  %v3127_v11 = vshll.u32 %v2911_v19, 16 }
 0x473   : > { %3323 = vst [vmem:[#allocation3 + $0x98] sm:$0x1] %v3322_v29  ;;  %v3053_v13 = vsel %vm6174_vm9, %v3045_v16, %v3052_v18  ;;  %v3294_v43 = vsel %vm6213_vm10, %v3054_v61, %v3293_v60  ;;  %v3624_v38 = vrot.slane %v3623_v9, 4  ;;  %v8379_v60 = vld [vmem:[%s9687_s2] ss:$0 sm:$0xff]  ;;  %v3695_v16 = vor.u32 %v8335_v57, %v8331_v4 }
 0x474   : > { %3292 = vst.msk [vmem:[#allocation3 + $0x64] sm:$0xf] %vm258_vm0, %v3053_v13  ;;  %v2784_v33 = vadd.f32 %v8379_v60, %v2783_v31  ;;  %v3698_v12 = vshll.u32 %v8363_v0, 16  ;;  %v3126_v24 = vrot.slane %v3124_v23, 7  ;;  %v3324_v61 = vld [vmem:[#allocation3 + $0x9c] sm:$0xf] }
 0x475   : > { %3295 = vst [vmem:[#allocation3 + $0x68] sm:$0x1] %v3294_v43  ;;  %v8382_v35 = vld [vmem:[#allocation3 + $0x60] sm:$0xf]  ;;  %v8389_v3 = vsel %vm5920_vm3, %v3624_v38, %v3628_v6  ;;  %v3662_v57 = vrot.slane %v3661_v39, 4  ;;  %v8397_v9 = vrot.slane %v3664_v54, 5 }
 0x476   : > { %10087 = vst [vmem:[#allocation21_spill] sm:$0xff] %v8382_v35  ;;  %v3631_v29 = vshrl.u32 %v8382_v35, 16  ;;  %v3634_v18 = vshll.u32 %v8382_v35, 16  ;;  %v2826_v19 = vmax.f32 %v2784_v33, 0.0  ;;  %3852 = vrot.lane.b32.xlu1 %v8389_v3, %s5839_s20  ;;  %v3129_v13 = vor.u32 %v3127_v11, %v3126_v24  ;;  %v8399_v38 = vld [vmem:[#allocation3 + $0x90] sm:$0xf] }
 0x477   : > { %10088 = vst [vmem:[#allocation25_spill] sm:$0xff] %v8389_v3  ;;  %v3670_v31 = vrot.slane %v3668_v62, 4  ;;  %v3696_v37 = vrot.slane %v3695_v16, 4  ;;  %v3700_v25 = vrot.slane %v3698_v12, 5  ;;  %v3679_v11 = vshrl.u32 %v8281_v21, 16  ;;  %v2786_v53 = vpop.f32.mrf.mxu2 }
 0x478   : > { %3422 = vst.msk [vmem:[#allocation4 + $0x40] sm:$0xf] %vm258_vm0, %v8382_v35  ;;  %v3633_v43 = vrot.slane %v3631_v29, 4  ;;  %v3636_v23 = vrot.slane %v3634_v18, 5  ;;  %v2912_v6 = vpack.c.bf16 %v2826_v19, %v2826_v19  ;;  %v3325_v33 = vsel %vm6160_vm8, %v3129_v13, %v3324_v61  ;;  %v3328_v19 = vld [vmem:[#allocation3 + $0xa4] sm:$0x1] }
 0x479   : > { %3430 = vst.msk [vmem:[#allocation4 + $0x60] sm:$0xf] %vm258_vm0, %v8399_v38  ;;  %v8406_v54 = vld [vmem:[#allocation3 + $0x94] sm:$0xf]  ;;  %v3682_v62 = vshll.u32 %v8281_v21, 16  ;;  %v3130_v29 = vrot.slane %v3126_v24, 4  ;;  %v8416_v61 = vsel %vm5920_vm3, %v3662_v57, %v8397_v9  ;;  %v3671_v24 = vor.u32 %v3670_v31, %v8397_v9 }
 0x47a   : > { %v3637_v39 = vor.u32 %v3636_v23, %v3633_v43  ;;  %3326 = vst [vmem:[#allocation3 + $0x9c] sm:$0xf] %v3325_v33  ;;  %v3132_v18 = vshrl.u32 %v2912_v6, 16  ;;  %v3727_v23 = vshrl.u32 %v8399_v38, 16  ;;  %v3135_v3 = vshll.u32 %v2912_v6, 16 }
 0x47b   : > { %v3831_v16 = vpop.permute.xlu2 %3830  ;;  %v8410_v12 = vld [vmem:[#allocation3 + $0x64] sm:$0xf]  ;;  %10090 = vst [vmem:[#allocation29_spill] sm:$0xff] %v8416_v61  ;;  %v2787_v20 = vadd.f32 %v8379_v60, %v2786_v53  ;;  %v3730_v47 = vshll.u32 %v8399_v38, 16  ;;  %v3684_v45 = vrot.slane %v3682_v62, 5 }
 0x47c   : > { %10089 = vst [vmem:[#allocation10_spill] sm:$0xff] %v8410_v12  ;;  %v3640_v13 = vshll.u32 %v8410_v12, 16  ;;  %v8419_v43 = vld [vmem:[#allocation3 + $0x68] sm:$0x1]  ;;  %v3134_v33 = vrot.slane %v3132_v18, 7  ;;  %v3638_v56 = vrot.slane %v3637_v39, 4  ;;  %v8439_v39 = vsel %vm5920_vm3, %v3696_v37, %v3700_v25 }
 0x47d   : > { %3922 = vst.msk [vmem:[#allocation4 + $0x10] sm:$0xf] %vm1356_vm14, %v3831_v16  ;;  %v3644_v16 = vshrl.u32 %v8410_v12, 16  ;;  %v3650_v27 = vshll.u32 %v8419_v43, 16  ;;  %v2827_v18 = vmax.f32 %v2787_v20, 0.0  ;;  %v3703_v25 = vshrl.u32 %v8323_v17, 16 }
 0x47e   : > { %3423 = vst.msk [vmem:[#allocation4 + $0x44] sm:$0xf] %vm258_vm0, %v8410_v12  ;;  %v3642_v57 = vrot.slane %v3640_v13, 5  ;;  %v3137_v9 = vor.u32 %v3135_v3, %v3134_v33  ;;  %v3139_v31 = vrot.slane %v3134_v33, 4  ;;  %3858 = vrot.lane.b32.xlu1 %v8416_v61, %s5839_s20  ;;  %v3681_v13 = vrot.slane %v3679_v11, 4 }
 0x47f   : > { %3431 = vst.msk [vmem:[#allocation4 + $0x64] sm:$0xf] %vm258_vm0, %v8406_v54  ;;  %v3646_v53 = vrot.slane %v3644_v16, 4  ;;  %v2913_v3 = vpack.c.bf16 %v2827_v18, %v2827_v18  ;;  %v3732_v16 = vrot.slane %v3730_v47, 5  ;;  %v3706_v37 = vshll.u32 %v8323_v17, 16 }
 0x480   : > { %v8435_v6 = vsel %vm5920_vm3, %v3638_v56, %v3642_v57  ;;  %10092 = vst [vmem:[#allocation12_spill] sm:$0xff] %v8439_v39  ;;  %v3138_v63 = vsel %vm6174_vm9, %v3130_v29, %v3137_v9  ;;  %v3329_v20 = vsel %vm6213_vm10, %v3139_v31, %v3328_v19  ;;  %v3729_v56 = vrot.slane %v3727_v23, 4  ;;  %v2788_v19 = vpop.f32.mrf.mxu2 }
 0x481   : > { %10091 = vst [vmem:[#allocation31_spill] sm:$0xff] %v8435_v6  ;;  %3854 = vrot.lane.b32.xlu2 %v8435_v6, %s5839_s20  ;;  %v3647_v33 = vor.u32 %v3646_v53, %v3642_v57  ;;  %v3141_v11 = vshrl.u32 %v2913_v3, 16  ;;  %v3652_v9 = vrot.slane %v3650_v27, 5  ;;  %v3672_v61 = vrot.slane %v3671_v24, 4  ;;  %v3331_v53 = vld [vmem:[#allocation3 + $0xa8] sm:$0xf] }
 0x482   : > { %3327 = vst.msk [vmem:[#allocation3 + $0xa0] sm:$0xf] %vm258_vm0, %v3138_v63  ;;  %v3736_v31 = vshll.u32 %v8406_v54, 16  ;;  %v3685_v57 = vor.u32 %v3684_v45, %v3681_v13  ;;  %v3712_v63 = vshll.u32 %v8352_v30, 16  ;;  %v3716_v47 = vshrl.u32 %v8352_v30, 16 }
 0x483   : > { %3330 = vst [vmem:[#allocation3 + $0xa4] sm:$0x1] %v3329_v20  ;;  %v3827_v62 = vpop.permute.xlu0 %3826  ;;  %v3648_v29 = vrot.slane %v3647_v33, 4  ;;  %v8454_v23 = vrot.slane %v3141_v11, 7  ;;  %v3144_v18 = vshll.u32 %v2913_v3, 16  ;;  %v2789_v20 = vadd.f32 %v8379_v60, %v2788_v19 }
 0x484   : > { %3920 = vst.msk [vmem:[#allocation4 + $0x8] sm:$0xf] %vm1356_vm14, %v3827_v62  ;;  %v8461_v24 = vld [vmem:[#allocation3 + $0x9c] sm:$0xf]  ;;  %v10095_v45 = vshll.u32 %v8373_v58, 16  ;;  %v3733_v33 = vor.u32 %v3732_v16, %v3729_v56  ;;  %v3705_v62 = vrot.slane %v3703_v25, 4 }
 0x485   : > { %v8459_v27 = vsel %vm5920_vm3, %v3648_v29, %v3652_v9  ;;  %10094 = vst [vmem:[#allocation35_spill] sm:$0xff] %v8461_v24  ;;  %v3708_v11 = vrot.slane %v3706_v37, 5  ;;  %v3146_v3 = vor.u32 %v3144_v18, %v8454_v23  ;;  %v2828_v19 = vmax.f32 %v2789_v20, 0.0  ;;  %v8472_v9 = vld [vmem:[#allocation3 + $0x8c] sm:$0x1] }
 0x486   : > { %10093 = vst [vmem:[#allocation33_spill] sm:$0xff] %v8459_v27  ;;  %3856 = vrot.lane.b32.xlu0 %v8459_v27, %s5839_s20  ;;  %v3676_v13 = vrot.slane %v10095_v45, 5  ;;  %3864 = vrot.lane.b32.xlu1 %v8439_v39, %s5839_s20  ;;  %v8479_v56 = vrot.slane %v3736_v31, 5  ;;  %v3686_v16 = vrot.slane %v3685_v57, 4  ;;  %v3740_v25 = vshrl.u32 %v8406_v54, 16 }
 0x487   : > { %3432 = vst.msk [vmem:[#allocation4 + $0x68] sm:$0xf] %vm258_vm0, %v8461_v24  ;;  %v3829_v29 = vpop.permute.xlu1 %3828  ;;  %v3332_v37 = vsel %vm6160_vm8, %v3146_v3, %v3331_v53  ;;  %v2914_v18 = vpack.c.bf16 %v2828_v19, %v2828_v19  ;;  %v3714_v20 = vrot.slane %v3712_v63, 5  ;;  %v3734_v27 = vrot.slane %v3733_v33, 4 }
 0x488   : > { %10096 = vst [vmem:[#allocation15_spill] sm:$0xff] %v8472_v9  ;;  %v8477_v45 = vsel %vm5920_vm3, %v3672_v61, %v3676_v13  ;;  %v3709_v61 = vor.u32 %v3708_v11, %v3705_v62  ;;  %v8493_v53 = vsel %vm5920_vm3, %v3686_v16, %v8331_v4  ;;  %v3722_v63 = vshll.u32 %v8472_v9, 16  ;;  %v2791_v3 = vpop.f32.mrf.mxu2  ;;  %v3335_v9 = vld [vmem:[#allocation3 + $0xb0] sm:$0x1] }
 0x489   : > { %3921 = vst.msk [vmem:[#allocation4 + $0xc] sm:$0xf] %vm1356_vm14, %v3829_v29  ;;  %3860 = vrot.lane.b32.xlu2 %v8477_v45, %s5839_s20  ;;  %v8486_v39 = vld [vmem:[#allocation3 + $0xa0] sm:$0xf]  ;;  %v3718_v29 = vrot.slane %v3716_v47, 4  ;;  %v3149_v13 = vshrl.u32 %v2914_v18, 16  ;;  %v8501_v47 = vsel %vm5920_vm3, %v3734_v27, %v8479_v56  ;;  %v2792_v4 = vadd.f32 %v8379_v60, %v2791_v3 }
 0x48a   : > { %10097 = vst [vmem:[#allocation36_spill] sm:$0xff] %v8477_v45  ;;  %v3760_v31 = vshll.u32 %v8486_v39, 16  ;;  %v3764_v57 = vshrl.u32 %v8486_v39, 16  ;;  %v3742_v11 = vrot.slane %v3740_v25, 4  ;;  %v8506_v16 = vld [vmem:[#allocation3 + $0xa4] sm:$0x1] }
 0x48b   : > { %10098 = vst [vmem:[#allocation18_spill] sm:$0xff] %v8486_v39  ;;  %v3151_v19 = vrot.slane %v3149_v13, 7  ;;  %v3719_v45 = vor.u32 %v3718_v29, %v3714_v20  ;;  %v3147_v6 = vrot.slane %v8454_v23, 4  ;;  %v2829_v13 = vmax.f32 %v2792_v4, 0.0  ;;  %v8515_v3 = vld [vmem:[#allocation3 + $0x98] sm:$0x1] }
 0x48c   : > { %3333 = vst [vmem:[#allocation3 + $0xa8] sm:$0xf] %v3332_v37  ;;  %v8503_v33 = vrot.slane %v3760_v31, 5  ;;  %v3766_v62 = vrot.slane %v3764_v57, 4  ;;  %v3152_v37 = vshll.u32 %v2914_v18, 16  ;;  %v3751_v31 = vshrl.u32 %v8461_v24, 16 }
 0x48d   : > { %10099 = vst [vmem:[#allocation40_spill] sm:$0xff] %v8493_v53  ;;  %v3156_v25 = vrot.slane %v3151_v19, 4  ;;  %v3754_v23 = vshll.u32 %v8461_v24, 16  ;;  %v5742_v29 = vld [vmem:[#allocation4 + $0x78] sm:$0xff] }
 0x48e   : > { %3433 = vst.msk [vmem:[#allocation4 + $0x6c] sm:$0xf] %vm258_vm0, %v8486_v39  ;;  %3862 = vrot.lane.b32.xlu0 %v8493_v53, %s5839_s20  ;;  %v3710_v39 = vrot.slane %v3709_v61, 4  ;;  %v3767_v27 = vor.u32 %v3766_v62, %v8503_v33  ;;  %v3154_v57 = vor.u32 %v3152_v37, %v3151_v19  ;;  %3870 = vrot.lane.b32.xlu1 %v8501_v47, %s5839_s20  ;;  %v3770_v62 = vshll.u32 %v8506_v16, 16 }
 0x48f   : > { %10100 = vst [vmem:[#allocation24_spill] sm:$0xff] %v8501_v47  ;;  %v3837_v18 = vpop.permute.xlu2 %3836  ;;  %v3743_v19 = vor.u32 %v3742_v11, %v8479_v56  ;;  %v3336_v4 = vsel %vm6213_vm10, %v3156_v25, %v3335_v9  ;;  %v2915_v47 = vpack.c.bf16 %v2829_v13, %v2829_v13  ;;  %v3720_v53 = vrot.slane %v3719_v45, 4  ;;  %5616 = vmatmul.msk.bf16.gmra.mxu2 %vm2659_vm12, %v5742_v29 }
 0x490   : > { %10101 = vst [vmem:[#allocation43_spill] sm:$0xff] %v8515_v3  ;;  %v8521_v61 = vsel %vm5920_vm3, %v3710_v39, %v3714_v20  ;;  %v3155_v37 = vsel %vm6174_vm9, %v3147_v6, %v3154_v57  ;;  %v3768_v39 = vrot.slane %v3767_v27, 4  ;;  %v3746_v56 = vshll.u32 %v8515_v3, 16  ;;  %v2793_v13 = vpop.f32.mrf.mxu2  ;;  %v3338_v3 = vld [vmem:[#allocation3 + $0xb4] sm:$0xf] }
 0x491   : > { %3925 = vst.msk [vmem:[#allocation4 + $0x1c] sm:$0xf] %vm1356_vm14, %v3837_v18  ;;  %3866 = vrot.lane.b32.xlu2 %v8521_v61, %s5839_s20  ;;  %v3158_v9 = vshrl.u32 %v2915_v47, 16  ;;  %v3724_v11 = vrot.slane %v3722_v63, 5  ;;  %v3753_v57 = vrot.slane %v3751_v31, 4  ;;  %v3756_v25 = vrot.slane %v3754_v23, 5 }
 0x492   : > { %10102 = vst [vmem:[#allocation27_spill] sm:$0xff] %v8521_v61  ;;  %v3772_v45 = vrot.slane %v3770_v62, 5  ;;  %v3744_v61 = vrot.slane %v3743_v19, 4  ;;  %v2794_v27 = vadd.f32 %v8379_v60, %v2793_v13  ;;  %v3748_v31 = vrot.slane %v3746_v56, 5 }
 0x493   : > { %v8531_v18 = vld [vmem:[#allocation3 + $0xa8] sm:$0xf]  ;;  %3334 = vst.msk [vmem:[#allocation3 + $0xac] sm:$0xf] %vm258_vm0, %v3155_v37  ;;  %v3160_v29 = vrot.slane %v3158_v9, 7  ;;  %v3161_v37 = vshll.u32 %v2915_v47, 16  ;;  %v8543_v24 = vsel %vm5920_vm3, %v3720_v53, %v3724_v11  ;;  %v3757_v9 = vor.u32 %v3756_v25, %v3753_v57 }
 0x494   : > { %v3775_v20 = vshrl.u32 %v8531_v18, 16  ;;  %v3778_v6 = vshll.u32 %v8531_v18, 16  ;;  %3337 = vst [vmem:[#allocation3 + $0xb0] sm:$0x1] %v3336_v4  ;;  %v8547_v63 = vsel %vm5920_vm3, %v3768_v39, %v3772_v45  ;;  %v2830_v4 = vmax.f32 %v2794_v27, 0.0 }
 0x495   : > { %3434 = vst.msk [vmem:[#allocation4 + $0x70] sm:$0xf] %vm258_vm0, %v8531_v18  ;;  %v3163_v19 = vor.u32 %v3161_v37, %v3160_v29  ;;  %v8556_v53 = vsel %vm5920_vm3, %v3744_v61, %v3748_v31  ;;  %v3758_v13 = vrot.slane %v3757_v9, 4 }
 0x496   : > { %3868 = vrot.lane.b32.xlu0 %v8543_v24, %s5839_s20  ;;  %v3777_v23 = vrot.slane %v3775_v20, 4  ;;  %v3780_v62 = vrot.slane %v3778_v6, 5  ;;  %3876 = vrot.lane.b32.xlu1 %v8547_v63, %s5839_s20  ;;  %v2916_v11 = vpack.c.bf16 %v2830_v4, %v2830_v4  ;;  %v3164_v4 = vrot.slane %v3160_v29, 4 }
 0x497   : > { %v3833_v47 = vpop.permute.xlu0 %3832  ;;  %v3339_v39 = vsel %vm6160_vm8, %v3163_v19, %v3338_v3  ;;  %v8573_v31 = vsel %vm5920_vm3, %v3758_v13, %v8503_v33 }
 0x498   : > { %3923 = vst.msk [vmem:[#allocation4 + $0x14] sm:$0xf] %vm1356_vm14, %v3833_v47  ;;  %v3781_v20 = vor.u32 %v3780_v62, %v3777_v23  ;;  %v3166_v25 = vshrl.u32 %v2916_v11, 16  ;;  %v3169_v27 = vshll.u32 %v2916_v11, 16  ;;  %v3342_v23 = vld [vmem:[#allocation3 + $0xbc] sm:$0x1] }
 0x499   : > { %3872 = vrot.lane.b32.xlu2 %v8556_v53, %s5839_s20  ;;  %3340 = vst [vmem:[#allocation3 + $0xb4] sm:$0xf] %v3339_v39 }
 0x49a   : > { %v8562_v56 = vld [vmem:[#allocation3 + $0xac] sm:$0xf]  ;;  %v3168_v37 = vrot.slane %v3166_v25, 7  ;;  %v3782_v62 = vrot.slane %v3781_v20, 4 }
 0x49b   : > { %v3784_v6 = vshll.u32 %v8562_v56, 16  ;;  %v3788_v57 = vshrl.u32 %v8562_v56, 16  ;;  %3435 = vst.msk [vmem:[#allocation4 + $0x74] sm:$0xf] %vm258_vm0, %v8562_v56  ;;  %v8568_v45 = vld [vmem:[#allocation3 + $0xb0] sm:$0x1] }
 0x49c   : > { %v3171_v47 = vor.u32 %v3169_v27, %v3168_v37  ;;  %v3173_v9 = vrot.slane %v3168_v37, 4  ;;  %v3794_v39 = vshll.u32 %v8568_v45, 16 }
 0x49d   : > { %v3786_v61 = vrot.slane %v3784_v6, 5  ;;  %v3790_v3 = vrot.slane %v3788_v57, 4 }
 0x49e   : > { %3874 = vrot.lane.b32.xlu0 %v8573_v31, %s5839_s20  ;;  %v3172_v11 = vsel %vm6174_vm9, %v3164_v4, %v3171_v47  ;;  %v3343_v33 = vsel %vm6213_vm10, %v3173_v9, %v3342_v23  ;;  %v5617_v23 = vrot.slane %v7973_v50, 9 }
 0x49f   : > { %v3791_v19 = vor.u32 %v3790_v3, %v3786_v61  ;;  %v8580_v6 = vsel %vm5920_vm3, %v3782_v62, %v3786_v61  ;;  %3341 = vst.msk [vmem:[#allocation3 + $0xb8] sm:$0xf] %vm258_vm0, %v3172_v11  ;;  %v3796_v61 = vrot.slane %v3794_v39, 5  ;;  %v4000_v62 = vrot.slane %v7971_v40, 5 }
 0x4a0   : > { %v8588_v57 = vld [vmem:[#allocation3 + $0xb4] sm:$0xf]  ;;  %3344 = vst [vmem:[#allocation3 + $0xbc] sm:$0x1] %v3343_v33 }
 0x4a1   : > { %3878 = vrot.lane.b32.xlu2 %v8580_v6, %s5839_s20  ;;  %v3792_v20 = vrot.slane %v3791_v19, 4  ;;  %10103 = vst [vmem:[#allocation44_spill] sm:$0xff] %v8588_v57  ;;  %v3799_v29 = vshrl.u32 %v8588_v57, 16  ;;  %v3802_v25 = vshll.u32 %v8588_v57, 16  ;;  %v4001_v33 = vsel %vm6995_vm13, %v5617_v23, %v4000_v62 }
 0x4a2   : > { %3436 = vst.msk [vmem:[#allocation4 + $0x78] sm:$0xf] %vm258_vm0, %v8588_v57  ;;  %v4002_v23 = vrot.slane %v4000_v62, 4 }
 0x4a3   : > { %v3835_v13 = vpop.permute.xlu1 %3834  ;;  %v3801_v3 = vrot.slane %v3799_v29, 4  ;;  %v3804_v37 = vrot.slane %v3802_v25, 5  ;;  %v8596_v27 = vsel %vm5920_vm3, %v3792_v20, %v3796_v61  ;;  %v4007_v25 = vrot.slane %v8066_v49, 5 }
 0x4a4   : > { %3924 = vst.msk [vmem:[#allocation4 + $0x18] sm:$0xf] %vm1356_vm14, %v3835_v13 }
 0x4a5   : > { %10104 = vst [vmem:[#allocation32_spill] sm:$0xff] %v8596_v27  ;;  %v3805_v19 = vor.u32 %v3804_v37, %v3801_v3 }
 0x4a6   : > { %3880 = vrot.lane.b32.xlu0 %v8596_v27, %s5839_s20  ;;  %v8604_v4 = vld [vmem:[#allocation3 + $0xb8] sm:$0xf] }
 0x4a7   : > { %10105 = vst [vmem:[#allocation45_spill] sm:$0xff] %v8604_v4  ;;  %v3808_v47 = vshll.u32 %v8604_v4, 16  ;;  %v8609_v9 = vld [vmem:[#allocation3 + $0xbc] sm:$0x1]  ;;  %v3812_v39 = vshrl.u32 %v8604_v4, 16  ;;  %v3806_v50 = vrot.slane %v3805_v19, 4 }
 0x4a8   : > { %3437 = vst.msk [vmem:[#allocation4 + $0x7c] sm:$0xf] %vm258_vm0, %v8604_v4  ;;  %v3818_v29 = vshll.u32 %v8609_v9, 16  ;;  %v5792_v19 = vld [vmem:[#allocation3 + $0x8] sm:$0x1] }
 0x4a9   : > { %v3810_v40 = vrot.slane %v3808_v47, 5  ;;  %v3814_v20 = vrot.slane %v3812_v39, 4  ;;  %v4003_v47 = vrot.slane %v5792_v19, 5  ;;  %v4009_v39 = vrot.slane %v4007_v25, 4 }
 0x4aa   : > { %v3820_v37 = vrot.slane %v3818_v29, 5  ;;  %v5618_v29 = vrot.slane %v8055_v48, 9 }
 0x4ab   : > { %v3843_v11 = vpop.permute.xlu2 %3842  ;;  %v8620_v13 = vsel %vm5920_vm3, %v3806_v50, %v3810_v40  ;;  %v3815_v61 = vor.u32 %v3814_v20, %v3810_v40  ;;  %v5793_v50 = vld [vmem:[#allocation3 + $0x14] sm:$0x1]  ;;  %v4004_v40 = vsel %vm6995_vm13, %v4002_v23, %v4003_v47  ;;  %v5619_v23 = vrot.slane %v8083_v8, 9 }
 0x4ac   : > { %3928 = vst.msk [vmem:[#allocation4 + $0x28] sm:$0xf] %vm1356_vm14, %v3843_v11  ;;  %3882 = vrot.lane.b32.xlu1 %v8620_v13, %s5839_s20  ;;  %v4010_v27 = vrot.slane %v5793_v50, 5  ;;  %v4028_v47 = vrot.slane %v8167_v7, 5  ;;  %v5794_v50 = vld [vmem:[#allocation3 + $0x20] sm:$0x1] }
 0x4ad   : > { %v3816_v3 = vrot.slane %v3815_v61, 4  ;;  %v4021_v61 = vrot.slane %v8132_v1, 5 }
 0x4ae   : > { %4110 = vrot.lane.b32.xlu0 %v4001_v33, %s5840_s25  ;;  %v8635_v62 = vsel %vm6995_vm13, %v4009_v39, %v4010_v27  ;;  %v5620_v27 = vrot.slane %v8116_v41, 9 }
 0x4af   : > { %v8626_v11 = vsel %vm5920_vm3, %v3816_v3, %v3820_v37  ;;  %10106 = vst [vmem:[#allocation37_spill] sm:$0xff] %v8635_v62  ;;  %v8645_v3 = vsel %vm6995_vm13, %v5618_v29, %v4007_v25  ;;  %v4014_v37 = vrot.slane %v8099_v2, 5 }
 0x4b0   : > { %3884 = vrot.lane.b32.xlu2 %v8626_v11, %s5839_s20  ;;  %v8654_v19 = vsel %vm6995_vm13, %v5620_v27, %v4021_v61  ;;  %v4023_v27 = vrot.slane %v4021_v61, 4  ;;  %v5621_v61 = vrot.slane %v8150_v5, 9 }
 0x4b1   : > { %10107 = vst [vmem:[#allocation9_spill] sm:$0xff] %v8654_v19  ;;  %v8661_v25 = vsel %vm6995_vm13, %v5619_v23, %v4014_v37  ;;  %v4016_v39 = vrot.slane %v4014_v37, 4  ;;  %v5795_v23 = vld [vmem:[#allocation3 + $0x38] sm:$0x1]  ;;  %v5796_v37 = vld [vmem:[#allocation3 + $0x2c] sm:$0x1] }
 0x4b2   : > { %10108 = vst [vmem:[#allocation47_spill] sm:$0xff] %v8661_v25 }
 0x4b3   : > { %v3839_v33 = vpop.permute.xlu0 %3838 }
 0x4b4   : > { %3926 = vst.msk [vmem:[#allocation4 + $0x20] sm:$0xf] %vm1356_vm14, %v3839_v33  ;;  %4112 = vrot.lane.b32.xlu1 %v4004_v40, %s5840_s25  ;;  %v4017_v40 = vrot.slane %v5794_v50, 5  ;;  %v4042_v50 = vrot.slane %v8269_v36, 5 }
 0x4b6   : > { %4116 = vrot.lane.b32.xlu0 %v8635_v62, %s5840_s25  ;;  %v8668_v29 = vsel %vm6995_vm13, %v4016_v39, %v4017_v40  ;;  %v4024_v62 = vrot.slane %v5796_v37, 5  ;;  %v4035_v40 = vrot.slane %v8217_v51, 5 }
 0x4b7   : > { %v3841_v20 = vpop.permute.xlu1 %3840 }
 0x4b8   : > { %3927 = vst.msk [vmem:[#allocation4 + $0x24] sm:$0xf] %vm1356_vm14, %v3841_v20  ;;  %4114 = vrot.lane.b32.xlu2 %v8645_v3, %s5840_s25  ;;  %v4030_v20 = vrot.slane %v4028_v47, 4  ;;  %v4037_v37 = vrot.slane %v4035_v40, 4 }
 0x4bc   : > { %4118 = vrot.lane.b32.xlu1 %v8661_v25, %s5840_s25 }
 0x4be   : > { %4122 = vrot.lane.b32.xlu0 %v8654_v19, %s5840_s25  ;;  %v4031_v19 = vrot.slane %v5795_v23, 5  ;;  %v4049_v23 = vrot.slane %v8333_v32, 5 }
 0x4bf   : > { %v3849_v33 = vpop.permute.xlu2 %3848 }
 0x4c0   : > { %3931 = vst.msk [vmem:[#allocation4 + $0x34] sm:$0xf] %vm1356_vm14, %v3849_v33  ;;  %4120 = vrot.lane.b32.xlu2 %v8668_v29, %s5840_s25  ;;  %v8674_v25 = vsel %vm6995_vm13, %v4030_v20, %v4031_v19  ;;  %v8680_v33 = vsel %vm6995_vm13, %v4023_v27, %v4024_v62  ;;  %v8689_v19 = vsel %vm6995_vm13, %v5621_v61, %v4028_v47  ;;  %v5623_v62 = vrot.slane %v8245_v28, 9  ;;  %v5797_v61 = vld [vmem:[#allocation3 + $0x44] sm:$0x1] }
 0x4c1   : > { %10109 = vst [vmem:[#allocation54_spill] sm:$0xff] %v8674_v25  ;;  %v5622_v20 = vrot.slane %v8199_v14, 9 }
 0x4c2   : > { %10110 = vst [vmem:[#allocation49_spill] sm:$0xff] %v8680_v33  ;;  %v8698_v27 = vsel %vm6995_vm13, %v5623_v62, %v4042_v50 }
 0x4c3   : > { %10111 = vst [vmem:[#allocation34_spill] sm:$0xff] %v8689_v19  ;;  %v8705_v47 = vsel %vm6995_vm13, %v5622_v20, %v4035_v40  ;;  %v4045_v40 = vrot.slane %v8276_v26, 5 }
 0x4c4   : > { %4124 = vrot.lane.b32.xlu1 %v8680_v33, %s5840_s25  ;;  %10112 = vst [vmem:[#allocation51_spill] sm:$0xff] %v8698_v27  ;;  %v4044_v33 = vrot.slane %v4042_v50, 4 }
 0x4c6   : > { %4128 = vrot.lane.b32.xlu0 %v8674_v25, %s5840_s25  ;;  %v4051_v25 = vrot.slane %v4049_v23, 4  ;;  %v8726_v50 = vsel %vm6995_vm13, %v4044_v33, %v4045_v40  ;;  %v5626_v33 = vrot.slane %v8192_v15, 9 }
 0x4c7   : > { %v3845_v39 = vpop.permute.xlu0 %3844  ;;  %10114 = vst [vmem:[#allocation53_spill] sm:$0xff] %v8726_v50 }
 0x4c8   : > { %3929 = vst.msk [vmem:[#allocation4 + $0x2c] sm:$0xf] %vm1356_vm14, %v3845_v39  ;;  %4126 = vrot.lane.b32.xlu2 %v8689_v19, %s5840_s25  ;;  %v4038_v39 = vrot.slane %v5797_v61, 5  ;;  %v4052_v19 = vrot.slane %v8343_v52, 5  ;;  %v5624_v52 = vrot.slane %v8308_v42, 9 }
 0x4ca   : > { %v8711_v62 = vsel %vm6995_vm13, %v4037_v37, %v4038_v39  ;;  %v8720_v20 = vsel %vm6995_vm13, %v4051_v25, %v4052_v19  ;;  %v8734_v26 = vsel %vm6995_vm13, %v5624_v52, %v4049_v23  ;;  %v4056_v25 = vrot.slane %v8410_v12, 5 }
 0x4cb   : > { %10113 = vst [vmem:[#allocation28_spill] sm:$0xff] %v8720_v20  ;;  %v5625_v37 = vrot.slane %v8382_v35, 9  ;;  %v4070_v39 = vrot.slane %v8262_v22, 5  ;;  %v4059_v52 = vrot.slane %v8419_v43, 5 }
 0x4cc   : > { %4130 = vrot.lane.b32.xlu1 %v8705_v47, %s5840_s25  ;;  %10115 = vst [vmem:[#allocation55_spill] sm:$0xff] %v8734_v26  ;;  %v4058_v40 = vrot.slane %v4056_v25, 4 }
 0x4cd   : > { %v8751_v23 = vsel %vm6995_vm13, %v5625_v37, %v4056_v25  ;;  %v4073_v37 = vrot.slane %v8363_v0, 5  ;;  %v4066_v25 = vrot.slane %v8373_v58, 5  ;;  %v5627_v0 = vrot.slane %v8281_v21, 9 }
 0x4ce   : > { %4134 = vrot.lane.b32.xlu0 %v8698_v27, %s5840_s25  ;;  %10117 = vst [vmem:[#allocation6_spill] sm:$0xff] %v8751_v23  ;;  %v4084_v58 = vrot.slane %v8406_v54, 5 }
 0x4d0   : > { %4132 = vrot.lane.b32.xlu2 %v8711_v62, %s5840_s25 }
 0x4d3   : > { %v3847_v27 = vpop.permute.xlu1 %3846 }
 0x4d4   : > { %3930 = vst.msk [vmem:[#allocation4 + $0x30] sm:$0xf] %vm1356_vm14, %v3847_v27  ;;  %4136 = vrot.lane.b32.xlu1 %v8726_v50, %s5840_s25  ;;  %v4063_v27 = vrot.slane %v8211_v46, 5 }
 0x4d6   : > { %4140 = vrot.lane.b32.xlu0 %v8720_v20, %s5840_s25  ;;  %v8744_v61 = vsel %vm6995_vm13, %v5626_v33, %v4063_v27  ;;  %v8758_v33 = vsel %vm6995_vm13, %v4058_v40, %v4059_v52  ;;  %v4065_v20 = vrot.slane %v4063_v27, 4  ;;  %v4077_v40 = vrot.slane %v8352_v30, 5 }
 0x4d7   : > { %10116 = vst [vmem:[#allocation56_spill] sm:$0xff] %v8744_v61  ;;  %v5629_v52 = vrot.slane %v8399_v38, 9 }
 0x4d8   : > { %4138 = vrot.lane.b32.xlu2 %v8734_v26, %s5840_s25  ;;  %10118 = vst [vmem:[#allocation7_spill] sm:$0xff] %v8758_v33  ;;  %v8774_v27 = vsel %vm6995_vm13, %v4065_v20, %v4066_v25  ;;  %v10123_v25 = vld [vmem:[#allocation18_spill] sm:$0xff] }
 0x4d9   : > { %10120 = vst [vmem:[#allocation57_spill] sm:$0xff] %v8774_v27 }
 0x4db   : > { %v3855_v19 = vpop.permute.xlu2 %3854 }
 0x4dc   : > { %3934 = vst.msk [vmem:[#allocation4 + $0x40] sm:$0xf] %vm1356_vm14, %v3855_v19  ;;  %4142 = vrot.lane.b32.xlu1 %v8751_v23, %s5840_s25  ;;  %v4072_v19 = vrot.slane %v4070_v39, 4  ;;  %v4086_v23 = vrot.slane %v4084_v58, 4 }
 0x4de   : > { %4146 = vrot.lane.b32.xlu0 %v8744_v61, %s5840_s25  ;;  %v8768_v43 = vsel %vm6995_vm13, %v4072_v19, %v4073_v37  ;;  %v5628_v19 = vrot.slane %v8323_v17, 9  ;;  %v8793_v37 = vsel %vm6995_vm13, %v5629_v52, %v4084_v58 }
 0x4df   : > { %10119 = vst [vmem:[#allocation8_spill] sm:$0xff] %v8768_v43 }
 0x4e0   : > { %4144 = vrot.lane.b32.xlu2 %v8758_v33, %s5840_s25  ;;  %10122 = vst [vmem:[#allocation59_spill] sm:$0xff] %v8793_v37 }
 0x4e3   : > { %v3851_v61 = vpop.permute.xlu0 %3850  ;;  %v3861_v50 = vpop.permute.xlu2 %3860 }
 0x4e4   : > { %3932 = vst.msk [vmem:[#allocation4 + $0x38] sm:$0xf] %vm1356_vm14, %v3851_v61  ;;  %4148 = vrot.lane.b32.xlu1 %v8774_v27, %s5840_s25 }
 0x4e5   : > { %3937 = vst.msk [vmem:[#allocation4 + $0x4c] sm:$0xf] %vm1356_vm14, %v3861_v50  ;;  %v8783_v50 = vsel %vm6995_vm13, %v5627_v0, %v4070_v39  ;;  %v8800_v39 = vsel %vm6995_vm13, %v5628_v19, %v4077_v40  ;;  %v4079_v0 = vrot.slane %v4077_v40, 4  ;;  %v4094_v40 = vrot.slane %v8506_v16, 5  ;;  %v10128_v16 = vld [vmem:[#allocation35_spill] sm:$0xff] }
 0x4e6   : > { %4152 = vrot.lane.b32.xlu0 %v8768_v43, %s5840_s25  ;;  %10121 = vst [vmem:[#allocation58_spill] sm:$0xff] %v8783_v50  ;;  %v5630_v58 = vrot.slane %v10128_v16, 9 }
 0x4e7   : > { %10124 = vst [vmem:[#allocation18_spill] sm:$0xff] %v8800_v39 }
 0x4e8   : > { %v3853_v61 = vpop.permute.xlu1 %3852  ;;  %4150 = vrot.lane.b32.xlu2 %v8783_v50, %s5840_s25 }
 0x4e9   : > { %3933 = vst.msk [vmem:[#allocation4 + $0x3c] sm:$0xf] %vm1356_vm14, %v3853_v61  ;;  %v4091_v61 = vrot.slane %v10123_v25, 5 }
 0x4eb   : > { %v3867_v20 = vpop.permute.xlu2 %3866  ;;  %v4093_v50 = vrot.slane %v4091_v61, 4 }
 0x4ec   : > { %3940 = vst.msk [vmem:[#allocation4 + $0x58] sm:$0xf] %vm1356_vm14, %v3867_v20  ;;  %4154 = vrot.lane.b32.xlu1 %v8800_v39, %s5840_s25  ;;  %v10125_v20 = vld [vmem:[#allocation15_spill] sm:$0xff] }
 0x4ed   : > { %v4080_v43 = vrot.slane %v10125_v20, 5  ;;  %v8817_v20 = vsel %vm6995_vm13, %v4093_v50, %v4094_v40  ;;  %v8833_v50 = vsel %vm6995_vm13, %v5630_v58, %v4091_v61  ;;  %v5631_v40 = vrot.slane %v8531_v18, 9 }
 0x4ee   : > { %4158 = vrot.lane.b32.xlu0 %v8793_v37, %s5840_s25  ;;  %v10126_v37 = vld [vmem:[#allocation43_spill] sm:$0xff]  ;;  %10127 = vst [vmem:[#allocation15_spill] sm:$0xff] %v8817_v20 }
 0x4ef   : > { %v8808_v52 = vsel %vm6995_vm13, %v4079_v0, %v4080_v43  ;;  %v4087_v39 = vrot.slane %v10126_v37, 5  ;;  %v4105_v37 = vrot.slane %v8604_v4, 5 }
 0x4f0   : > { %v3859_v27 = vpop.permute.xlu1 %3858  ;;  %4156 = vrot.lane.b32.xlu2 %v8808_v52, %s5840_s25 }
 0x4f1   : > { %3936 = vst.msk [vmem:[#allocation4 + $0x48] sm:$0xf] %vm1356_vm14, %v3859_v27  ;;  %v8823_v43 = vsel %vm6995_vm13, %v4086_v23, %v4087_v39  ;;  %v4098_v23 = vrot.slane %v8562_v56, 5 }
 0x4f3   : > { %v3873_v19 = vpop.permute.xlu2 %3872  ;;  %v8849_v61 = vsel %vm6995_vm13, %v5631_v40, %v4098_v23  ;;  %v4100_v58 = vrot.slane %v4098_v23, 4  ;;  %v4108_v23 = vrot.slane %v8609_v9, 5 }
 0x4f4   : > { %3943 = vst.msk [vmem:[#allocation4 + $0x64] sm:$0xf] %vm1356_vm14, %v3873_v19  ;;  %4160 = vrot.lane.b32.xlu1 %v8823_v43, %s5840_s25  ;;  %v5632_v19 = vrot.slane %v8588_v57, 9 }
 0x4f6   : > { %4164 = vrot.lane.b32.xlu0 %v8817_v20, %s5840_s25 }
 0x4f8   : > { %v3857_v27 = vpop.permute.xlu0 %3856  ;;  %v3865_v0 = vpop.permute.xlu1 %3864  ;;  %4162 = vrot.lane.b32.xlu2 %v8833_v50, %s5840_s25 }
 0x4f9   : > { %3935 = vst.msk [vmem:[#allocation4 + $0x44] sm:$0xf] %vm1356_vm14, %v3857_v27  ;;  %v8843_v27 = vsel %vm6995_vm13, %v5632_v19, %v4105_v37 }
 0x4fa   : > { %3939 = vst.msk [vmem:[#allocation4 + $0x54] sm:$0xf] %vm1356_vm14, %v3865_v0 }
 0x4fb   : > { %v3879_v39 = vpop.permute.xlu2 %3878  ;;  %10129 = vst [vmem:[#allocation43_spill] sm:$0xff] %v8843_v27 }
 0x4fc   : > { %3946 = vst.msk [vmem:[#allocation4 + $0x70] sm:$0xf] %vm1356_vm14, %v3879_v39  ;;  %4166 = vrot.lane.b32.xlu1 %v8849_v61, %s5840_s25  ;;  %v4101_v39 = vrot.slane %v8568_v45, 5 }
 0x4fe   : > { %4170 = vrot.lane.b32.xlu0 %v8843_v27, %s5840_s25  ;;  %v8858_v19 = vsel %vm6995_vm13, %v4100_v58, %v4101_v39  ;;  %v4107_v27 = vrot.slane %v4105_v37, 4 }
 0x500   : > { %v3863_v0 = vpop.permute.xlu0 %3862  ;;  %v3871_v20 = vpop.permute.xlu1 %3870  ;;  %4168 = vrot.lane.b32.xlu2 %v8858_v19, %s5840_s25  ;;  %v8867_v45 = vsel %vm6995_vm13, %v4107_v27, %v4108_v23 }
 0x501   : > { %3938 = vst.msk [vmem:[#allocation4 + $0x50] sm:$0xf] %vm1356_vm14, %v3863_v0 }
 0x502   : > { %3942 = vst.msk [vmem:[#allocation4 + $0x60] sm:$0xf] %vm1356_vm14, %v3871_v20 }
 0x503   : > { %10130 = vst [vmem:[#allocation35_spill] sm:$0xff] %v8867_v45 }
 0x504   : > { %4172 = vrot.lane.b32.xlu1 %v8867_v45, %s5840_s25 }
 0x506   : > { %4242 = vrot.lane.b32.xlu0 %v8066_v49, %s5841_s26 }
 0x508   : > { %v3869_v20 = vpop.permute.xlu0 %3868  ;;  %v3877_v40 = vpop.permute.xlu1 %3876  ;;  %4240 = vrot.lane.b32.xlu2 %v8055_v48, %s5841_s26 }
 0x509   : > { %3941 = vst.msk [vmem:[#allocation4 + $0x5c] sm:$0xf] %vm1356_vm14, %v3869_v20 }
 0x50a   : > { %3945 = vst.msk [vmem:[#allocation4 + $0x6c] sm:$0xf] %vm1356_vm14, %v3877_v40  ;;  %v3885_v9 = vpop.permute.xlu2 %3884 }
 0x50b   : > { %3949 = vst.msk [vmem:[#allocation4 + $0x7c] sm:$0xf] %vm1356_vm14, %v3885_v9 }
 0x50c   : > { %4244 = vrot.lane.b32.xlu1 %v8083_v8, %s5841_s26 }
 0x50e   : > { %4248 = vrot.lane.b32.xlu0 %v8116_v41, %s5841_s26 }
 0x510   : > { %v3875_v49 = vpop.permute.xlu0 %3874  ;;  %4246 = vrot.lane.b32.xlu2 %v8099_v2, %s5841_s26 }
 0x511   : > { %3944 = vst.msk [vmem:[#allocation4 + $0x68] sm:$0xf] %vm1356_vm14, %v3875_v49 }
 0x512   : > { %v2796_v37 = vpop.f32.mrf.mxu2  ;;  %v4115_v27 = vpop.permute.xlu2 %4114 }
 0x513   : > { %v2797_v58 = vadd.f32 %v8379_v60, %v2796_v37  ;;  %4208 = vst.msk [vmem:[#allocation4 + $0x8] sm:$0xf] %vm1648_vm15, %v4115_v27  ;;  %v3345_v27 = vld [vmem:[#allocation3 + $0xc0] sm:$0xf] }
 0x514   : > { %4250 = vrot.lane.b32.xlu1 %v8132_v1, %s5841_s26 }
 0x515   : > { %v2831_v48 = vmax.f32 %v2797_v58, 0.0 }
 0x516   : > { %4254 = vrot.lane.b32.xlu0 %v8167_v7, %s5841_s26 }
 0x517   : > { %v2917_v39 = vpack.c.bf16 %v2831_v48, %v2831_v48 }
 0x518   : > { %v3881_v0 = vpop.permute.xlu0 %3880  ;;  %4252 = vrot.lane.b32.xlu2 %v8150_v5, %s5841_s26 }
 0x519   : > { %3947 = vst.msk [vmem:[#allocation4 + $0x74] sm:$0xf] %vm1356_vm14, %v3881_v0  ;;  %v3175_v23 = vshrl.u32 %v2917_v39, 16  ;;  %v3178_v20 = vshll.u32 %v2917_v39, 16 }
 0x51a   : > { %v2798_v40 = vpop.f32.mrf.mxu2  ;;  %v4121_v9 = vpop.permute.xlu2 %4120 }
 0x51b   : > { %v3177_v49 = vrot.slane %v3175_v23, 7  ;;  %v2799_v37 = vadd.f32 %v8379_v60, %v2798_v40  ;;  %4211 = vst.msk [vmem:[#allocation4 + $0x14] sm:$0xf] %vm1648_vm15, %v4121_v9 }
 0x51c   : > { %4256 = vrot.lane.b32.xlu1 %v8199_v14, %s5841_s26 }
 0x51d   : > { %v3180_v58 = vor.u32 %v3178_v20, %v3177_v49  ;;  %v2832_v48 = vmax.f32 %v2799_v37, 0.0  ;;  %v3181_v45 = vrot.slane %v3177_v49, 4  ;;  %v3349_v37 = vld [vmem:[#allocation3 + $0xc8] sm:$0x1] }
 0x51e   : > { %4260 = vrot.lane.b32.xlu0 %v8245_v28, %s5841_s26  ;;  %v3883_v39 = vpop.permute.xlu1 %3882 }
 0x51f   : > { %v3346_v23 = vsel %vm6160_vm8, %v3180_v58, %v3345_v27  ;;  %v2918_v44 = vpack.c.bf16 %v2832_v48, %v2832_v48  ;;  %3948 = vst.msk [vmem:[#allocation4 + $0x78] sm:$0xf] %vm1356_vm14, %v3883_v39 }
 0x520   : > { %v4111_v0 = vpop.permute.xlu0 %4110  ;;  %4258 = vrot.lane.b32.xlu2 %v8217_v51, %s5841_s26  ;;  %3347 = vst [vmem:[#allocation3 + $0xc0] sm:$0xf] %v3346_v23 }
 0x521   : > { %4206 = vst.msk [vmem:[#allocation4] sm:$0xf] %vm1648_vm15, %v4111_v0  ;;  %v3183_v60 = vshrl.u32 %v2918_v44, 16  ;;  %v3186_v40 = vshll.u32 %v2918_v44, 16 }
 0x522   : > { %v4127_v9 = vpop.permute.xlu2 %4126 }
 0x523   : > { %v3185_v20 = vrot.slane %v3183_v60, 7  ;;  %4214 = vst.msk [vmem:[#allocation4 + $0x20] sm:$0xf] %vm1648_vm15, %v4127_v9 }
 0x524   : > { %4262 = vrot.lane.b32.xlu1 %v8269_v36, %s5841_s26 }
 0x525   : > { %v3188_v59 = vor.u32 %v3186_v40, %v3185_v20  ;;  %v3190_v27 = vrot.slane %v3185_v20, 4 }
 0x526   : > { %4266 = vrot.lane.b32.xlu0 %v8333_v32, %s5841_s26  ;;  %v4113_v48 = vpop.permute.xlu1 %4112 }
 0x527   : > { %v3189_v44 = vsel %vm6174_vm9, %v3181_v45, %v3188_v59  ;;  %v3350_v49 = vsel %vm6213_vm10, %v3190_v27, %v3349_v37  ;;  %4207 = vst.msk [vmem:[#allocation4 + $0x4] sm:$0xf] %vm1648_vm15, %v4113_v48 }
 0x528   : > { %v4117_v58 = vpop.permute.xlu0 %4116  ;;  %4264 = vrot.lane.b32.xlu2 %v8308_v42, %s5841_s26  ;;  %3348 = vst.msk [vmem:[#allocation3 + $0xc4] sm:$0xf] %vm258_vm0, %v3189_v44  ;;  %vm5414_vm0 = vcmask 31744  }
 0x529   : > { %4209 = vst.msk [vmem:[#allocation4 + $0xc] sm:$0xf] %vm1648_vm15, %v4117_v58 }
 0x52a   : > { %3351 = vst [vmem:[#allocation3 + $0xc8] sm:$0x1] %v3350_v49  ;;  %v4133_v0 = vpop.permute.xlu2 %4132 }
 0x52b   : > { %4217 = vst.msk [vmem:[#allocation4 + $0x2c] sm:$0xf] %vm1648_vm15, %v4133_v0 }
 0x52c   : > { %4268 = vrot.lane.b32.xlu1 %v8382_v35, %s5841_s26 }
 0x52e   : > { %4272 = vrot.lane.b32.xlu0 %v8192_v15, %s5841_s26  ;;  %v4119_v55 = vpop.permute.xlu1 %4118 }
 0x52f   : > { %4210 = vst.msk [vmem:[#allocation4 + $0x10] sm:$0xf] %vm1648_vm15, %v4119_v55  ;;  %v8963_v49 = vld [vmem:[#allocation3 + $0xc4] sm:$0xf]  ;;  %v8972_v55 = vld [vmem:[#allocation3 + $0xc0] sm:$0xf] }
 0x530   : > { %v4123_v34 = vpop.permute.xlu0 %4122  ;;  %4270 = vrot.lane.b32.xlu2 %v8410_v12, %s5841_s26  ;;  %10131 = vst [vmem:[#allocation60_spill] sm:$0xff] %v8963_v49  ;;  %v4372_v32 = vshll.u32 %v8972_v55, 16 }
 0x531   : > { %4212 = vst.msk [vmem:[#allocation4 + $0x18] sm:$0xf] %vm1648_vm15, %v4123_v34 }
 0x532   : > { %v4139_v45 = vpop.permute.xlu2 %4138  ;;  %10132 = vst [vmem:[#allocation61_spill] sm:$0xff] %v8972_v55 }
 0x533   : > { %4220 = vst.msk [vmem:[#allocation4 + $0x38] sm:$0xf] %vm1648_vm15, %v4139_v45 }
 0x534   : > { %4274 = vrot.lane.b32.xlu1 %v8211_v46, %s5841_s26 }
 0x536   : > { %4278 = vrot.lane.b32.xlu0 %v8262_v22, %s5841_s26  ;;  %v4125_v23 = vpop.permute.xlu1 %4124 }
 0x537   : > { %4213 = vst.msk [vmem:[#allocation4 + $0x1c] sm:$0xf] %vm1648_vm15, %v4125_v23  ;;  %v10134_v23 = vld [vmem:[#allocation11_spill] sm:$0xff] }
 0x538   : > { %v4129_v39 = vpop.permute.xlu0 %4128  ;;  %4276 = vrot.lane.b32.xlu2 %v8281_v21, %s5841_s26 }
 0x539   : > { %4215 = vst.msk [vmem:[#allocation4 + $0x24] sm:$0xf] %vm1648_vm15, %v4129_v39  ;;  %v10133_v39 = vld [vmem:[#allocation26_spill] sm:$0xff] }
 0x53a   : > { %v4145_v60 = vpop.permute.xlu2 %4144 }
 0x53b   : > { %4223 = vst.msk [vmem:[#allocation4 + $0x44] sm:$0xf] %vm1648_vm15, %v4145_v60 }
 0x53c   : > { %4280 = vrot.lane.b32.xlu1 %v8323_v17, %s5841_s26 }
 0x53e   : > { %4284 = vrot.lane.b32.xlu0 %v8399_v38, %s5841_s26  ;;  %v4131_v9 = vpop.permute.xlu1 %4130 }
 0x53f   : > { %4216 = vst.msk [vmem:[#allocation4 + $0x28] sm:$0xf] %vm1648_vm15, %v4131_v9  ;;  %v10135_v9 = vld [vmem:[#allocation16_spill] sm:$0xff] }
 0x540   : > { %v4135_v40 = vpop.permute.xlu0 %4134  ;;  %4282 = vrot.lane.b32.xlu2 %v8352_v30, %s5841_s26 }
 0x541   : > { %4218 = vst.msk [vmem:[#allocation4 + $0x30] sm:$0xf] %vm1648_vm15, %v4135_v40 }
 0x542   : > { %v4151_v20 = vpop.permute.xlu2 %4150 }
 0x543   : > { %4226 = vst.msk [vmem:[#allocation4 + $0x50] sm:$0xf] %vm1648_vm15, %v4151_v20 }
 0x544   : > { %4286 = vrot.lane.b32.xlu1 %v8406_v54, %s5841_s26 }
 0x546   : > { %4290 = vrot.lane.b32.xlu0 %v10123_v25, %s5841_s26  ;;  %v4137_v59 = vpop.permute.xlu1 %4136 }
 0x547   : > { %4219 = vst.msk [vmem:[#allocation4 + $0x34] sm:$0xf] %vm1648_vm15, %v4137_v59  ;;  %v10137_v59 = vld [vmem:[#allocation38_spill] sm:$0xff] }
 0x548   : > { %v4141_v37 = vpop.permute.xlu0 %4140  ;;  %4288 = vrot.lane.b32.xlu2 %v10128_v16, %s5841_s26 }
 0x549   : > { %4221 = vst.msk [vmem:[#allocation4 + $0x3c] sm:$0xf] %vm1648_vm15, %v4141_v37  ;;  %v10136_v37 = vld [vmem:[#allocation46_spill] sm:$0xff] }
 0x54a   : > { %v4157_v27 = vpop.permute.xlu2 %4156 }
 0x54b   : > { %4229 = vst.msk [vmem:[#allocation4 + $0x5c] sm:$0xf] %vm1648_vm15, %v4157_v27 }
 0x54c   : > { %4292 = vrot.lane.b32.xlu1 %v8531_v18, %s5841_s26 }
 0x54e   : > { %4296 = vrot.lane.b32.xlu0 %v8588_v57, %s5841_s26  ;;  %v4143_v48 = vpop.permute.xlu1 %4142 }
 0x54f   : > { %4222 = vst.msk [vmem:[#allocation4 + $0x40] sm:$0xf] %vm1648_vm15, %v4143_v48  ;;  %v10138_v48 = vld [vmem:[#allocation39_spill] sm:$0xff] }
 0x550   : > { %v4147_v58 = vpop.permute.xlu0 %4146  ;;  %4294 = vrot.lane.b32.xlu2 %v8562_v56, %s5841_s26 }
 0x551   : > { %4224 = vst.msk [vmem:[#allocation4 + $0x48] sm:$0xf] %vm1648_vm15, %v4147_v58 }
 0x552   : > { %v4163_v44 = vpop.permute.xlu2 %4162 }
 0x553   : > { %4232 = vst.msk [vmem:[#allocation4 + $0x68] sm:$0xf] %vm1648_vm15, %v4163_v44 }
 0x554   : > { %4298 = vrot.lane.b32.xlu1 %v8604_v4, %s5841_s26  ;;  %v4382_v4 = vshrl.u32 %v8963_v49, 16 }
 0x556   : > { %4302 = vrot.lane.b32.xlu0 %v8963_v49, %s5841_s26  ;;  %v4149_v34 = vpop.permute.xlu1 %4148 }
 0x557   : > { %4225 = vst.msk [vmem:[#allocation4 + $0x4c] sm:$0xf] %vm1648_vm15, %v4149_v34  ;;  %v10140_v34 = vld [vmem:[#allocation48_spill] sm:$0xff] }
 0x558   : > { %v4153_v0 = vpop.permute.xlu0 %4152  ;;  %4300 = vrot.lane.b32.xlu2 %v8972_v55, %s5841_s26 }
 0x559   : > { %4227 = vst.msk [vmem:[#allocation4 + $0x54] sm:$0xf] %vm1648_vm15, %v4153_v0  ;;  %v10139_v0 = vld [vmem:[#allocation22_spill] sm:$0xff] }
 0x55a   : > { %v4169_v45 = vpop.permute.xlu2 %4168 }
 0x55b   : > { %4235 = vst.msk [vmem:[#allocation4 + $0x74] sm:$0xf] %vm1648_vm15, %v4169_v45 }
 0x55c   : > { %4392 = vrot.lane.b32.xlu1 %v10134_v23, %s5842_s27 }
 0x55e   : > { %4396 = vrot.lane.b32.xlu0 %v10133_v39, %s5842_s27  ;;  %v4155_v40 = vpop.permute.xlu1 %4154 }
 0x55f   : > { %4228 = vst.msk [vmem:[#allocation4 + $0x58] sm:$0xf] %vm1648_vm15, %v4155_v40 }
 0x560   : > { %v4159_v60 = vpop.permute.xlu0 %4158  ;;  %4394 = vrot.lane.b32.xlu2 %v10135_v9, %s5842_s27  ;;  %v10142_v9 = vld [vmem:[#allocation13_spill] sm:$0xff] }
 0x561   : > { %4230 = vst.msk [vmem:[#allocation4 + $0x60] sm:$0xf] %vm1648_vm15, %v4159_v60  ;;  %v10141_v60 = vld [vmem:[#allocation52_spill] sm:$0xff] }
 0x562   : > { %v4241_v20 = vpop.permute.xlu2 %4240 }
 0x563   : > { %4336 = vst.msk [vmem:[#allocation4] sm:$0xf] %vm1779_vm1, %v4241_v20  ;;  %v10143_v20 = vld [vmem:[#allocation19_spill] sm:$0xff] }
 0x564   : > { %4398 = vrot.lane.b32.xlu1 %v10137_v59, %s5842_s27 }
 0x566   : > { %4402 = vrot.lane.b32.xlu0 %v10136_v37, %s5842_s27  ;;  %v4161_v58 = vpop.permute.xlu1 %4160 }
 0x567   : > { %4231 = vst.msk [vmem:[#allocation4 + $0x64] sm:$0xf] %vm1648_vm15, %v4161_v58 }
 0x568   : > { %v4165_v27 = vpop.permute.xlu0 %4164  ;;  %4400 = vrot.lane.b32.xlu2 %v10138_v48, %s5842_s27 }
 0x569   : > { %4233 = vst.msk [vmem:[#allocation4 + $0x6c] sm:$0xf] %vm1648_vm15, %v4165_v27 }
 0x56a   : > { %v4247_v44 = vpop.permute.xlu2 %4246 }
 0x56b   : > { %4339 = vst.msk [vmem:[#allocation4 + $0xc] sm:$0xf] %vm1779_vm1, %v4247_v44  ;;  %v10144_v44 = vld [vmem:[#allocation23_spill] sm:$0xff] }
 0x56c   : > { %4404 = vrot.lane.b32.xlu1 %v10140_v34, %s5842_s27 }
 0x56e   : > { %4408 = vrot.lane.b32.xlu0 %v10139_v0, %s5842_s27  ;;  %v4167_v23 = vpop.permute.xlu1 %4166 }
 0x56f   : > { %4234 = vst.msk [vmem:[#allocation4 + $0x70] sm:$0xf] %vm1648_vm15, %v4167_v23  ;;  %v10145_v23 = vld [vmem:[#allocation31_spill] sm:$0xff] }
 0x570   : > { %v4171_v45 = vpop.permute.xlu0 %4170  ;;  %4406 = vrot.lane.b32.xlu2 %v10141_v60, %s5842_s27 }
 0x571   : > { %4236 = vst.msk [vmem:[#allocation4 + $0x78] sm:$0xf] %vm1648_vm15, %v4171_v45 }
 0x572   : > { %v4253_v40 = vpop.permute.xlu2 %4252 }
 0x573   : > { %4342 = vst.msk [vmem:[#allocation4 + $0x18] sm:$0xf] %vm1779_vm1, %v4253_v40  ;;  %v10146_v40 = vld [vmem:[#allocation20_spill] sm:$0xff] }
 0x574   : > { %4410 = vrot.lane.b32.xlu1 %v10143_v20, %s5842_s27 }
 0x576   : > { %4414 = vrot.lane.b32.xlu0 %v10142_v9, %s5842_s27  ;;  %v4173_v58 = vpop.permute.xlu1 %4172  ;;  %v4384_v9 = vrot.slane %v4382_v4, 4 }
 0x577   : > { %4237 = vst.msk [vmem:[#allocation4 + $0x7c] sm:$0xf] %vm1648_vm15, %v4173_v58 }
 0x578   : > { %v4243_v27 = vpop.permute.xlu0 %4242  ;;  %4412 = vrot.lane.b32.xlu2 %v10144_v44, %s5842_s27 }
 0x579   : > { %4337 = vst.msk [vmem:[#allocation4 + $0x4] sm:$0xf] %vm1779_vm1, %v4243_v27  ;;  %v10147_v27 = vld [vmem:[#allocation25_spill] sm:$0xff] }
 0x57a   : > { %v4259_v45 = vpop.permute.xlu2 %4258 }
 0x57b   : > { %4345 = vst.msk [vmem:[#allocation4 + $0x24] sm:$0xf] %vm1779_vm1, %v4259_v45  ;;  %v10148_v45 = vld [vmem:[#allocation36_spill] sm:$0xff] }
 0x57c   : > { %4416 = vrot.lane.b32.xlu1 %v10146_v40, %s5842_s27  ;;  %v4374_v40 = vrot.slane %v4372_v32, 5  ;;  %v9066_v32 = vld [vmem:[#allocation3 + $0xc8] sm:$0x1] }
 0x57d   : > { %10156 = vst [vmem:[#allocation26_spill] sm:$0xff] %v9066_v32 }
 0x57e   : > { %4420 = vrot.lane.b32.xlu0 %v10145_v23, %s5842_s27  ;;  %v4245_v46 = vpop.permute.xlu1 %4244  ;;  %v10149_v23 = vld [vmem:[#allocation33_spill] sm:$0xff] }
 0x57f   : > { %4338 = vst.msk [vmem:[#allocation4 + $0x8] sm:$0xf] %vm1779_vm1, %v4245_v46 }
 0x580   : > { %v4249_v15 = vpop.permute.xlu0 %4248  ;;  %4418 = vrot.lane.b32.xlu2 %v10147_v27, %s5842_s27 }
 0x581   : > { %4340 = vst.msk [vmem:[#allocation4 + $0x10] sm:$0xf] %vm1779_vm1, %v4249_v15  ;;  %v10150_v15 = vld [vmem:[#allocation29_spill] sm:$0xff] }
 0x582   : > { %v4265_v58 = vpop.permute.xlu2 %4264 }
 0x583   : > { %4348 = vst.msk [vmem:[#allocation4 + $0x30] sm:$0xf] %vm1779_vm1, %v4265_v58  ;;  %v10151_v58 = vld [vmem:[#allocation27_spill] sm:$0xff] }
 0x584   : > { %4422 = vrot.lane.b32.xlu1 %v10149_v23, %s5842_s27 }
 0x586   : > { %4426 = vrot.lane.b32.xlu0 %v10148_v45, %s5842_s27  ;;  %v4251_v35 = vpop.permute.xlu1 %4250  ;;  %v10152_v45 = vld [vmem:[#allocation40_spill] sm:$0xff] }
 0x587   : > { %4341 = vst.msk [vmem:[#allocation4 + $0x14] sm:$0xf] %vm1779_vm1, %v4251_v35  ;;  %v10153_v35 = vld [vmem:[#allocation12_spill] sm:$0xff] }
 0x588   : > { %v4255_v12 = vpop.permute.xlu0 %4254  ;;  %4424 = vrot.lane.b32.xlu2 %v10150_v15, %s5842_s27 }
 0x589   : > { %4343 = vst.msk [vmem:[#allocation4 + $0x1c] sm:$0xf] %vm1779_vm1, %v4255_v12 }
 0x58a   : > { %v4271_v46 = vpop.permute.xlu2 %4270 }
 0x58b   : > { %4351 = vst.msk [vmem:[#allocation4 + $0x3c] sm:$0xf] %vm1779_vm1, %v4271_v46 }
 0x58c   : > { %4428 = vrot.lane.b32.xlu1 %v10152_v45, %s5842_s27 }
 0x58e   : > { %4432 = vrot.lane.b32.xlu0 %v10151_v58, %s5842_s27  ;;  %v4257_v23 = vpop.permute.xlu1 %4256 }
 0x58f   : > { %4344 = vst.msk [vmem:[#allocation4 + $0x20] sm:$0xf] %vm1779_vm1, %v4257_v23  ;;  %v10154_v23 = vld [vmem:[#allocation24_spill] sm:$0xff] }
 0x590   : > { %v4261_v27 = vpop.permute.xlu0 %4260  ;;  %4430 = vrot.lane.b32.xlu2 %v10153_v35, %s5842_s27 }
 0x591   : > { %4346 = vst.msk [vmem:[#allocation4 + $0x28] sm:$0xf] %vm1779_vm1, %v4261_v27 }
 0x592   : > { %v4277_v12 = vpop.permute.xlu2 %4276 }
 0x593   : > { %4354 = vst.msk [vmem:[#allocation4 + $0x48] sm:$0xf] %vm1779_vm1, %v4277_v12  ;;  %v4369_v12 = vshrl.u32 %v8972_v55, 16 }
 0x594   : > { %4434 = vrot.lane.b32.xlu1 %v8543_v24, %s5842_s27 }
 0x595   : > { %v4371_v42 = vrot.slane %v4369_v12, 4 }
 0x596   : > { %4438 = vrot.lane.b32.xlu0 %v8556_v53, %s5842_s27  ;;  %v4263_v15 = vpop.permute.xlu1 %4262 }
 0x597   : > { %4347 = vst.msk [vmem:[#allocation4 + $0x2c] sm:$0xf] %vm1779_vm1, %v4263_v15  ;;  %v4375_v55 = vor.u32 %v4374_v40, %v4371_v42 }
 0x598   : > { %v4267_v46 = vpop.permute.xlu0 %4266  ;;  %4436 = vrot.lane.b32.xlu2 %v10154_v23, %s5842_s27 }
 0x599   : > { %4349 = vst.msk [vmem:[#allocation4 + $0x34] sm:$0xf] %vm1779_vm1, %v4267_v46  ;;  %v4376_v44 = vrot.slane %v4375_v55, 4 }
 0x59a   : > { %v4283_v27 = vpop.permute.xlu2 %4282 }
 0x59b   : > { %4357 = vst.msk [vmem:[#allocation4 + $0x54] sm:$0xf] %vm1779_vm1, %v4283_v27  ;;  %v4378_v27 = vshll.u32 %v8963_v49, 16 }
 0x59c   : > { %4440 = vrot.lane.b32.xlu1 %v8573_v31, %s5842_s27 }
 0x59e   : > { %4444 = vrot.lane.b32.xlu0 %v8580_v6, %s5842_s27  ;;  %v4269_v15 = vpop.permute.xlu1 %4268 }
 0x59f   : > { %4350 = vst.msk [vmem:[#allocation4 + $0x38] sm:$0xf] %vm1779_vm1, %v4269_v15  ;;  %v10155_v15 = vld [vmem:[#allocation32_spill] sm:$0xff] }
 0x5a0   : > { %v4273_v46 = vpop.permute.xlu0 %4272  ;;  %4442 = vrot.lane.b32.xlu2 %v8547_v63, %s5842_s27 }
 0x5a1   : > { %4352 = vst.msk [vmem:[#allocation4 + $0x40] sm:$0xf] %vm1779_vm1, %v4273_v46  ;;  %v4380_v46 = vrot.slane %v4378_v27, 5 }
 0x5a2   : > { %v4289_v57 = vpop.permute.xlu2 %4288 }
 0x5a3   : > { %4360 = vst.msk [vmem:[#allocation4 + $0x60] sm:$0xf] %vm1779_vm1, %v4289_v57  ;;  %v4385_v28 = vor.u32 %v4384_v9, %v4380_v46  ;;  %v4388_v57 = vshll.u32 %v9066_v32, 16  ;;  %v9078_v4 = vsel %vm5920_vm3, %v4376_v44, %v4380_v46 }
 0x5a4   : > { %4446 = vrot.lane.b32.xlu1 %v10155_v15, %s5842_s27  ;;  %10157 = vst [vmem:[#allocation11_spill] sm:$0xff] %v9078_v4 }
 0x5a5   : > { %v4386_v40 = vrot.slane %v4385_v28, 4  ;;  %v4390_v27 = vrot.slane %v4388_v57, 5  ;;  %v10159_v28 = vld [vmem:[#allocation37_spill] sm:$0xff] }
 0x5a6   : > { %4450 = vrot.lane.b32.xlu0 %v8626_v11, %s5842_s27  ;;  %v4275_v49 = vpop.permute.xlu1 %4274 }
 0x5a7   : > { %4353 = vst.msk [vmem:[#allocation4 + $0x44] sm:$0xf] %vm1779_vm1, %v4275_v49  ;;  %v9086_v9 = vsel %vm5920_vm3, %v4386_v40, %v4390_v27  ;;  %v10162_v40 = vld [vmem:[#allocation9_spill] sm:$0xff] }
 0x5a8   : > { %v4279_v12 = vpop.permute.xlu0 %4278  ;;  %4448 = vrot.lane.b32.xlu2 %v8620_v13, %s5842_s27  ;;  %10158 = vst [vmem:[#allocation16_spill] sm:$0xff] %v9086_v9 }
 0x5a9   : > { %4355 = vst.msk [vmem:[#allocation4 + $0x4c] sm:$0xf] %vm1779_vm1, %v4279_v12  ;;  %v10160_v12 = vld [vmem:[#allocation47_spill] sm:$0xff] }
 0x5aa   : > { %v4295_v42 = vpop.permute.xlu2 %4294 }
 0x5ab   : > { %4363 = vst.msk [vmem:[#allocation4 + $0x6c] sm:$0xf] %vm1779_vm1, %v4295_v42  ;;  %v10161_v42 = vld [vmem:[#allocation34_spill] sm:$0xff] }
 0x5ac   : > { %4452 = vrot.lane.b32.xlu1 %v9078_v4, %s5842_s27 }
 0x5ae   : > { %4528 = vrot.lane.b32.xlu0 %v8645_v3, %s5843_s28  ;;  %v4281_v55 = vpop.permute.xlu1 %4280 }
 0x5af   : > { %4356 = vst.msk [vmem:[#allocation4 + $0x50] sm:$0xf] %vm1779_vm1, %v4281_v55  ;;  %v10163_v55 = vld [vmem:[#allocation49_spill] sm:$0xff] }
 0x5b0   : > { %v4285_v49 = vpop.permute.xlu0 %4284  ;;  %4454 = vrot.lane.b32.xlu2 %v9086_v9, %s5842_s27 }
 0x5b1   : > { %4358 = vst.msk [vmem:[#allocation4 + $0x58] sm:$0xf] %vm1779_vm1, %v4285_v49 }
 0x5b2   : > { %v4301_v3 = vpop.permute.xlu2 %4300 }
 0x5b3   : > { %4366 = vst.msk [vmem:[#allocation4 + $0x78] sm:$0xf] %vm1779_vm1, %v4301_v3 }
 0x5b4   : > { %4530 = vrot.lane.b32.xlu1 %v10159_v28, %s5843_s28  ;;  %v10164_v28 = vld [vmem:[#allocation54_spill] sm:$0xff] }
 0x5b6   : > { %4534 = vrot.lane.b32.xlu0 %v8668_v29, %s5843_s28  ;;  %v4287_v46 = vpop.permute.xlu1 %4286 }
 0x5b7   : > { %4359 = vst.msk [vmem:[#allocation4 + $0x5c] sm:$0xf] %vm1779_vm1, %v4287_v46 }
 0x5b8   : > { %v4291_v44 = vpop.permute.xlu0 %4290  ;;  %4532 = vrot.lane.b32.xlu2 %v10160_v12, %s5843_s28 }
 0x5b9   : > { %4361 = vst.msk [vmem:[#allocation4 + $0x64] sm:$0xf] %vm1779_vm1, %v4291_v44 }
 0x5ba   : > { %v4395_v57 = vpop.permute.xlu2 %4394 }
 0x5bb   : > { %4489 = vst.msk [vmem:[#allocation4 + $0x4] sm:$0xf] %vm1932_vm2, %v4395_v57 }
 0x5bc   : > { %4536 = vrot.lane.b32.xlu1 %v10162_v40, %s5843_s28 }
 0x5be   : > { %4540 = vrot.lane.b32.xlu0 %v10161_v42, %s5843_s28  ;;  %v4293_v49 = vpop.permute.xlu1 %4292 }
 0x5bf   : > { %4362 = vst.msk [vmem:[#allocation4 + $0x68] sm:$0xf] %vm1779_vm1, %v4293_v49 }
 0x5c0   : > { %v4297_v27 = vpop.permute.xlu0 %4296  ;;  %4538 = vrot.lane.b32.xlu2 %v10163_v55, %s5843_s28 }
 0x5c1   : > { %4364 = vst.msk [vmem:[#allocation4 + $0x70] sm:$0xf] %vm1779_vm1, %v4297_v27  ;;  %v10165_v27 = vld [vmem:[#allocation51_spill] sm:$0xff] }
 0x5c2   : > { %v4401_v3 = vpop.permute.xlu2 %4400 }
 0x5c3   : > { %4492 = vst.msk [vmem:[#allocation4 + $0x10] sm:$0xf] %vm1932_vm2, %v4401_v3 }
 0x5c4   : > { %4542 = vrot.lane.b32.xlu1 %v10164_v28, %s5843_s28 }
 0x5c6   : > { %4546 = vrot.lane.b32.xlu0 %v8711_v62, %s5843_s28  ;;  %v4299_v46 = vpop.permute.xlu1 %4298 }
 0x5c7   : > { %4365 = vst.msk [vmem:[#allocation4 + $0x74] sm:$0xf] %vm1779_vm1, %v4299_v46 }
 0x5c8   : > { %v4303_v44 = vpop.permute.xlu0 %4302  ;;  %4544 = vrot.lane.b32.xlu2 %v8705_v47, %s5843_s28 }
 0x5c9   : > { %4367 = vst.msk [vmem:[#allocation4 + $0x7c] sm:$0xf] %vm1779_vm1, %v4303_v44  ;;  %v10166_v44 = vld [vmem:[#allocation53_spill] sm:$0xff] }
 0x5ca   : > { %v4407_v57 = vpop.permute.xlu2 %4406 }
 0x5cb   : > { %4495 = vst.msk [vmem:[#allocation4 + $0x1c] sm:$0xf] %vm1932_vm2, %v4407_v57  ;;  %v10167_v57 = vld [vmem:[#allocation28_spill] sm:$0xff] }
 0x5cc   : > { %4548 = vrot.lane.b32.xlu1 %v10165_v27, %s5843_s28 }
 0x5ce   : > { %4552 = vrot.lane.b32.xlu0 %v8734_v26, %s5843_s28  ;;  %v4393_v3 = vpop.permute.xlu1 %4392 }
 0x5cf   : > { %4488 = vst.msk [vmem:[#allocation4] sm:$0xf] %vm1932_vm2, %v4393_v3 }
 0x5d0   : > { %v4397_v49 = vpop.permute.xlu0 %4396  ;;  %4550 = vrot.lane.b32.xlu2 %v10166_v44, %s5843_s28 }
 0x5d1   : > { %4490 = vst.msk [vmem:[#allocation4 + $0x8] sm:$0xf] %vm1932_vm2, %v4397_v49  ;;  %v10168_v49 = vld [vmem:[#allocation6_spill] sm:$0xff] }
 0x5d2   : > { %v4413_v46 = vpop.permute.xlu2 %4412 }
 0x5d3   : > { %4498 = vst.msk [vmem:[#allocation4 + $0x28] sm:$0xf] %vm1932_vm2, %v4413_v46  ;;  %v10169_v46 = vld [vmem:[#allocation58_spill] sm:$0xff] }
 0x5d4   : > { %4554 = vrot.lane.b32.xlu1 %v10167_v57, %s5843_s28 }
 0x5d6   : > { %4558 = vrot.lane.b32.xlu0 %v8758_v33, %s5843_s28  ;;  %v4399_v32 = vpop.permute.xlu1 %4398  ;;  %v10170_v33 = vld [vmem:[#allocation56_spill] sm:$0xff] }
 0x5d7   : > { %4491 = vst.msk [vmem:[#allocation4 + $0xc] sm:$0xf] %vm1932_vm2, %v4399_v32 }
 0x5d8   : > { %v4403_v10 = vpop.permute.xlu0 %4402  ;;  %4556 = vrot.lane.b32.xlu2 %v10168_v49, %s5843_s28 }
 0x5d9   : > { %4493 = vst.msk [vmem:[#allocation4 + $0x14] sm:$0xf] %vm1932_vm2, %v4403_v10  ;;  %v10171_v10 = vld [vmem:[#allocation57_spill] sm:$0xff] }
 0x5da   : > { %v4419_v3 = vpop.permute.xlu2 %4418 }
 0x5db   : > { %4501 = vst.msk [vmem:[#allocation4 + $0x34] sm:$0xf] %vm1932_vm2, %v4419_v3  ;;  %v10172_v3 = vld [vmem:[#allocation8_spill] sm:$0xff] }
 0x5dc   : > { %4560 = vrot.lane.b32.xlu1 %v10170_v33, %s5843_s28 }
 0x5de   : > { %4564 = vrot.lane.b32.xlu0 %v10169_v46, %s5843_s28  ;;  %v4405_v9 = vpop.permute.xlu1 %4404 }
 0x5df   : > { %4494 = vst.msk [vmem:[#allocation4 + $0x18] sm:$0xf] %vm1932_vm2, %v4405_v9 }
 0x5e0   : > { %v4409_v4 = vpop.permute.xlu0 %4408  ;;  %4562 = vrot.lane.b32.xlu2 %v10171_v10, %s5843_s28 }
 0x5e1   : > { %4496 = vst.msk [vmem:[#allocation4 + $0x20] sm:$0xf] %vm1932_vm2, %v4409_v4  ;;  %v10173_v4 = vld [vmem:[#allocation18_spill] sm:$0xff] }
 0x5e2   : > { %v4425_v32 = vpop.permute.xlu2 %4424 }
 0x5e3   : > { %4504 = vst.msk [vmem:[#allocation4 + $0x40] sm:$0xf] %vm1932_vm2, %v4425_v32  ;;  %v10174_v32 = vld [vmem:[#allocation59_spill] sm:$0xff] }
 0x5e4   : > { %4566 = vrot.lane.b32.xlu1 %v10172_v3, %s5843_s28 }
 0x5e6   : > { %4570 = vrot.lane.b32.xlu0 %v8808_v52, %s5843_s28  ;;  %v4411_v33 = vpop.permute.xlu1 %4410 }
 0x5e7   : > { %4497 = vst.msk [vmem:[#allocation4 + $0x24] sm:$0xf] %vm1932_vm2, %v4411_v33 }
 0x5e8   : > { %v4415_v49 = vpop.permute.xlu0 %4414  ;;  %4568 = vrot.lane.b32.xlu2 %v10173_v4, %s5843_s28 }
 0x5e9   : > { %4499 = vst.msk [vmem:[#allocation4 + $0x2c] sm:$0xf] %vm1932_vm2, %v4415_v49 }
 0x5ea   : > { %v4431_v9 = vpop.permute.xlu2 %4430 }
 0x5eb   : > { %4507 = vst.msk [vmem:[#allocation4 + $0x4c] sm:$0xf] %vm1932_vm2, %v4431_v9 }
 0x5ec   : > { %4572 = vrot.lane.b32.xlu1 %v10174_v32, %s5843_s28 }
 0x5ee   : > { %4576 = vrot.lane.b32.xlu0 %v8833_v50, %s5843_s28  ;;  %v4417_v26 = vpop.permute.xlu1 %4416 }
 0x5ef   : > { %4500 = vst.msk [vmem:[#allocation4 + $0x30] sm:$0xf] %vm1932_vm2, %v4417_v26 }
 0x5f0   : > { %v4421_v10 = vpop.permute.xlu0 %4420  ;;  %4574 = vrot.lane.b32.xlu2 %v8823_v43, %s5843_s28 }
 0x5f1   : > { %4502 = vst.msk [vmem:[#allocation4 + $0x38] sm:$0xf] %vm1932_vm2, %v4421_v10 }
 0x5f2   : > { %v4437_v33 = vpop.permute.xlu2 %4436 }
 0x5f3   : > { %4510 = vst.msk [vmem:[#allocation4 + $0x58] sm:$0xf] %vm1932_vm2, %v4437_v33 }
 0x5f4   : > { %4690 = vrot.lane.b32.xlu1 %v8281_v21, %s5844_s29 }
 0x5f6   : > { %4842 = vrot.lane.b32.xlu0 %v10152_v45, %s5845_s30  ;;  %v4423_v9 = vpop.permute.xlu1 %4422 }
 0x5f7   : > { %4503 = vst.msk [vmem:[#allocation4 + $0x3c] sm:$0xf] %vm1932_vm2, %v4423_v9  ;;  %v5762_v9 = vld [vmem:[%s9688_s3 + $0x8] sm:$0xff] }
 0x5f8   : > { %v4427_v49 = vpop.permute.xlu0 %4426  ;;  %4692 = vrot.lane.b32.xlu2 %v8262_v22, %s5844_s29 }
 0x5f9   : > { %4505 = vst.msk [vmem:[#allocation4 + $0x44] sm:$0xf] %vm1932_vm2, %v4427_v49 }
 0x5fa   : > { %v4443_v26 = vpop.permute.xlu2 %4442 }
 0x5fb   : > { %4513 = vst.msk [vmem:[#allocation4 + $0x64] sm:$0xf] %vm1932_vm2, %v4443_v26  ;;  %v10175_v26 = vld [vmem:[#allocation15_spill] sm:$0xff] }
 0x5fc   : > { %4844 = vrot.lane.b32.xlu1 %v10153_v35, %s5845_s30 }
 0x5fe   : > { %4980 = vrot.lane.b32.xlu0 %v10172_v3, %s5846_s6  ;;  %v4429_v21 = vpop.permute.xlu1 %4428 }
 0x5ff   : > { %4506 = vst.msk [vmem:[#allocation4 + $0x48] sm:$0xf] %vm1932_vm2, %v4429_v21 }
 0x600   : > { %v4433_v45 = vpop.permute.xlu0 %4432  ;;  %4978 = vrot.lane.b32.xlu2 %v10169_v46, %s5846_s6 }
 0x601   : > { %4508 = vst.msk [vmem:[#allocation4 + $0x50] sm:$0xf] %vm1932_vm2, %v4433_v45 }
 0x602   : > { %v4449_v10 = vpop.permute.xlu2 %4448 }
 0x603   : > { %4516 = vst.msk [vmem:[#allocation4 + $0x70] sm:$0xf] %vm1932_vm2, %v4449_v10 }
 0x604   : > { %4658 = vrot.lane.b32.xlu1 %v8083_v8, %s5844_s29 }
 0x606   : > { %4810 = vrot.lane.b32.xlu0 %v10133_v39, %s5845_s30  ;;  %v4435_v35 = vpop.permute.xlu1 %4434 }
 0x607   : > { %4509 = vst.msk [vmem:[#allocation4 + $0x54] sm:$0xf] %vm1932_vm2, %v4435_v35 }
 0x608   : > { %v4439_v22 = vpop.permute.xlu0 %4438  ;;  %4660 = vrot.lane.b32.xlu2 %v8099_v2, %s5844_s29 }
 0x609   : > { %4511 = vst.msk [vmem:[#allocation4 + $0x5c] sm:$0xf] %vm1932_vm2, %v4439_v22 }
 0x60a   : > { %v4455_v3 = vpop.permute.xlu2 %4454 }
 0x60b   : > { %4519 = vst.msk [vmem:[#allocation4 + $0x7c] sm:$0xf] %vm1932_vm2, %v4455_v3 }
 0x60c   : > { %4812 = vrot.lane.b32.xlu1 %v10137_v59, %s5845_s30 }
 0x60e   : > { %4948 = vrot.lane.b32.xlu0 %v8668_v29, %s5846_s6  ;;  %v4441_v8 = vpop.permute.xlu1 %4440 }
 0x60f   : > { %4512 = vst.msk [vmem:[#allocation4 + $0x60] sm:$0xf] %vm1932_vm2, %v4441_v8  ;;  %v10176_v8 = vld [vmem:[#allocation14_spill] sm:$0xff] }
 0x610   : > { %v4445_v39 = vpop.permute.xlu0 %4444  ;;  %4946 = vrot.lane.b32.xlu2 %v10160_v12, %s5846_s6 }
 0x611   : > { %4514 = vst.msk [vmem:[#allocation4 + $0x68] sm:$0xf] %vm1932_vm2, %v4445_v39 }
 0x612   : > { %v4533_v46 = vpop.permute.xlu2 %4532 }
 0x613   : > { %4626 = vst.msk [vmem:[#allocation4 + $0x8] sm:$0xf] %vm2069_vm4, %v4533_v46 }
 0x614   : > { %4694 = vrot.lane.b32.xlu1 %v8323_v17, %s5844_s29 }
 0x616   : > { %4846 = vrot.lane.b32.xlu0 %v10151_v58, %s5845_s30  ;;  %v4447_v29 = vpop.permute.xlu1 %4446 }
 0x617   : > { %4515 = vst.msk [vmem:[#allocation4 + $0x6c] sm:$0xf] %vm1932_vm2, %v4447_v29  ;;  %v10178_v29 = vld [vmem:[#allocation13_spill] sm:$0xff] }
 0x618   : > { %v4451_v2 = vpop.permute.xlu0 %4450  ;;  %4696 = vrot.lane.b32.xlu2 %v8352_v30, %s5844_s29 }
 0x619   : > { %4517 = vst.msk [vmem:[#allocation4 + $0x74] sm:$0xf] %vm1932_vm2, %v4451_v2 }
 0x61a   : > { %v4539_v59 = vpop.permute.xlu2 %4538 }
 0x61b   : > { %4629 = vst.msk [vmem:[#allocation4 + $0x14] sm:$0xf] %vm2069_vm4, %v4539_v59 }
 0x61c   : > { %4848 = vrot.lane.b32.xlu1 %v8543_v24, %s5845_s30 }
 0x61e   : > { %4984 = vrot.lane.b32.xlu0 %v8808_v52, %s5846_s6  ;;  %v4453_v17 = vpop.permute.xlu1 %4452 }
 0x61f   : > { %4518 = vst.msk [vmem:[#allocation4 + $0x78] sm:$0xf] %vm1932_vm2, %v4453_v17 }
 0x620   : > { %v4529_v58 = vpop.permute.xlu0 %4528  ;;  %4982 = vrot.lane.b32.xlu2 %v10173_v4, %s5846_s6 }
 0x621   : > { %4624 = vst.msk [vmem:[#allocation4] sm:$0xf] %vm2069_vm4, %v4529_v58 }
 0x622   : > { %v4545_v12 = vpop.permute.xlu2 %4544 }
 0x623   : > { %4632 = vst.msk [vmem:[#allocation4 + $0x20] sm:$0xf] %vm2069_vm4, %v4545_v12 }
 0x624   : > { %4662 = vrot.lane.b32.xlu1 %v8116_v41, %s5844_s29 }
 0x626   : > { %4814 = vrot.lane.b32.xlu0 %v10138_v48, %s5845_s30  ;;  %v4531_v24 = vpop.permute.xlu1 %4530 }
 0x627   : > { %4625 = vst.msk [vmem:[#allocation4 + $0x4] sm:$0xf] %vm2069_vm4, %v4531_v24  ;;  %v10180_v24 = vld [vmem:[#allocation45_spill] sm:$0xff] }
 0x628   : > { %v4535_v30 = vpop.permute.xlu0 %4534  ;;  %4664 = vrot.lane.b32.xlu2 %v8132_v1, %s5844_s29 }
 0x629   : > { %4627 = vst.msk [vmem:[#allocation4 + $0xc] sm:$0xf] %vm2069_vm4, %v4535_v30 }
 0x62a   : > { %v4551_v52 = vpop.permute.xlu2 %4550 }
 0x62b   : > { %4635 = vst.msk [vmem:[#allocation4 + $0x2c] sm:$0xf] %vm2069_vm4, %v4551_v52  ;;  %v10181_v52 = vld [vmem:[#allocation35_spill] sm:$0xff] }
 0x62c   : > { %4816 = vrot.lane.b32.xlu1 %v10136_v37, %s5845_s30 }
 0x62e   : > { %4952 = vrot.lane.b32.xlu0 %v10163_v55, %s5846_s6  ;;  %v4537_v41 = vpop.permute.xlu1 %4536 }
 0x62f   : > { %4628 = vst.msk [vmem:[#allocation4 + $0x10] sm:$0xf] %vm2069_vm4, %v4537_v41 }
 0x630   : > { %v4541_v48 = vpop.permute.xlu0 %4540  ;;  %4950 = vrot.lane.b32.xlu2 %v10162_v40, %s5846_s6 }
 0x631   : > { %4630 = vst.msk [vmem:[#allocation4 + $0x18] sm:$0xf] %vm2069_vm4, %v4541_v48 }
 0x632   : > { %v4557_v4 = vpop.permute.xlu2 %4556 }
 0x633   : > { %4638 = vst.msk [vmem:[#allocation4 + $0x38] sm:$0xf] %vm2069_vm4, %v4557_v4  ;;  %v10182_v4 = vld [vmem:[#allocation43_spill] sm:$0xff] }
 0x634   : > { %4698 = vrot.lane.b32.xlu1 %v8399_v38, %s5844_s29 }
 0x636   : > { %4850 = vrot.lane.b32.xlu0 %v10154_v23, %s5845_s30  ;;  %v4543_v37 = vpop.permute.xlu1 %4542 }
 0x637   : > { %4631 = vst.msk [vmem:[#allocation4 + $0x1c] sm:$0xf] %vm2069_vm4, %v4543_v37  ;;  %v10183_v37 = vld [vmem:[#allocation20_spill] sm:$0xff] }
 0x638   : > { %v4547_v1 = vpop.permute.xlu0 %4546  ;;  %4700 = vrot.lane.b32.xlu2 %v8406_v54, %s5844_s29 }
 0x639   : > { %4633 = vst.msk [vmem:[#allocation4 + $0x24] sm:$0xf] %vm2069_vm4, %v4547_v1 }
 0x63a   : > { %v4563_v55 = vpop.permute.xlu2 %4562 }
 0x63b   : > { %4641 = vst.msk [vmem:[#allocation4 + $0x44] sm:$0xf] %vm2069_vm4, %v4563_v55 }
 0x63c   : > { %4852 = vrot.lane.b32.xlu1 %v8556_v53, %s5845_s30 }
 0x63e   : > { %4988 = vrot.lane.b32.xlu0 %v8823_v43, %s5846_s6  ;;  %v4549_v38 = vpop.permute.xlu1 %4548 }
 0x63f   : > { %4634 = vst.msk [vmem:[#allocation4 + $0x28] sm:$0xf] %vm2069_vm4, %v4549_v38  ;;  %v10185_v38 = vld [vmem:[#allocation17_spill] sm:$0xff] }
 0x640   : > { %v4553_v23 = vpop.permute.xlu0 %4552  ;;  %4986 = vrot.lane.b32.xlu2 %v10174_v32, %s5846_s6 }
 0x641   : > { %4636 = vst.msk [vmem:[#allocation4 + $0x30] sm:$0xf] %vm2069_vm4, %v4553_v23 }
 0x642   : > { %v4569_v40 = vpop.permute.xlu2 %4568 }
 0x643   : > { %4644 = vst.msk [vmem:[#allocation4 + $0x50] sm:$0xf] %vm2069_vm4, %v4569_v40 }
 0x644   : > { %4666 = vrot.lane.b32.xlu1 %v8150_v5, %s5844_s29 }
 0x646   : > { %4818 = vrot.lane.b32.xlu0 %v10140_v34, %s5845_s30  ;;  %v4555_v53 = vpop.permute.xlu1 %4554 }
 0x647   : > { %4637 = vst.msk [vmem:[#allocation4 + $0x34] sm:$0xf] %vm2069_vm4, %v4555_v53 }
 0x648   : > { %v4559_v54 = vpop.permute.xlu0 %4558  ;;  %4668 = vrot.lane.b32.xlu2 %v8167_v7, %s5844_s29  ;;  %v5110_v7 = vld [vmem:[%s9688_s3 + $0x10] sm:$0x3] }
 0x649   : > { %4639 = vst.msk [vmem:[#allocation4 + $0x3c] sm:$0xf] %vm2069_vm4, %v4559_v54  ;;  %v5204_v32 = vunpack.c.l.b16 %v5110_v7  ;;  %v10186_v54 = vld [vmem:[#allocation25_spill] sm:$0xff] }
 0x64a   : > { %v4575_v43 = vpop.permute.xlu2 %4574 }
 0x64b   : > { %4647 = vst.msk [vmem:[#allocation4 + $0x5c] sm:$0xf] %vm2069_vm4, %v4575_v43 }
 0x64c   : > { %4820 = vrot.lane.b32.xlu1 %v10141_v60, %s5845_s30  ;;  %v5207_v60 = vpack.c.b16 %v5204_v32, %v5204_v32 }
 0x64e   : > { %4956 = vrot.lane.b32.xlu0 %v10164_v28, %s5846_s6  ;;  %v4561_v5 = vpop.permute.xlu1 %4560  ;;  %v5259_v49 = vsel %vm2708_vm7, %v5207_v60, 0 }
 0x64f   : > { %4640 = vst.msk [vmem:[#allocation4 + $0x40] sm:$0xf] %vm2069_vm4, %v4561_v5  ;;  %5766 = vmatpush.bf16.msra.mxu3 %v5259_v49  ;;  %5266 = vmatpush.bf16.msra.mxu1 %v5259_v49  ;;  %v10187_v5 = vld [vmem:[#allocation55_spill] sm:$0xff]  ;;  %v10190_v49 = vld [vmem:[#allocation60_spill] sm:$0xff] }
 0x650   : > { %v4565_v34 = vpop.permute.xlu0 %4564  ;;  %4954 = vrot.lane.b32.xlu2 %v10161_v42, %s5846_s6 }
 0x651   : > { %4642 = vst.msk [vmem:[#allocation4 + $0x48] sm:$0xf] %vm2069_vm4, %v4565_v34 }
 0x652   : > { %v4693_v33 = vpop.permute.xlu2 %4692 }
 0x653   : > { %4771 = vst.msk [vmem:[#allocation4 + $0x44] sm:$0xf] %vm2200_vm5, %v4693_v33  ;;  %5767 = vmatpush.bf16.msra.mxu3 %v5762_v9  ;;  %5267 = vmatpush.bf16.msra.mxu1 %v5762_v9 }
 0x654   : > { %4702 = vrot.lane.b32.xlu1 %v10128_v16, %s5844_s29  ;;  %v5761_v16 = vld [vmem:[%s9688_s3] sm:$0xff] }
 0x656   : > { %4854 = vrot.lane.b32.xlu0 %v8573_v31, %s5845_s30  ;;  %v4567_v42 = vpop.permute.xlu1 %4566 }
 0x657   : > { %4643 = vst.msk [vmem:[#allocation4 + $0x4c] sm:$0xf] %vm2069_vm4, %v4567_v42  ;;  %5768 = vmatpush.bf16.msra.mxu3 %v5761_v16  ;;  %5268 = vmatpush.bf16.msra.mxu1 %v5761_v16 }
 0x658   : > { %v4571_v28 = vpop.permute.xlu0 %4570  ;;  %4704 = vrot.lane.b32.xlu2 %v10123_v25, %s5844_s29 }
 0x659   : > { %4645 = vst.msk [vmem:[#allocation4 + $0x54] sm:$0xf] %vm2069_vm4, %v4571_v28  ;;  %v10189_v28 = vld [vmem:[#allocation16_spill] sm:$0xff] }
 0x65a   : > { %v4979_v31 = vpop.permute.xlu2 %4978 }
 0x65c   : > { %4856 = vrot.lane.b32.xlu1 %v8547_v63, %s5845_s30 }
 0x65e   : > { %4992 = vrot.lane.b32.xlu0 %v10175_v26, %s5846_s6  ;;  %v4573_v21 = vpop.permute.xlu1 %4572 }
 0x65f   : > { %4646 = vst.msk [vmem:[#allocation4 + $0x58] sm:$0xf] %vm2069_vm4, %v4573_v21 }
 0x660   : > { %v4577_v45 = vpop.permute.xlu0 %4576  ;;  %4990 = vrot.lane.b32.xlu2 %v8833_v50, %s5846_s6 }
 0x661   : > { %4648 = vst.msk [vmem:[#allocation4 + $0x60] sm:$0xf] %vm2069_vm4, %v4577_v45  ;;  %v10191_v45 = vld [vmem:[#allocation11_spill] sm:$0xff] }
 0x662   : > { %v4661_v25 = vpop.permute.xlu2 %4660 }
 0x663   : > { %4755 = vst.msk [vmem:[#allocation4 + $0x4] sm:$0xf] %vm2200_vm5, %v4661_v25  ;;  %v10192_v25 = vld [vmem:[#allocation21_spill] sm:$0xff] }
 0x664   : > { %4670 = vrot.lane.b32.xlu1 %v8199_v14, %s5844_s29 }
 0x666   : > { %4822 = vrot.lane.b32.xlu0 %v10139_v0, %s5845_s30  ;;  %v4691_v10 = vpop.permute.xlu1 %4690 }
 0x667   : > { %4770 = vst.msk [vmem:[#allocation4 + $0x40] sm:$0xf] %vm2200_vm5, %v4691_v10 }
 0x668   : > { %v4843_v63 = vpop.permute.xlu0 %4842  ;;  %4672 = vrot.lane.b32.xlu2 %v8217_v51, %s5844_s29 }
 0x669   : > { %4922 = vst.msk [vmem:[#allocation4 + $0x40] sm:$0xf] %vm2353_vm6, %v4843_v63 }
 0x66a   : > { %5058 = vst.msk [vmem:[#allocation4 + $0x40] sm:$0xf] %vm2490_vm11, %v4979_v31  ;;  %v4947_v50 = vpop.permute.xlu2 %4946 }
 0x66c   : > { %4824 = vrot.lane.b32.xlu1 %v10143_v20, %s5845_s30 }
 0x66e   : > { %4960 = vrot.lane.b32.xlu0 %v8711_v62, %s5846_s6  ;;  %v4845_v14 = vpop.permute.xlu1 %4844 }
 0x66f   : > { %4923 = vst.msk [vmem:[#allocation4 + $0x44] sm:$0xf] %vm2353_vm6, %v4845_v14 }
 0x670   : > { %v4981_v0 = vpop.permute.xlu0 %4980  ;;  %4958 = vrot.lane.b32.xlu2 %v8705_v47, %s5846_s6 }
 0x671   : > { %5059 = vst.msk [vmem:[#allocation4 + $0x44] sm:$0xf] %vm2490_vm11, %v4981_v0  ;;  %v10194_v0 = vld [vmem:[#allocation26_spill] sm:$0xff] }
 0x672   : > { %v4697_v22 = vpop.permute.xlu2 %4696  ;;  %v4526_v14 = vrot.slane %v10194_v0, 5 }
 0x673   : > { %4773 = vst.msk [vmem:[#allocation4 + $0x4c] sm:$0xf] %vm2200_vm5, %v4697_v22 }
 0x674   : > { %4578 = vrot.lane.b32.xlu1 %v10175_v26, %s5843_s28  ;;  %v4523_v26 = vrot.slane %v10190_v49, 5 }
 0x676   : > { %4708 = vrot.lane.b32.xlu0 %v8562_v56, %s5844_s29  ;;  %v4659_v62 = vpop.permute.xlu1 %4658 }
 0x677   : > { %4754 = vst.msk [vmem:[#allocation4] sm:$0xf] %vm2200_vm5, %v4659_v62 }
 0x678   : > { %v4811_v51 = vpop.permute.xlu0 %4810  ;;  %v5753_v20 = vld [vmem:[#allocation4 + $0x40] sm:$0xff]  ;;  %4706 = vrot.lane.b32.xlu2 %v8531_v18, %s5844_s29 }
 0x679   : > { %4906 = vst.msk [vmem:[#allocation4] sm:$0xf] %vm2353_vm6, %v4811_v51  ;;  %5715 = vmatmul.msk.bf16.vlgmr.msra.gmra.mxu3 %vm2659_vm12, %v5753_v20 }
 0x67a   : > { %5042 = vst.msk [vmem:[#allocation4] sm:$0xf] %vm2490_vm11, %v4947_v50  ;;  %v4983_v47 = vpop.permute.xlu2 %4982  ;;  %v4525_v50 = vrot.slane %v4523_v26, 4 }
 0x67c   : > { %4858 = vrot.lane.b32.xlu1 %v8580_v6, %s5845_s30  ;;  %v4527_v62 = vsel %vm6995_vm13, %v4525_v50, %v4526_v14  ;;  %v5798_v50 = vld [vmem:[%s6071_s24 + $0x80] sm:$0xff] }
 0x67e   : > { %4994 = vrot.lane.b32.xlu0 %v8849_v61, %s5846_s6  ;;  %v4813_v35 = vpop.permute.xlu1 %4812 }
 0x67f   : > { %4907 = vst.msk [vmem:[#allocation4 + $0x4] sm:$0xf] %vm2353_vm6, %v4813_v35 }
 0x680   : > { %v4949_v56 = vpop.permute.xlu0 %4948  ;;  %4860 = vrot.lane.b32.xlu2 %v10155_v15, %s5845_s30 }
 0x681   : > { %5043 = vst.msk [vmem:[#allocation4 + $0x4] sm:$0xf] %vm2490_vm11, %v4949_v56  ;;  %v10196_v56 = vld [vmem:[#allocation10_spill] sm:$0xff] }
 0x682   : > { %v4665_v18 = vpop.permute.xlu2 %4664 }
 0x683   : > { %4757 = vst.msk [vmem:[#allocation4 + $0xc] sm:$0xf] %vm2200_vm5, %v4665_v18 }
 0x684   : > { %4996 = vrot.lane.b32.xlu1 %v8858_v19, %s5846_s6 }
 0x686   : > { %4676 = vrot.lane.b32.xlu0 %v8269_v36, %s5844_s29  ;;  %v4695_v6 = vpop.permute.xlu1 %4694  ;;  %v10177_v36 = vld [vmem:[#allocation23_spill] sm:$0xff] }
 0x687   : > { %4772 = vst.msk [vmem:[#allocation4 + $0x48] sm:$0xf] %vm2200_vm5, %v4695_v6 }
 0x688   : > { %v4847_v3 = vpop.permute.xlu0 %4846  ;;  %v5745_v39 = vld [vmem:[#allocation4] sm:$0xff]  ;;  %4674 = vrot.lane.b32.xlu2 %v10176_v8, %s5844_s29 }
 0x689   : > { %4924 = vst.msk [vmem:[#allocation4 + $0x48] sm:$0xf] %vm2353_vm6, %v4847_v3  ;;  %5707 = vmatmul.msk.bf16.vlgmr.msra.gmra.mxu1 %vm2659_vm12, %v5745_v39  ;;  %v3403_v3 = vld [vmem:[#allocation3 + $0xcc] sm:$0xf] }
 0x68a   : > { %5060 = vst.msk [vmem:[#allocation4 + $0x48] sm:$0xf] %vm2490_vm11, %v4983_v47  ;;  %v4951_v15 = vpop.permute.xlu2 %4950  ;;  %v10195_v47 = vld [vmem:[#allocation33_spill] sm:$0xff]  ;;  %v10197_v39 = vld [vmem:[#allocation31_spill] sm:$0xff]  ;;  %v4787_v8 = vshrl.u32 %v3403_v3, 16 }
 0x68c   : > { %4826 = vrot.lane.b32.xlu1 %v10177_v36, %s5845_s30 }
 0x68e   : > { %4962 = vrot.lane.b32.xlu0 %v10165_v27, %s5846_s6  ;;  %v4849_v2 = vpop.permute.xlu1 %4848 }
 0x68f   : > { %4925 = vst.msk [vmem:[#allocation4 + $0x4c] sm:$0xf] %vm2353_vm6, %v4849_v2  ;;  %v3404_v2 = vld [vmem:[#allocation3 + $0xd0] sm:$0xf] }
 0x690   : > { %v4985_v46 = vpop.permute.xlu0 %4984  ;;  %4828 = vrot.lane.b32.xlu2 %v10178_v29, %s5845_s30 }
 0x691   : > { %5061 = vst.msk [vmem:[#allocation4 + $0x4c] sm:$0xf] %vm2490_vm11, %v4985_v46  ;;  %v10198_v46 = vld [vmem:[#allocation6_spill] sm:$0xff] }
 0x692   : > { %v4701_v59 = vpop.permute.xlu2 %4700 }
 0x693   : > { %4775 = vst.msk [vmem:[#allocation4 + $0x54] sm:$0xf] %vm2200_vm5, %v4701_v59  ;;  %v4796_v59 = vshll.u32 %v3404_v2, 16 }
 0x694   : > { %4964 = vrot.lane.b32.xlu1 %v10166_v44, %s5846_s6 }
 0x696   : > { %4582 = vrot.lane.b32.xlu0 %v8858_v19, %s5843_s28  ;;  %v4663_v58 = vpop.permute.xlu1 %4662  ;;  %v10179_v19 = vld [vmem:[#allocation44_spill] sm:$0xff] }
 0x697   : > { %4756 = vst.msk [vmem:[#allocation4 + $0x8] sm:$0xf] %vm2200_vm5, %v4663_v58  ;;  %v4789_v58 = vrot.slane %v4787_v8, 4 }
 0x698   : > { %v4815_v27 = vpop.permute.xlu0 %4814  ;;  %v5754_v17 = vld [vmem:[#allocation4 + $0x48] sm:$0xff]  ;;  %4580 = vrot.lane.b32.xlu2 %v8849_v61, %s5843_s28 }
 0x699   : > { %4908 = vst.msk [vmem:[#allocation4 + $0x8] sm:$0xf] %vm2353_vm6, %v4815_v27  ;;  %5716 = vmatmul.msk.bf16.gmra.mxu3 %vm2659_vm12, %v5754_v17  ;;  %v4800_v27 = vshrl.u32 %v3404_v2, 16 }
 0x69a   : > { %5044 = vst.msk [vmem:[#allocation4 + $0x8] sm:$0xf] %vm2490_vm11, %v4951_v15  ;;  %v4987_v12 = vpop.permute.xlu2 %4986  ;;  %v4790_v15 = vshll.u32 %v3403_v3, 16 }
 0x69c   : > { %4710 = vrot.lane.b32.xlu1 %v10179_v19, %s5844_s29  ;;  %v4792_v17 = vrot.slane %v4790_v15, 5  ;;  %v10199_v19 = vld [vmem:[#allocation7_spill] sm:$0xff] }
 0x69e   : > { %4862 = vrot.lane.b32.xlu0 %v8620_v13, %s5845_s30  ;;  %v4817_v30 = vpop.permute.xlu1 %4816 }
 0x69f   : > { %4909 = vst.msk [vmem:[#allocation4 + $0xc] sm:$0xf] %vm2353_vm6, %v4817_v30  ;;  %v4793_v30 = vor.u32 %v4792_v17, %v4789_v58 }
 0x6a0   : > { %v4953_v44 = vpop.permute.xlu0 %4952  ;;  %4712 = vrot.lane.b32.xlu2 %v10180_v24, %s5844_s29  ;;  %v4798_v24 = vrot.slane %v4796_v59, 5 }
 0x6a1   : > { %5045 = vst.msk [vmem:[#allocation4 + $0xc] sm:$0xf] %vm2490_vm11, %v4953_v44  ;;  %v4802_v44 = vrot.slane %v4800_v27, 4 }
 0x6a2   : > { %v4669_v61 = vpop.permute.xlu2 %4668 }
 0x6a3   : > { %4759 = vst.msk [vmem:[#allocation4 + $0x14] sm:$0xf] %vm2200_vm5, %v4669_v61 }
 0x6a4   : > { %4864 = vrot.lane.b32.xlu1 %v8626_v11, %s5845_s30  ;;  %v10184_v11 = vld [vmem:[#allocation41_spill] sm:$0xff] }
 0x6a6   : > { %5000 = vrot.lane.b32.xlu0 %v10181_v52, %s5846_s6  ;;  %v4699_v48 = vpop.permute.xlu1 %4698 }
 0x6a7   : > { %4774 = vst.msk [vmem:[#allocation4 + $0x50] sm:$0xf] %vm2200_vm5, %v4699_v48  ;;  %v5634_v48 = vrot.slane %v3403_v3, 9 }
 0x6a8   : > { %v4851_v13 = vpop.permute.xlu0 %4850  ;;  %v5746_v41 = vld [vmem:[#allocation4 + $0x8] sm:$0xff]  ;;  %4998 = vrot.lane.b32.xlu2 %v10182_v4, %s5846_s6 }
 0x6a9   : > { %4926 = vst.msk [vmem:[#allocation4 + $0x50] sm:$0xf] %vm2353_vm6, %v4851_v13  ;;  %5708 = vmatmul.msk.bf16.gmra.mxu1 %vm2659_vm12, %v5746_v41  ;;  %v4941_v13 = vrot.slane %v3404_v2, 5 }
 0x6aa   : > { %5062 = vst.msk [vmem:[#allocation4 + $0x50] sm:$0xf] %vm2490_vm11, %v4987_v12  ;;  %v4955_v1 = vpop.permute.xlu2 %4954 }
 0x6ac   : > { %4678 = vrot.lane.b32.xlu1 %v10184_v11, %s5844_s29 }
 0x6ae   : > { %4830 = vrot.lane.b32.xlu0 %v10183_v37, %s5845_s30  ;;  %v4853_v23 = vpop.permute.xlu1 %4852 }
 0x6af   : > { %4927 = vst.msk [vmem:[#allocation4 + $0x54] sm:$0xf] %vm2353_vm6, %v4853_v23  ;;  %v4942_v23 = vsel %vm6995_vm13, %v5634_v48, %v4941_v13 }
 0x6b0   : > { %v4989_v55 = vpop.permute.xlu0 %4988  ;;  %4680 = vrot.lane.b32.xlu2 %v10185_v38, %s5844_s29 }
 0x6b1   : > { %5063 = vst.msk [vmem:[#allocation4 + $0x54] sm:$0xf] %vm2490_vm11, %v4989_v55 }
 0x6b2   : > { %v4705_v40 = vpop.permute.xlu2 %4704 }
 0x6b3   : > { %4777 = vst.msk [vmem:[#allocation4 + $0x5c] sm:$0xf] %vm2200_vm5, %v4705_v40 }
 0x6b4   : > { %4832 = vrot.lane.b32.xlu1 %v10186_v54, %s5845_s30 }
 0x6b6   : > { %4968 = vrot.lane.b32.xlu0 %v10167_v57, %s5846_s6  ;;  %v4667_v43 = vpop.permute.xlu1 %4666  ;;  %v10188_v57 = vld [vmem:[#allocation61_spill] sm:$0xff] }
 0x6b7   : > { %4758 = vst.msk [vmem:[#allocation4 + $0x10] sm:$0xf] %vm2200_vm5, %v4667_v43  ;;  %v5633_v16 = vrot.slane %v10188_v57, 9 }
 0x6b8   : > { %v4819_v53 = vpop.permute.xlu0 %4818  ;;  %v5755_v34 = vld [vmem:[#allocation4 + $0x50] sm:$0xff]  ;;  %4966 = vrot.lane.b32.xlu2 %v10187_v5, %s5846_s6 }
 0x6b9   : > { %4910 = vst.msk [vmem:[#allocation4 + $0x10] sm:$0xf] %vm2353_vm6, %v4819_v53  ;;  %5717 = vmatmul.msk.bf16.gmra.mxu3 %vm2659_vm12, %v5755_v34  ;;  %v4524_v10 = vsel %vm6995_vm13, %v5633_v16, %v4523_v26  ;;  %v10203_v26 = vld [vmem:[#allocation56_spill] sm:$0xff] }
 0x6ba   : > { %5046 = vst.msk [vmem:[#allocation4 + $0x10] sm:$0xf] %vm2490_vm11, %v4955_v1  ;;  %v4991_v7 = vpop.permute.xlu2 %4990  ;;  %v4803_v1 = vor.u32 %v4802_v44, %v4798_v24 }
 0x6bc   : > { %4584 = vrot.lane.b32.xlu1 %v10182_v4, %s5843_s28  ;;  %v4794_v4 = vrot.slane %v4793_v30, 4  ;;  %v4804_v54 = vrot.slane %v4803_v1, 4 }
 0x6be   : > { %4714 = vrot.lane.b32.xlu0 %v10188_v57, %s5844_s29  ;;  %v4821_v33 = vpop.permute.xlu1 %4820  ;;  %v4799_v40 = vsel %vm5920_vm3, %v4794_v4, %v4798_v24 }
 0x6bf   : > { %4911 = vst.msk [vmem:[#allocation4 + $0x14] sm:$0xf] %vm2353_vm6, %v4821_v33 }
 0x6c0   : > { %v4957_v32 = vpop.permute.xlu0 %4956  ;;  %4586 = vrot.lane.b32.xlu2 %v10181_v52, %s5843_s28  ;;  %v3405_v52 = vld [vmem:[#allocation3 + $0xd4] sm:$0x1] }
 0x6c1   : > { %5047 = vst.msk [vmem:[#allocation4 + $0x14] sm:$0xf] %vm2490_vm11, %v4957_v32  ;;  %v4806_v37 = vshll.u32 %v3405_v52, 16  ;;  %v4944_v57 = vrot.slane %v3405_v52, 5 }
 0x6c2   : > { %v4673_v60 = vpop.permute.xlu2 %4672 }
 0x6c3   : > { %4761 = vst.msk [vmem:[#allocation4 + $0x1c] sm:$0xf] %vm2200_vm5, %v4673_v60  ;;  %v4808_v53 = vrot.slane %v4806_v37, 5  ;;  %v5802_v37 = vld [vmem:[%s6071_s24 + $0x90] sm:$0xff] }
 0x6c4   : > { %4716 = vrot.lane.b32.xlu1 %v10190_v49, %s5844_s29 }
 0x6c5   : > { %v4809_v5 = vsel %vm5920_vm3, %v4804_v54, %v4808_v53 }
 0x6c6   : > { %4868 = vrot.lane.b32.xlu0 %v10189_v28, %s5845_s30  ;;  %v4703_v9 = vpop.permute.xlu1 %4702  ;;  %v10201_v28 = vld [vmem:[#allocation30_spill] sm:$0xff] }
 0x6c7   : > { %4776 = vst.msk [vmem:[#allocation4 + $0x58] sm:$0xf] %vm2200_vm5, %v4703_v9  ;;  %v10202_v9 = vld [vmem:[#allocation50_spill] sm:$0xff] }
 0x6c8   : > { %v4855_v42 = vpop.permute.xlu0 %4854  ;;  %v5747_v31 = vld [vmem:[#allocation4 + $0x10] sm:$0xff]  ;;  %4866 = vrot.lane.b32.xlu2 %v10191_v45, %s5845_s30  ;;  %v10204_v45 = vld [vmem:[#allocation29_spill] sm:$0xff] }
 0x6c9   : > { %4928 = vst.msk [vmem:[#allocation4 + $0x58] sm:$0xf] %vm2353_vm6, %v4855_v42  ;;  %5709 = vmatmul.msk.bf16.gmra.mxu1 %vm2659_vm12, %v5747_v31  ;;  %v9485_v31 = vld [vmem:[%s9689_s4] ss:$0 sm:$0xff] }
 0x6ca   : > { %5064 = vst.msk [vmem:[#allocation4 + $0x58] sm:$0xf] %vm2490_vm11, %v4991_v7  ;;  %v4959_v21 = vpop.permute.xlu2 %4958  ;;  %v4943_v7 = vrot.slane %v4941_v13, 4 }
 0x6cc   : > { %5002 = vrot.lane.b32.xlu1 %v4524_v10, %s5846_s6  ;;  %v4945_v33 = vsel %vm6995_vm13, %v4943_v7, %v4944_v57 }
 0x6ce   : > { %4682 = vrot.lane.b32.xlu0 %v10192_v25, %s5844_s29  ;;  %v4857_v51 = vpop.permute.xlu1 %4856 }
 0x6cf   : > { %4929 = vst.msk [vmem:[#allocation4 + $0x5c] sm:$0xf] %vm2353_vm6, %v4857_v51 }
 0x6d0   : > { %v4993_v22 = vpop.permute.xlu0 %4992  ;;  %5004 = vrot.lane.b32.xlu2 %v4527_v62, %s5846_s6 }
 0x6d1   : > { %5065 = vst.msk [vmem:[#allocation4 + $0x5c] sm:$0xf] %vm2490_vm11, %v4993_v22  ;;  %v10205_v22 = vld [vmem:[#allocation36_spill] sm:$0xff] }
 0x6d2   : > { %v4707_v20 = vpop.permute.xlu2 %4706 }
 0x6d3   : > { %4778 = vst.msk [vmem:[#allocation4 + $0x60] sm:$0xf] %vm2200_vm5, %v4707_v20  ;;  %v10206_v20 = vld [vmem:[#allocation57_spill] sm:$0xff] }
 0x6d4   : > { %4684 = vrot.lane.b32.xlu1 %v10196_v56, %s5844_s29 }
 0x6d6   : > { %4836 = vrot.lane.b32.xlu0 %v10195_v47, %s5845_s30  ;;  %v4671_v18 = vpop.permute.xlu1 %4670 }
 0x6d7   : > { %4760 = vst.msk [vmem:[#allocation4 + $0x18] sm:$0xf] %vm2200_vm5, %v4671_v18 }
 0x6d8   : > { %v4823_v35 = vpop.permute.xlu0 %4822  ;;  %v5756_v6 = vld [vmem:[#allocation4 + $0x58] sm:$0xff]  ;;  %4834 = vrot.lane.b32.xlu2 %v10197_v39, %s5845_s30 }
 0x6d9   : > { %4912 = vst.msk [vmem:[#allocation4 + $0x18] sm:$0xf] %vm2353_vm6, %v4823_v35  ;;  %5718 = vmatmul.msk.bf16.gmra.mxu3 %vm2659_vm12, %v5756_v6  ;;  %v5799_v6 = vld [vmem:[%s6071_s24 + $0x88] sm:$0xff] }
 0x6da   : > { %5048 = vst.msk [vmem:[#allocation4 + $0x18] sm:$0xf] %vm2490_vm11, %v4959_v21  ;;  %v4861_v36 = vpop.permute.xlu2 %4860 }
 0x6dc   : > { %4970 = vrot.lane.b32.xlu1 %v10198_v46, %s5846_s6 }
 0x6de   : > { %4588 = vrot.lane.b32.xlu0 %v4524_v10, %s5843_s28  ;;  %v4825_v12 = vpop.permute.xlu1 %4824 }
 0x6df   : > { %4913 = vst.msk [vmem:[#allocation4 + $0x1c] sm:$0xf] %vm2353_vm6, %v4825_v12 }
 0x6e0   : > { %v4961_v29 = vpop.permute.xlu0 %4960  ;;  %4972 = vrot.lane.b32.xlu2 %v10199_v19, %s5846_s6  ;;  %v5801_v19 = vld [vmem:[%s6071_s24 + $0x8] sm:$0xff] }
 0x6e1   : > { %5049 = vst.msk [vmem:[#allocation4 + $0x1c] sm:$0xf] %vm2490_vm11, %v4961_v29 }
 0x6e2   : > { %v4675_v61 = vpop.permute.xlu2 %4674 }
 0x6e3   : > { %4762 = vst.msk [vmem:[#allocation4 + $0x20] sm:$0xf] %vm2200_vm5, %v4675_v61 }
 0x6e4   : > { %4590 = vrot.lane.b32.xlu1 %v4527_v62, %s5843_s28 }
 0x6e6   : > { %4720 = vrot.lane.b32.xlu0 %v3404_v2, %s5844_s29  ;;  %v4579_v11 = vpop.permute.xlu1 %4578 }
 0x6e7   : > { %4649 = vst.msk [vmem:[#allocation4 + $0x64] sm:$0xf] %vm2069_vm4, %v4579_v11 }
 0x6e8   : > { %v4709_v41 = vpop.permute.xlu0 %4708  ;;  %v5748_v55 = vld [vmem:[#allocation4 + $0x18] sm:$0xff]  ;;  %4718 = vrot.lane.b32.xlu2 %v3403_v3, %s5844_s29 }
 0x6e9   : > { %4779 = vst.msk [vmem:[#allocation4 + $0x64] sm:$0xf] %vm2200_vm5, %v4709_v41  ;;  %5710 = vmatmul.msk.bf16.gmra.mxu1 %vm2659_vm12, %v5748_v55 }
 0x6ea   : > { %4931 = vst.msk [vmem:[#allocation4 + $0x64] sm:$0xf] %vm2353_vm6, %v4861_v36  ;;  %v4829_v43 = vpop.permute.xlu2 %4828  ;;  %v5800_v36 = vld [vmem:[%s6071_s24] sm:$0xff] }
 0x6ec   : > { %4870 = vrot.lane.b32.xlu1 %v4799_v40, %s5845_s30 }
 0x6ee   : > { %5006 = vrot.lane.b32.xlu0 %v4942_v23, %s5846_s6  ;;  %v4859_v32 = vpop.permute.xlu1 %4858 }
 0x6ef   : > { %4930 = vst.msk [vmem:[#allocation4 + $0x60] sm:$0xf] %vm2353_vm6, %v4859_v32 }
 0x6f0   : > { %v4995_v34 = vpop.permute.xlu0 %4994  ;;  %4872 = vrot.lane.b32.xlu2 %v4809_v5, %s5845_s30  ;;  %v5803_v5 = vld [vmem:[%s6071_s24 + $0x98] sm:$0xff] }
 0x6f1   : > { %5066 = vst.msk [vmem:[#allocation4 + $0x60] sm:$0xf] %vm2490_vm11, %v4995_v34 }
 0x6f2   : > { %v4581_v60 = vpop.permute.xlu2 %4580 }
 0x6f3   : > { %4650 = vst.msk [vmem:[#allocation4 + $0x68] sm:$0xf] %vm2069_vm4, %v4581_v60 }
 0x6f4   : > { %5008 = vrot.lane.b32.xlu1 %v4945_v33, %s5846_s6  ;;  %v5804_v33 = vld [vmem:[%s6071_s24 + $0x10] sm:$0xff] }
 0x6f6   : > { %4688 = vrot.lane.b32.xlu0 %v10201_v28, %s5844_s29  ;;  %v4997_v42 = vpop.permute.xlu1 %4996 }
 0x6f7   : > { %5067 = vst.msk [vmem:[#allocation4 + $0x64] sm:$0xf] %vm2490_vm11, %v4997_v42 }
 0x6f8   : > { %v4677_v49 = vpop.permute.xlu0 %4676  ;;  %4686 = vrot.lane.b32.xlu2 %v10202_v9, %s5844_s29 }
 0x6f9   : > { %4763 = vst.msk [vmem:[#allocation4 + $0x24] sm:$0xf] %vm2200_vm5, %v4677_v49 }
 0x6fa   : > { %4915 = vst.msk [vmem:[#allocation4 + $0x24] sm:$0xf] %vm2353_vm6, %v4829_v43  ;;  %v4713_v16 = vpop.permute.xlu2 %4712 }
 0x6fc   : > { %4838 = vrot.lane.b32.xlu1 %v10204_v45, %s5845_s30  ;;  %v5310_v21 = vpop.f32.mrf.mxu3 }
 0x6fd   : > { %v5311_v63 = vadd.f32 %v9485_v31, %v5310_v21  ;;  %v5805_v21 = vld [vmem:[%s6071_s24 + $0x18] sm:$0xff] }
 0x6fe   : > { %4974 = vrot.lane.b32.xlu0 %v10203_v26, %s5846_s6  ;;  %v4827_v10 = vpop.permute.xlu1 %4826  ;;  %v5757_v14 = vld [vmem:[#allocation4 + $0x60] sm:$0xff] }
 0x6ff   : > { %v5366_v0 = vadd.f32 %v5798_v50, %v5311_v63  ;;  %4914 = vst.msk [vmem:[#allocation4 + $0x20] sm:$0xf] %vm2353_vm6, %v4827_v10  ;;  %5719 = vmatmul.msk.bf16.gmra.mxu3 %vm2659_vm12, %v5757_v14 }
 0x700   : > { %v4963_v25 = vpop.permute.xlu0 %4962  ;;  %4840 = vrot.lane.b32.xlu2 %v10205_v22, %s5845_s30 }
 0x701   : > { %5050 = vst.msk [vmem:[#allocation4 + $0x20] sm:$0xf] %vm2490_vm11, %v4963_v25  ;;  %v5398_v51 = vmax.f32 %v5366_v0, 0.0 }
 0x702   : > { %v4999_v62 = vpop.permute.xlu2 %4998 }
 0x703   : > { %5431 = vst.msk [vmem:[%s9499_s8 + $0x80] sm:$0xff] %vm5414_vm0, %v5398_v51 }
 0x704   : > { %4976 = vrot.lane.b32.xlu1 %v10206_v20, %s5846_s6  ;;  %v5312_v47 = vpop.f32.mrf.mxu3 }
 0x705   : > { %v5313_v35 = vadd.f32 %v9485_v31, %v5312_v47  ;;  %v5806_v47 = vld [vmem:[%s6071_s24 + $0xa0] sm:$0xff] }
 0x706   : > { %v4965_v18 = vpop.permute.xlu1 %4964  ;;  %v5270_v3 = vpop.f32.mrf.mxu1 }
 0x707   : > { %v5367_v39 = vadd.f32 %v5799_v6, %v5313_v35  ;;  %v5271_v8 = vadd.f32 %v9485_v31, %v5270_v3  ;;  %5051 = vst.msk [vmem:[#allocation4 + $0x24] sm:$0xf] %vm2490_vm11, %v4965_v18 }
 0x708   : > { %v4583_v56 = vpop.permute.xlu0 %4582 }
 0x709   : > { %4651 = vst.msk [vmem:[#allocation4 + $0x6c] sm:$0xf] %vm2069_vm4, %v4583_v56  ;;  %v5399_v15 = vmax.f32 %v5367_v39, 0.0  ;;  %v5350_v46 = vadd.f32 %v5800_v36, %v5271_v8  ;;  %v5807_v36 = vld [vmem:[%s6071_s24 + $0xa8] sm:$0xff] }
 0x70a   : > { %4781 = vst.msk [vmem:[#allocation4 + $0x6c] sm:$0xf] %vm2200_vm5, %v4713_v16  ;;  %v4681_v2 = vpop.permute.xlu2 %4680 }
 0x70b   : > { %5432 = vst.msk [vmem:[%s9499_s8 + $0x88] sm:$0xff] %vm5414_vm0, %v5399_v15  ;;  %v5382_v29 = vmax.f32 %v5350_v46, 0.0 }
 0x70c   : > { %4765 = vst.msk [vmem:[#allocation4 + $0x2c] sm:$0xf] %vm2200_vm5, %v4681_v2 }
 0x70d   : > { %5415 = vst.msk [vmem:[%s9499_s8] sm:$0xff] %vm5414_vm0, %v5382_v29 }
 0x70e   : > { %v4711_v27 = vpop.permute.xlu1 %4710  ;;  %v5272_v58 = vpop.f32.mrf.mxu1  ;;  %v5749_v12 = vld [vmem:[#allocation4 + $0x20] sm:$0xff] }
 0x70f   : > { %4780 = vst.msk [vmem:[#allocation4 + $0x68] sm:$0xf] %vm2200_vm5, %v4711_v27  ;;  %v5273_v17 = vadd.f32 %v9485_v31, %v5272_v58  ;;  %5711 = vmatmul.msk.bf16.gmra.mxu1 %vm2659_vm12, %v5749_v12  ;;  %v5808_v27 = vld [vmem:[%s6071_s24 + $0x20] sm:$0xff] }
 0x710   : > { %v4863_v59 = vpop.permute.xlu0 %4862 }
 0x711   : > { %4932 = vst.msk [vmem:[#allocation4 + $0x68] sm:$0xf] %vm2353_vm6, %v4863_v59  ;;  %v5351_v44 = vadd.f32 %v5801_v19, %v5273_v17 }
 0x712   : > { %5068 = vst.msk [vmem:[#allocation4 + $0x68] sm:$0xf] %vm2490_vm11, %v4999_v62  ;;  %v4967_v30 = vpop.permute.xlu2 %4966 }
 0x713   : > { %v5383_v24 = vmax.f32 %v5351_v44, 0.0 }
 0x715   : > { %5416 = vst.msk [vmem:[%s9499_s8 + $0x8] sm:$0xff] %vm5414_vm0, %v5383_v24 }
 0x716   : > { %v4865_v52 = vpop.permute.xlu1 %4864 }
 0x717   : > { %4933 = vst.msk [vmem:[#allocation4 + $0x6c] sm:$0xf] %vm2353_vm6, %v4865_v52 }
 0x718   : > { %v5001_v61 = vpop.permute.xlu0 %5000 }
 0x719   : > { %5069 = vst.msk [vmem:[#allocation4 + $0x6c] sm:$0xf] %vm2490_vm11, %v5001_v61  ;;  %v5809_v61 = vld [vmem:[%s6071_s24 + $0x28] sm:$0xff] }
 0x71a   : > { %v4587_v13 = vpop.permute.xlu2 %4586 }
 0x71b   : > { %4653 = vst.msk [vmem:[#allocation4 + $0x74] sm:$0xf] %vm2069_vm4, %v4587_v13 }
 0x71c   : > { %v5315_v48 = vpop.f32.mrf.mxu3 }
 0x71d   : > { %v5316_v4 = vadd.f32 %v9485_v31, %v5315_v48 }
 0x71e   : > { %v4679_v1 = vpop.permute.xlu1 %4678 }
 0x71f   : > { %v5368_v11 = vadd.f32 %v5802_v37, %v5316_v4  ;;  %4764 = vst.msk [vmem:[#allocation4 + $0x28] sm:$0xf] %vm2200_vm5, %v4679_v1 }
 0x720   : > { %v4831_v41 = vpop.permute.xlu0 %4830  ;;  %v5758_v55 = vld [vmem:[#allocation4 + $0x68] sm:$0xff] }
 0x721   : > { %4916 = vst.msk [vmem:[#allocation4 + $0x28] sm:$0xf] %vm2353_vm6, %v4831_v41  ;;  %v5400_v23 = vmax.f32 %v5368_v11, 0.0  ;;  %5720 = vmatmul.msk.bf16.gmra.mxu3 %vm2659_vm12, %v5758_v55 }
 0x722   : > { %5052 = vst.msk [vmem:[#allocation4 + $0x28] sm:$0xf] %vm2490_vm11, %v4967_v30  ;;  %v4867_v38 = vpop.permute.xlu2 %4866 }
 0x723   : > { %5433 = vst.msk [vmem:[%s9499_s8 + $0x90] sm:$0xff] %vm5414_vm0, %v5400_v23 }
 0x724   : > { %v5317_v40 = vpop.f32.mrf.mxu3 }
 0x725   : > { %v5318_v53 = vadd.f32 %v9485_v31, %v5317_v40 }
 0x726   : > { %v4833_v43 = vpop.permute.xlu1 %4832  ;;  %v5275_v34 = vpop.f32.mrf.mxu1 }
 0x727   : > { %v5369_v7 = vadd.f32 %v5803_v5, %v5318_v53  ;;  %4917 = vst.msk [vmem:[#allocation4 + $0x2c] sm:$0xf] %vm2353_vm6, %v4833_v43  ;;  %v5276_v57 = vadd.f32 %v9485_v31, %v5275_v34 }
 0x728   : > { %v4969_v54 = vpop.permute.xlu0 %4968 }
 0x729   : > { %5053 = vst.msk [vmem:[#allocation4 + $0x2c] sm:$0xf] %vm2490_vm11, %v4969_v54  ;;  %v5401_v32 = vmax.f32 %v5369_v7, 0.0  ;;  %v5352_v60 = vadd.f32 %v5804_v33, %v5276_v57 }
 0x72a   : > { %v5005_v28 = vpop.permute.xlu2 %5004 }
 0x72b   : > { %5434 = vst.msk [vmem:[%s9499_s8 + $0x98] sm:$0xff] %vm5414_vm0, %v5401_v32  ;;  %v5384_v49 = vmax.f32 %v5352_v60, 0.0  ;;  %v5811_v32 = vld [vmem:[%s6071_s24 + $0xb8] sm:$0xff] }
 0x72d   : > { %5417 = vst.msk [vmem:[%s9499_s8 + $0x10] sm:$0xff] %vm5414_vm0, %v5384_v49  ;;  %v5812_v49 = vld [vmem:[%s6071_s24 + $0x30] sm:$0xff] }
 0x72e   : > { %v4585_v9 = vpop.permute.xlu1 %4584  ;;  %v5277_v16 = vpop.f32.mrf.mxu1 }
 0x72f   : > { %4652 = vst.msk [vmem:[#allocation4 + $0x70] sm:$0xf] %vm2069_vm4, %v4585_v9  ;;  %v5278_v26 = vadd.f32 %v9485_v31, %v5277_v16 }
 0x730   : > { %v4715_v42 = vpop.permute.xlu0 %4714  ;;  %v5750_v45 = vld [vmem:[#allocation4 + $0x28] sm:$0xff] }
 0x731   : > { %4782 = vst.msk [vmem:[#allocation4 + $0x70] sm:$0xf] %vm2200_vm5, %v4715_v42  ;;  %v5353_v25 = vadd.f32 %v5805_v21, %v5278_v26  ;;  %5712 = vmatmul.msk.bf16.gmra.mxu1 %vm2659_vm12, %v5750_v45 }
 0x732   : > { %4934 = vst.msk [vmem:[#allocation4 + $0x70] sm:$0xf] %vm2353_vm6, %v4867_v38  ;;  %v4835_v63 = vpop.permute.xlu2 %4834  ;;  %v5810_v38 = vld [vmem:[%s6071_s24 + $0xb0] sm:$0xff] }
 0x733   : > { %v5385_v10 = vmax.f32 %v5353_v25, 0.0 }
 0x735   : > { %5418 = vst.msk [vmem:[%s9499_s8 + $0x18] sm:$0xff] %vm5414_vm0, %v5385_v10 }
 0x736   : > { %v4717_v0 = vpop.permute.xlu1 %4716 }
 0x737   : > { %4783 = vst.msk [vmem:[#allocation4 + $0x74] sm:$0xf] %vm2200_vm5, %v4717_v0 }
 0x738   : > { %v4869_v50 = vpop.permute.xlu0 %4868 }
 0x739   : > { %4935 = vst.msk [vmem:[#allocation4 + $0x74] sm:$0xf] %vm2353_vm6, %v4869_v50 }
 0x73a   : > { %5071 = vst.msk [vmem:[#allocation4 + $0x74] sm:$0xf] %vm2490_vm11, %v5005_v28  ;;  %v4973_v14 = vpop.permute.xlu2 %4972 }
 0x73c   : > { %v5320_v22 = vpop.f32.mrf.mxu3 }
 0x73d   : > { %v5321_v62 = vadd.f32 %v9485_v31, %v5320_v22 }
 0x73e   : > { %v5003_v20 = vpop.permute.xlu1 %5002 }
 0x73f   : > { %v5370_v56 = vadd.f32 %v5806_v47, %v5321_v62  ;;  %5070 = vst.msk [vmem:[#allocation4 + $0x70] sm:$0xf] %vm2490_vm11, %v5003_v20  ;;  %v5814_v62 = vld [vmem:[%s6071_s24 + $0xc0] sm:$0xff] }
 0x740   : > { %v4683_v51 = vpop.permute.xlu0 %4682 }
 0x741   : > { %4766 = vst.msk [vmem:[#allocation4 + $0x30] sm:$0xf] %vm2200_vm5, %v4683_v51  ;;  %v5402_v35 = vmax.f32 %v5370_v56, 0.0 }
 0x742   : > { %4918 = vst.msk [vmem:[#allocation4 + $0x30] sm:$0xf] %vm2353_vm6, %v4835_v63  ;;  %v4719_v18 = vpop.permute.xlu2 %4718  ;;  %v5813_v63 = vld [vmem:[%s6071_s24 + $0x38] sm:$0xff] }
 0x743   : > { %5435 = vst.msk [vmem:[%s9499_s8 + $0xa0] sm:$0xff] %vm5414_vm0, %v5402_v35 }
 0x744   : > { %v5322_v3 = vpop.f32.mrf.mxu3 }
 0x745   : > { %v5323_v39 = vadd.f32 %v9485_v31, %v5322_v3  ;;  %v5815_v3 = vld [vmem:[%s6071_s24 + $0xc8] sm:$0xff] }
 0x746   : > { %v4685_v8 = vpop.permute.xlu1 %4684  ;;  %v5280_v15 = vpop.f32.mrf.mxu1  ;;  %v5759_v29 = vld [vmem:[#allocation4 + $0x70] sm:$0xff] }
 0x747   : > { %v5371_v46 = vadd.f32 %v5807_v36, %v5323_v39  ;;  %4767 = vst.msk [vmem:[#allocation4 + $0x34] sm:$0xf] %vm2200_vm5, %v4685_v8  ;;  %v5281_v2 = vadd.f32 %v9485_v31, %v5280_v15  ;;  %5721 = vmatmul.msk.bf16.gmra.mxu3 %vm2659_vm12, %v5759_v29  ;;  %v5816_v15 = vld [vmem:[%s6071_s24 + $0x40] sm:$0xff] }
 0x748   : > { %v4837_v6 = vpop.permute.xlu0 %4836 }
 0x749   : > { %4919 = vst.msk [vmem:[#allocation4 + $0x34] sm:$0xf] %vm2353_vm6, %v4837_v6  ;;  %v5403_v59 = vmax.f32 %v5371_v46, 0.0  ;;  %v5354_v58 = vadd.f32 %v5808_v27, %v5281_v2 }
 0x74a   : > { %5055 = vst.msk [vmem:[#allocation4 + $0x34] sm:$0xf] %vm2490_vm11, %v4973_v14  ;;  %v4873_v17 = vpop.permute.xlu2 %4872 }
 0x74b   : > { %5436 = vst.msk [vmem:[%s9499_s8 + $0xa8] sm:$0xff] %vm5414_vm0, %v5403_v59  ;;  %v5386_v12 = vmax.f32 %v5354_v58, 0.0  ;;  %v5817_v59 = vld [vmem:[%s6071_s24 + $0x48] sm:$0xff] }
 0x74d   : > { %5419 = vst.msk [vmem:[%s9499_s8 + $0x20] sm:$0xff] %vm5414_vm0, %v5386_v12 }
 0x74e   : > { %v4971_v44 = vpop.permute.xlu1 %4970  ;;  %v5282_v30 = vpop.f32.mrf.mxu1 }
 0x74f   : > { %v5283_v24 = vadd.f32 %v9485_v31, %v5282_v30  ;;  %5054 = vst.msk [vmem:[#allocation4 + $0x30] sm:$0xf] %vm2490_vm11, %v4971_v44 }
 0x750   : > { %v4589_v19 = vpop.permute.xlu0 %4588 }
 0x751   : > { %4654 = vst.msk [vmem:[#allocation4 + $0x78] sm:$0xf] %vm2069_vm4, %v4589_v19  ;;  %v5355_v52 = vadd.f32 %v5809_v61, %v5283_v24  ;;  %v5818_v19 = vld [vmem:[%s6071_s24 + $0xd0] sm:$0xff] }
 0x752   : > { %4784 = vst.msk [vmem:[#allocation4 + $0x78] sm:$0xf] %vm2200_vm5, %v4719_v18  ;;  %v4687_v13 = vpop.permute.xlu2 %4686 }
 0x753   : > { %v5387_v48 = vmax.f32 %v5355_v52, 0.0  ;;  %4768 = vst.msk [vmem:[#allocation4 + $0x38] sm:$0xf] %vm2200_vm5, %v4687_v13  ;;  %v5819_v13 = vld [vmem:[%s6071_s24 + $0xd8] sm:$0xff] }
 0x755   : > { %5420 = vst.msk [vmem:[%s9499_s8 + $0x28] sm:$0xff] %vm5414_vm0, %v5387_v48 }
 0x756   : > { %v4591_v4 = vpop.permute.xlu1 %4590  ;;  %v5751_v1 = vld [vmem:[#allocation4 + $0x30] sm:$0xff] }
 0x757   : > { %4655 = vst.msk [vmem:[#allocation4 + $0x7c] sm:$0xf] %vm2069_vm4, %v4591_v4  ;;  %5713 = vmatmul.msk.bf16.gmra.mxu1 %vm2659_vm12, %v5751_v1  ;;  %v5820_v1 = vld [vmem:[%s6071_s24 + $0x50] sm:$0xff] }
 0x758   : > { %v4721_v41 = vpop.permute.xlu0 %4720 }
 0x759   : > { %4785 = vst.msk [vmem:[#allocation4 + $0x7c] sm:$0xf] %vm2200_vm5, %v4721_v41 }
 0x75a   : > { %4937 = vst.msk [vmem:[#allocation4 + $0x7c] sm:$0xf] %vm2353_vm6, %v4873_v17  ;;  %v4841_v43 = vpop.permute.xlu2 %4840 }
 0x75c   : > { %v5325_v37 = vpop.f32.mrf.mxu3 }
 0x75d   : > { %v5326_v55 = vadd.f32 %v9485_v31, %v5325_v37 }
 0x75e   : > { %v4871_v23 = vpop.permute.xlu1 %4870 }
 0x75f   : > { %v5372_v40 = vadd.f32 %v5810_v38, %v5326_v55  ;;  %4936 = vst.msk [vmem:[#allocation4 + $0x78] sm:$0xf] %vm2353_vm6, %v4871_v23  ;;  %v5821_v38 = vld [vmem:[%s6071_s24 + $0x58] sm:$0xff] }
 0x760   : > { %v5007_v11 = vpop.permute.xlu0 %5006 }
 0x761   : > { %5072 = vst.msk [vmem:[#allocation4 + $0x78] sm:$0xf] %vm2490_vm11, %v5007_v11  ;;  %v5404_v54 = vmax.f32 %v5372_v40, 0.0 }
 0x763   : > { %5437 = vst.msk [vmem:[%s9499_s8 + $0xb0] sm:$0xff] %vm5414_vm0, %v5404_v54 }
 0x764   : > { %v5327_v53 = vpop.f32.mrf.mxu3 }
 0x765   : > { %v5328_v5 = vadd.f32 %v9485_v31, %v5327_v53 }
 0x766   : > { %v5009_v7 = vpop.permute.xlu1 %5008  ;;  %v5285_v57 = vpop.f32.mrf.mxu1 }
 0x767   : > { %v5373_v33 = vadd.f32 %v5811_v32, %v5328_v5  ;;  %v5286_v60 = vadd.f32 %v9485_v31, %v5285_v57  ;;  %5073 = vst.msk [vmem:[#allocation4 + $0x7c] sm:$0xf] %vm2490_vm11, %v5009_v7 }
 0x768   : > { %v4689_v34 = vpop.permute.xlu0 %4688 }
 0x769   : > { %4769 = vst.msk [vmem:[#allocation4 + $0x3c] sm:$0xf] %vm2200_vm5, %v4689_v34  ;;  %v5405_v28 = vmax.f32 %v5373_v33, 0.0  ;;  %v5356_v42 = vadd.f32 %v5812_v49, %v5286_v60  ;;  %v5822_v34 = vld [vmem:[%s6071_s24 + $0xe0] sm:$0xff]  ;;  %v5823_v60 = vld [vmem:[%s6071_s24 + $0xe8] sm:$0xff] }
 0x76a   : > { %4921 = vst.msk [vmem:[#allocation4 + $0x3c] sm:$0xf] %vm2353_vm6, %v4841_v43 }
 0x76b   : > { %5438 = vst.msk [vmem:[%s9499_s8 + $0xb8] sm:$0xff] %vm5414_vm0, %v5405_v28  ;;  %v5388_v9 = vmax.f32 %v5356_v42, 0.0 }
 0x76d   : > { %5421 = vst.msk [vmem:[%s9499_s8 + $0x30] sm:$0xff] %vm5414_vm0, %v5388_v9  ;;  %v5824_v9 = vld [vmem:[%s6071_s24 + $0x60] sm:$0xff] }
 0x76e   : > { %v4839_v26 = vpop.permute.xlu1 %4838  ;;  %v5287_v45 = vpop.f32.mrf.mxu1  ;;  %v5760_v25 = vld [vmem:[#allocation4 + $0x78] sm:$0xff] }
 0x76f   : > { %4920 = vst.msk [vmem:[#allocation4 + $0x38] sm:$0xf] %vm2353_vm6, %v4839_v26  ;;  %v5288_v21 = vadd.f32 %v9485_v31, %v5287_v45  ;;  %5722 = vmatmul.msk.bf16.gmra.mxu3 %vm2659_vm12, %v5760_v25  ;;  %v5825_v25 = vld [vmem:[%s6071_s24 + $0x68] sm:$0xff] }
 0x770   : > { %v4975_v16 = vpop.permute.xlu0 %4974 }
 0x771   : > { %5056 = vst.msk [vmem:[#allocation4 + $0x38] sm:$0xf] %vm2490_vm11, %v4975_v16  ;;  %v5357_v10 = vadd.f32 %v5813_v63, %v5288_v21 }
 0x773   : > { %v5389_v50 = vmax.f32 %v5357_v10, 0.0 }
 0x775   : > { %5422 = vst.msk [vmem:[%s9499_s8 + $0x38] sm:$0xff] %vm5414_vm0, %v5389_v50 }
 0x776   : > { %v4977_v0 = vpop.permute.xlu1 %4976 }
 0x777   : > { %5057 = vst.msk [vmem:[#allocation4 + $0x3c] sm:$0xf] %vm2490_vm11, %v4977_v0 }
 0x77e   : > { %v5752_v14 = vld [vmem:[#allocation4 + $0x38] sm:$0xff] }
 0x77f   : > { %5714 = vmatmul.msk.bf16.gmra.mxu1 %vm2659_vm12, %v5752_v14  ;;  %v5826_v14 = vld [vmem:[%s6071_s24 + $0xf0] sm:$0xff] }
 0x782   : > { %v5330_v22 = vpop.f32.mrf.mxu3 }
 0x783   : > { %v5331_v51 = vadd.f32 %v9485_v31, %v5330_v22 }
 0x785   : > { %v5374_v20 = vadd.f32 %v5814_v62, %v5331_v51 }
 0x787   : > { %v5406_v47 = vmax.f32 %v5374_v20, 0.0 }
 0x789   : > { %5439 = vst.msk [vmem:[%s9499_s8 + $0xc0] sm:$0xff] %vm5414_vm0, %v5406_v47 }
 0x78a   : > { %v5332_v56 = vpop.f32.mrf.mxu3 }
 0x78b   : > { %v5333_v35 = vadd.f32 %v9485_v31, %v5332_v56 }
 0x78c   : > { %v5290_v18 = vpop.f32.mrf.mxu1 }
 0x78d   : > { %v5375_v6 = vadd.f32 %v5815_v3, %v5333_v35  ;;  %v5291_v39 = vadd.f32 %v9485_v31, %v5290_v18  ;;  %v5827_v35 = vld [vmem:[%s6071_s24 + $0xf8] sm:$0xff]  ;;  %v5828_v3 = vld [vmem:[%s6071_s24 + $0x70] sm:$0xff] }
 0x78f   : > { %v5407_v8 = vmax.f32 %v5375_v6, 0.0  ;;  %v5358_v36 = vadd.f32 %v5816_v15, %v5291_v39 }
 0x791   : > { %5440 = vst.msk [vmem:[%s9499_s8 + $0xc8] sm:$0xff] %vm5414_vm0, %v5407_v8  ;;  %v5390_v46 = vmax.f32 %v5358_v36, 0.0 }
 0x793   : > { %5423 = vst.msk [vmem:[%s9499_s8 + $0x40] sm:$0xff] %vm5414_vm0, %v5390_v46  ;;  %v5829_v46 = vld [vmem:[%s6071_s24 + $0x78] sm:$0xff] }
 0x794   : > { %v5292_v2 = vpop.f32.mrf.mxu1 }
 0x795   : > { %v5293_v29 = vadd.f32 %v9485_v31, %v5292_v2 }
 0x797   : > { %v5359_v27 = vadd.f32 %v5817_v59, %v5293_v29 }
 0x799   : > { %v5391_v58 = vmax.f32 %v5359_v27, 0.0 }
 0x79b   : > { %5424 = vst.msk [vmem:[%s9499_s8 + $0x48] sm:$0xff] %vm5414_vm0, %v5391_v58 }
 0x7a4   : > { %v5335_v17 = vpop.f32.mrf.mxu3 }
 0x7a5   : > { %v5336_v12 = vadd.f32 %v9485_v31, %v5335_v17 }
 0x7a7   : > { %v5376_v44 = vadd.f32 %v5818_v19, %v5336_v12 }
 0x7a9   : > { %v5408_v30 = vmax.f32 %v5376_v44, 0.0 }
 0x7ab   : > { %5441 = vst.msk [vmem:[%s9499_s8 + $0xd0] sm:$0xff] %vm5414_vm0, %v5408_v30 }
 0x7ac   : > { %v5337_v24 = vpop.f32.mrf.mxu3 }
 0x7ad   : > { %v5338_v61 = vadd.f32 %v9485_v31, %v5337_v24 }
 0x7ae   : > { %v5295_v52 = vpop.f32.mrf.mxu1 }
 0x7af   : > { %v5377_v48 = vadd.f32 %v5819_v13, %v5338_v61  ;;  %v5296_v41 = vadd.f32 %v9485_v31, %v5295_v52 }
 0x7b1   : > { %v5409_v4 = vmax.f32 %v5377_v48, 0.0  ;;  %v5360_v37 = vadd.f32 %v5820_v1, %v5296_v41 }
 0x7b3   : > { %5442 = vst.msk [vmem:[%s9499_s8 + $0xd8] sm:$0xff] %vm5414_vm0, %v5409_v4  ;;  %v5392_v11 = vmax.f32 %v5360_v37, 0.0 }
 0x7b5   : > { %5425 = vst.msk [vmem:[%s9499_s8 + $0x50] sm:$0xff] %vm5414_vm0, %v5392_v11 }
 0x7b6   : > { %v5297_v55 = vpop.f32.mrf.mxu1 }
 0x7b7   : > { %v5298_v23 = vadd.f32 %v9485_v31, %v5297_v55 }
 0x7b9   : > { %v5361_v40 = vadd.f32 %v5821_v38, %v5298_v23 }
 0x7bb   : > { %v5393_v54 = vmax.f32 %v5361_v40, 0.0 }
 0x7bd   : > { %5426 = vst.msk [vmem:[%s9499_s8 + $0x58] sm:$0xff] %vm5414_vm0, %v5393_v54 }
 0x7ca   : > { %v5340_v53 = vpop.f32.mrf.mxu3 }
 0x7cb   : > { %v5341_v43 = vadd.f32 %v9485_v31, %v5340_v53 }
 0x7cd   : > { %v5378_v5 = vadd.f32 %v5822_v34, %v5341_v43 }
 0x7cf   : > { %v5410_v7 = vmax.f32 %v5378_v5, 0.0 }
 0x7d1   : > { %5443 = vst.msk [vmem:[%s9499_s8 + $0xe0] sm:$0xff] %vm5414_vm0, %v5410_v7 }
 0x7d2   : > { %v5342_v57 = vpop.f32.mrf.mxu3 }
 0x7d3   : > { %v5343_v32 = vadd.f32 %v9485_v31, %v5342_v57 }
 0x7d4   : > { %v5300_v33 = vpop.f32.mrf.mxu1 }
 0x7d5   : > { %v5379_v28 = vadd.f32 %v5823_v60, %v5343_v32  ;;  %v5301_v49 = vadd.f32 %v9485_v31, %v5300_v33 }
 0x7d7   : > { %v5411_v42 = vmax.f32 %v5379_v28, 0.0  ;;  %v5362_v16 = vadd.f32 %v5824_v9, %v5301_v49 }
 0x7d9   : > { %5444 = vst.msk [vmem:[%s9499_s8 + $0xe8] sm:$0xff] %vm5414_vm0, %v5411_v42  ;;  %v5394_v26 = vmax.f32 %v5362_v16, 0.0 }
 0x7db   : > { %5427 = vst.msk [vmem:[%s9499_s8 + $0x60] sm:$0xff] %vm5414_vm0, %v5394_v26 }
 0x7dc   : > { %v5302_v45 = vpop.f32.mrf.mxu1 }
 0x7dd   : > { %v5303_v21 = vadd.f32 %v9485_v31, %v5302_v45 }
 0x7df   : > { %v5363_v63 = vadd.f32 %v5825_v25, %v5303_v21 }
 0x7e1   : > { %v5395_v10 = vmax.f32 %v5363_v63, 0.0 }
 0x7e3   : > { %5428 = vst.msk [vmem:[%s9499_s8 + $0x68] sm:$0xff] %vm5414_vm0, %v5395_v10 }
 0x7f2   : > { %v5345_v50 = vpop.f32.mrf.mxu3 }
 0x7f3   : > { %v5346_v0 = vadd.f32 %v9485_v31, %v5345_v50 }
 0x7f5   : > { %v5380_v22 = vadd.f32 %v5826_v14, %v5346_v0 }
 0x7f7   : > { %v5412_v51 = vmax.f32 %v5380_v22, 0.0 }
 0x7f9   : > { %5445 = vst.msk [vmem:[%s9499_s8 + $0xf0] sm:$0xff] %vm5414_vm0, %v5412_v51 }
 0x7fa   : > { %v5347_v62 = vpop.f32.mrf.mxu3 }
 0x7fb   : > { %v5348_v20 = vadd.f32 %v9485_v31, %v5347_v62 }
 0x7fc   : > { %v5305_v47 = vpop.f32.mrf.mxu1 }
 0x7fd   : > { %v5306_v56 = vadd.f32 %v9485_v31, %v5305_v47  ;;  %v5381_v18 = vadd.f32 %v5827_v35, %v5348_v20 }
 0x7ff   : > { %v5364_v6 = vadd.f32 %v5828_v3, %v5306_v56  ;;  %v5413_v39 = vmax.f32 %v5381_v18, 0.0 }
 0x801   : > { %v5396_v8 = vmax.f32 %v5364_v6, 0.0  ;;  %5446 = vst.msk [vmem:[%s9499_s8 + $0xf8] sm:$0xff] %vm5414_vm0, %v5413_v39 }
 0x803   : > { %5429 = vst.msk [vmem:[%s9499_s8 + $0x70] sm:$0xff] %vm5414_vm0, %v5396_v8 }
 0x804   : > { %v5307_v15 = vpop.f32.mrf.mxu1 }
 0x805   : > { %v5308_v36 = vadd.f32 %v9485_v31, %v5307_v15 }
 0x807   : > { %v5365_v2 = vadd.f32 %v5829_v46, %v5308_v36 }
 0x809   : > { %v5397_v29 = vmax.f32 %v5365_v2, 0.0 }
 0x80b   : > { %5430 = vst.msk [vmem:[%s9499_s8 + $0x78] sm:$0xff] %vm5414_vm0, %v5397_v29 }
 0x80c PF: > { %s15_s18 = sadd.s32 1, %s5836_s18  }
 0x80d   : > { %p12_p4 = scmp.ge.s32.totalorder %s15_s18, 4  }
 0x80f   :  { %14 = sbr.rel (!%p12_p4) target bundleno = 1 (0x1), region = 72 }

</bundles_post_ra>
